<compile_context>
chip_gen: v6e
topology: v6e:2x2x1
jax: 0.10.0
libtpu: 0.0.40
codegen_flags: <defaults>
</compile_context>

<pallas_src>
import functools
import math

import jax
import jax.numpy as jnp
from jax import lax
from jax.experimental import pallas as pl
from jax.experimental.pallas import tpu as pltpu

LEAKY_SLOPE = 0.01          # nn.LeakyReLU default
MIN_BIN_WIDTH = 1e-3
MIN_BIN_HEIGHT = 1e-3
MIN_DERIVATIVE = 1e-3
TWO_PI = 2.0 * math.pi      # circular spline domain [0, 2*pi)
OUT_LANES = 128


def _round_up(a, b):
    return ((a + b - 1) // b) * b


def _cdiv(a, b):
    return (a + b - 1) // b


def _mm(a, b):
    # f32 accumulate, full f32 precision on the MXU (kernel) / XLA (wrapper).
    return jnp.dot(a, b, preferred_element_type=jnp.float32,
                   precision=lax.Precision.HIGHEST)


# --------------------------------------------------------------------------- #
# Pallas kernel
# --------------------------------------------------------------------------- #
def _coupling_kernel(inp_ref, xmap_ref,
                     w1_ref, b1_ref, w2_ref, b2_ref, w3_ref, b3_ref,
                     cm_ref, expand_ref, red_ref, ldred_ref,
                     out_ref, *, n_bins, inverse, out_width):
    f32 = jnp.float32
    K = n_bins

    def leaky(v):
        return jnp.where(v >= 0, v, LEAKY_SLOPE * v)

    inp = inp_ref[...].astype(f32)          # (tile, R*(3C+n_ctx))  folded
    xm = xmap_ref[...].astype(f32)          # (tile, G)  G = R*M folded x_map

    # ---- conditioner MLP (weights block-diag replicated for lane folding) -- #
    h1 = leaky(_mm(inp, w1_ref[...]) + b1_ref[...])
    h2 = leaky(_mm(h1, w2_ref[...]) + b2_ref[...])
    uw = _mm(h2, w3_ref[0]) + b3_ref[0]     # (tile, GK) width logits
    uh = _mm(h2, w3_ref[1]) + b3_ref[1]     # (tile, GK) height logits
    ud = _mm(h2, w3_ref[2]) + b3_ref[2]     # (tile, GK) derivative logits

    trix = cm_ref[0]     # (GK, GK) block-diag strictly-lower->exclusive cumsum
    gsum = cm_ref[1]     # (GK, GK) block-diag all-ones (same group)
    shift = cm_ref[2]    # (GK, GK) within-group shift-by-one (no wrap)
    rot = cm_ref[3]      # (GK, GK) within-group circular rotate-by-one
    expand = expand_ref[...]   # (G, GK) broadcast (tile,G) -> (tile,GK)
    red = red_ref[...]         # (GK, G) per-group sum
    ldred = ldred_ref[...]     # (G, R)  per-sample sum of group logdets

    def grouped_softmax(v):
        # Row max is constant within each group, so the shift cancels exactly
        # in the ratio; avoids per-group max reductions (lane shuffles).
        v = v - jnp.max(v, axis=-1, keepdims=True)
        e = jnp.exp(v)
        s = jnp.maximum(_mm(e, gsum), 1e-30)
        return e / s

    widths = MIN_BIN_WIDTH + (1.0 - MIN_BIN_WIDTH * K) * grouped_softmax(uw)
    heights = MIN_BIN_HEIGHT + (1.0 - MIN_BIN_HEIGHT * K) * grouped_softmax(uh)

    bin_w = TWO_PI * widths
    bin_h = TWO_PI * heights
    knot_w = TWO_PI * _mm(widths, trix)     # exclusive cumsum: lower knots,
    knot_h = TWO_PI * _mm(heights, trix)    # first knot of every group == 0

    # softplus; circular spline: derivative wraps around (knot K == knot 0)
    d_all = MIN_DERIVATIVE + (jnp.maximum(ud, 0.0)
                              + jnp.log1p(jnp.exp(-jnp.abs(ud))))

    # ---- bin search + one-hots derived directly from `ge` ----------------- #
    x_b = _mm(xm, expand)                              # x broadcast to group
    knot_search = knot_h if inverse else knot_w
    ge = (x_b >= knot_search).astype(f32)              # monotone 1..1 0..0
    onehot_lo = ge - _mm(ge, shift)                    # exact {0,1}, one per group
    onehot_hi = _mm(onehot_lo, rot)                    # (idx+1) mod K, circular

    def pick(v, oh):
        return _mm(v * oh, red)                        # (tile, G)

    kw_p = pick(knot_w, onehot_lo)
    bw_p = pick(bin_w, onehot_lo)
    kh_p = pick(knot_h, onehot_lo)
    bh_p = pick(bin_h, onehot_lo)
    d_k = pick(d_all, onehot_lo)
    d_k1 = pick(d_all, onehot_hi)

    inv_bw = 1.0 / bw_p                                # shared reciprocal
    delta = bh_p * inv_bw
    s_dd = d_k + d_k1 - 2.0 * delta

    if not inverse:
        theta = (xm - kw_p) * inv_bw
        tt = theta * (1.0 - theta)
        denom = delta + s_dd * tt
        inv_denom = 1.0 / denom                        # shared reciprocal
        y = kh_p + bh_p * (delta * theta * theta + d_k * tt) * inv_denom
        dnum = delta * delta * (d_k1 * theta * theta + 2.0 * delta * tt
                                + d_k * (1.0 - theta) * (1.0 - theta))
        log_ratio = jnp.log(dnum * inv_denom * inv_denom)   # one log per group
        ld = _mm(log_ratio, ldred)                     # (tile, R)
    else:
        diff = xm - kh_p
        a = diff * s_dd + bh_p * (delta - d_k)
        b = bh_p * d_k - diff * s_dd
        c2 = -delta * diff
        disc = jnp.maximum(b * b - 4.0 * a * c2, 0.0)  # guard fp-negative
        root = (2.0 * c2) / (-b - jnp.sqrt(disc))
        y = root * bw_p + kw_p
        tt = root * (1.0 - root)
        denom = delta + s_dd * tt
        inv_denom = 1.0 / denom
        dnum = delta * delta * (d_k1 * root * root + 2.0 * delta * tt
                                + d_k * (1.0 - root) * (1.0 - root))
        log_ratio = jnp.log(dnum * inv_denom * inv_denom)
        ld = -_mm(log_ratio, ldred)

    # ---- lane-dense packed output: [y folded | logdet folded | zero pad] --- #
    rows = y.shape[0]
    used = y.shape[1] + ld.shape[1]
    pieces = [y, ld]
    if out_width > used:
        pieces.append(jnp.zeros((rows, out_width - used), f32))
    out_ref[...] = jnp.concatenate(pieces, axis=-1).astype(out_ref.dtype)


# --------------------------------------------------------------------------- #
# Wrapper: dim split/merge/sort, lane folding, constants, padding, tiling
# --------------------------------------------------------------------------- #
def coupling_forward_pallas(x, c, params, mapping_dims, n_spline_bins,
                            inverse=False, max_fold_tile=1024):
    *lead, n_dims = x.shape
    n_ctx = c.shape[-1]
    mapping_dims = list(mapping_dims)
    condition_dims = [i for i in range(n_dims) if i not in mapping_dims]
    M, C, K = len(mapping_dims), len(condition_dims), int(n_spline_bins)

    N = 1
    for s in lead:
        N *= int(s)

    xf = x.reshape(N, n_dims).astype(jnp.float32)
    cf = c.reshape(N, n_ctx).astype(jnp.float32)
    x_map = xf[:, jnp.array(mapping_dims)]
    x_cond = xf[:, jnp.array(condition_dims)]

    # conditioner input built here (XLA fuses it) -> one fused W1 matmul
    inp = jnp.concatenate([x_cond, jnp.sin(x_cond), jnp.cos(x_cond), cf],
                          axis=-1)
    IN = 3 * C + n_ctx

    W1, b1, W2, b2, W3, b3 = [jnp.asarray(p, jnp.float32) for p in params]
    H = W1.shape[1]

    # split W3/b3 columns by parameter type; PyTorch layout is (m, k, t)
    W3_w, W3_h, W3_d = W3[:, 0::3], W3[:, 1::3], W3[:, 2::3]
    b3_w, b3_h, b3_d = b3[0::3], b3[1::3], b3[2::3]

    # ---- lane folding: R samples per lane-row ------------------------------ #
    MK = M * K
    R = max(1, OUT_LANES // max(MK, 1))
    G = R * M                      # spline groups per folded row
    GK = G * K

    eyeR = jnp.eye(R, dtype=jnp.float32)
    W1f = jnp.kron(eyeR, W1)                                    # (R*IN, R*H)
    W2f = jnp.kron(eyeR, W2)                                    # (R*H, R*H)
    W3f = jnp.stack([jnp.kron(eyeR, W3_w), jnp.kron(eyeR, W3_h),
                     jnp.kron(eyeR, W3_d)])                     # (3, R*H, GK)
    b1f = jnp.tile(b1, R).reshape(1, R * H)
    b2f = jnp.tile(b2, R).reshape(1, R * H)
    b3f = jnp.stack([jnp.tile(b3_w, R), jnp.tile(b3_h, R),
                     jnp.tile(b3_d, R)]).reshape(3, 1, GK)

    # structural 0/1 constants over GK lanes (group = lane // K)
    ids = jnp.arange(GK)
    grp = ids // K
    lk = ids % K
    same = grp[:, None] == grp[None, :]
    TRIX = (same & (ids[:, None] < ids[None, :])).astype(jnp.float32)
    GSUM = same.astype(jnp.float32)
    SHIFT = (same & (ids[:, None] == ids[None, :] + 1)).astype(jnp.float32)
    ROT = (same & (((lk[:, None] + 1) % K) == lk[None, :])).astype(jnp.float32)
    CM = jnp.stack([TRIX, GSUM, SHIFT, ROT])                    # (4, GK, GK)
    EXPAND = (jnp.arange(G)[:, None] == grp[None, :]).astype(jnp.float32)
    RED = EXPAND.T                                              # (GK, G)
    LDRED = (jnp.arange(G)[:, None] // M
             == jnp.arange(R)[None, :]).astype(jnp.float32)     # (G, R)

    # ---- batch tiling ------------------------------------------------------ #
    n_fold = _cdiv(max(N, 1), R)
    num_tc = 1
    try:
        if "v7" in jax.devices()[0].device_kind.lower():
            num_tc = 2            # 2 TensorCores per chip on v7x
    except Exception:
        pass
    # single-TC chips: 1 step for small N (grid is a serial loop there);
    # 2-TC chips: aim for >= 4 steps so each core overlaps DMA with compute.
    min_steps = 4 if (num_tc > 1 and n_fold >= 32) else 1
    tile = int(min(max_fold_tile,
                   max(8, _round_up(_cdiv(n_fold, min_steps), 8))))
    n_fold_pad = _round_up(n_fold, tile)
    N_pad = n_fold_pad * R
    pad = N_pad - N
    # pad rows are all-zero: x=0 lands in bin 0, denominators stay positive,
    # so they are NaN-free and simply sliced off below.
    inp_p = jnp.pad(inp, ((0, pad), (0, 0))).reshape(n_fold_pad, R * IN)
    xm_p = jnp.pad(x_map, ((0, pad), (0, 0))).reshape(n_fold_pad, G)

    out_w = max(OUT_LANES, _round_up(G + R, OUT_LANES))
    grid = (n_fold_pad // tile,)
    # footprint-derived VMEM allowance (generous ~40 KB/folded row), capped
    # well under v7x's 64 MiB physical VMEM.
    vmem_limit = int(min(48 * 1024 * 1024,
                         max(16 * 1024 * 1024, tile * 40 * 1024)))

    row_inputs = [inp_p, xm_p]
    const_inputs = [W1f, b1f, W2f, b2f, W3f, b3f, CM, EXPAND, RED, LDRED]

    def row_spec(a):
        w = a.shape[1]
        return pl.BlockSpec((tile, w), lambda i: (i, 0))

    def const_spec(a):
        zeros = (0,) * a.ndim
        return pl.BlockSpec(tuple(a.shape), lambda i: zeros)

    kernel = functools.partial(_coupling_kernel, n_bins=K,
                               inverse=bool(inverse), out_width=out_w)
    packed = pl.pallas_call(
        kernel,
        out_shape=jax.ShapeDtypeStruct((n_fold_pad, out_w), jnp.float32),
        grid_spec=pltpu.PrefetchScalarGridSpec(
            num_scalar_prefetch=0,
            grid=grid,
            in_specs=[row_spec(a) for a in row_inputs]
                     + [const_spec(a) for a in const_inputs],
            out_specs=pl.BlockSpec((tile, out_w), lambda i: (i, 0)),
        ),
        compiler_params=pltpu.CompilerParams(
            dimension_semantics=("parallel",),
            vmem_limit_bytes=vmem_limit),
    )(*row_inputs, *const_inputs)

    y_map = packed[:, :G].reshape(N_pad, M)[:N]
    logdet = packed[:, G:G + R].reshape(N_pad)[:N]

    # _merge_and_sortdim
    y_unsort = jnp.concatenate([y_map, x_cond], axis=-1)
    idx = [0] * n_dims
    for i, j in enumerate(mapping_dims + condition_dims):
        idx[j] = i
    y = y_unsort[:, jnp.array(idx)].reshape(*lead, n_dims)
    logabsdet = logdet.reshape(*lead)
    return y, logabsdet


# --------------------------------------------------------------------------- #
# Pure-JAX reference (mirrors the PyTorch module + standard circular RQS)
# --------------------------------------------------------------------------- #
def _hi_dot(a, b):
    return jnp.dot(a, b, precision=lax.Precision.HIGHEST)


def _circular_rqs_ref(x, uw, uh, ud, inverse=False):
    K = uw.shape[-1]
    widths = MIN_BIN_WIDTH + (1.0 - MIN_BIN_WIDTH * K) * jax.nn.softmax(uw, axis=-1)
    cumw = jnp.cumsum(widths, axis=-1) * TWO_PI
    knots_w = jnp.concatenate([jnp.zeros_like(cumw[..., :1]), cumw], axis=-1)
    bin_w = knots_w[..., 1:] - knots_w[..., :-1]

    heights = MIN_BIN_HEIGHT + (1.0 - MIN_BIN_HEIGHT * K) * jax.nn.softmax(uh, axis=-1)
    cumh = jnp.cumsum(heights, axis=-1) * TWO_PI
    knots_h = jnp.concatenate([jnp.zeros_like(cumh[..., :1]), cumh], axis=-1)
    bin_h = knots_h[..., 1:] - knots_h[..., :-1]

    d_all = MIN_DERIVATIVE + jax.nn.softplus(ud)
    d_hi = jnp.concatenate([d_all[..., 1:], d_all[..., :1]], axis=-1)

    knots_search = knots_h if inverse else knots_w
    ge = (x[..., None] >= knots_search[..., :K]).astype(jnp.int32)
    bin_idx = jnp.clip(jnp.sum(ge, axis=-1) - 1, 0, K - 1)[..., None]

    def pick(v):
        return jnp.take_along_axis(v, bin_idx, axis=-1)[..., 0]

    in_cw, in_bw = pick(knots_w[..., :K]), pick(bin_w)
    in_ch, in_bh = pick(knots_h[..., :K]), pick(bin_h)
    d_k, d_k1 = pick(d_all), pick(d_hi)
    delta = in_bh / in_bw

    if not inverse:
        theta = (x - in_cw) / in_bw
        tt = theta * (1.0 - theta)
        numer = in_bh * (delta * theta ** 2 + d_k * tt)
        denom = delta + (d_k + d_k1 - 2.0 * delta) * tt
        y = in_ch + numer / denom
        dnum = delta ** 2 * (d_k1 * theta ** 2 + 2.0 * delta * tt
                             + d_k * (1.0 - theta) ** 2)
        ld = jnp.log(dnum) - 2.0 * jnp.log(denom)
    else:
        diff = x - in_ch
        a = diff * (d_k + d_k1 - 2.0 * delta) + in_bh * (delta - d_k)
        b = in_bh * d_k - diff * (d_k + d_k1 - 2.0 * delta)
        cc = -delta * diff
        disc = jnp.maximum(b * b - 4.0 * a * cc, 0.0)
        root = (2.0 * cc) / (-b - jnp.sqrt(disc))
        y = root * in_bw + in_cw
        tt = root * (1.0 - root)
        denom = delta + (d_k + d_k1 - 2.0 * delta) * tt
        dnum = delta ** 2 * (d_k1 * root ** 2 + 2.0 * delta * tt
                             + d_k * (1.0 - root) ** 2)
        ld = -(jnp.log(dnum) - 2.0 * jnp.log(denom))
    return y, ld


def reference_forward(x, c, params, mapping_dims, n_spline_bins, inverse=False):
    *lead, n_dims = x.shape
    mapping_dims = list(mapping_dims)
    condition_dims = [i for i in range(n_dims) if i not in mapping_dims]
    M, K = len(mapping_dims), n_spline_bins
    W1, b1, W2, b2, W3, b3 = params

    x_map = x[..., jnp.array(mapping_dims)]
    x_cond = x[..., jnp.array(condition_dims)]
    inp = jnp.concatenate([x_cond, jnp.sin(x_cond), jnp.cos(x_cond), c], axis=-1)

    def leaky(v):
        return jnp.where(v >= 0, v, LEAKY_SLOPE * v)

    h1 = leaky(_hi_dot(inp, W1) + b1)
    h2 = leaky(_hi_dot(h1, W2) + b2)
    out = _hi_dot(h2, W3) + b3
    outs = out.reshape(*out.shape[:-1], M, K, 3)
    w, h, d = outs[..., 0], outs[..., 1], outs[..., 2]

    y_map, ld = _circular_rqs_ref(x_map, w, h, d, inverse=inverse)
    y_unsort = jnp.concatenate([y_map, x_cond], axis=-1)
    idx = [0] * n_dims
    for i, j in enumerate(mapping_dims + condition_dims):
        idx[j] = i
    y = y_unsort[..., jnp.array(idx)]
    return y, ld.sum(axis=-1)


# --------------------------------------------------------------------------- #
if __name__ == "__main__":
    n_dims = 6
    mapping_dims = [0, 2, 4]
    n_context_dims = 4
    n_hidden_dims = 32
    n_spline_bins = 8
    batch, seq = 2, 8                      # flattened batch N = 16

    n_cond = n_dims - len(mapping_dims)
    in_dim = 3 * n_cond + n_context_dims
    out_dim = len(mapping_dims) * n_spline_bins * 3

    key = jax.random.PRNGKey(0)
    k_x, k_c, k1, k2, k3 = jax.random.split(key, 5)
    x = jax.random.uniform(k_x, (batch, seq, n_dims), jnp.float32,
                           minval=0.0, maxval=TWO_PI)
    c = jax.random.normal(k_c, (batch, seq, n_context_dims), jnp.float32)

    def linear_params(kk, fan_in, fan_out):
        kw, kb = jax.random.split(kk)
        bound = 1.0 / math.sqrt(fan_in)
        W = jax.random.uniform(kw, (fan_in, fan_out), jnp.float32, -bound, bound)
        b = jax.random.uniform(kb, (fan_out,), jnp.float32, -bound, bound)
        return W, b

    W1, b1 = linear_params(k1, in_dim, n_hidden_dims)
    W2, b2 = linear_params(k2, n_hidden_dims, n_hidden_dims)
    W3, b3 = linear_params(k3, n_hidden_dims, out_dim)
    params = (W1, b1, W2, b2, W3, b3)

    for inv in (False, True):
        y, logdet = coupling_forward_pallas(x, c, params, mapping_dims,
                                            n_spline_bins, inverse=inv)
        jax.block_until_ready((y, logdet))
        y_ref, ld_ref = reference_forward(x, c, params, mapping_dims,
                                          n_spline_bins, inverse=inv)
        dy = float(jnp.max(jnp.abs(y - y_ref)))
        dl = float(jnp.max(jnp.abs(logdet - ld_ref)))
        assert bool(jnp.allclose(y, y_ref, atol=5e-4, rtol=5e-4)), \
            f"y mismatch (inverse={inv}): max abs diff {dy}"
        assert bool(jnp.allclose(logdet, ld_ref, atol=5e-4, rtol=5e-4)), \
            f"logdet mismatch (inverse={inv}): max abs diff {dl}"
    print("KERNEL_OK")
</pallas_src>

<mosaic_0001>
module attributes {stable_mosaic.version = 11 : i64} {
  func.func @_coupling_kernel(%arg0: i32, %arg1: memref<8x65xf32, #tpu.memory_space<vmem>>, %arg2: memref<8x15xf32, #tpu.memory_space<vmem>>, %arg3: memref<65x160xf32, #tpu.memory_space<vmem>>, %arg4: memref<1x160xf32, #tpu.memory_space<vmem>>, %arg5: memref<160x160xf32, #tpu.memory_space<vmem>>, %arg6: memref<1x160xf32, #tpu.memory_space<vmem>>, %arg7: memref<3x160x120xf32, #tpu.memory_space<vmem>>, %arg8: memref<3x1x120xf32, #tpu.memory_space<vmem>>, %arg9: memref<4x120x120xf32, #tpu.memory_space<vmem>>, %arg10: memref<15x120xf32, #tpu.memory_space<vmem>>, %arg11: memref<120x15xf32, #tpu.memory_space<vmem>>, %arg12: memref<15x5xf32, #tpu.memory_space<vmem>>, %arg13: memref<8x128xf32, #tpu.memory_space<vmem>>) attributes {dimension_semantics = [#tpu.dimension_semantics<parallel>], iteration_bounds = array<i64: 1>, scalar_prefetch = 0 : i64, scratch_operands = 0 : i64, tpu.core_type = #tpu.core_type<tc>, window_params = [{transform_indices = @transform_0, window_bounds = array<i64: 8, 65>}, {transform_indices = @transform_1, window_bounds = array<i64: 8, 15>}, {pipeline_mode = #tpu.pipeline_mode<synchronous>, transform_indices = @transform_2, window_bounds = array<i64: 65, 160>}, {pipeline_mode = #tpu.pipeline_mode<synchronous>, transform_indices = @transform_3, window_bounds = array<i64: 1, 160>}, {pipeline_mode = #tpu.pipeline_mode<synchronous>, transform_indices = @transform_4, window_bounds = array<i64: 160, 160>}, {pipeline_mode = #tpu.pipeline_mode<synchronous>, transform_indices = @transform_5, window_bounds = array<i64: 1, 160>}, {pipeline_mode = #tpu.pipeline_mode<synchronous>, transform_indices = @transform_6, window_bounds = array<i64: 3, 160, 120>}, {pipeline_mode = #tpu.pipeline_mode<synchronous>, transform_indices = @transform_7, window_bounds = array<i64: 3, 1, 120>}, {pipeline_mode = #tpu.pipeline_mode<synchronous>, transform_indices = @transform_8, window_bounds = array<i64: 4, 120, 120>}, {pipeline_mode = #tpu.pipeline_mode<synchronous>, transform_indices = @transform_9, window_bounds = array<i64: 15, 120>}, {pipeline_mode = #tpu.pipeline_mode<synchronous>, transform_indices = @transform_10, window_bounds = array<i64: 120, 15>}, {pipeline_mode = #tpu.pipeline_mode<synchronous>, transform_indices = @transform_11, window_bounds = array<i64: 15, 5>}, {transform_indices = @transform_12, window_bounds = array<i64: 8, 128>}]} {
    %c0 = arith.constant 0 : index
    %c0_0 = arith.constant 0 : index
    %0 = vector.load %arg1[%c0, %c0_0] : memref<8x65xf32, #tpu.memory_space<vmem>>, vector<8x65xf32>
    %c0_1 = arith.constant 0 : index
    %c0_2 = arith.constant 0 : index
    %1 = vector.load %arg2[%c0_1, %c0_2] : memref<8x15xf32, #tpu.memory_space<vmem>>, vector<8x15xf32>
    %c0_3 = arith.constant 0 : index
    %c0_4 = arith.constant 0 : index
    %2 = vector.load %arg3[%c0_3, %c0_4] : memref<65x160xf32, #tpu.memory_space<vmem>>, vector<65x160xf32>
    %cst = arith.constant dense<0.000000e+00> : vector<8x160xf32>
    %3 = tpu.matmul %0, %2, %cst {dimension_numbers = #tpu.dot_dimension_numbers<[1], [0], [0], [1], [0, 0, 1, 1], [], []>, precision = #tpu.contract_precision<fp32>} : vector<8x65xf32>, vector<65x160xf32>, vector<8x160xf32> -> vector<8x160xf32>
    %c0_5 = arith.constant 0 : index
    %c0_6 = arith.constant 0 : index
    %4 = vector.load %arg4[%c0_5, %c0_6] : memref<1x160xf32, #tpu.memory_space<vmem>>, vector<1x160xf32>
    %5 = vector.broadcast %4 : vector<1x160xf32> to vector<8x160xf32>
    %6 = arith.addf %3, %5 : vector<8x160xf32>
    %cst_7 = arith.constant 0.000000e+00 : f32
    %7 = vector.broadcast %cst_7 : f32 to vector<8x160xf32>
    %8 = arith.cmpf oge, %6, %7 : vector<8x160xf32>
    %cst_8 = arith.constant 0.00999999977 : f32
    %9 = vector.broadcast %cst_8 : f32 to vector<8x160xf32>
    %10 = arith.mulf %9, %6 : vector<8x160xf32>
    %11 = arith.select %8, %6, %10 : vector<8x160xi1>, vector<8x160xf32>
    %c0_9 = arith.constant 0 : index
    %c0_10 = arith.constant 0 : index
    %12 = vector.load %arg5[%c0_9, %c0_10] : memref<160x160xf32, #tpu.memory_space<vmem>>, vector<160x160xf32>
    %cst_11 = arith.constant dense<0.000000e+00> : vector<8x160xf32>
    %13 = tpu.matmul %11, %12, %cst_11 {dimension_numbers = #tpu.dot_dimension_numbers<[1], [0], [0], [1], [0, 0, 1, 1], [], []>, precision = #tpu.contract_precision<fp32>} : vector<8x160xf32>, vector<160x160xf32>, vector<8x160xf32> -> vector<8x160xf32>
    %c0_12 = arith.constant 0 : index
    %c0_13 = arith.constant 0 : index
    %14 = vector.load %arg6[%c0_12, %c0_13] : memref<1x160xf32, #tpu.memory_space<vmem>>, vector<1x160xf32>
    %15 = vector.broadcast %14 : vector<1x160xf32> to vector<8x160xf32>
    %16 = arith.addf %13, %15 : vector<8x160xf32>
    %cst_14 = arith.constant 0.000000e+00 : f32
    %17 = vector.broadcast %cst_14 : f32 to vector<8x160xf32>
    %18 = arith.cmpf oge, %16, %17 : vector<8x160xf32>
    %cst_15 = arith.constant 0.00999999977 : f32
    %19 = vector.broadcast %cst_15 : f32 to vector<8x160xf32>
    %20 = arith.mulf %19, %16 : vector<8x160xf32>
    %21 = arith.select %18, %16, %20 : vector<8x160xi1>, vector<8x160xf32>
    %c0_16 = arith.constant 0 : index
    %c0_17 = arith.constant 0 : index
    %c0_18 = arith.constant 0 : index
    %22 = vector.load %arg7[%c0_16, %c0_17, %c0_18] : memref<3x160x120xf32, #tpu.memory_space<vmem>>, vector<1x160x120xf32>
    %23 = vector.shape_cast %22 : vector<1x160x120xf32> to vector<160x120xf32>
    %cst_19 = arith.constant dense<0.000000e+00> : vector<8x120xf32>
    %24 = tpu.matmul %21, %23, %cst_19 {dimension_numbers = #tpu.dot_dimension_numbers<[1], [0], [0], [1], [0, 0, 1, 1], [], []>, precision = #tpu.contract_precision<fp32>} : vector<8x160xf32>, vector<160x120xf32>, vector<8x120xf32> -> vector<8x120xf32>
    %c0_20 = arith.constant 0 : index
    %c0_21 = arith.constant 0 : index
    %c0_22 = arith.constant 0 : index
    %25 = vector.load %arg8[%c0_20, %c0_21, %c0_22] : memref<3x1x120xf32, #tpu.memory_space<vmem>>, vector<1x1x120xf32>
    %26 = vector.shape_cast %25 : vector<1x1x120xf32> to vector<1x120xf32>
    %27 = vector.broadcast %26 : vector<1x120xf32> to vector<8x120xf32>
    %28 = arith.addf %24, %27 : vector<8x120xf32>
    %c1 = arith.constant 1 : index
    %c0_23 = arith.constant 0 : index
    %c0_24 = arith.constant 0 : index
    %29 = vector.load %arg7[%c1, %c0_23, %c0_24] : memref<3x160x120xf32, #tpu.memory_space<vmem>>, vector<1x160x120xf32>
    %30 = vector.shape_cast %29 : vector<1x160x120xf32> to vector<160x120xf32>
    %cst_25 = arith.constant dense<0.000000e+00> : vector<8x120xf32>
    %31 = tpu.matmul %21, %30, %cst_25 {dimension_numbers = #tpu.dot_dimension_numbers<[1], [0], [0], [1], [0, 0, 1, 1], [], []>, precision = #tpu.contract_precision<fp32>} : vector<8x160xf32>, vector<160x120xf32>, vector<8x120xf32> -> vector<8x120xf32>
    %c1_26 = arith.constant 1 : index
    %c0_27 = arith.constant 0 : index
    %c0_28 = arith.constant 0 : index
    %32 = vector.load %arg8[%c1_26, %c0_27, %c0_28] : memref<3x1x120xf32, #tpu.memory_space<vmem>>, vector<1x1x120xf32>
    %33 = vector.shape_cast %32 : vector<1x1x120xf32> to vector<1x120xf32>
    %34 = vector.broadcast %33 : vector<1x120xf32> to vector<8x120xf32>
    %35 = arith.addf %31, %34 : vector<8x120xf32>
    %c2 = arith.constant 2 : index
    %c0_29 = arith.constant 0 : index
    %c0_30 = arith.constant 0 : index
    %36 = vector.load %arg7[%c2, %c0_29, %c0_30] : memref<3x160x120xf32, #tpu.memory_space<vmem>>, vector<1x160x120xf32>
    %37 = vector.shape_cast %36 : vector<1x160x120xf32> to vector<160x120xf32>
    %cst_31 = arith.constant dense<0.000000e+00> : vector<8x120xf32>
    %38 = tpu.matmul %21, %37, %cst_31 {dimension_numbers = #tpu.dot_dimension_numbers<[1], [0], [0], [1], [0, 0, 1, 1], [], []>, precision = #tpu.contract_precision<fp32>} : vector<8x160xf32>, vector<160x120xf32>, vector<8x120xf32> -> vector<8x120xf32>
    %c2_32 = arith.constant 2 : index
    %c0_33 = arith.constant 0 : index
    %c0_34 = arith.constant 0 : index
    %39 = vector.load %arg8[%c2_32, %c0_33, %c0_34] : memref<3x1x120xf32, #tpu.memory_space<vmem>>, vector<1x1x120xf32>
    %40 = vector.shape_cast %39 : vector<1x1x120xf32> to vector<1x120xf32>
    %41 = vector.broadcast %40 : vector<1x120xf32> to vector<8x120xf32>
    %42 = arith.addf %38, %41 : vector<8x120xf32>
    %c0_35 = arith.constant 0 : index
    %c0_36 = arith.constant 0 : index
    %c0_37 = arith.constant 0 : index
    %43 = vector.load %arg9[%c0_35, %c0_36, %c0_37] : memref<4x120x120xf32, #tpu.memory_space<vmem>>, vector<1x120x120xf32>
    %44 = vector.shape_cast %43 : vector<1x120x120xf32> to vector<120x120xf32>
    %c1_38 = arith.constant 1 : index
    %c0_39 = arith.constant 0 : index
    %c0_40 = arith.constant 0 : index
    %45 = vector.load %arg9[%c1_38, %c0_39, %c0_40] : memref<4x120x120xf32, #tpu.memory_space<vmem>>, vector<1x120x120xf32>
    %46 = vector.shape_cast %45 : vector<1x120x120xf32> to vector<120x120xf32>
    %c2_41 = arith.constant 2 : index
    %c0_42 = arith.constant 0 : index
    %c0_43 = arith.constant 0 : index
    %47 = vector.load %arg9[%c2_41, %c0_42, %c0_43] : memref<4x120x120xf32, #tpu.memory_space<vmem>>, vector<1x120x120xf32>
    %48 = vector.shape_cast %47 : vector<1x120x120xf32> to vector<120x120xf32>
    %c3 = arith.constant 3 : index
    %c0_44 = arith.constant 0 : index
    %c0_45 = arith.constant 0 : index
    %49 = vector.load %arg9[%c3, %c0_44, %c0_45] : memref<4x120x120xf32, #tpu.memory_space<vmem>>, vector<1x120x120xf32>
    %50 = vector.shape_cast %49 : vector<1x120x120xf32> to vector<120x120xf32>
    %c0_46 = arith.constant 0 : index
    %c0_47 = arith.constant 0 : index
    %51 = vector.load %arg10[%c0_46, %c0_47] : memref<15x120xf32, #tpu.memory_space<vmem>>, vector<15x120xf32>
    %c0_48 = arith.constant 0 : index
    %c0_49 = arith.constant 0 : index
    %52 = vector.load %arg11[%c0_48, %c0_49] : memref<120x15xf32, #tpu.memory_space<vmem>>, vector<120x15xf32>
    %c0_50 = arith.constant 0 : index
    %c0_51 = arith.constant 0 : index
    %53 = vector.load %arg12[%c0_50, %c0_51] : memref<15x5xf32, #tpu.memory_space<vmem>>, vector<15x5xf32>
    %cst_52 = arith.constant dense<0xFF800000> : vector<8xf32>
    %54 = vector.multi_reduction <maximumf>, %28, %cst_52 [1] : vector<8x120xf32> to vector<8xf32>
    %55 = vector.shape_cast %54 : vector<8xf32> to vector<8x1xf32>
    %56 = vector.broadcast %55 : vector<8x1xf32> to vector<8x120xf32>
    %57 = arith.subf %28, %56 : vector<8x120xf32>
    %58 = math.exp %57 : vector<8x120xf32>
    %cst_53 = arith.constant dense<0.000000e+00> : vector<8x120xf32>
    %59 = tpu.matmul %58, %46, %cst_53 {dimension_numbers = #tpu.dot_dimension_numbers<[1], [0], [0], [1], [0, 0, 1, 1], [], []>, precision = #tpu.contract_precision<fp32>} : vector<8x120xf32>, vector<120x120xf32>, vector<8x120xf32> -> vector<8x120xf32>
    %cst_54 = arith.constant 1.000000e-30 : f32
    %60 = vector.broadcast %cst_54 : f32 to vector<8x120xf32>
    %61 = arith.maximumf %59, %60 : vector<8x120xf32>
    %62 = arith.divf %58, %61 : vector<8x120xf32>
    %cst_55 = arith.constant 0.991999983 : f32
    %63 = vector.broadcast %cst_55 : f32 to vector<8x120xf32>
    %64 = arith.mulf %63, %62 : vector<8x120xf32>
    %cst_56 = arith.constant 1.000000e-03 : f32
    %65 = vector.broadcast %cst_56 : f32 to vector<8x120xf32>
    %66 = arith.addf %65, %64 : vector<8x120xf32>
    %cst_57 = arith.constant dense<0xFF800000> : vector<8xf32>
    %67 = vector.multi_reduction <maximumf>, %35, %cst_57 [1] : vector<8x120xf32> to vector<8xf32>
    %68 = vector.shape_cast %67 : vector<8xf32> to vector<8x1xf32>
    %69 = vector.broadcast %68 : vector<8x1xf32> to vector<8x120xf32>
    %70 = arith.subf %35, %69 : vector<8x120xf32>
    %71 = math.exp %70 : vector<8x120xf32>
    %cst_58 = arith.constant dense<0.000000e+00> : vector<8x120xf32>
    %72 = tpu.matmul %71, %46, %cst_58 {dimension_numbers = #tpu.dot_dimension_numbers<[1], [0], [0], [1], [0, 0, 1, 1], [], []>, precision = #tpu.contract_precision<fp32>} : vector<8x120xf32>, vector<120x120xf32>, vector<8x120xf32> -> vector<8x120xf32>
    %cst_59 = arith.constant 1.000000e-30 : f32
    %73 = vector.broadcast %cst_59 : f32 to vector<8x120xf32>
    %74 = arith.maximumf %72, %73 : vector<8x120xf32>
    %75 = arith.divf %71, %74 : vector<8x120xf32>
    %cst_60 = arith.constant 0.991999983 : f32
    %76 = vector.broadcast %cst_60 : f32 to vector<8x120xf32>
    %77 = arith.mulf %76, %75 : vector<8x120xf32>
    %cst_61 = arith.constant 1.000000e-03 : f32
    %78 = vector.broadcast %cst_61 : f32 to vector<8x120xf32>
    %79 = arith.addf %78, %77 : vector<8x120xf32>
    %cst_62 = arith.constant 6.28318548 : f32
    %80 = vector.broadcast %cst_62 : f32 to vector<8x120xf32>
    %81 = arith.mulf %80, %66 : vector<8x120xf32>
    %cst_63 = arith.constant 6.28318548 : f32
    %82 = vector.broadcast %cst_63 : f32 to vector<8x120xf32>
    %83 = arith.mulf %82, %79 : vector<8x120xf32>
    %cst_64 = arith.constant dense<0.000000e+00> : vector<8x120xf32>
    %84 = tpu.matmul %66, %44, %cst_64 {dimension_numbers = #tpu.dot_dimension_numbers<[1], [0], [0], [1], [0, 0, 1, 1], [], []>, precision = #tpu.contract_precision<fp32>} : vector<8x120xf32>, vector<120x120xf32>, vector<8x120xf32> -> vector<8x120xf32>
    %cst_65 = arith.constant 6.28318548 : f32
    %85 = vector.broadcast %cst_65 : f32 to vector<8x120xf32>
    %86 = arith.mulf %85, %84 : vector<8x120xf32>
    %cst_66 = arith.constant dense<0.000000e+00> : vector<8x120xf32>
    %87 = tpu.matmul %79, %44, %cst_66 {dimension_numbers = #tpu.dot_dimension_numbers<[1], [0], [0], [1], [0, 0, 1, 1], [], []>, precision = #tpu.contract_precision<fp32>} : vector<8x120xf32>, vector<120x120xf32>, vector<8x120xf32> -> vector<8x120xf32>
    %cst_67 = arith.constant 6.28318548 : f32
    %88 = vector.broadcast %cst_67 : f32 to vector<8x120xf32>
    %89 = arith.mulf %88, %87 : vector<8x120xf32>
    %cst_68 = arith.constant 0.000000e+00 : f32
    %90 = vector.broadcast %cst_68 : f32 to vector<8x120xf32>
    %91 = arith.maximumf %42, %90 : vector<8x120xf32>
    %92 = math.absf %42 : vector<8x120xf32>
    %cst_69 = arith.constant 0.000000e+00 : f32
    %93 = vector.broadcast %cst_69 : f32 to vector<8x120xf32>
    %94 = arith.subf %93, %92 : vector<8x120xf32>
    %95 = math.exp %94 : vector<8x120xf32>
    %96 = math.log1p %95 : vector<8x120xf32>
    %97 = arith.addf %91, %96 : vector<8x120xf32>
    %cst_70 = arith.constant 1.000000e-03 : f32
    %98 = vector.broadcast %cst_70 : f32 to vector<8x120xf32>
    %99 = arith.addf %98, %97 : vector<8x120xf32>
    %cst_71 = arith.constant dense<0.000000e+00> : vector<8x120xf32>
    %100 = tpu.matmul %1, %51, %cst_71 {dimension_numbers = #tpu.dot_dimension_numbers<[1], [0], [0], [1], [0, 0, 1, 1], [], []>, precision = #tpu.contract_precision<fp32>} : vector<8x15xf32>, vector<15x120xf32>, vector<8x120xf32> -> vector<8x120xf32>
    %101 = arith.cmpf oge, %100, %86 : vector<8x120xf32>
    %102 = arith.extui %101 : vector<8x120xi1> to vector<8x120xi32>
    %103 = arith.sitofp %102 : vector<8x120xi32> to vector<8x120xf32>
    %cst_72 = arith.constant dense<0.000000e+00> : vector<8x120xf32>
    %104 = tpu.matmul %103, %48, %cst_72 {dimension_numbers = #tpu.dot_dimension_numbers<[1], [0], [0], [1], [0, 0, 1, 1], [], []>, precision = #tpu.contract_precision<fp32>} : vector<8x120xf32>, vector<120x120xf32>, vector<8x120xf32> -> vector<8x120xf32>
    %105 = arith.subf %103, %104 : vector<8x120xf32>
    %cst_73 = arith.constant dense<0.000000e+00> : vector<8x120xf32>
    %106 = tpu.matmul %105, %50, %cst_73 {dimension_numbers = #tpu.dot_dimension_numbers<[1], [0], [0], [1], [0, 0, 1, 1], [], []>, precision = #tpu.contract_precision<fp32>} : vector<8x120xf32>, vector<120x120xf32>, vector<8x120xf32> -> vector<8x120xf32>
    %107 = arith.mulf %86, %105 : vector<8x120xf32>
    %cst_74 = arith.constant dense<0.000000e+00> : vector<8x15xf32>
    %108 = tpu.matmul %107, %52, %cst_74 {dimension_numbers = #tpu.dot_dimension_numbers<[1], [0], [0], [1], [0, 0, 1, 1], [], []>, precision = #tpu.contract_precision<fp32>} : vector<8x120xf32>, vector<120x15xf32>, vector<8x15xf32> -> vector<8x15xf32>
    %109 = arith.mulf %81, %105 : vector<8x120xf32>
    %cst_75 = arith.constant dense<0.000000e+00> : vector<8x15xf32>
    %110 = tpu.matmul %109, %52, %cst_75 {dimension_numbers = #tpu.dot_dimension_numbers<[1], [0], [0], [1], [0, 0, 1, 1], [], []>, precision = #tpu.contract_precision<fp32>} : vector<8x120xf32>, vector<120x15xf32>, vector<8x15xf32> -> vector<8x15xf32>
    %111 = arith.mulf %89, %105 : vector<8x120xf32>
    %cst_76 = arith.constant dense<0.000000e+00> : vector<8x15xf32>
    %112 = tpu.matmul %111, %52, %cst_76 {dimension_numbers = #tpu.dot_dimension_numbers<[1], [0], [0], [1], [0, 0, 1, 1], [], []>, precision = #tpu.contract_precision<fp32>} : vector<8x120xf32>, vector<120x15xf32>, vector<8x15xf32> -> vector<8x15xf32>
    %113 = arith.mulf %83, %105 : vector<8x120xf32>
    %cst_77 = arith.constant dense<0.000000e+00> : vector<8x15xf32>
    %114 = tpu.matmul %113, %52, %cst_77 {dimension_numbers = #tpu.dot_dimension_numbers<[1], [0], [0], [1], [0, 0, 1, 1], [], []>, precision = #tpu.contract_precision<fp32>} : vector<8x120xf32>, vector<120x15xf32>, vector<8x15xf32> -> vector<8x15xf32>
    %115 = arith.mulf %99, %105 : vector<8x120xf32>
    %cst_78 = arith.constant dense<0.000000e+00> : vector<8x15xf32>
    %116 = tpu.matmul %115, %52, %cst_78 {dimension_numbers = #tpu.dot_dimension_numbers<[1], [0], [0], [1], [0, 0, 1, 1], [], []>, precision = #tpu.contract_precision<fp32>} : vector<8x120xf32>, vector<120x15xf32>, vector<8x15xf32> -> vector<8x15xf32>
    %117 = arith.mulf %99, %106 : vector<8x120xf32>
    %cst_79 = arith.constant dense<0.000000e+00> : vector<8x15xf32>
    %118 = tpu.matmul %117, %52, %cst_79 {dimension_numbers = #tpu.dot_dimension_numbers<[1], [0], [0], [1], [0, 0, 1, 1], [], []>, precision = #tpu.contract_precision<fp32>} : vector<8x120xf32>, vector<120x15xf32>, vector<8x15xf32> -> vector<8x15xf32>
    %cst_80 = arith.constant 1.000000e+00 : f32
    %119 = vector.broadcast %cst_80 : f32 to vector<8x15xf32>
    %120 = arith.divf %119, %110 : vector<8x15xf32>
    %121 = arith.mulf %114, %120 : vector<8x15xf32>
    %122 = arith.addf %116, %118 : vector<8x15xf32>
    %cst_81 = arith.constant 2.000000e+00 : f32
    %123 = vector.broadcast %cst_81 : f32 to vector<8x15xf32>
    %124 = arith.mulf %123, %121 : vector<8x15xf32>
    %125 = arith.subf %122, %124 : vector<8x15xf32>
    %126 = arith.subf %1, %108 : vector<8x15xf32>
    %127 = arith.mulf %126, %120 : vector<8x15xf32>
    %cst_82 = arith.constant 1.000000e+00 : f32
    %128 = vector.broadcast %cst_82 : f32 to vector<8x15xf32>
    %129 = arith.subf %128, %127 : vector<8x15xf32>
    %130 = arith.mulf %127, %129 : vector<8x15xf32>
    %131 = arith.mulf %125, %130 : vector<8x15xf32>
    %132 = arith.addf %121, %131 : vector<8x15xf32>
    %cst_83 = arith.constant 1.000000e+00 : f32
    %133 = vector.broadcast %cst_83 : f32 to vector<8x15xf32>
    %134 = arith.divf %133, %132 : vector<8x15xf32>
    %135 = arith.mulf %121, %127 : vector<8x15xf32>
    %136 = arith.mulf %135, %127 : vector<8x15xf32>
    %137 = arith.mulf %116, %130 : vector<8x15xf32>
    %138 = arith.addf %136, %137 : vector<8x15xf32>
    %139 = arith.mulf %114, %138 : vector<8x15xf32>
    %140 = arith.mulf %139, %134 : vector<8x15xf32>
    %141 = arith.addf %112, %140 : vector<8x15xf32>
    %142 = arith.mulf %121, %121 : vector<8x15xf32>
    %143 = arith.mulf %118, %127 : vector<8x15xf32>
    %144 = arith.mulf %143, %127 : vector<8x15xf32>
    %cst_84 = arith.constant 2.000000e+00 : f32
    %145 = vector.broadcast %cst_84 : f32 to vector<8x15xf32>
    %146 = arith.mulf %145, %121 : vector<8x15xf32>
    %147 = arith.mulf %146, %130 : vector<8x15xf32>
    %148 = arith.addf %144, %147 : vector<8x15xf32>
    %cst_85 = arith.constant 1.000000e+00 : f32
    %149 = vector.broadcast %cst_85 : f32 to vector<8x15xf32>
    %150 = arith.subf %149, %127 : vector<8x15xf32>
    %151 = arith.mulf %116, %150 : vector<8x15xf32>
    %cst_86 = arith.constant 1.000000e+00 : f32
    %152 = vector.broadcast %cst_86 : f32 to vector<8x15xf32>
    %153 = arith.subf %152, %127 : vector<8x15xf32>
    %154 = arith.mulf %151, %153 : vector<8x15xf32>
    %155 = arith.addf %148, %154 : vector<8x15xf32>
    %156 = arith.mulf %142, %155 : vector<8x15xf32>
    %157 = arith.mulf %156, %134 : vector<8x15xf32>
    %158 = arith.mulf %157, %134 : vector<8x15xf32>
    %159 = math.log %158 : vector<8x15xf32>
    %cst_87 = arith.constant dense<0.000000e+00> : vector<8x5xf32>
    %160 = tpu.matmul %159, %53, %cst_87 {dimension_numbers = #tpu.dot_dimension_numbers<[1], [0], [0], [1], [0, 0, 1, 1], [], []>, precision = #tpu.contract_precision<fp32>} : vector<8x15xf32>, vector<15x5xf32>, vector<8x5xf32> -> vector<8x5xf32>
    %cst_88 = arith.constant 0.000000e+00 : f32
    %161 = vector.broadcast %cst_88 : f32 to vector<8x108xf32>
    %162 = tpu.concatenate %141, %160, %161 in 1 : vector<8x15xf32>, vector<8x5xf32>, vector<8x108xf32> -> vector<8x128xf32>
    %c0_89 = arith.constant 0 : index
    %c0_90 = arith.constant 0 : index
    %163 = vector.load %arg13[%c0_89, %c0_90] : memref<8x128xf32, #tpu.memory_space<vmem>>, vector<8x128xf32>
    tpu.vector_store %arg13[%c0_89, %c0_90], %162 {strides = array<i32>} : memref<8x128xf32, #tpu.memory_space<vmem>>, vector<8x128xf32>,
    return
  }
  func.func @transform_0(%arg0: i32) -> (i32, i32) {
    %c0_i32 = arith.constant 0 : i32
    %c0_i32_0 = arith.constant 0 : i32
    return %arg0, %c0_i32 : i32, i32
  }
  func.func @transform_1(%arg0: i32) -> (i32, i32) {
    %c0_i32 = arith.constant 0 : i32
    %c0_i32_0 = arith.constant 0 : i32
    return %arg0, %c0_i32 : i32, i32
  }
  func.func @transform_2(%arg0: i32) -> (i32, i32) {
    %c0_i32 = arith.constant 0 : i32
    %c0_i32_0 = arith.constant 0 : i32
    %c0_i32_1 = arith.constant 0 : i32
    return %c0_i32, %c0_i32_0 : i32, i32
  }
  func.func @transform_3(%arg0: i32) -> (i32, i32) {
    %c0_i32 = arith.constant 0 : i32
    %c0_i32_0 = arith.constant 0 : i32
    %c0_i32_1 = arith.constant 0 : i32
    return %c0_i32, %c0_i32_0 : i32, i32
  }
  func.func @transform_4(%arg0: i32) -> (i32, i32) {
    %c0_i32 = arith.constant 0 : i32
    %c0_i32_0 = arith.constant 0 : i32
    %c0_i32_1 = arith.constant 0 : i32
    return %c0_i32, %c0_i32_0 : i32, i32
  }
  func.func @transform_5(%arg0: i32) -> (i32, i32) {
    %c0_i32 = arith.constant 0 : i32
    %c0_i32_0 = arith.constant 0 : i32
    %c0_i32_1 = arith.constant 0 : i32
    return %c0_i32, %c0_i32_0 : i32, i32
  }
  func.func @transform_6(%arg0: i32) -> (i32, i32, i32) {
    %c0_i32 = arith.constant 0 : i32
    %c0_i32_0 = arith.constant 0 : i32
    %c0_i32_1 = arith.constant 0 : i32
    %c0_i32_2 = arith.constant 0 : i32
    return %c0_i32, %c0_i32_0, %c0_i32_1 : i32, i32, i32
  }
  func.func @transform_7(%arg0: i32) -> (i32, i32, i32) {
    %c0_i32 = arith.constant 0 : i32
    %c0_i32_0 = arith.constant 0 : i32
    %c0_i32_1 = arith.constant 0 : i32
    %c0_i32_2 = arith.constant 0 : i32
    return %c0_i32, %c0_i32_0, %c0_i32_1 : i32, i32, i32
  }
  func.func @transform_8(%arg0: i32) -> (i32, i32, i32) {
    %c0_i32 = arith.constant 0 : i32
    %c0_i32_0 = arith.constant 0 : i32
    %c0_i32_1 = arith.constant 0 : i32
    %c0_i32_2 = arith.constant 0 : i32
    return %c0_i32, %c0_i32_0, %c0_i32_1 : i32, i32, i32
  }
  func.func @transform_9(%arg0: i32) -> (i32, i32) {
    %c0_i32 = arith.constant 0 : i32
    %c0_i32_0 = arith.constant 0 : i32
    %c0_i32_1 = arith.constant 0 : i32
    return %c0_i32, %c0_i32_0 : i32, i32
  }
  func.func @transform_10(%arg0: i32) -> (i32, i32) {
    %c0_i32 = arith.constant 0 : i32
    %c0_i32_0 = arith.constant 0 : i32
    %c0_i32_1 = arith.constant 0 : i32
    return %c0_i32, %c0_i32_0 : i32, i32
  }
  func.func @transform_11(%arg0: i32) -> (i32, i32) {
    %c0_i32 = arith.constant 0 : i32
    %c0_i32_0 = arith.constant 0 : i32
    %c0_i32_1 = arith.constant 0 : i32
    return %c0_i32, %c0_i32_0 : i32, i32
  }
  func.func @transform_12(%arg0: i32) -> (i32, i32) {
    %c0_i32 = arith.constant 0 : i32
    %c0_i32_0 = arith.constant 0 : i32
    return %arg0, %c0_i32 : i32, i32
  }
}

</mosaic_0001>

<bundles_post_ra>
// kernel: tpu_custom_call.1
= control target key start
LH: loop header
LB: loop body
LE: loop exit
PB: predicated region body
PF: predicated region fallthrough
CT: control target
= control target key end

     0   :  { %17 = vsyncpa [#allocation3], 0  ;;  %s22743_s0 = inlined_call_operand.hbm [shape: f32[8,65], index: 0, kind: input, shape index: {}]   ;;  %s22744_s1 = inlined_call_operand.hbm [shape: f32[8,15], index: 1, kind: input, shape index: {}]   ;;  %s22745_s2 = inlined_call_operand.vmem [shape: f32[65,160], index: 2, kind: input, shape index: {}]   ;;  %s22746_s3 = inlined_call_operand.hbm [shape: f32[1,160], index: 3, kind: input, shape index: {}]   ;;  %s22747_s4 = inlined_call_operand.hbm [shape: f32[160,160], index: 4, kind: input, shape index: {}]   ;;  %s22748_s5 = inlined_call_operand.hbm [shape: f32[1,160], index: 5, kind: input, shape index: {}]   ;;  %s22749_s6 = inlined_call_operand.hbm [shape: f32[3,160,120], index: 6, kind: input, shape index: {}]   ;;  %s22750_s7 = inlined_call_operand.hbm [shape: f32[3,1,120], index: 7, kind: input, shape index: {}]   ;;  %s22751_s8 = inlined_call_operand.hbm [shape: f32[4,120,120], index: 8, kind: input, shape index: {}]   ;;  %s22752_s9 = inlined_call_operand.vmem [shape: f32[15,120], index: 9, kind: input, shape index: {}]   ;;  %s22753_s10 = inlined_call_operand.vmem [shape: f32[120,15], index: 10, kind: input, shape index: {}]   ;;  %s22754_s11 = inlined_call_operand.vmem [shape: f32[15,5], index: 11, kind: input, shape index: {}]   ;;  %s22755_s12 = inlined_call_operand.hbm [shape: f32[8,128], index: 12, kind: output, shape index: {}]  }
   0x1   :  { %18 = vsyncpa [#allocation6], 0 }
   0x2   :  { %19 = vsyncpa [#allocation9], 0 }
   0x3   :  { %20 = vsyncpa [#allocation12], 0 }
   0x4   :  { %21 = vsyncpa [#allocation15], 0 }
   0x5   :  { %22 = vsyncpa [#allocation4], 0  ;;  %s16687_s21 = smov [#allocation5]   ;;  %s16688_s23 = smov [#allocation8]  }
   0x6   :  { %s39_s22 = sshll.u32 %s16687_s21, 4  ;;  %s60_s24 = sshll.u32 %s16688_s23, 4  ;;  %s40_s22 = int_to_ptr.vmem [resolvable:$true] %s39_s22  ;;  %s61_s24 = int_to_ptr.vmem [resolvable:$true] %s60_s24 }
   0x7   :  { %s16503_s25 = scalar_lea.vmem %s40_s22, 128  ;;  %p16508_p1 = scmp.lt.s32.totalorder %s40_s22, %s40_s22 }
   0x8   :  { %p16504_p0 = scmp.ne.s32.totalorder %s40_s22, %s16503_s25  ;;  %p16509_p2 = scmp.lt.s32.totalorder %s16503_s25, %s16503_s25 }
   0xa   :  { %p16510_p3 = por %p16509_p2, %p16508_p1 }
   0xc   :  { %p16511_p4 = pnand %p16510_p3, %p16504_p0 }
   0xe   :  { %16514 = shalt.err (!%p16511_p4)
}
   0xf   :  { %42 = dma.hbm_to_vmem [thread:$0]  %s22744_s1, 128, %s40_s22, [#allocation6]  }
  0x10   :  { %s16523_s28 = scalar_lea.vmem %s61_s24, 5120  ;;  %p16528_p6 = scmp.lt.s32.totalorder %s61_s24, %s61_s24 }
  0x11   :  { %p16524_p5 = scmp.ne.s32.totalorder %s61_s24, %s16523_s28  ;;  %p16529_p7 = scmp.lt.s32.totalorder %s16523_s28, %s16523_s28 }
  0x13   :  { %p16530_p8 = por %p16529_p7, %p16528_p6 }
  0x15   :  { %p16531_p9 = pnand %p16530_p8, %p16524_p5 }
  0x17   :  { %16534 = shalt.err (!%p16531_p9)
}
  0x18   :  { %s16689_s29 = smov 256   ;;  %s16690_s30 = smov 16  }
  0x19   :  { %66 = dma.hbm_to_vmem [thread:$0]  %s22747_s4, 5120, %s61_s24, [#allocation9], %s16689_s29, %s16689_s29, %s16690_s30  }
  0x1a   :  { %s16691_s15 = smov [#allocation11]  }
  0x1b   :  { %s82_s16 = sshll.u32 %s16691_s15, 4  ;;  %s83_s16 = int_to_ptr.vmem [resolvable:$true] %s82_s16 }
  0x1c   :  { %s16543_s17 = scalar_lea.vmem %s83_s16, 7680  ;;  %p16548_p11 = scmp.lt.s32.totalorder %s83_s16, %s83_s16 }
  0x1d   :  { %p16544_p10 = scmp.ne.s32.totalorder %s83_s16, %s16543_s17  ;;  %p16549_p12 = scmp.lt.s32.totalorder %s16543_s17, %s16543_s17 }
  0x1f   :  { %p16550_p13 = por %p16549_p12, %p16548_p11 }
  0x21   :  { %p16551_p0 = pnand %p16550_p13, %p16544_p10 }
  0x23   :  { %16554 = shalt.err (!%p16551_p0)
}
  0x24   :  { %s16692_s1 = smov 128   ;;  %s16693_s18 = smov 8  }
  0x25   :  { %88 = dma.hbm_to_vmem [thread:$0]  %s22749_s6, 7680, %s83_s16, [#allocation12], %s16692_s1, %s16692_s1, %s16693_s18  }
  0x26   :  { %s16694_s4 = smov [#allocation2]   ;;  %s16695_s22 = smov [#allocation7]  }
  0x27   :  { %s29_s21 = sshll.u32 %s16694_s4, 4  ;;  %s51_s23 = sshll.u32 %s16695_s22, 4  ;;  %s30_s21 = int_to_ptr.vmem [resolvable:$true] %s29_s21  ;;  %s52_s23 = int_to_ptr.vmem [resolvable:$true] %s51_s23 }
  0x28   :  { %s16563_s24 = scalar_lea.vmem %s30_s21, 128  ;;  %p16568_p2 = scmp.lt.s32.totalorder %s30_s21, %s30_s21 }
  0x29   :  { %p16564_p1 = scmp.ne.s32.totalorder %s30_s21, %s16563_s24  ;;  %p16569_p3 = scmp.lt.s32.totalorder %s16563_s24, %s16563_s24 }
  0x2b   :  { %p16570_p4 = por %p16569_p3, %p16568_p2 }
  0x2d   :  { %p16571_p5 = pnand %p16570_p4, %p16564_p1 }
  0x2f   :  { %16574 = shalt.err (!%p16571_p5)
}
  0x30   :  { %32 = dma.hbm_to_vmem [thread:$0]  %s22743_s0, 128, %s30_s21, [#allocation3]  }
  0x31   :  { %s16583_s27 = scalar_lea.vmem %s52_s23, 32  ;;  %p16588_p7 = scmp.lt.s32.totalorder %s52_s23, %s52_s23 }
  0x32   :  { %p16584_p6 = scmp.ne.s32.totalorder %s52_s23, %s16583_s27  ;;  %p16589_p8 = scmp.lt.s32.totalorder %s16583_s27, %s16583_s27 }
  0x34   :  { %p16590_p9 = por %p16589_p8, %p16588_p7 }
  0x36   :  { %p16591_p10 = pnand %p16590_p9, %p16584_p6 }
  0x38   :  { %16594 = shalt.err (!%p16591_p10)
}
  0x39   :  { %54 = dma.hbm_to_vmem [thread:$0]  %s22746_s3, 32, %s52_s23, [#allocation6]  }
  0x3a   :  { %s16696_s29 = smov [#allocation10]   ;;  %s16697_s14 = smov [#allocation13]  }
  0x3b   :  { %s73_s13 = sshll.u32 %s16696_s29, 4  ;;  %s94_s15 = sshll.u32 %s16697_s14, 4  ;;  %s74_s13 = int_to_ptr.vmem [resolvable:$true] %s73_s13  ;;  %s95_s15 = int_to_ptr.vmem [resolvable:$true] %s94_s15 }
  0x3c   :  { %s16603_s16 = scalar_lea.vmem %s74_s13, 32  ;;  %p16608_p12 = scmp.lt.s32.totalorder %s74_s13, %s74_s13 }
  0x3d   :  { %p16604_p11 = scmp.ne.s32.totalorder %s74_s13, %s16603_s16  ;;  %p16609_p13 = scmp.lt.s32.totalorder %s16603_s16, %s16603_s16 }
  0x3f   :  { %p16610_p0 = por %p16609_p13, %p16608_p12 }
  0x41   :  { %p16611_p1 = pnand %p16610_p0, %p16604_p11 }
  0x43   :  { %16614 = shalt.err (!%p16611_p1)
}
  0x44   :  { %76 = dma.hbm_to_vmem [thread:$0]  %s22748_s5, 32, %s74_s13, [#allocation9]  }
  0x45   :  { %s16623_s19 = scalar_lea.vmem %s95_s15, 48  ;;  %s16627_s3 = scalar_lea.vmem %s95_s15, 64 }
  0x46   :  { %p16624_p2 = scmp.ne.s32.totalorder %s95_s15, %s16623_s19  ;;  %p16628_p3 = scmp.lt.s32.totalorder %s95_s15, %s95_s15 }
  0x47   :  { %p16629_p4 = scmp.lt.s32.totalorder %s16627_s3, %s16623_s19 }
  0x49   :  { %p16630_p5 = por %p16629_p4, %p16628_p3 }
  0x4b   :  { %p16631_p6 = pnand %p16630_p5, %p16624_p2 }
  0x4d   :  { %16634 = shalt.err (!%p16631_p6)
}
  0x4e   :  { %s16698_s20 = smov 1   ;;  %s16699_s22 = smov [#allocation14]  }
  0x4f   :  { %100 = dma.hbm_to_vmem [thread:$0]  %s22750_s7, 48, %s95_s15, [#allocation12], %s16690_s30, %s16690_s30, %s16698_s20  }
  0x50   :  { %s106_s23 = sshll.u32 %s16699_s22, 4  ;;  %s107_s23 = int_to_ptr.vmem [resolvable:$true] %s106_s23 }
  0x51   :  { %s16643_s5 = scalar_lea.vmem %s107_s23, 7680  ;;  %p16648_p8 = scmp.lt.s32.totalorder %s107_s23, %s107_s23 }
  0x52   :  { %p16644_p7 = scmp.ne.s32.totalorder %s107_s23, %s16643_s5  ;;  %p16649_p9 = scmp.lt.s32.totalorder %s16643_s5, %s16643_s5 }
  0x54   :  { %p16650_p10 = por %p16649_p9, %p16648_p8 }
  0x56   :  { %p16651_p11 = pnand %p16650_p10, %p16644_p7 }
  0x58   :  { %16654 = shalt.err (!%p16651_p11)
}
  0x59   :  { %112 = dma.hbm_to_vmem [thread:$0]  %s22751_s8, 7680, %s107_s23, [#allocation15], %s16692_s1, %s16692_s1, %s16693_s18  }
  0x5a   :  { %16675 = dma.done.wait [#allocation3], 128  }
  0x5b   :  { %16676 = vsyncadd [#allocation3], 4294967168 }
  0x5c   :  { %16677 = dma.done.wait [#allocation6], 160  }
  0x5d   :  { %16678 = vsyncadd [#allocation6], 4294967136 }
  0x5e   :  { %16679 = dma.done.wait [#allocation9], 5152  }
  0x5f   :  { %16680 = vsyncadd [#allocation9], 4294962144 }
  0x60   :  { %16681 = dma.done.wait [#allocation12], 7728  }
  0x61   :  { %16682 = vsyncadd [#allocation12], 4294959568 }
  0x62   :  { %16683 = dma.done.wait [#allocation15], 7680  }
  0x63   :  { %16684 = vsyncadd [#allocation15], 4294959616  ;;  %v22759_v0 = vmov 0.0   ;;  %vm179_vm0 = vcmask 1040384   ;;  %v162_v1 = vld [vmem:[%s22745_s2 + $0x88] sm:$0x1] }
  0x64   :  { %268 = vmatprep.mubr.f32.mxu0 %v22759_v0  ;;  %434 = vmatprep.mubr.f32.mxu1 %v22759_v0  ;;  %v161_v2 = vld [vmem:[%s22745_s2 + $0x80] sm:$0x1]  ;;  %v160_v3 = vld [vmem:[%s22745_s2 + $0x78] sm:$0xff]  ;;  %v184_v4 = vsel %vm179_vm0, %v162_v1, 0  ;;  %v159_v7 = vld [vmem:[%s22745_s2 + $0x70] sm:$0xff]  ;;  %vm175_vm1 = vcmask 531456  }
  0x65   :  { %v181_v5 = vsel %vm179_vm0, %v161_v2, 0  ;;  %v16813_v6 = vand.u32 4294901760, %v160_v3  ;;  %v158_v8 = vld [vmem:[%s22745_s2 + $0x68] sm:$0xff]  ;;  %v157_v9 = vld [vmem:[%s22745_s2 + $0x60] sm:$0xff]  ;;  %v16824_v10 = vand.u32 4294901760, %v184_v4  ;;  %v16828_v12 = vand.u32 4294901760, %v159_v7 }
  0x66   :  { %v16826_v11 = vand.u32 4294901760, %v181_v5  ;;  %v16830_v13 = vand.u32 4294901760, %v158_v8  ;;  %v156_v14 = vld [vmem:[%s22745_s2 + $0x58] sm:$0xff]  ;;  %v155_v15 = vld [vmem:[%s22745_s2 + $0x50] sm:$0xff]  ;;  %v16838_v16 = vand.u32 4294901760, %v157_v9  ;;  %v154_v19 = vld [vmem:[%s22745_s2 + $0x48] sm:$0xff] }
  0x67   :  { %v16840_v17 = vand.u32 4294901760, %v156_v14  ;;  %v16842_v18 = vand.u32 4294901760, %v155_v15  ;;  %v16850_v20 = vld [vmem:[%s22745_s2 + $0x40] sm:$0xff]  ;;  %v16855_v21 = vld [vmem:[%s22745_s2 + $0x38] sm:$0xff]  ;;  %v16858_v22 = vsub.f32 %v160_v3, %v16813_v6  ;;  %201 = vmatprep.subr.mxu0 %v16824_v10  ;;  %v16861_v23 = vand.u32 4294901760, %v154_v19  ;;  %v151_v27 = vld [vmem:[%s22745_s2 + $0x30] sm:$0xff] }
  0x68   :  { %v16864_v24 = vsub.f32 %v184_v4, %v16824_v10  ;;  %v16867_v25 = vand.u32 4294901760, %v16850_v20  ;;  %v16870_v26 = vsub.f32 %v181_v5, %v16826_v11  ;;  %v16878_v28 = vld [vmem:[%s22745_s2 + $0x28] sm:$0xff]  ;;  %v16883_v29 = vld [vmem:[%s22745_s2 + $0x20] sm:$0xff]  ;;  %203 = vmatpush1.msra.mxu0 %v16826_v11  ;;  %v16887_v30 = vand.u32 4294901760, %v16855_v21  ;;  %v16898_v34 = vld [vmem:[%s22745_s2 + $0x18] sm:$0xff]  ;;  %s16703_s3 = smov [#allocation16]  }
  0x69   :  { %v308_v31 = vand.u32 4294901760, %v16858_v22  ;;  %v16890_v32 = vand.u32 4294901760, %v151_v27  ;;  %v16893_v33 = vsub.f32 %v159_v7, %v16828_v12  ;;  %205 = vmatprep.subr.mxu0 %v16813_v6  ;;  %v16904_v37 = vand.u32 4294901760, %v16878_v28  ;;  %v16923_v43 = vld [vmem:[%s22745_s2 + $0x10] sm:$0xff]  ;;  %v16947_v52 = vld [vmem:[%s22745_s2 + $0x8] sm:$0xff]  ;;  %v16952_v53 = vld [vmem:[%s22745_s2] sm:$0xff] }
  0x6a   :  { %v296_v35 = vand.u32 4294901760, %v16864_v24  ;;  %v302_v36 = vand.u32 4294901760, %v16870_v26  ;;  %v16907_v38 = vsub.f32 %v158_v8, %v16830_v13  ;;  %207 = vmatpush1.msra.mxu0 %v16828_v12  ;;  %v16915_v41 = vand.u32 4294901760, %v16883_v29  ;;  %v143_v62 = vld [vmem:[#allocation2] sm:$0xff]  ;;  %s12791_s20 = sshll.u32 %s16703_s3, 4  ;;  %s12792_s20 = int_to_ptr.vmem [resolvable:$true] %s12791_s20 }
  0x6b   :  { %v309_v39 = vsub.f32 %v16858_v22, %v308_v31  ;;  %v314_v40 = vand.u32 4294901760, %v16893_v33  ;;  %v16918_v42 = vsub.f32 %v157_v9, %v16838_v16  ;;  %209 = vmatprep.subr.mxu0 %v16830_v13  ;;  %v16934_v47 = vand.u32 4294901760, %v16898_v34  ;;  %s16655_s4 = scalar_lea.vmem %s12792_s20, 128  ;;  %p16660_p13 = scmp.lt.s32.totalorder %s12792_s20, %s12792_s20 }
  0x6c   :  { %v297_v44 = vsub.f32 %v16864_v24, %v296_v35  ;;  %v303_v45 = vsub.f32 %v16870_v26, %v302_v36  ;;  %v320_v46 = vand.u32 4294901760, %v16907_v38  ;;  %211 = vmatpush1.msra.mxu0 %v16838_v16  ;;  %v16942_v51 = vsub.f32 %v156_v14, %v16840_v17  ;;  %p16656_p12 = scmp.ne.s32.totalorder %s12792_s20, %s16655_s4  ;;  %p16661_p0 = scmp.lt.s32.totalorder %s16655_s4, %s16655_s4 }
  0x6d   :  { %v310_v48 = vand.u32 4294901760, %v309_v39  ;;  %v315_v49 = vsub.f32 %v16893_v33, %v314_v40  ;;  %v326_v50 = vand.u32 4294901760, %v16918_v42  ;;  %213 = vmatprep.subr.mxu0 %v16840_v17  ;;  %v16959_v57 = vand.u32 4294901760, %v16923_v43 }
  0x6e   :  { %v298_v54 = vand.u32 4294901760, %v297_v44  ;;  %v304_v55 = vand.u32 4294901760, %v303_v45  ;;  %v321_v56 = vsub.f32 %v16907_v38, %v320_v46  ;;  %215 = vmatpush1.msra.mxu0 %v16842_v18  ;;  %v332_v60 = vand.u32 4294901760, %v16942_v51  ;;  %p16662_p1 = por %p16661_p0, %p16660_p13 }
  0x6f   :  { %v316_v58 = vand.u32 4294901760, %v315_v49  ;;  %v327_v59 = vsub.f32 %v16918_v42, %v326_v50  ;;  %v16967_v61 = vsub.f32 %v155_v15, %v16842_v18  ;;  %217 = vmatprep.subr.mxu0 %v16861_v23  ;;  %v16971_v1 = vand.u32 4294901760, %v16947_v52 }
  0x70   :  { %299 = vmatprep.subr.mxu1 %v298_v54  ;;  %v322_v63 = vand.u32 4294901760, %v321_v56  ;;  %v16974_v2 = vsub.f32 %v154_v19, %v16861_v23  ;;  %v16977_v3 = vand.u32 4294901760, %v16952_v53  ;;  %219 = vmatpush1.msra.mxu0 %v16867_v25  ;;  %v333_v5 = vsub.f32 %v16942_v51, %v332_v60  ;;  %p16663_p2 = pnand %p16662_p1, %p16656_p12 }
  0x71   :  { %305 = vmatpush1.msra.mxu1 %v304_v55  ;;  %v328_v4 = vand.u32 4294901760, %v327_v59  ;;  %v338_v7 = vand.u32 4294901760, %v16967_v61  ;;  %v16986_v8 = vsub.f32 %v16850_v20, %v16867_v25  ;;  %221 = vmatprep.subr.mxu0 %v16887_v30  ;;  %v16992_v14 = vsub.f32 %v16855_v21, %v16887_v30 }
  0x72   :  { %311 = vmatprep.subr.mxu1 %v310_v48  ;;  %v344_v9 = vand.u32 4294901760, %v16974_v2  ;;  %v177_v15 = vsel %vm175_vm1, %v143_v62, 0  ;;  %v16996_v19 = vsub.f32 %v151_v27, %v16890_v32  ;;  %223 = vmatpush1.msra.mxu0 %v16890_v32  ;;  %v334_v39 = vand.u32 4294901760, %v333_v5 }
  0x73   :  { %317 = vmatpush1.msra.mxu1 %v316_v58  ;;  %v339_v20 = vsub.f32 %v16967_v61, %v338_v7  ;;  %v350_v44 = vand.u32 4294901760, %v16986_v8  ;;  %v17003_v45 = vand.u32 4294901760, %v177_v15  ;;  %225 = vmatprep.subr.mxu0 %v16904_v37  ;;  %v356_v27 = vand.u32 4294901760, %v16992_v14 }
  0x74   :  { %323 = vmatprep.subr.mxu1 %v322_v63  ;;  %v345_v21 = vsub.f32 %v16974_v2, %v344_v9  ;;  %v22757_v48 = vand.u32 4294901760, %v16996_v19  ;;  %v17013_v49 = vsub.f32 %v16878_v28, %v16904_v37  ;;  %227 = vmatpush1.msra.mxu0 %v16915_v41  ;;  %v17024_v58 = vsub.f32 %v16883_v29, %v16915_v41 }
  0x75   :  { %329 = vmatpush1.msra.mxu1 %v328_v4  ;;  %v340_v54 = vand.u32 4294901760, %v339_v20  ;;  %v351_v55 = vsub.f32 %v16986_v8, %v350_v44  ;;  %v17020_v56 = vsub.f32 %v177_v15, %v17003_v45  ;;  %229 = vmatprep.subr.mxu0 %v16934_v47  ;;  %v357_v59 = vsub.f32 %v16992_v14, %v356_v27 }
  0x76   :  { %335 = vmatprep.subr.mxu1 %v334_v39  ;;  %v346_v28 = vand.u32 4294901760, %v345_v21  ;;  %v363_v62 = vsub.f32 %v16996_v19, %v22757_v48  ;;  %v22756_v63 = vand.u32 4294901760, %v17013_v49  ;;  %231 = vmatpush1.msra.mxu0 %v16959_v57  ;;  %v22758_v5 = vand.u32 4294901760, %v17024_v58 }
  0x77   :  { %341 = vmatpush1.msra.mxu1 %v340_v54  ;;  %v352_v4 = vand.u32 4294901760, %v351_v55  ;;  %v271_v29 = vand.u32 4294901760, %v17020_v56  ;;  %v17039_v15 = vsub.f32 %v16898_v34, %v16934_v47  ;;  %233 = vmatprep.subr.mxu0 %v16971_v1  ;;  %v358_v39 = vand.u32 4294901760, %v357_v59 }
  0x78   :  { %347 = vmatprep.subr.mxu1 %v346_v28  ;;  %v364_v20 = vand.u32 4294901760, %v363_v62  ;;  %v369_v21 = vsub.f32 %v17013_v49, %v22756_v63  ;;  %v17047_v54 = vsub.f32 %v16923_v43, %v16959_v57  ;;  %235 = vmatpush1.msra.mxu0 %v16977_v3  ;;  %v375_v55 = vsub.f32 %v17024_v58, %v22758_v5 }
  0x79   :  { %353 = vmatpush1.msra.mxu1 %v352_v4  ;;  %v272_v34 = vsub.f32 %v17020_v56, %v271_v29  ;;  %v380_v28 = vand.u32 4294901760, %v17039_v15  ;;  %v17059_v59 = vsub.f32 %v16947_v52, %v16971_v1  ;;  %458 = vmatprep.subr.mxu0 %v16864_v24  ;;  %v17065_v4 = vsub.f32 %v16952_v53, %v16977_v3 }
  0x7a   :  { %359 = vmatprep.subr.mxu1 %v358_v39  ;;  %v370_v43 = vand.u32 4294901760, %v369_v21  ;;  %v386_v62 = vand.u32 4294901760, %v17047_v54  ;;  %v376_v48 = vand.u32 4294901760, %v375_v55  ;;  %v23027_v24 = vand.u32 4294901760, %v17013_v49 }
  0x7b   :  { %v273_v63 = vand.u32 4294901760, %v272_v34  ;;  %365 = vmatpush1.msra.mxu1 %v364_v20  ;;  %v381_v5 = vsub.f32 %v17039_v15, %v380_v28  ;;  %v392_v52 = vand.u32 4294901760, %v17059_v59  ;;  %v398_v21 = vand.u32 4294901760, %v17065_v4 }
  0x7c   :  { %371 = vmatprep.subr.mxu1 %v370_v43  ;;  %v387_v39 = vsub.f32 %v17047_v54, %v386_v62  ;;  %vm917_vm4 = vcmask 261120   ;;  %vm4187_vm7 = vcmask 982016   ;;  %vm16701_vm8 = vmmov 0  }
  0x7d   :  { %274 = vmatmul.mubr.f32.vlgmr.msra.gmra.mxu0 %v273_v63  ;;  %377 = vmatpush1.msra.mxu1 %v376_v48  ;;  %v382_v53 = vand.u32 4294901760, %v381_v5  ;;  %v393_v20 = vsub.f32 %v17059_v59, %v392_v52  ;;  %v399_v55 = vsub.f32 %v17065_v4, %v398_v21  ;;  %vm6758_vm9 = vcmask 1046528  }
  0x7e   :  { %461 = vmatpush1.msra.mxu0 %v16870_v26  ;;  %v388_v34 = vand.u32 4294901760, %v387_v39  ;;  %542 = vmatprep.mubr.f32.mxu0 %v22759_v0  ;;  %vm6754_vm10 = vcmask 121856   ;;  %vm12782_vm13 = vcmask 162816  }
  0x7f   :  { %464 = vmatprep.subr.mxu0 %v16858_v22  ;;  %383 = vmatprep.subr.mxu1 %v382_v53  ;;  %v394_v43 = vand.u32 4294901760, %v393_v20  ;;  %v400_v48 = vand.u32 4294901760, %v399_v55  ;;  %v23026_v22 = vand.u32 4294901760, %v16996_v19 }
  0x80   :  { %467 = vmatpush1.msra.mxu0 %v16893_v33  ;;  %389 = vmatpush1.msra.mxu1 %v388_v34 }
  0x81   :  { %470 = vmatprep.subr.mxu0 %v16907_v38  ;;  %395 = vmatprep.subr.mxu1 %v394_v43  ;;  %v882_v43 = vld [vmem:[#allocation8 + $0x88] sm:$0xff] }
  0x82   :  { %473 = vmatpush1.msra.mxu0 %v16918_v42  ;;  %401 = vmatpush1.msra.mxu1 %v400_v48 }
  0x83   :  { %476 = vmatprep.subr.mxu0 %v16942_v51  ;;  %436 = vmatmul.mubr.f32.vlgmr.msra.gmra.mxu1 %v17003_v45 }
  0x84   :  { %479 = vmatpush1.msra.mxu0 %v16967_v61  ;;  %566 = vmatprep.subr.mxu1 %v16824_v10 }
  0x85   :  { %482 = vmatprep.subr.mxu0 %v16974_v2  ;;  %568 = vmatpush1.msra.mxu1 %v16826_v11 }
  0x86   :  { %485 = vmatpush1.msra.mxu0 %v16986_v8  ;;  %570 = vmatprep.subr.mxu1 %v16813_v6 }
  0x87   :  { %488 = vmatprep.subr.mxu0 %v16992_v14  ;;  %572 = vmatpush1.msra.mxu1 %v16828_v12 }
  0x88   :  { %491 = vmatpush1.msra.mxu0 %v16996_v19  ;;  %574 = vmatprep.subr.mxu1 %v16830_v13 }
  0x89   :  { %494 = vmatprep.subr.mxu0 %v17013_v49  ;;  %576 = vmatpush1.msra.mxu1 %v16838_v16 }
  0x8a   :  { %497 = vmatpush1.msra.mxu0 %v17024_v58  ;;  %578 = vmatprep.subr.mxu1 %v16840_v17 }
  0x8b   :  { %500 = vmatprep.subr.mxu0 %v17039_v15  ;;  %580 = vmatpush1.msra.mxu1 %v16842_v18 }
  0x8c   :  { %503 = vmatpush1.msra.mxu0 %v17047_v54  ;;  %582 = vmatprep.subr.mxu1 %v16861_v23 }
  0x8d   :  { %506 = vmatprep.subr.mxu0 %v17059_v59  ;;  %584 = vmatpush1.msra.mxu1 %v16867_v25  ;;  %v884_v59 = vld [vmem:[#allocation8 + $0x98] sm:$0xff] }
  0x8e   :  { %509 = vmatpush1.msra.mxu0 %v17065_v4  ;;  %586 = vmatprep.subr.mxu1 %v16887_v30 }
  0x8f   :  { %545 = vmatmul.mubr.f32.vlgmr.msra.gmra.mxu0 %v17020_v56  ;;  %660 = vmatprep.subr.mxu0 %v296_v35  ;;  %v891_v35 = vld [vmem:[#allocation8 + $0xd0] sm:$0xff] }
  0x90   :  { %588 = vmatpush1.msra.mxu1 %v16890_v32  ;;  %664 = vmatpush1.msra.mxu0 %v302_v36  ;;  %v17207_v38 = vand.u32 4294901760, %v891_v35 }
  0x91   :  { %590 = vmatprep.subr.mxu1 %v16904_v37  ;;  %668 = vmatprep.subr.mxu0 %v308_v31 }
  0x92   :  { %592 = vmatpush1.msra.mxu1 %v16915_v41  ;;  %672 = vmatpush1.msra.mxu0 %v314_v40  ;;  %v890_v40 = vld [vmem:[#allocation8 + $0xc8] sm:$0xff] }
  0x93   :  { %594 = vmatprep.subr.mxu1 %v16934_v47  ;;  %676 = vmatprep.subr.mxu0 %v320_v46 }
  0x94   :  { %596 = vmatpush1.msra.mxu1 %v16959_v57  ;;  %680 = vmatpush1.msra.mxu0 %v326_v50  ;;  %v889_v50 = vld [vmem:[#allocation8 + $0xc0] sm:$0xff] }
  0x95   :  { %598 = vmatprep.subr.mxu1 %v16971_v1  ;;  %684 = vmatprep.subr.mxu0 %v332_v60  ;;  %v17225_v60 = vsub.f32 %v891_v35, %v17207_v38  ;;  %v17227_v61 = vand.u32 4294901760, %v889_v50 }
  0x96   :  { %600 = vmatpush1.msra.mxu1 %v16977_v3  ;;  %633 = vmatprep.mubr.f32.mxu1 %v22759_v0 }
  0x97   :  { %688 = vmatpush1.msra.mxu0 %v338_v7  ;;  %637 = vmatmul.mubr.f32.vlgmr.msra.gmra.mxu1 %v271_v29  ;;  %v885_v29 = vld [vmem:[#allocation8 + $0xa0] sm:$0xff] }
  0x98   :  { %692 = vmatprep.subr.mxu0 %v344_v9  ;;  %784 = vmatprep.subr.mxu1 %v16824_v10  ;;  %v23028_v10 = vand.u32 4294901760, %v17024_v58  ;;  %v887_v9 = vld [vmem:[#allocation8 + $0xb0] sm:$0xff]  ;;  %v17273_v55 = vand.u32 4294901760, %v885_v29 }
  0x99   :  { %696 = vmatpush1.msra.mxu0 %v350_v44  ;;  %786 = vmatpush1.msra.mxu1 %v16826_v11  ;;  %v22772_v44 = vand.u32 4294901760, %v17225_v60 }
  0x9a   :  { %700 = vmatprep.subr.mxu0 %v356_v27  ;;  %788 = vmatprep.subr.mxu1 %v16813_v6  ;;  %v896_v6 = vld [vmem:[#allocation8 + $0xf8] sm:$0xff]  ;;  %v886_v27 = vld [vmem:[#allocation8 + $0xa8] sm:$0xff] }
  0x9b   :  { %704 = vmatpush1.msra.mxu0 %v23026_v22  ;;  %790 = vmatpush1.msra.mxu1 %v16828_v12  ;;  %v17180_v11 = vand.u32 4294901760, %v896_v6  ;;  %v895_v12 = vld [vmem:[#allocation8 + $0xf0] sm:$0xff]  ;;  %v1075_v15 = vsub.f32 %v17225_v60, %v22772_v44  ;;  %v17264_v39 = vand.u32 4294901760, %v886_v27 }
  0x9c   :  { %708 = vmatprep.subr.mxu0 %v23027_v24  ;;  %792 = vmatprep.subr.mxu1 %v16830_v13  ;;  %v17182_v13 = vand.u32 4294901760, %v895_v12 }
  0x9d   :  { %712 = vmatpush1.msra.mxu0 %v23028_v10  ;;  %794 = vmatpush1.msra.mxu1 %v16838_v16  ;;  %23029 = vst [vmem:[#allocation23_spill] sm:$0xff] %v17180_v11  ;;  %v894_v16 = vld [vmem:[#allocation8 + $0xe8] sm:$0xff]  ;;  %v1076_v53 = vand.u32 4294901760, %v1075_v15  ;;  %v17278_v24 = vsub.f32 %v886_v27, %v17264_v39  ;;  %v17280_v10 = vand.u32 4294901760, %v884_v59 }
  0x9e   :  { %716 = vmatprep.subr.mxu0 %v380_v28  ;;  %796 = vmatprep.subr.mxu1 %v16840_v17  ;;  %v17185_v17 = vsub.f32 %v896_v6, %v17180_v11  ;;  %v17256_v28 = vand.u32 4294901760, %v887_v9  ;;  %v881_v6 = vld [vmem:[#allocation8 + $0x80] sm:$0xff] }
  0x9f   :  { %720 = vmatpush1.msra.mxu0 %v386_v62  ;;  %798 = vmatpush1.msra.mxu1 %v16842_v18  ;;  %v17187_v18 = vand.u32 4294901760, %v894_v16 }
  0xa0   :  { %724 = vmatprep.subr.mxu0 %v392_v52  ;;  %800 = vmatprep.subr.mxu1 %v16861_v23  ;;  %23030 = vst [vmem:[#allocation24_spill] sm:$0xff] %v17185_v17  ;;  %v893_v23 = vld [vmem:[#allocation8 + $0xe0] sm:$0xff]  ;;  %v22779_v31 = vand.u32 4294901760, %v17185_v17  ;;  %v17271_v34 = vsub.f32 %v887_v9, %v17256_v28  ;;  %v880_v9 = vld [vmem:[#allocation8 + $0x78] sm:$0xff] }
  0xa1   :  { %728 = vmatpush1.msra.mxu0 %v398_v21  ;;  %761 = vmatprep.mubr.f32.mxu0 %v22759_v0  ;;  %v17193_v26 = vand.u32 4294901760, %v893_v23  ;;  %v883_v21 = vld [vmem:[#allocation8 + $0x90] sm:$0xff] }
  0xa2   :  { %802 = vmatpush1.msra.mxu1 %v16867_v25  ;;  %763 = vmatmul.mubr.f32.vlgmr.msra.gmra.mxu0 %v17003_v45  ;;  %v17191_v25 = vsub.f32 %v895_v12, %v17182_v13 }
  0xa3   :  { %804 = vmatprep.subr.mxu1 %v16887_v30  ;;  %851 = vmatprep.mubr.f32.mxu1 %v22759_v0  ;;  %v892_v30 = vld [vmem:[#allocation8 + $0xd8] sm:$0xff] }
  0xa4   :  { %806 = vmatpush1.msra.mxu1 %v16890_v32  ;;  %922 = vmatprep.subr.mxu0 %v17180_v11  ;;  %v17198_v32 = vsub.f32 %v894_v16, %v17187_v18  ;;  %v17200_v33 = vand.u32 4294901760, %v892_v30  ;;  %v22778_v36 = vand.u32 4294901760, %v17191_v25  ;;  %v22767_v16 = vand.u32 4294901760, %v17271_v34 }
  0xa5   :  { %808 = vmatprep.subr.mxu1 %v16904_v37  ;;  %924 = vmatpush1.msra.mxu0 %v17182_v13  ;;  %v17205_v37 = vsub.f32 %v893_v23, %v17193_v26  ;;  %v17285_v23 = vsub.f32 %v885_v29, %v17273_v55 }
  0xa6   :  { %810 = vmatpush1.msra.mxu1 %v16915_v41  ;;  %926 = vmatprep.subr.mxu0 %v17187_v18  ;;  %v1045_v41 = vsub.f32 %v17185_v17, %v22779_v31  ;;  %v22776_v42 = vand.u32 4294901760, %v17198_v32  ;;  %v17215_v46 = vsub.f32 %v892_v30, %v17200_v33  ;;  %v1051_v51 = vsub.f32 %v17191_v25, %v22778_v36  ;;  %v869_v31 = vld [vmem:[#allocation8 + $0x20] sm:$0xff] }
  0xa7   :  { %812 = vmatprep.subr.mxu1 %v16934_v47  ;;  %928 = vmatpush1.msra.mxu0 %v17193_v26  ;;  %v17217_v47 = vand.u32 4294901760, %v890_v40  ;;  %v17287_v30 = vand.u32 4294901760, %v883_v21 }
  0xa8   :  { %814 = vmatpush1.msra.mxu1 %v16959_v57  ;;  %930 = vmatprep.subr.mxu0 %v17200_v33  ;;  %v22775_v57 = vand.u32 4294901760, %v17205_v37  ;;  %v1046_v2 = vand.u32 4294901760, %v1045_v41  ;;  %v22774_v7 = vand.u32 4294901760, %v17215_v46  ;;  %v1052_v14 = vand.u32 4294901760, %v1051_v51 }
  0xa9   :  { %816 = vmatprep.subr.mxu1 %v16971_v1  ;;  %v888_v1 = vld [vmem:[#allocation8 + $0xb8] sm:$0xff]  ;;  %932 = vmatpush1.msra.mxu0 %v17207_v38  ;;  %v17235_v8 = vsub.f32 %v890_v40, %v17217_v47  ;;  %v22765_v40 = vand.u32 4294901760, %v17278_v24  ;;  %v17295_v41 = vsub.f32 %v884_v59, %v17280_v10  ;;  %v1099_v51 = vsub.f32 %v17271_v34, %v22767_v16 }
  0xaa   :  { %818 = vmatpush1.msra.mxu1 %v16977_v3  ;;  %v1057_v3 = vsub.f32 %v17198_v32, %v22776_v42  ;;  %934 = vmatprep.subr.mxu0 %v17217_v47  ;;  %v1063_v19 = vsub.f32 %v17205_v37, %v22775_v57  ;;  %v1069_v56 = vsub.f32 %v17215_v46, %v22774_v7  ;;  %v17250_v63 = vand.u32 4294901760, %v888_v1  ;;  %v870_v42 = vld [vmem:[#allocation8 + $0x28] sm:$0xff] }
  0xab   :  { %853 = vmatmul.mubr.f32.vlgmr.msra.gmra.mxu1 %v17003_v45  ;;  %v17243_v45 = vsub.f32 %v889_v50, %v17227_v61  ;;  %936 = vmatpush1.msra.mxu0 %v17227_v61  ;;  %v22771_v58 = vand.u32 4294901760, %v17235_v8  ;;  %v17297_v50 = vand.u32 4294901760, %v882_v43  ;;  %v22762_v27 = vand.u32 4294901760, %v17295_v41 }
  0xac   :  { %1047 = vmatprep.subr.mxu1 %v1046_v2  ;;  %v1058_v49 = vand.u32 4294901760, %v1057_v3  ;;  %v1064_v5 = vand.u32 4294901760, %v1063_v19  ;;  %v1070_v62 = vand.u32 4294901760, %v1069_v56  ;;  %v17262_v52 = vsub.f32 %v888_v1, %v17250_v63  ;;  %938 = vmatprep.subr.mxu0 %v17250_v63  ;;  %v879_v56 = vld [vmem:[#allocation8 + $0x70] sm:$0xff] }
  0xad   :  { %1053 = vmatpush1.msra.mxu1 %v1052_v14  ;;  %v22770_v54 = vand.u32 4294901760, %v17243_v45  ;;  %v1081_v4 = vsub.f32 %v17235_v8, %v22771_v58  ;;  %940 = vmatpush1.msra.mxu0 %v17256_v28  ;;  %v22764_v1 = vand.u32 4294901760, %v17285_v23  ;;  %v17305_v2 = vsub.f32 %v883_v21, %v17287_v30 }
  0xae   :  { %1059 = vmatprep.subr.mxu1 %v1058_v49  ;;  %v22768_v22 = vand.u32 4294901760, %v17262_v52  ;;  %942 = vmatprep.subr.mxu0 %v17264_v39  ;;  %v17307_v3 = vand.u32 4294901760, %v881_v6  ;;  %v1105_v19 = vsub.f32 %v17278_v24, %v22765_v40  ;;  %v17315_v49 = vsub.f32 %v882_v43, %v17297_v50  ;;  %v877_v43 = vld [vmem:[#allocation8 + $0x60] sm:$0xff] }
  0xaf   :  { %1065 = vmatpush1.msra.mxu1 %v1064_v5  ;;  %v1087_v20 = vsub.f32 %v17243_v45, %v22770_v54  ;;  %v1082_v48 = vand.u32 4294901760, %v1081_v4  ;;  %944 = vmatpush1.msra.mxu0 %v17273_v55  ;;  %v1100_v29 = vand.u32 4294901760, %v1099_v51  ;;  %v1111_v5 = vsub.f32 %v17285_v23, %v22764_v1  ;;  %v876_v51 = vld [vmem:[#allocation8 + $0x58] sm:$0xff] }
  0xb0   :  { %1071 = vmatprep.subr.mxu1 %v1070_v62  ;;  %v1093_v35 = vsub.f32 %v17262_v52, %v22768_v22  ;;  %946 = vmatprep.subr.mxu0 %v17280_v10  ;;  %v22761_v15 = vand.u32 4294901760, %v17305_v2  ;;  %v17323_v59 = vsub.f32 %v881_v6, %v17307_v3  ;;  %v878_v62 = vld [vmem:[#allocation8 + $0x68] sm:$0xff]  ;;  %v1106_v4 = vand.u32 4294901760, %v1105_v19  ;;  %v872_v54 = vld [vmem:[#allocation8 + $0x38] sm:$0xff] }
  0xb1   :  { %1077 = vmatpush1.msra.mxu1 %v1076_v53  ;;  %v1088_v12 = vand.u32 4294901760, %v1087_v20  ;;  %948 = vmatpush1.msra.mxu0 %v17287_v30  ;;  %v1117_v21 = vsub.f32 %v17295_v41, %v22762_v27  ;;  %v22763_v53 = vand.u32 4294901760, %v17315_v49  ;;  %v17330_v20 = vand.u32 4294901760, %v880_v9 }
  0xb2   :  { %1083 = vmatprep.subr.mxu1 %v1082_v48  ;;  %v1094_v14 = vand.u32 4294901760, %v1093_v35  ;;  %950 = vmatprep.subr.mxu0 %v17297_v50  ;;  %v1112_v48 = vand.u32 4294901760, %v1111_v5  ;;  %v1123_v6 = vsub.f32 %v17305_v2, %v22761_v15  ;;  %v17336_v35 = vand.u32 4294901760, %v879_v56  ;;  %v875_v5 = vld [vmem:[#allocation8 + $0x50] sm:$0xff] }
  0xb3   :  { %1089 = vmatpush1.msra.mxu1 %v1088_v12  ;;  %952 = vmatpush1.msra.mxu0 %v17307_v3  ;;  %v22766_v12 = vand.u32 4294901760, %v17323_v59  ;;  %v1129_v19 = vsub.f32 %v17315_v49, %v22763_v53  ;;  %v17342_v0 = vsub.f32 %v880_v9, %v17330_v20  ;;  %v874_v53 = vld [vmem:[#allocation8 + $0x48] sm:$0xff]  ;;  %v17367_v22 = vand.u32 4294901760, %v875_v5 }
  0xb4   :  { %1095 = vmatprep.subr.mxu1 %v1094_v14  ;;  %v1118_v14 = vand.u32 4294901760, %v1117_v21  ;;  %954 = vmatprep.subr.mxu0 %v17330_v20  ;;  %v1124_v15 = vand.u32 4294901760, %v1123_v6  ;;  %v17353_v21 = vand.u32 4294901760, %v877_v43  ;;  %v873_v6 = vld [vmem:[#allocation8 + $0x40] sm:$0xff]  ;;  %v17410_v36 = vand.u32 4294901760, %v872_v54 }
  0xb5   :  { %1101 = vmatpush1.msra.mxu1 %v1100_v29  ;;  %23031 = vst [vmem:[#allocation25_spill] sm:$0xff] %v17342_v0  ;;  %v17344_v29 = vand.u32 4294901760, %v878_v62  ;;  %v1135_v27 = vsub.f32 %v17323_v59, %v22766_v12  ;;  %956 = vmatpush1.msra.mxu0 %v17336_v35  ;;  %v1130_v9 = vand.u32 4294901760, %v1129_v19  ;;  %v22769_v1 = vand.u32 4294901760, %v17342_v0 }
  0xb6   :  { %1107 = vmatprep.subr.mxu1 %v1106_v4  ;;  %v17351_v4 = vsub.f32 %v879_v56, %v17336_v35  ;;  %v17365_v16 = vsub.f32 %v877_v43, %v17353_v21  ;;  %23039 = vst [vmem:[#allocation33_spill] sm:$0xff] %v17410_v36 }
  0xb7   :  { %1113 = vmatpush1.msra.mxu1 %v1112_v48  ;;  %v17358_v40 = vsub.f32 %v878_v62, %v17344_v29  ;;  %v17360_v48 = vand.u32 4294901760, %v876_v51  ;;  %958 = vmatprep.subr.mxu0 %v17344_v29  ;;  %v1136_v56 = vand.u32 4294901760, %v1135_v27  ;;  %v1141_v62 = vsub.f32 %v17342_v0, %v22769_v1 }
  0xb8   :  { %23032 = vst [vmem:[#allocation26_spill] sm:$0xff] %v17351_v4  ;;  %1119 = vmatprep.subr.mxu1 %v1118_v14  ;;  %v22773_v12 = vand.u32 4294901760, %v17351_v4  ;;  %23034 = vst [vmem:[#allocation28_spill] sm:$0xff] %v17365_v16  ;;  %960 = vmatpush1.msra.mxu0 %v17353_v21  ;;  %v17377_v27 = vand.u32 4294901760, %v874_v53  ;;  %v22780_v43 = vand.u32 4294901760, %v17365_v16  ;;  %v17387_v1 = vand.u32 4294901760, %v873_v6 }
  0xb9   :  { %23033 = vst [vmem:[#allocation27_spill] sm:$0xff] %v17358_v40  ;;  %1125 = vmatpush1.msra.mxu1 %v1124_v15  ;;  %v22777_v14 = vand.u32 4294901760, %v17358_v40  ;;  %v17375_v19 = vsub.f32 %v876_v51, %v17360_v48  ;;  %962 = vmatprep.subr.mxu0 %v17360_v48  ;;  %v1142_v51 = vand.u32 4294901760, %v1141_v62 }
  0xba   :  { %1131 = vmatprep.subr.mxu1 %v1130_v9  ;;  %v1147_v15 = vsub.f32 %v17351_v4, %v22773_v12  ;;  %v17385_v9 = vsub.f32 %v875_v5, %v17367_v22  ;;  %964 = vmatpush1.msra.mxu0 %v17367_v22  ;;  %v17395_v44 = vsub.f32 %v874_v53, %v17377_v27  ;;  %v871_v12 = vld [vmem:[#allocation8 + $0x30] sm:$0xff] }
  0xbb   :  { %23035 = vst [vmem:[#allocation29_spill] sm:$0xff] %v17375_v19  ;;  %1137 = vmatpush1.msra.mxu1 %v1136_v56  ;;  %v1153_v58 = vsub.f32 %v17358_v40, %v22777_v14  ;;  %v22785_v56 = vand.u32 4294901760, %v17375_v19  ;;  %966 = vmatprep.subr.mxu0 %v17377_v27  ;;  %v1159_v7 = vsub.f32 %v17365_v16, %v22780_v43  ;;  %v17416_v40 = vand.u32 4294901760, %v871_v12 }
  0xbc   :  { %23036 = vst [vmem:[#allocation30_spill] sm:$0xff] %v17385_v9  ;;  %23037 = vst [vmem:[#allocation31_spill] sm:$0xff] %v17395_v44  ;;  %v1148_v5 = vand.u32 4294901760, %v1147_v15  ;;  %v22788_v57 = vand.u32 4294901760, %v17385_v9  ;;  %v17403_v62 = vsub.f32 %v873_v6, %v17387_v1  ;;  %968 = vmatpush1.msra.mxu0 %v17387_v1  ;;  %1143 = vmatprep.subr.mxu1 %v1142_v51  ;;  %v22791_v15 = vand.u32 4294901760, %v17395_v44 }
  0xbd   :  { %v1154_v14 = vand.u32 4294901760, %v1153_v58  ;;  %v1165_v53 = vsub.f32 %v17375_v19, %v22785_v56  ;;  %v1160_v43 = vand.u32 4294901760, %v1159_v7  ;;  %23040 = vst [vmem:[#allocation34_spill] sm:$0xff] %v17416_v40  ;;  %v868_v58 = vld [vmem:[#allocation8 + $0x18] sm:$0xff]  ;;  %v17422_v19 = vsub.f32 %v872_v54, %v17410_v36  ;;  %v867_v7 = vld [vmem:[#allocation8 + $0x10] sm:$0xff]  ;;  %970 = vmatprep.subr.mxu0 %v17410_v36 }
  0xbe   :  { %23038 = vst [vmem:[#allocation32_spill] sm:$0xff] %v17403_v62  ;;  %1149 = vmatpush1.msra.mxu1 %v1148_v5  ;;  %v1171_v6 = vsub.f32 %v17385_v9, %v22788_v57  ;;  %v22796_v16 = vand.u32 4294901760, %v17403_v62  ;;  %v1177_v56 = vsub.f32 %v17395_v44, %v22791_v15  ;;  %v17424_v5 = vand.u32 4294901760, %v870_v42  ;;  %v866_v15 = vld [vmem:[#allocation8 + $0x8] sm:$0xff]  ;;  %972 = vmatpush1.msra.mxu0 %v17416_v40 }
  0xbf   :  { %1155 = vmatprep.subr.mxu1 %v1154_v14  ;;  %v1166_v51 = vand.u32 4294901760, %v1165_v53  ;;  %23041 = vst [vmem:[#allocation35_spill] sm:$0xff] %v17422_v19  ;;  %v17431_v14 = vsub.f32 %v871_v12, %v17416_v40  ;;  %v17433_v53 = vand.u32 4294901760, %v869_v31  ;;  %v22801_v44 = vand.u32 4294901760, %v17422_v19 }
  0xc0   :  { %23042 = vst [vmem:[#allocation36_spill] sm:$0xff] %v17424_v5  ;;  %1161 = vmatpush1.msra.mxu1 %v1160_v43  ;;  %v1172_v57 = vand.u32 4294901760, %v1171_v6  ;;  %v1183_v9 = vsub.f32 %v17403_v62, %v22796_v16  ;;  %v1178_v54 = vand.u32 4294901760, %v1177_v56  ;;  %v17438_v4 = vsub.f32 %v870_v42, %v17424_v5  ;;  %v865_v6 = vld [vmem:[#allocation8] sm:$0xff]  ;;  %974 = vmatprep.subr.mxu0 %v17424_v5  ;;  %v904_v56 = vld [vmem:[#allocation8 + $0x138] sm:$0xff]  ;;  %v902_v5 = vld [vmem:[#allocation8 + $0x128] sm:$0xff] }
  0xc1   :  { %23043 = vst [vmem:[#allocation37_spill] sm:$0xff] %v17431_v14  ;;  %23044 = vst [vmem:[#allocation38_spill] sm:$0xff] %v17433_v53  ;;  %1167 = vmatprep.subr.mxu1 %v1166_v51  ;;  %v17440_v43 = vand.u32 4294901760, %v868_v58  ;;  %v22808_v16 = vand.u32 4294901760, %v17431_v14  ;;  %v17445_v62 = vsub.f32 %v869_v31, %v17433_v53  ;;  %v17447_v40 = vand.u32 4294901760, %v867_v7  ;;  %976 = vmatpush1.msra.mxu0 %v17433_v53 }
  0xc2   :  { %23045 = vst [vmem:[#allocation39_spill] sm:$0xff] %v17438_v4  ;;  %1173 = vmatpush1.msra.mxu1 %v1172_v57  ;;  %v1184_v12 = vand.u32 4294901760, %v1183_v9  ;;  %v1189_v42 = vsub.f32 %v17422_v19, %v22801_v44  ;;  %v17457_v57 = vand.u32 4294901760, %v866_v15  ;;  %v17467_v44 = vand.u32 4294901760, %v865_v6 }
  0xc3   :  { %23046 = vst [vmem:[#allocation40_spill] sm:$0xff] %v17440_v43  ;;  %23047 = vst [vmem:[#allocation41_spill] sm:$0xff] %v17445_v62  ;;  %1179 = vmatprep.subr.mxu1 %v1178_v54  ;;  %v17455_v51 = vsub.f32 %v868_v58, %v17440_v43  ;;  %978 = vmatprep.subr.mxu0 %v17440_v43  ;;  %v1195_v31 = vsub.f32 %v17431_v14, %v22808_v16  ;;  %v22819_v9 = vand.u32 4294901760, %v17445_v62  ;;  %v903_v16 = vld [vmem:[#allocation8 + $0x130] sm:$0xff] }
  0xc4   :  { %23048 = vst [vmem:[#allocation42_spill] sm:$0xff] %v17447_v40  ;;  %23050 = vst [vmem:[#allocation44_spill] sm:$0xff] %v17457_v57  ;;  %1185 = vmatpush1.msra.mxu1 %v1184_v12  ;;  %v17465_v54 = vsub.f32 %v867_v7, %v17447_v40  ;;  %980 = vmatpush1.msra.mxu0 %v17447_v40  ;;  %v1190_v58 = vand.u32 4294901760, %v1189_v42  ;;  %v23053_v19 = vand.u32 4294901760, %v17438_v4 }
  0xc5   :  { %23049 = vst [vmem:[#allocation43_spill] sm:$0xff] %v17455_v51  ;;  %23052 = vst [vmem:[#allocation46_spill] sm:$0xff] %v17467_v44  ;;  %v22824_v12 = vand.u32 4294901760, %v17455_v51  ;;  %v17475_v53 = vsub.f32 %v866_v15, %v17457_v57  ;;  %982 = vmatprep.subr.mxu0 %v17457_v57  ;;  %v1196_v7 = vand.u32 4294901760, %v1195_v31  ;;  %v1207_v14 = vsub.f32 %v17445_v62, %v22819_v9  ;;  %v901_v57 = vld [vmem:[#allocation8 + $0x120] sm:$0xff] }
  0xc6   :  { %23051 = vst [vmem:[#allocation45_spill] sm:$0xff] %v17465_v54  ;;  %v1201_v43 = vsub.f32 %v17438_v4, %v23053_v19  ;;  %v22827_v40 = vand.u32 4294901760, %v17465_v54  ;;  %v17483_v42 = vsub.f32 %v865_v6, %v17467_v44  ;;  %984 = vmatpush1.msra.mxu0 %v17467_v44  ;;  %1191 = vmatprep.subr.mxu1 %v1190_v58  ;;  %v17490_v4 = vand.u32 4294901760, %v904_v56 }
  0xc7   :  { %23054 = vst [vmem:[#allocation47_spill] sm:$0xff] %v17475_v53  ;;  %v1213_v15 = vsub.f32 %v17455_v51, %v22824_v12  ;;  %v22830_v31 = vand.u32 4294901760, %v17475_v53  ;;  %1197 = vmatpush1.msra.mxu1 %v1196_v7  ;;  %v1208_v9 = vand.u32 4294901760, %v1207_v14  ;;  %v17496_v44 = vand.u32 4294901760, %v903_v16  ;;  %v899_v14 = vld [vmem:[#allocation8 + $0x110] sm:$0xff] }
  0xc8   :  { %23055 = vst [vmem:[#allocation48_spill] sm:$0xff] %v17483_v42  ;;  %v1202_v19 = vand.u32 4294901760, %v1201_v43  ;;  %23056 = vst [vmem:[#allocation49_spill] sm:$0xff] %v17490_v4  ;;  %v1219_v6 = vsub.f32 %v17465_v54, %v22827_v40  ;;  %v22833_v62 = vand.u32 4294901760, %v17483_v42  ;;  %v900_v43 = vld [vmem:[#allocation8 + $0x118] sm:$0xff]  ;;  %v17502_v51 = vsub.f32 %v904_v56, %v17490_v4  ;;  %1010 = vmatprep.subr.mxu0 %v17490_v4 }
  0xc9   :  { %23057 = vst [vmem:[#allocation50_spill] sm:$0xff] %v17496_v44  ;;  %v1214_v58 = vand.u32 4294901760, %v1213_v15  ;;  %v1225_v12 = vsub.f32 %v17475_v53, %v22830_v31  ;;  %v17504_v7 = vand.u32 4294901760, %v902_v5  ;;  %v17513_v15 = vand.u32 4294901760, %v901_v57  ;;  %1012 = vmatpush2.msra.mxu0 %v17496_v44 }
  0xca   :  { %1203 = vmatprep.subr.mxu1 %v1202_v19  ;;  %23058 = vst [vmem:[#allocation51_spill] sm:$0xff] %v17502_v51  ;;  %v1220_v40 = vand.u32 4294901760, %v1219_v6  ;;  %v1231_v54 = vsub.f32 %v17483_v42, %v22833_v62  ;;  %v17511_v19 = vsub.f32 %v903_v16, %v17496_v44  ;;  %v22840_v31 = vand.u32 4294901760, %v17502_v51  ;;  %v898_v6 = vld [vmem:[#allocation8 + $0x108] sm:$0xff] }
  0xcb   :  { %23059 = vst [vmem:[#allocation52_spill] sm:$0xff] %v17504_v7  ;;  %1209 = vmatpush1.msra.mxu1 %v1208_v9  ;;  %23061 = vst [vmem:[#allocation54_spill] sm:$0xff] %v17513_v15  ;;  %v1226_v56 = vand.u32 4294901760, %v1225_v12  ;;  %v17518_v53 = vsub.f32 %v902_v5, %v17504_v7  ;;  %v17520_v9 = vand.u32 4294901760, %v900_v43  ;;  %1014 = vmatprep.subr.mxu0 %v17504_v7  ;;  %v17527_v44 = vand.u32 4294901760, %v899_v14  ;;  %v897_v12 = vld [vmem:[#allocation8 + $0x100] sm:$0xff] }
  0xcc   :  { %23060 = vst [vmem:[#allocation53_spill] sm:$0xff] %v17511_v19  ;;  %1215 = vmatprep.subr.mxu1 %v1214_v58  ;;  %v1232_v62 = vand.u32 4294901760, %v1231_v54  ;;  %v22845_v16 = vand.u32 4294901760, %v17511_v19  ;;  %v17525_v42 = vsub.f32 %v901_v57, %v17513_v15  ;;  %1016 = vmatpush2.msra.mxu0 %v17513_v15  ;;  %v1261_v5 = vsub.f32 %v17502_v51, %v22840_v31 }
  0xcd   :  { %23062 = vst [vmem:[#allocation55_spill] sm:$0xff] %v17518_v53  ;;  %23063 = vst [vmem:[#allocation56_spill] sm:$0xff] %v17520_v9  ;;  %1221 = vmatpush1.msra.mxu1 %v1220_v40  ;;  %v22848_v58 = vand.u32 4294901760, %v17518_v53  ;;  %v17535_v40 = vsub.f32 %v900_v43, %v17520_v9  ;;  %1018 = vmatprep.subr.mxu0 %v17520_v9  ;;  %v17545_v15 = vand.u32 4294901760, %v898_v6  ;;  %v17552_v51 = vand.u32 4294901760, %v897_v12 }
  0xce   :  { %23064 = vst [vmem:[#allocation57_spill] sm:$0xff] %v17525_v42  ;;  %23065 = vst [vmem:[#allocation58_spill] sm:$0xff] %v17527_v44  ;;  %1227 = vmatprep.subr.mxu1 %v1226_v56  ;;  %v1267_v57 = vsub.f32 %v17511_v19, %v22845_v16  ;;  %v22851_v54 = vand.u32 4294901760, %v17525_v42  ;;  %v17543_v56 = vsub.f32 %v899_v14, %v17527_v44  ;;  %1020 = vmatpush2.msra.mxu0 %v17527_v44 }
  0xcf   :  { %23066 = vst [vmem:[#allocation59_spill] sm:$0xff] %v17535_v40  ;;  %1233 = vmatpush1.msra.mxu1 %v1232_v62  ;;  %23068 = vst [vmem:[#allocation61_spill] sm:$0xff] %v17545_v15  ;;  %v1262_v31 = vand.u32 4294901760, %v1261_v5  ;;  %v1273_v43 = vsub.f32 %v17518_v53, %v22848_v58  ;;  %v22852_v62 = vand.u32 4294901760, %v17535_v40  ;;  %v17559_v19 = vsub.f32 %v898_v6, %v17545_v15 }
  0xd0   :  { %23067 = vst [vmem:[#allocation60_spill] sm:$0xff] %v17543_v56  ;;  %23069 = vst [vmem:[#allocation62_spill] sm:$0xff] %v17552_v51  ;;  %v1268_v9 = vand.u32 4294901760, %v1267_v57  ;;  %v1279_v16 = vsub.f32 %v17525_v42, %v22851_v54  ;;  %v22853_v14 = vand.u32 4294901760, %v17543_v56  ;;  %1022 = vmatprep.subr.mxu0 %v17545_v15  ;;  %v17566_v53 = vsub.f32 %v897_v12, %v17552_v51 }
  0xd1   :  { %23070 = vst [vmem:[#allocation63_spill] sm:$0xff] %v17559_v19  ;;  %1263 = vmatprep.subr.mxu1 %v1262_v31  ;;  %v1274_v5 = vand.u32 4294901760, %v1273_v43  ;;  %v1285_v58 = vsub.f32 %v17535_v40, %v22852_v62  ;;  %1024 = vmatpush2.msra.mxu0 %v17552_v51  ;;  %v22855_v54 = vand.u32 4294901760, %v17559_v19 }
  0xd2   :  { %23071 = vst [vmem:[#allocation64_spill] sm:$0xff] %v17566_v53  ;;  %1269 = vmatpush2.msra.mxu1 %v1268_v9  ;;  %v1280_v57 = vand.u32 4294901760, %v1279_v16  ;;  %v1291_v6 = vsub.f32 %v17543_v56, %v22853_v14  ;;  %1317 = vmatprep.subr.mxu0 %v17185_v17  ;;  %v22856_v43 = vand.u32 4294901760, %v17566_v53 }
  0xd3   :  { %1275 = vmatprep.subr.mxu1 %v1274_v5  ;;  %v1286_v31 = vand.u32 4294901760, %v1285_v58  ;;  %v1297_v12 = vsub.f32 %v17559_v19, %v22855_v54  ;;  %v165_v58 = vlaneseq }
  0xd4   :  { %1281 = vmatpush2.msra.mxu1 %v1280_v57  ;;  %v1292_v62 = vand.u32 4294901760, %v1291_v6  ;;  %v1303_v9 = vsub.f32 %v17566_v53, %v22856_v43  ;;  %v163_v6 = vld [vmem:[#allocation7] sm:$0x3] }
  0xd5   :  { %1287 = vmatprep.subr.mxu1 %v1286_v31  ;;  %v1298_v16 = vand.u32 4294901760, %v1297_v12  ;;  %v17582_v5 = vshrl.u32 %v165_v58, 7 }
  0xd6   :  { %1293 = vmatpush2.msra.mxu1 %v1292_v62  ;;  %v1304_v14 = vand.u32 4294901760, %v1303_v9 }
  0xd7   :  { %1299 = vmatprep.subr.mxu1 %v1298_v16  ;;  %23072 = vst [vmem:[#allocation65_spill] sm:$0xff] %v17582_v5  ;;  %v22876_v57 = vsub.s32 0, %v17582_v5  ;;  %v22885_v31 = vsub.s32 1, %v17582_v5 }
  0xd8   :  { %1305 = vmatpush2.msra.mxu1 %v1304_v14 }
  0xd9   :  { %1471 = vmatprep.subr.mxu1 %v17180_v11  ;;  %v168_v54 = vrot.slane %v163_v6, %v22876_v57  ;;  %v172_v12 = vrot.slane %v163_v6, %v22885_v31  ;;  %v23095_v31 = vld [vmem:[#allocation52_spill] sm:$0xff] }
 0x13d   :  { %v275_v17 = vpop.f32.mrf.mxu0 }
 0x13e   :  { %v276_v9 = vadd.f32 %v275_v17, %v168_v54 }
 0x13f   :  { %v277_v43 = vpop.f32.mrf.mxu0 }
 0x140   :  { %v278_v53 = vadd.f32 %v277_v43, %v172_v12 }
 0x143   :  { %v437_v62 = vpop.f32.mrf.mxu1 }
 0x144   :  { %v438_v56 = vadd.f32 %v437_v62, %v276_v9  ;;  %v23079_v9 = vld [vmem:[#allocation36_spill] sm:$0xff] }
 0x145   :  { %v439_v16 = vpop.f32.mrf.mxu1 }
 0x146   :  { %v440_v42 = vadd.f32 %v439_v16, %v278_v53  ;;  %v23080_v16 = vld [vmem:[#allocation28_spill] sm:$0xff] }
 0x14f   :  { %v546_v14 = vpop.f32.mrf.mxu0 }
 0x150   :  { %v547_v11 = vadd.f32 %v546_v14, %v438_v56  ;;  %v23075_v56 = vld [vmem:[#allocation33_spill] sm:$0xff]  ;;  %v23078_v14 = vld [vmem:[#allocation27_spill] sm:$0xff] }
 0x151   :  { %v548_v58 = vpop.f32.mrf.mxu0 }
 0x152   :  { %v549_v15 = vadd.f32 %v548_v58, %v440_v42  ;;  %v23081_v58 = vld [vmem:[#allocation38_spill] sm:$0xff] }
 0x157   :  { %v638_v19 = vpop.f32.mrf.mxu1 }
 0x158   :  { %v639_v44 = vadd.f32 %v638_v19, %v547_v11 }
 0x159   :  { %v640_v51 = vpop.f32.mrf.mxu1 }
 0x15a   :  { %v641_v57 = vadd.f32 %v640_v51, %v549_v15 }
 0x162   :  { %v764_v40 = vpop.f32.mrf.mxu0 }
 0x163   :  { %v765_v4 = vadd.f32 %v764_v40, %v639_v44  ;;  %v23074_v40 = vld [vmem:[#allocation25_spill] sm:$0xff] }
 0x164   :  { %v766_v7 = vpop.f32.mrf.mxu0 }
 0x165   :  { %v767_v0 = vadd.f32 %v766_v7, %v641_v57  ;;  %v23077_v57 = vld [vmem:[#allocation34_spill] sm:$0xff] }
 0x16b   :  { %v854_v36 = vpop.f32.mrf.mxu1 }
 0x16c   :  { %v855_v5 = vadd.f32 %v854_v36, %v765_v4 }
 0x16d   :  { %v856_v6 = vpop.f32.mrf.mxu1 }
 0x16e   :  { %vm859_vm2 = vcmp.ge.f32.partialorder %v855_v5, 0.0  ;;  %v861_v17 = vmul.f32 0.01, %v855_v5  ;;  %v857_v54 = vadd.f32 %v856_v6, %v767_v0  ;;  %v23082_v6 = vld [vmem:[#allocation29_spill] sm:$0xff] }
 0x170   :  { %v863_v43 = vsel %vm859_vm2, %v855_v5, %v861_v17  ;;  %vm860_vm3 = vcmp.ge.f32.partialorder %v857_v54, 0.0  ;;  %v862_v12 = vmul.f32 0.01, %v857_v54  ;;  %v23076_v5 = vld [vmem:[#allocation26_spill] sm:$0xff]  ;;  %v23083_v17 = vld [vmem:[#allocation40_spill] sm:$0xff] }
 0x171   :  { %v17590_v62 = vand.u32 4294901760, %v863_v43 }
 0x172   :  { %v864_v53 = vsel %vm860_vm3, %v857_v54, %v862_v12  ;;  %v23084_v54 = vld [vmem:[#allocation30_spill] sm:$0xff]  ;;  %v23086_v12 = vld [vmem:[#allocation31_spill] sm:$0xff] }
 0x173   :  { %23073 = vst [vmem:[#allocation66_spill] sm:$0xff] %v17590_v62  ;;  %v17593_v42 = vsub.f32 %v863_v43, %v17590_v62  ;;  %v919_v11 = vsel %vm917_vm4, %v864_v53, 0  ;;  %v23085_v43 = vld [vmem:[#allocation42_spill] sm:$0xff]  ;;  %v23087_v53 = vld [vmem:[#allocation44_spill] sm:$0xff] }
 0x174   :  { %v17596_v44 = vand.u32 4294901760, %v919_v11 }
 0x175   :  { %v22886_v36 = vand.u32 4294901760, %v17593_v42 }
 0x176   :  { %v1026_v4 = vsub.f32 %v919_v11, %v17596_v44  ;;  %1307 = vmatprep.mubr.f32.mxu1 %v17596_v44  ;;  %v23088_v11 = vld [vmem:[#allocation32_spill] sm:$0xff] }
 0x177   :  { %1309 = vmatmul.mubr.f32.vlgmr.msra.gmra.mxu1 %v17590_v62  ;;  %v1034_v51 = vsub.f32 %v17593_v42, %v22886_v36  ;;  %v23096_v36 = vld [vmem:[#allocation41_spill] sm:$0xff]  ;;  %v23097_v62 = vld [vmem:[#allocation54_spill] sm:$0xff] }
 0x178   :  { %1473 = vmatpush1.msra.mxu1 %v17182_v13  ;;  %v1027_v0 = vand.u32 4294901760, %v1026_v4 }
 0x179   :  { %1475 = vmatprep.subr.mxu1 %v17187_v18  ;;  %v1035_v15 = vand.u32 4294901760, %v1034_v51  ;;  %v23091_v51 = vld [vmem:[#allocation49_spill] sm:$0xff] }
 0x17a   :  { %1477 = vmatpush1.msra.mxu1 %v17193_v26  ;;  %1577 = vmatprep.mubr.f32.mxu1 %v1027_v0  ;;  %v1028_v7 = vsub.f32 %v1026_v4, %v1027_v0  ;;  %v23090_v0 = vld [vmem:[#allocation35_spill] sm:$0xff] }
 0x17b   :  { %1479 = vmatprep.subr.mxu1 %v17200_v33 }
 0x17c   :  { %1481 = vmatpush1.msra.mxu1 %v17207_v38  ;;  %v1029_v19 = vand.u32 4294901760, %v1028_v7  ;;  %v23092_v7 = vld [vmem:[#allocation37_spill] sm:$0xff] }
 0x17d   :  { %1483 = vmatprep.subr.mxu1 %v17217_v47 }
 0x17e   :  { %1485 = vmatpush1.msra.mxu1 %v17227_v61  ;;  %1030 = vmatprep.mubr.f32.mxu0 %v1029_v19  ;;  %v23093_v19 = vld [vmem:[#allocation50_spill] sm:$0xff] }
 0x17f   :  { %1487 = vmatprep.subr.mxu1 %v17250_v63  ;;  %1036 = vmatmul.mubr.f32.vlgmr.msra.gmra.mxu0 %v1035_v15  ;;  %v23094_v15 = vld [vmem:[#allocation39_spill] sm:$0xff] }
 0x180   :  { %1320 = vmatpush1.msra.mxu0 %v17191_v25  ;;  %1489 = vmatpush1.msra.mxu1 %v17256_v28 }
 0x181   :  { %1323 = vmatprep.subr.mxu0 %v17198_v32  ;;  %1461 = vmatprep.mubr.f32.mxu0 %v1026_v4  ;;  %v23089_v4 = vld [vmem:[#allocation46_spill] sm:$0xff] }
 0x182   :  { %1491 = vmatprep.subr.mxu1 %v17264_v39  ;;  %1326 = vmatpush1.msra.mxu0 %v17205_v37 }
 0x183   :  { %1493 = vmatpush1.msra.mxu1 %v17273_v55  ;;  %1329 = vmatprep.subr.mxu0 %v17215_v46 }
 0x184   :  { %1495 = vmatprep.subr.mxu1 %v17280_v10  ;;  %1332 = vmatpush1.msra.mxu0 %v17225_v60 }
 0x185   :  { %1497 = vmatpush1.msra.mxu1 %v17287_v30  ;;  %1335 = vmatprep.subr.mxu0 %v17235_v8 }
 0x186   :  { %1499 = vmatprep.subr.mxu1 %v17297_v50  ;;  %1338 = vmatpush1.msra.mxu0 %v17243_v45 }
 0x187   :  { %1501 = vmatpush1.msra.mxu1 %v17307_v3  ;;  %1341 = vmatprep.subr.mxu0 %v17262_v52 }
 0x188   :  { %1503 = vmatprep.subr.mxu1 %v17330_v20  ;;  %1344 = vmatpush1.msra.mxu0 %v17271_v34 }
 0x189   :  { %1505 = vmatpush1.msra.mxu1 %v17336_v35  ;;  %1347 = vmatprep.subr.mxu0 %v17278_v24 }
 0x18a   :  { %1507 = vmatprep.subr.mxu1 %v17344_v29  ;;  %1350 = vmatpush1.msra.mxu0 %v17285_v23 }
 0x18b   :  { %1509 = vmatpush1.msra.mxu1 %v17353_v21  ;;  %1353 = vmatprep.subr.mxu0 %v17295_v41 }
 0x18c   :  { %1511 = vmatprep.subr.mxu1 %v17360_v48  ;;  %1356 = vmatpush1.msra.mxu0 %v17305_v2 }
 0x18d   :  { %1513 = vmatpush1.msra.mxu1 %v17367_v22  ;;  %1359 = vmatprep.subr.mxu0 %v17315_v49 }
 0x18e   :  { %1515 = vmatprep.subr.mxu1 %v17377_v27  ;;  %1362 = vmatpush1.msra.mxu0 %v17323_v59 }
 0x18f   :  { %1517 = vmatpush1.msra.mxu1 %v17387_v1  ;;  %1365 = vmatprep.subr.mxu0 %v23074_v40 }
 0x190   :  { %1519 = vmatprep.subr.mxu1 %v23075_v56  ;;  %1368 = vmatpush1.msra.mxu0 %v23076_v5 }
 0x191   :  { %1521 = vmatpush1.msra.mxu1 %v23077_v57  ;;  %1371 = vmatprep.subr.mxu0 %v23078_v14 }
 0x192   :  { %1523 = vmatprep.subr.mxu1 %v23079_v9  ;;  %1374 = vmatpush1.msra.mxu0 %v23080_v16 }
 0x193   :  { %1525 = vmatpush1.msra.mxu1 %v23081_v58  ;;  %1377 = vmatprep.subr.mxu0 %v23082_v6 }
 0x194   :  { %1527 = vmatprep.subr.mxu1 %v23083_v17  ;;  %1380 = vmatpush1.msra.mxu0 %v23084_v54 }
 0x195   :  { %1529 = vmatpush1.msra.mxu1 %v23085_v43  ;;  %1383 = vmatprep.subr.mxu0 %v23086_v12 }
 0x196   :  { %1531 = vmatprep.subr.mxu1 %v23087_v53  ;;  %1386 = vmatpush1.msra.mxu0 %v23088_v11  ;;  %v23098_v53 = vld [vmem:[#allocation43_spill] sm:$0xff]  ;;  %v23099_v11 = vld [vmem:[#allocation56_spill] sm:$0xff] }
 0x197   :  { %1533 = vmatpush1.msra.mxu1 %v23089_v4  ;;  %1389 = vmatprep.subr.mxu0 %v23090_v0  ;;  %v23100_v4 = vld [vmem:[#allocation45_spill] sm:$0xff]  ;;  %v23101_v0 = vld [vmem:[#allocation58_spill] sm:$0xff] }
 0x198   :  { %1559 = vmatprep.subr.mxu1 %v23091_v51  ;;  %1392 = vmatpush1.msra.mxu0 %v23092_v7  ;;  %v23102_v51 = vld [vmem:[#allocation47_spill] sm:$0xff]  ;;  %v23103_v7 = vld [vmem:[#allocation61_spill] sm:$0xff] }
 0x199   :  { %1561 = vmatpush2.msra.mxu1 %v23093_v19  ;;  %1395 = vmatprep.subr.mxu0 %v23094_v15  ;;  %v23104_v19 = vld [vmem:[#allocation48_spill] sm:$0xff]  ;;  %v23105_v15 = vld [vmem:[#allocation62_spill] sm:$0xff] }
 0x19a   :  { %1563 = vmatprep.subr.mxu1 %v23095_v31  ;;  %1398 = vmatpush1.msra.mxu0 %v23096_v36  ;;  %v23106_v31 = vld [vmem:[#allocation51_spill] sm:$0xff] }
 0x19b   :  { %1565 = vmatpush2.msra.mxu1 %v23097_v62  ;;  %1401 = vmatprep.subr.mxu0 %v23098_v53  ;;  %v23107_v62 = vand.u32 4294901760, %v17593_v42  ;;  %v23108_v53 = vld [vmem:[#allocation23_spill] sm:$0xff] }
 0x19c   :  { %1567 = vmatprep.subr.mxu1 %v23099_v11  ;;  %1404 = vmatpush1.msra.mxu0 %v23100_v4  ;;  %v23109_v11 = vld [vmem:[#allocation53_spill] sm:$0xff] }
 0x19d   :  { %1569 = vmatpush2.msra.mxu1 %v23101_v0  ;;  %1407 = vmatprep.subr.mxu0 %v23102_v51  ;;  %v23110_v51 = vld [vmem:[#allocation55_spill] sm:$0xff] }
 0x19e   :  { %1571 = vmatprep.subr.mxu1 %v23103_v7  ;;  %1410 = vmatpush1.msra.mxu0 %v23104_v19  ;;  %v23111_v19 = vld [vmem:[#allocation57_spill] sm:$0xff] }
 0x19f   :  { %1573 = vmatpush2.msra.mxu1 %v23105_v15  ;;  %1437 = vmatprep.subr.mxu0 %v23106_v31  ;;  %v23112_v31 = vld [vmem:[#allocation59_spill] sm:$0xff] }
 0x1a0   :  { %1581 = vmatmul.mubr.f32.vlgmr.msra.gmra.mxu1 %v23107_v62  ;;  %1781 = vmatprep.subr.mxu1 %v23108_v53  ;;  %v23113_v62 = vld [vmem:[#allocation60_spill] sm:$0xff]  ;;  %v23114_v53 = vld [vmem:[#allocation63_spill] sm:$0xff] }
 0x1a1   :  { %1440 = vmatpush2.msra.mxu0 %v23109_v11  ;;  %1783 = vmatpush1.msra.mxu1 %v17182_v13  ;;  %v23115_v13 = vld [vmem:[#allocation64_spill] sm:$0xff] }
 0x1a2   :  { %1885 = vmatprep.mubr.f32.mxu1 %v17596_v44  ;;  %1443 = vmatprep.subr.mxu0 %v23110_v51 }
 0x1a3   :  { %1785 = vmatprep.subr.mxu1 %v17187_v18  ;;  %1446 = vmatpush2.msra.mxu0 %v23111_v19  ;;  %v23116_v18 = vld [vmem:[#allocation24_spill] sm:$0xff] }
 0x1a4   :  { %1787 = vmatpush1.msra.mxu1 %v17193_v26  ;;  %1449 = vmatprep.subr.mxu0 %v23112_v31  ;;  %v23117_v26 = vand.u32 4294901760, %v23116_v18  ;;  %v1913_v18 = vld [vmem:[#allocation11 + $0x70] sm:$0xff] }
 0x1a5   :  { %1789 = vmatprep.subr.mxu1 %v17200_v33  ;;  %1452 = vmatpush2.msra.mxu0 %v23113_v62  ;;  %v23118_v33 = vand.u32 4294901760, %v17191_v25  ;;  %v23122_v25 = vand.u32 4294901760, %v17225_v60  ;;  %v23126_v60 = vand.u32 4294901760, %v17271_v34  ;;  %v23133_v34 = vand.u32 4294901760, %v23074_v40  ;;  %v23155_v40 = vld [vmem:[#allocation43_spill] sm:$0xff] }
 0x1a6   :  { %1791 = vmatpush1.msra.mxu1 %v17207_v38  ;;  %1455 = vmatprep.subr.mxu0 %v23114_v53  ;;  %v23119_v38 = vand.u32 4294901760, %v17198_v32  ;;  %v23123_v32 = vand.u32 4294901760, %v17235_v8  ;;  %v23127_v8 = vand.u32 4294901760, %v17278_v24  ;;  %v23136_v24 = vand.u32 4294901760, %v23080_v16  ;;  %v23161_v16 = vld [vmem:[#allocation48_spill] sm:$0xff] }
 0x1a7   :  { %1793 = vmatprep.subr.mxu1 %v17217_v47  ;;  %1458 = vmatpush2.msra.mxu0 %v23115_v13  ;;  %v23120_v47 = vand.u32 4294901760, %v17205_v37  ;;  %v23124_v37 = vand.u32 4294901760, %v17243_v45  ;;  %v23128_v45 = vand.u32 4294901760, %v17285_v23  ;;  %v23138_v23 = vand.u32 4294901760, %v23084_v54 }
 0x1a8   :  { %1795 = vmatpush1.msra.mxu1 %v17227_v61  ;;  %1464 = vmatmul.mubr.f32.vlgmr.msra.gmra.mxu0 %v17593_v42  ;;  %v23121_v61 = vand.u32 4294901760, %v17215_v46  ;;  %v23125_v46 = vand.u32 4294901760, %v17262_v52  ;;  %v23131_v52 = vand.u32 4294901760, %v17315_v49  ;;  %v23153_v42 = vand.u32 4294901760, %v23096_v36 }
 0x1a9   :  { %1590 = vmatprep.subr.mxu0 %v23117_v26  ;;  %1797 = vmatprep.subr.mxu1 %v17250_v63  ;;  %v23129_v63 = vand.u32 4294901760, %v17295_v41  ;;  %v23140_v41 = vld [vmem:[#allocation44_spill] sm:$0xff]  ;;  %v23162_v36 = vand.u32 4294901760, %v23161_v16  ;;  %v23166_v54 = vand.u32 4294901760, %v23109_v11  ;;  %v23173_v11 = vand.u32 4294901760, %v23115_v13 }
 0x1aa   :  { %1594 = vmatpush1.msra.mxu0 %v23118_v33  ;;  %1772 = vmatprep.mubr.f32.mxu0 %v17596_v44  ;;  %v23154_v44 = vld [vmem:[#allocation54_spill] sm:$0xff] }
 0x1ab   :  { %1799 = vmatpush1.msra.mxu1 %v17256_v28  ;;  %1598 = vmatprep.subr.mxu0 %v23119_v38  ;;  %v23130_v28 = vand.u32 4294901760, %v17305_v2  ;;  %v23143_v2 = vld [vmem:[#allocation46_spill] sm:$0xff]  ;;  %v1910_v38 = vld [vmem:[#allocation11 + $0x58] sm:$0xff] }
 0x1ac   :  { %1801 = vmatprep.subr.mxu1 %v17264_v39  ;;  %1602 = vmatpush1.msra.mxu0 %v23120_v47  ;;  %v23132_v39 = vand.u32 4294901760, %v17323_v59  ;;  %v23146_v59 = vld [vmem:[#allocation49_spill] sm:$0xff]  ;;  %v17820_v13 = vand.u32 4294901760, %v1910_v38 }
 0x1ad   :  { %1803 = vmatpush1.msra.mxu1 %v17273_v55  ;;  %1606 = vmatprep.subr.mxu0 %v23121_v61  ;;  %v23134_v55 = vand.u32 4294901760, %v23076_v5  ;;  %v23157_v5 = vld [vmem:[#allocation56_spill] sm:$0xff] }
 0x1ae   :  { %1805 = vmatprep.subr.mxu1 %v17280_v10  ;;  %1610 = vmatpush1.msra.mxu0 %v23122_v25  ;;  %v23137_v10 = vand.u32 4294901760, %v23082_v6  ;;  %v1908_v25 = vld [vmem:[#allocation11 + $0x48] sm:$0xff] }
 0x1af   :  { %1807 = vmatpush1.msra.mxu1 %v17287_v30  ;;  %1614 = vmatprep.subr.mxu0 %v23123_v32  ;;  %v23139_v30 = vand.u32 4294901760, %v23086_v12  ;;  %v23168_v12 = vmov 0.0   ;;  %v1907_v32 = vld [vmem:[#allocation11 + $0x40] sm:$0xff] }
 0x1b0   :  { %1809 = vmatprep.subr.mxu1 %v17297_v50  ;;  %1618 = vmatpush1.msra.mxu0 %v23124_v37  ;;  %v23141_v50 = vld [vmem:[#allocation32_spill] sm:$0xff] }
 0x1b1   :  { %1811 = vmatpush1.msra.mxu1 %v17307_v3  ;;  %1622 = vmatprep.subr.mxu0 %v23125_v46  ;;  %v23144_v3 = vld [vmem:[#allocation35_spill] sm:$0xff] }
 0x1b2   :  { %1813 = vmatprep.subr.mxu1 %v17330_v20  ;;  %1626 = vmatpush1.msra.mxu0 %v23126_v60  ;;  %v23145_v49 = vand.u32 4294901760, %v23144_v3  ;;  %v23147_v20 = vld [vmem:[#allocation37_spill] sm:$0xff] }
 0x1b3   :  { %1815 = vmatpush1.msra.mxu1 %v17336_v35  ;;  %1630 = vmatprep.subr.mxu0 %v23127_v8  ;;  %v23148_v35 = vand.u32 4294901760, %v23147_v20  ;;  %v17834_v8 = vand.u32 4294901760, %v1908_v25 }
 0x1b4   :  { %1817 = vmatprep.subr.mxu1 %v17344_v29  ;;  %1634 = vmatpush1.msra.mxu0 %v23128_v45  ;;  %v23149_v29 = vld [vmem:[#allocation50_spill] sm:$0xff] }
 0x1b5   :  { %1819 = vmatpush1.msra.mxu1 %v17353_v21  ;;  %1638 = vmatprep.subr.mxu0 %v23129_v63  ;;  %v23150_v21 = vld [vmem:[#allocation39_spill] sm:$0xff]  ;;  %v17840_v63 = vsub.f32 %v1910_v38, %v17820_v13 }
 0x1b6   :  { %1821 = vmatprep.subr.mxu1 %v17360_v48  ;;  %1642 = vmatpush1.msra.mxu0 %v23130_v28  ;;  %v23151_v48 = vand.u32 4294901760, %v23150_v21 }
 0x1b7   :  { %1823 = vmatpush1.msra.mxu1 %v17367_v22  ;;  %1646 = vmatprep.subr.mxu0 %v23131_v52  ;;  %v23135_v22 = vand.u32 4294901760, %v23078_v14  ;;  %v23159_v14 = vld [vmem:[#allocation47_spill] sm:$0xff] }
 0x1b8   :  { %1825 = vmatprep.subr.mxu1 %v17377_v27  ;;  %1650 = vmatpush1.msra.mxu0 %v23132_v39  ;;  %v23152_v27 = vld [vmem:[#allocation52_spill] sm:$0xff] }
 0x1b9   :  { %1827 = vmatpush1.msra.mxu1 %v17387_v1  ;;  %1654 = vmatprep.subr.mxu0 %v23133_v34  ;;  %v23142_v1 = vand.u32 4294901760, %v23141_v50 }
 0x1ba   :  { %1829 = vmatprep.subr.mxu1 %v23075_v56  ;;  %1658 = vmatpush1.msra.mxu0 %v23134_v55  ;;  %v23156_v56 = vand.u32 4294901760, %v23155_v40  ;;  %v17850_v55 = vand.u32 4294901760, %v1907_v32 }
 0x1bb   :  { %1831 = vmatpush1.msra.mxu1 %v23077_v57  ;;  %1662 = vmatprep.subr.mxu0 %v23135_v22  ;;  %v23158_v57 = vand.u32 4294901760, %v23100_v4  ;;  %v23169_v4 = vand.u32 4294901760, %v23111_v19  ;;  %v1912_v19 = vld [vmem:[#allocation11 + $0x68] sm:$0xff] }
 0x1bc   :  { %1833 = vmatprep.subr.mxu1 %v23079_v9  ;;  %1666 = vmatpush1.msra.mxu0 %v23136_v24  ;;  %v23160_v9 = vand.u32 4294901760, %v23159_v14  ;;  %v17816_v33 = vand.u32 4294901760, %v1912_v19  ;;  %v17855_v24 = vsub.f32 %v1908_v25, %v17834_v8 }
 0x1bd   :  { %1835 = vmatpush1.msra.mxu1 %v23081_v58  ;;  %1670 = vmatprep.subr.mxu0 %v23137_v10  ;;  %v23163_v58 = vld [vmem:[#allocation51_spill] sm:$0xff] }
 0x1be   :  { %1837 = vmatprep.subr.mxu1 %v23083_v17  ;;  %1674 = vmatpush1.msra.mxu0 %v23138_v23  ;;  %v23164_v6 = vand.u32 4294901760, %v23163_v58  ;;  %v23165_v17 = vld [vmem:[#allocation66_spill] sm:$0xff]  ;;  %v17831_v60 = vsub.f32 %v1912_v19, %v17816_v33 }
 0x1bf   :  { %1839 = vmatpush1.msra.mxu1 %v23085_v43  ;;  %1678 = vmatprep.subr.mxu0 %v23139_v30  ;;  %v23167_v43 = vand.u32 4294901760, %v23110_v51  ;;  %v1914_v51 = vld [vmem:[#allocation11 + $0x78] sm:$0xff] }
 0x1c0   :  { %1841 = vmatprep.subr.mxu1 %v23140_v41  ;;  %1682 = vmatpush1.msra.mxu0 %v23142_v1  ;;  %v17812_v26 = vand.u32 4294901760, %v1914_v51  ;;  %v22906_v34 = vand.u32 4294901760, %v17831_v60  ;;  %v22904_v41 = vand.u32 4294901760, %v17840_v63  ;;  %v1906_v1 = vld [vmem:[#allocation11 + $0x38] sm:$0xff] }
 0x1c1   :  { %1843 = vmatpush1.msra.mxu1 %v23143_v2  ;;  %1686 = vmatprep.subr.mxu0 %v23145_v49  ;;  %v17883_v21 = vand.u32 4294901760, %v1906_v1 }
 0x1c2   :  { %1869 = vmatprep.subr.mxu1 %v23146_v59  ;;  %1690 = vmatpush1.msra.mxu0 %v23148_v35  ;;  %v17825_v37 = vsub.f32 %v1914_v51, %v17812_v26  ;;  %v2047_v30 = vsub.f32 %v17831_v60, %v22906_v34  ;;  %v17875_v59 = vsub.f32 %v1907_v32, %v17850_v55  ;;  %v1902_v51 = vld [vmem:[#allocation11 + $0x18] sm:$0xff] }
 0x1c3   :  { %1871 = vmatpush2.msra.mxu1 %v23149_v29  ;;  %1694 = vmatprep.subr.mxu0 %v23151_v48  ;;  %v2061_v35 = vsub.f32 %v17840_v63, %v22904_v41  ;;  %v22902_v29 = vand.u32 4294901760, %v17855_v24  ;;  %v17943_v38 = vand.u32 4294901760, %v1902_v51 }
 0x1c4   :  { %1873 = vmatprep.subr.mxu1 %v23152_v27  ;;  %1698 = vmatpush1.msra.mxu0 %v23153_v42  ;;  %v22908_v52 = vand.u32 4294901760, %v17825_v37  ;;  %v2048_v20 = vand.u32 4294901760, %v2047_v30  ;;  %v22901_v42 = vand.u32 4294901760, %v17875_v59 }
 0x1c5   :  { %1875 = vmatpush2.msra.mxu1 %v23154_v44  ;;  %1702 = vmatprep.subr.mxu0 %v23156_v56  ;;  %v17892_v44 = vsub.f32 %v1906_v1, %v17883_v21  ;;  %v2062_v40 = vand.u32 4294901760, %v2061_v35  ;;  %v2075_v56 = vsub.f32 %v17855_v24, %v22902_v29  ;;  %v1900_v1 = vld [vmem:[#allocation11 + $0x8] sm:$0xff] }
 0x1c6   :  { %1877 = vmatprep.subr.mxu1 %v23157_v5  ;;  %1706 = vmatpush1.msra.mxu0 %v23158_v57  ;;  %v2033_v10 = vsub.f32 %v17825_v37, %v22908_v52  ;;  %v2082_v14 = vsub.f32 %v17875_v59, %v22901_v42 }
 0x1c7   :  { %1879 = vmatpush2.msra.mxu1 %v23101_v0  ;;  %1710 = vmatprep.subr.mxu0 %v23160_v9  ;;  %v23170_v0 = vand.u32 4294901760, %v23112_v31  ;;  %v17814_v31 = vand.u32 4294901760, %v1913_v18  ;;  %v22900_v5 = vand.u32 4294901760, %v17892_v44  ;;  %v2076_v9 = vand.u32 4294901760, %v2075_v56 }
 0x1c8   :  { %1881 = vmatprep.subr.mxu1 %v23103_v7  ;;  %1714 = vmatpush1.msra.mxu0 %v23162_v36  ;;  %v23171_v7 = vand.u32 4294901760, %v23113_v62  ;;  %v1911_v62 = vld [vmem:[#allocation11 + $0x60] sm:$0xff]  ;;  %v2034_v2 = vand.u32 4294901760, %v2033_v10  ;;  %v1905_v36 = vld [vmem:[#allocation11 + $0x30] sm:$0xff]  ;;  %v2083_v58 = vand.u32 4294901760, %v2082_v14 }
 0x1c9   :  { %1883 = vmatpush2.msra.mxu1 %v23105_v15  ;;  %1742 = vmatprep.subr.mxu0 %v23164_v6  ;;  %v23172_v15 = vand.u32 4294901760, %v23114_v53  ;;  %v1909_v53 = vld [vmem:[#allocation11 + $0x50] sm:$0xff]  ;;  %v17818_v47 = vand.u32 4294901760, %v1911_v62  ;;  %v17828_v46 = vsub.f32 %v1913_v18, %v17814_v31  ;;  %v2089_v16 = vsub.f32 %v17892_v44, %v22900_v5 }
 0x1ca   :  { %1887 = vmatmul.mubr.f32.vlgmr.msra.gmra.mxu1 %v23165_v17  ;;  %1746 = vmatpush2.msra.mxu0 %v23166_v54  ;;  %v17822_v61 = vand.u32 4294901760, %v1909_v53  ;;  %v17916_v6 = vand.u32 4294901760, %v1905_v36 }
 0x1cb   :  { %1750 = vmatprep.subr.mxu0 %v23167_v43  ;;  %2029 = vmatprep.subr.mxu1 %v23168_v12  ;;  %v17837_v45 = vsub.f32 %v1911_v62, %v17818_v47  ;;  %v22907_v39 = vand.u32 4294901760, %v17828_v46  ;;  %v2090_v54 = vand.u32 4294901760, %v2089_v16 }
 0x1cc   :  { %1754 = vmatpush2.msra.mxu0 %v23169_v4  ;;  %v17844_v28 = vsub.f32 %v1909_v53, %v17822_v61  ;;  %2035 = vmatpush1.msra.mxu1 %v2034_v2  ;;  %v17920_v43 = vsub.f32 %v1905_v36, %v17916_v6  ;;  %v1901_v53 = vld [vmem:[#allocation11 + $0x10] sm:$0xff] }
 0x1cd   :  { %1758 = vmatprep.subr.mxu0 %v23170_v0  ;;  %v22905_v22 = vand.u32 4294901760, %v17837_v45  ;;  %v2040_v23 = vsub.f32 %v17828_v46, %v22907_v39  ;;  %2036 = vmatprep.subr.mxu1 %v23168_v12  ;;  %v1903_v0 = vld [vmem:[#allocation11 + $0x20] sm:$0xff]  ;;  %v17956_v30 = vand.u32 4294901760, %v1901_v53 }
 0x1ce   :  { %1762 = vmatpush2.msra.mxu0 %v23171_v7  ;;  %v22903_v50 = vand.u32 4294901760, %v17844_v28  ;;  %v22899_v7 = vand.u32 4294901760, %v17920_v43 }
 0x1cf   :  { %1766 = vmatprep.subr.mxu0 %v23172_v15  ;;  %v2041_v3 = vand.u32 4294901760, %v2040_v23  ;;  %v2054_v49 = vsub.f32 %v17837_v45, %v22905_v22  ;;  %v17953_v23 = vsub.f32 %v1902_v51, %v17943_v38  ;;  %v17967_v35 = vsub.f32 %v1901_v53, %v17956_v30 }
 0x1d0   :  { %1770 = vmatpush2.msra.mxu0 %v23173_v11  ;;  %v2068_v27 = vsub.f32 %v17844_v28, %v22903_v50  ;;  %v17931_v11 = vand.u32 4294901760, %v1903_v0  ;;  %v2096_v18 = vsub.f32 %v17920_v43, %v22899_v7 }
 0x1d1   :  { %1774 = vmatmul.mubr.f32.vlgmr.msra.gmra.mxu0 %v23165_v17  ;;  %1929 = vmatprep.subr.mxu0 %v23168_v12  ;;  %v2055_v48 = vand.u32 4294901760, %v2054_v49  ;;  %v1904_v17 = vld [vmem:[#allocation11 + $0x28] sm:$0xff]  ;;  %v22895_v49 = vand.u32 4294901760, %v17953_v23  ;;  %v22894_v14 = vand.u32 4294901760, %v17967_v35 }
 0x1d2   :  { %1931 = vmatpush1.msra.mxu0 %v17812_v26  ;;  %2042 = vmatpush1.msra.mxu1 %v2041_v3  ;;  %v2069_v57 = vand.u32 4294901760, %v2068_v27  ;;  %v17922_v4 = vand.u32 4294901760, %v1904_v17  ;;  %v17941_v62 = vsub.f32 %v1903_v0, %v17931_v11  ;;  %v2097_v25 = vand.u32 4294901760, %v2096_v18  ;;  %v1917_v0 = vld [vmem:[#allocation11 + $0x90] sm:$0xff] }
 0x1d3   :  { %1932 = vmatprep.subr.mxu0 %v23168_v12  ;;  %2043 = vmatprep.subr.mxu1 %v23168_v12 }
 0x1d4   :  { %1934 = vmatpush1.msra.mxu0 %v17814_v31  ;;  %2049 = vmatpush1.msra.mxu1 %v2048_v20  ;;  %v17929_v15 = vsub.f32 %v1904_v17, %v17922_v4  ;;  %v22896_v10 = vand.u32 4294901760, %v17941_v62  ;;  %v17963_v20 = vand.u32 4294901760, %v1900_v1 }
 0x1d5   :  { %1935 = vmatprep.subr.mxu0 %v23168_v12  ;;  %2050 = vmatprep.subr.mxu1 %v23168_v12 }
 0x1d6   :  { %1937 = vmatpush1.msra.mxu0 %v17816_v33  ;;  %2056 = vmatpush1.msra.mxu1 %v2055_v48  ;;  %v22897_v19 = vand.u32 4294901760, %v17929_v15  ;;  %v2110_v3 = vsub.f32 %v17941_v62, %v22896_v10  ;;  %v1899_v48 = vld [vmem:[#allocation11] sm:$0xff]  ;;  %v17974_v56 = vsub.f32 %v1900_v1, %v17963_v20  ;;  %v1916_v1 = vld [vmem:[#allocation11 + $0x88] sm:$0xff] }
 0x1d7   :  { %1938 = vmatprep.subr.mxu0 %v23168_v12  ;;  %2057 = vmatprep.subr.mxu1 %v23168_v12 }
 0x1d8   :  { %1940 = vmatpush1.msra.mxu0 %v17818_v47  ;;  %2063 = vmatpush1.msra.mxu1 %v2062_v40  ;;  %v2103_v32 = vsub.f32 %v17929_v15, %v22897_v19  ;;  %v2111_v27 = vand.u32 4294901760, %v2110_v3  ;;  %v2117_v40 = vsub.f32 %v17953_v23, %v22895_v49  ;;  %v22891_v36 = vand.u32 4294901760, %v17974_v56 }
 0x1d9   :  { %1941 = vmatprep.subr.mxu0 %v23168_v12  ;;  %2064 = vmatprep.subr.mxu1 %v23168_v12 }
 0x1da   :  { %1943 = vmatpush1.msra.mxu0 %v17820_v13  ;;  %2070 = vmatpush1.msra.mxu1 %v2069_v57  ;;  %v2104_v2 = vand.u32 4294901760, %v2103_v32  ;;  %v17976_v57 = vand.u32 4294901760, %v1899_v48  ;;  %v2118_v16 = vand.u32 4294901760, %v2117_v40  ;;  %v2131_v51 = vsub.f32 %v17974_v56, %v22891_v36 }
 0x1db   :  { %1944 = vmatprep.subr.mxu0 %v23168_v12  ;;  %2071 = vmatprep.subr.mxu1 %v23168_v12  ;;  %v18014_v40 = vand.u32 4294901760, %v1916_v1 }
 0x1dc   :  { %1946 = vmatpush1.msra.mxu0 %v17822_v61  ;;  %2077 = vmatpush1.msra.mxu1 %v2076_v9  ;;  %v1918_v9 = vld [vmem:[#allocation11 + $0x98] sm:$0xff] }
 0x1dd   :  { %1947 = vmatprep.subr.mxu0 %v23168_v12  ;;  %2078 = vmatprep.subr.mxu1 %v23168_v12  ;;  %v17986_v17 = vand.u32 4294901760, %v1918_v9 }
 0x1de   :  { %1949 = vmatpush1.msra.mxu0 %v17834_v8  ;;  %2084 = vmatpush1.msra.mxu1 %v2083_v58  ;;  %v17984_v58 = vsub.f32 %v1899_v48, %v17976_v57 }
 0x1df   :  { %1950 = vmatprep.subr.mxu0 %v23168_v12  ;;  %2085 = vmatprep.subr.mxu1 %v23168_v12  ;;  %v17999_v53 = vsub.f32 %v1918_v9, %v17986_v17  ;;  %v1915_v9 = vld [vmem:[#allocation11 + $0x80] sm:$0xff] }
 0x1e0   :  { %1952 = vmatpush1.msra.mxu0 %v17850_v55  ;;  %2091 = vmatpush1.msra.mxu1 %v2090_v54  ;;  %v2124_v54 = vsub.f32 %v17967_v35, %v22894_v14  ;;  %v22889_v18 = vand.u32 4294901760, %v17984_v58 }
 0x1e1   :  { %1953 = vmatprep.subr.mxu0 %v23168_v12  ;;  %2092 = vmatprep.subr.mxu1 %v23168_v12  ;;  %v22890_v48 = vand.u32 4294901760, %v17999_v53 }
 0x1e2   :  { %1955 = vmatpush1.msra.mxu0 %v17883_v21  ;;  %2098 = vmatpush1.msra.mxu1 %v2097_v25  ;;  %v18001_v25 = vand.u32 4294901760, %v1917_v0  ;;  %v2125_v32 = vand.u32 4294901760, %v2124_v54  ;;  %v2138_v3 = vsub.f32 %v17984_v58, %v22889_v18  ;;  %v18022_v18 = vand.u32 4294901760, %v1915_v9 }
 0x1e3   :  { %1956 = vmatprep.subr.mxu0 %v23168_v12  ;;  %2099 = vmatprep.subr.mxu1 %v23168_v12  ;;  %v2169_v54 = vsub.f32 %v17999_v53, %v22890_v48 }
 0x1e4   :  { %1958 = vmatpush1.msra.mxu0 %v17916_v6  ;;  %2105 = vmatpush1.msra.mxu1 %v2104_v2  ;;  %v2132_v2 = vand.u32 4294901760, %v2131_v51  ;;  %v18034_v48 = vsub.f32 %v1915_v9, %v18022_v18 }
 0x1e5   :  { %1959 = vmatprep.subr.mxu0 %v23168_v12  ;;  %2106 = vmatprep.subr.mxu1 %v23168_v12 }
 0x1e6   :  { %1961 = vmatpush1.msra.mxu0 %v17922_v4  ;;  %2112 = vmatpush1.msra.mxu1 %v2111_v27  ;;  %v18011_v27 = vsub.f32 %v1917_v0, %v18001_v25  ;;  %v18026_v0 = vsub.f32 %v1916_v1, %v18014_v40  ;;  %23175 = vst [vmem:[#allocation33_spill] sm:$0xff] %v18034_v48  ;;  %v22898_v36 = vand.u32 4294901760, %v18034_v48 }
 0x1e7   :  { %1962 = vmatprep.subr.mxu0 %v23168_v12  ;;  %2113 = vmatprep.subr.mxu1 %v23168_v12 }
 0x1e8   :  { %1964 = vmatpush1.msra.mxu0 %v17931_v11  ;;  %2119 = vmatpush1.msra.mxu1 %v2118_v16  ;;  %v2139_v16 = vand.u32 4294901760, %v2138_v3  ;;  %v22892_v51 = vand.u32 4294901760, %v18011_v27  ;;  %23174 = vst [vmem:[#allocation25_spill] sm:$0xff] %v18026_v0 }
 0x1e9   :  { %1965 = vmatprep.subr.mxu0 %v23168_v12  ;;  %2120 = vmatprep.subr.mxu1 %v23168_v12 }
 0x1ea   :  { %1967 = vmatpush1.msra.mxu0 %v17943_v38  ;;  %2126 = vmatpush1.msra.mxu1 %v2125_v32  ;;  %v2170_v32 = vand.u32 4294901760, %v2169_v54  ;;  %v2176_v3 = vsub.f32 %v18011_v27, %v22892_v51 }
 0x1eb   :  { %1968 = vmatprep.subr.mxu0 %v23168_v12  ;;  %2127 = vmatprep.subr.mxu1 %v23168_v12 }
 0x1ec   :  { %1970 = vmatpush1.msra.mxu0 %v17956_v30  ;;  %2133 = vmatpush1.msra.mxu1 %v2132_v2  ;;  %v22893_v2 = vand.u32 4294901760, %v18026_v0  ;;  %v2177_v1 = vand.u32 4294901760, %v2176_v3 }
 0x1ed   :  { %1971 = vmatprep.subr.mxu0 %v23168_v12  ;;  %2134 = vmatprep.subr.mxu1 %v23168_v12 }
 0x1ee   :  { %1973 = vmatpush1.msra.mxu0 %v17963_v20  ;;  %2140 = vmatpush1.msra.mxu1 %v2139_v16  ;;  %v2183_v9 = vsub.f32 %v18026_v0, %v22893_v2  ;;  %v2190_v16 = vsub.f32 %v18034_v48, %v22898_v36  ;;  %v23176_v2 = vld [vmem:[#allocation65_spill] sm:$0xff] }
 0x1ef   :  { %1974 = vmatprep.subr.mxu0 %v23168_v12  ;;  %2165 = vmatprep.subr.mxu1 %v23168_v12  ;;  %v23177_v14 = vsub.s32 0, %v23176_v2  ;;  %v23178_v10 = vsub.s32 1, %v23176_v2 }
 0x1f0   :  { %1976 = vmatpush1.msra.mxu0 %v17976_v57  ;;  %2171 = vmatpush2.msra.mxu1 %v2170_v32  ;;  %v2184_v54 = vand.u32 4294901760, %v2183_v9  ;;  %v2191_v3 = vand.u32 4294901760, %v2190_v16  ;;  %v905_v32 = vld [vmem:[#allocation10] sm:$0x3] }
 0x1f1   :  { %2001 = vmatprep.subr.mxu0 %v23168_v12  ;;  %2172 = vmatprep.subr.mxu1 %v23168_v12  ;;  %v910_v49 = vrot.slane %v905_v32, %v23177_v14  ;;  %v914_v19 = vrot.slane %v905_v32, %v23178_v10 }
 0x1f2   :  { %2003 = vmatpush2.msra.mxu0 %v17986_v17  ;;  %2178 = vmatpush2.msra.mxu1 %v2177_v1 }
 0x1f3   :  { %2004 = vmatprep.subr.mxu0 %v23168_v12  ;;  %2179 = vmatprep.subr.mxu1 %v23168_v12 }
 0x1f4   :  { %2006 = vmatpush2.msra.mxu0 %v18001_v25  ;;  %2185 = vmatpush2.msra.mxu1 %v2184_v54 }
 0x1f5   :  { %2007 = vmatprep.subr.mxu0 %v23168_v12  ;;  %2186 = vmatprep.subr.mxu1 %v23168_v12 }
 0x1f6   :  { %2009 = vmatpush2.msra.mxu0 %v18014_v40  ;;  %2192 = vmatpush2.msra.mxu1 %v2191_v3 }
 0x1f7   :  { %2010 = vmatprep.subr.mxu0 %v23168_v12  ;;  %2315 = vmatprep.subr.mxu1 %v23168_v12 }
 0x1f8   :  { %2012 = vmatpush2.msra.mxu0 %v18022_v18 }
 0x1f9   :  { %2201 = vmatprep.subr.mxu0 %v23168_v12 }
 0x237   :  { %v1310_v36 = vpop.f32.mrf.mxu1 }
 0x239   :  { %v1312_v16 = vpop.f32.mrf.mxu1 }
 0x23f   :  { %v1037_v51 = vpop.f32.mrf.mxu0 }
 0x240   :  { %v1038_v9 = vadd.f32 %v1037_v51, %v910_v49 }
 0x241   :  { %v1039_v1 = vpop.f32.mrf.mxu0 }
 0x242   :  { %v1040_v5 = vadd.f32 %v1039_v1, %v914_v19  ;;  %v1311_v54 = vadd.f32 %v1310_v36, %v1038_v9  ;;  %v2647_v9 = vld [vmem:[#allocation11 + $0xf8] sm:$0xff] }
 0x244   :  { %v1313_v50 = vadd.f32 %v1312_v16, %v1040_v5  ;;  %v2646_v16 = vld [vmem:[#allocation11 + $0xf0] sm:$0xff] }
 0x260   :  { %v1582_v42 = vpop.f32.mrf.mxu1 }
 0x262   :  { %v1584_v22 = vpop.f32.mrf.mxu1 }
 0x268   :  { %v1465_v7 = vpop.f32.mrf.mxu0 }
 0x269   :  { %v1466_v3 = vadd.f32 %v1465_v7, %v1311_v54  ;;  %v18256_v54 = vand.u32 4294901760, %v2647_v9 }
 0x26a   :  { %v1467_v29 = vpop.f32.mrf.mxu0 }
 0x26b   :  { %v1468_v41 = vadd.f32 %v1467_v29, %v1313_v50  ;;  %v1583_v34 = vadd.f32 %v1582_v42, %v1466_v3 }
 0x26d   :  { %v1585_v48 = vadd.f32 %v1584_v22, %v1468_v41 }
 0x28a   :  { %v1888_v39 = vpop.f32.mrf.mxu1 }
 0x28c   :  { %v1890_v0 = vpop.f32.mrf.mxu1 }
 0x291   :  { %v1775_v52 = vpop.f32.mrf.mxu0 }
 0x292   :  { %v1776_v14 = vadd.f32 %v1775_v52, %v1583_v34 }
 0x293   :  { %v1777_v2 = vpop.f32.mrf.mxu0 }
 0x294   :  { %v1889_v10 = vadd.f32 %v1888_v39, %v1776_v14  ;;  %v1778_v32 = vadd.f32 %v1777_v2, %v1585_v48  ;;  %v2645_v14 = vld [vmem:[#allocation11 + $0xe8] sm:$0xff]  ;;  %v18270_v2 = vand.u32 4294901760, %v2646_v16 }
 0x296   :  { %vm1893_vm5 = vcmp.ge.f32.partialorder %v1889_v10, 0.0  ;;  %v1895_v49 = vmul.f32 0.01, %v1889_v10  ;;  %v1891_v19 = vadd.f32 %v1890_v0, %v1778_v32  ;;  %v23179_v0 = vld [vmem:[#allocation25_spill] sm:$0xff] }
 0x297   :  { %v2644_v32 = vld [vmem:[#allocation11 + $0xe0] sm:$0xff] }
 0x298   :  { %v1897_v51 = vsel %vm1893_vm5, %v1889_v10, %v1895_v49  ;;  %vm1894_vm6 = vcmp.ge.f32.partialorder %v1891_v19, 0.0  ;;  %v1896_v36 = vmul.f32 0.01, %v1891_v19  ;;  %v18281_v49 = vand.u32 4294901760, %v2645_v14 }
 0x299   :  { %v18056_v1 = vand.u32 4294901760, %v1897_v51 }
 0x29a   :  { %v1898_v5 = vsel %vm1894_vm6, %v1891_v19, %v1896_v36  ;;  %v23195_v19 = vand.u32 4294901760, %v17974_v56  ;;  %v2643_v36 = vld [vmem:[#allocation11 + $0xd8] sm:$0xff] }
 0x29b   :  { %v18059_v50 = vsub.f32 %v1897_v51, %v18056_v1  ;;  %v1927_v29 = vsel %vm917_vm4, %v1898_v5, 0  ;;  %v18293_v5 = vsub.f32 %v2646_v16, %v18270_v2 }
 0x29c   :  { %v18062_v52 = vand.u32 4294901760, %v1927_v29 }
 0x29d   :  { %v18065_v39 = vand.u32 4294901760, %v18059_v50 }
 0x29e   :  { %v18068_v34 = vsub.f32 %v1927_v29, %v18062_v52  ;;  %2194 = vmatprep.mubr.f32.mxu1 %v18062_v52  ;;  %v18295_v29 = vand.u32 4294901760, %v2644_v32 }
 0x29f   :  { %2196 = vmatmul.mubr.f32.vlgmr.msra.gmra.mxu1 %v18056_v1  ;;  %v2022_v41 = vsub.f32 %v18059_v50, %v18065_v39 }
 0x2a0   :  { %2317 = vmatpush1.msra.mxu1 %v17812_v26  ;;  %v18074_v22 = vand.u32 4294901760, %v18068_v34 }
 0x2a1   :  { %2318 = vmatprep.subr.mxu1 %v23168_v12  ;;  %v18088_v48 = vand.u32 4294901760, %v2022_v41 }
 0x2a2   :  { %2320 = vmatpush1.msra.mxu1 %v17814_v31  ;;  %2402 = vmatprep.mubr.f32.mxu1 %v18074_v22  ;;  %v2016_v42 = vsub.f32 %v18068_v34, %v18074_v22 }
 0x2a3   :  { %2321 = vmatprep.subr.mxu1 %v23168_v12 }
 0x2a4   :  { %2323 = vmatpush1.msra.mxu1 %v17816_v33  ;;  %v18085_v7 = vand.u32 4294901760, %v2016_v42  ;;  %v2642_v42 = vld [vmem:[#allocation11 + $0xd0] sm:$0xff] }
 0x2a5   :  { %2324 = vmatprep.subr.mxu1 %v23168_v12 }
 0x2a6   :  { %2326 = vmatpush1.msra.mxu1 %v17818_v47  ;;  %2018 = vmatprep.mubr.f32.mxu0 %v18085_v7 }
 0x2a7   :  { %2327 = vmatprep.subr.mxu1 %v23168_v12  ;;  %2024 = vmatmul.mubr.f32.vlgmr.msra.gmra.mxu0 %v18088_v48 }
 0x2a8   :  { %2204 = vmatpush1.msra.mxu0 %v17825_v37  ;;  %2329 = vmatpush1.msra.mxu1 %v17820_v13 }
 0x2a9   :  { %2205 = vmatprep.subr.mxu0 %v23168_v12  ;;  %2307 = vmatprep.mubr.f32.mxu0 %v18068_v34 }
 0x2aa   :  { %2330 = vmatprep.subr.mxu1 %v23168_v12  ;;  %2208 = vmatpush1.msra.mxu0 %v17828_v46 }
 0x2ab   :  { %2332 = vmatpush1.msra.mxu1 %v17822_v61  ;;  %2209 = vmatprep.subr.mxu0 %v23168_v12 }
 0x2ac   :  { %2333 = vmatprep.subr.mxu1 %v23168_v12  ;;  %2212 = vmatpush1.msra.mxu0 %v17831_v60 }
 0x2ad   :  { %2335 = vmatpush1.msra.mxu1 %v17834_v8  ;;  %2213 = vmatprep.subr.mxu0 %v23168_v12 }
 0x2ae   :  { %2336 = vmatprep.subr.mxu1 %v23168_v12  ;;  %2216 = vmatpush1.msra.mxu0 %v17837_v45 }
 0x2af   :  { %2338 = vmatpush1.msra.mxu1 %v17850_v55  ;;  %2217 = vmatprep.subr.mxu0 %v23168_v12 }
 0x2b0   :  { %2339 = vmatprep.subr.mxu1 %v23168_v12  ;;  %2220 = vmatpush1.msra.mxu0 %v17840_v63 }
 0x2b1   :  { %2341 = vmatpush1.msra.mxu1 %v17883_v21  ;;  %2221 = vmatprep.subr.mxu0 %v23168_v12 }
 0x2b2   :  { %2342 = vmatprep.subr.mxu1 %v23168_v12  ;;  %2224 = vmatpush1.msra.mxu0 %v17844_v28 }
 0x2b3   :  { %2344 = vmatpush1.msra.mxu1 %v17916_v6  ;;  %2225 = vmatprep.subr.mxu0 %v23168_v12 }
 0x2b4   :  { %2345 = vmatprep.subr.mxu1 %v23168_v12  ;;  %2228 = vmatpush1.msra.mxu0 %v17855_v24 }
 0x2b5   :  { %2347 = vmatpush1.msra.mxu1 %v17922_v4  ;;  %2229 = vmatprep.subr.mxu0 %v23168_v12 }
 0x2b6   :  { %2348 = vmatprep.subr.mxu1 %v23168_v12  ;;  %2232 = vmatpush1.msra.mxu0 %v17875_v59 }
 0x2b7   :  { %2350 = vmatpush1.msra.mxu1 %v17931_v11  ;;  %2233 = vmatprep.subr.mxu0 %v23168_v12 }
 0x2b8   :  { %2351 = vmatprep.subr.mxu1 %v23168_v12  ;;  %2236 = vmatpush1.msra.mxu0 %v17892_v44 }
 0x2b9   :  { %2353 = vmatpush1.msra.mxu1 %v17943_v38  ;;  %2237 = vmatprep.subr.mxu0 %v23168_v12 }
 0x2ba   :  { %2354 = vmatprep.subr.mxu1 %v23168_v12  ;;  %2240 = vmatpush1.msra.mxu0 %v17920_v43 }
 0x2bb   :  { %2356 = vmatpush1.msra.mxu1 %v17956_v30  ;;  %2241 = vmatprep.subr.mxu0 %v23168_v12 }
 0x2bc   :  { %2357 = vmatprep.subr.mxu1 %v23168_v12  ;;  %2244 = vmatpush1.msra.mxu0 %v17929_v15 }
 0x2bd   :  { %2359 = vmatpush1.msra.mxu1 %v17963_v20  ;;  %2245 = vmatprep.subr.mxu0 %v23168_v12 }
 0x2be   :  { %2360 = vmatprep.subr.mxu1 %v23168_v12  ;;  %2248 = vmatpush1.msra.mxu0 %v17941_v62 }
 0x2bf   :  { %2362 = vmatpush1.msra.mxu1 %v17976_v57  ;;  %2249 = vmatprep.subr.mxu0 %v23168_v12 }
 0x2c0   :  { %2387 = vmatprep.subr.mxu1 %v23168_v12  ;;  %2252 = vmatpush1.msra.mxu0 %v17953_v23 }
 0x2c1   :  { %2389 = vmatpush2.msra.mxu1 %v17986_v17  ;;  %2253 = vmatprep.subr.mxu0 %v23168_v12 }
 0x2c2   :  { %2390 = vmatprep.subr.mxu1 %v23168_v12  ;;  %2256 = vmatpush1.msra.mxu0 %v17967_v35 }
 0x2c3   :  { %2392 = vmatpush2.msra.mxu1 %v18001_v25  ;;  %2257 = vmatprep.subr.mxu0 %v23168_v12 }
 0x2c4   :  { %2393 = vmatprep.subr.mxu1 %v23168_v12  ;;  %2260 = vmatpush1.msra.mxu0 %v17974_v56  ;;  %v23196_v56 = vand.u32 4294901760, %v17984_v58 }
 0x2c5   :  { %2395 = vmatpush2.msra.mxu1 %v18014_v40  ;;  %2261 = vmatprep.subr.mxu0 %v23168_v12 }
 0x2c6   :  { %2396 = vmatprep.subr.mxu1 %v23168_v12  ;;  %2264 = vmatpush1.msra.mxu0 %v17984_v58 }
 0x2c7   :  { %2398 = vmatpush2.msra.mxu1 %v18022_v18  ;;  %2289 = vmatprep.subr.mxu0 %v23168_v12 }
 0x2c8   :  { %2406 = vmatmul.mubr.f32.vlgmr.msra.gmra.mxu1 %v18065_v39  ;;  %2543 = vmatprep.subr.mxu1 %v23168_v12 }
 0x2c9   :  { %2292 = vmatpush2.msra.mxu0 %v17999_v53  ;;  %2545 = vmatpush1.msra.mxu1 %v17812_v26  ;;  %v23180_v26 = vld [vmem:[#allocation33_spill] sm:$0xff] }
 0x2ca   :  { %2628 = vmatprep.mubr.f32.mxu1 %v18062_v52  ;;  %2293 = vmatprep.subr.mxu0 %v23168_v12 }
 0x2cb   :  { %2546 = vmatprep.subr.mxu1 %v23168_v12  ;;  %2296 = vmatpush2.msra.mxu0 %v18011_v27 }
 0x2cc   :  { %2548 = vmatpush1.msra.mxu1 %v17814_v31  ;;  %2297 = vmatprep.subr.mxu0 %v23168_v12  ;;  %v23181_v31 = vand.u32 4294901760, %v17825_v37  ;;  %v23186_v37 = vand.u32 4294901760, %v17844_v28  ;;  %v2649_v28 = vld [vmem:[#allocation11 + $0x108] sm:$0xff] }
 0x2cd   :  { %2549 = vmatprep.subr.mxu1 %v23168_v12  ;;  %2300 = vmatpush2.msra.mxu0 %v23179_v0 }
 0x2ce   :  { %2551 = vmatpush1.msra.mxu1 %v17816_v33  ;;  %2301 = vmatprep.subr.mxu0 %v23168_v12  ;;  %v23182_v33 = vand.u32 4294901760, %v17828_v46  ;;  %v2651_v46 = vld [vmem:[#allocation11 + $0x118] sm:$0xff] }
 0x2cf   :  { %2552 = vmatprep.subr.mxu1 %v23168_v12  ;;  %2304 = vmatpush2.msra.mxu0 %v23180_v26 }
 0x2d0   :  { %2554 = vmatpush1.msra.mxu1 %v17818_v47  ;;  %2310 = vmatmul.mubr.f32.vlgmr.msra.gmra.mxu0 %v18059_v50  ;;  %v23183_v47 = vand.u32 4294901760, %v17831_v60  ;;  %v23187_v60 = vand.u32 4294901760, %v17855_v24 }
 0x2d1   :  { %2411 = vmatprep.subr.mxu0 %v23168_v12  ;;  %2555 = vmatprep.subr.mxu1 %v23168_v12 }
 0x2d2   :  { %2415 = vmatpush1.msra.mxu0 %v23181_v31  ;;  %2536 = vmatprep.mubr.f32.mxu0 %v18062_v52  ;;  %v18307_v31 = vsub.f32 %v2645_v14, %v18281_v49 }
 0x2d3   :  { %2557 = vmatpush1.msra.mxu1 %v17820_v13  ;;  %2416 = vmatprep.subr.mxu0 %v23168_v12  ;;  %v23184_v13 = vand.u32 4294901760, %v17837_v45  ;;  %v2650_v45 = vld [vmem:[#allocation11 + $0x110] sm:$0xff] }
 0x2d4   :  { %2558 = vmatprep.subr.mxu1 %v23168_v12  ;;  %2420 = vmatpush1.msra.mxu0 %v23182_v33  ;;  %v18223_v24 = vand.u32 4294901760, %v2650_v45  ;;  %v18309_v33 = vand.u32 4294901760, %v2643_v36 }
 0x2d5   :  { %2560 = vmatpush1.msra.mxu1 %v17822_v61  ;;  %2421 = vmatprep.subr.mxu0 %v23168_v12  ;;  %v23185_v61 = vand.u32 4294901760, %v17840_v63  ;;  %v23188_v63 = vand.u32 4294901760, %v17875_v59  ;;  %v2648_v59 = vld [vmem:[#allocation11 + $0x100] sm:$0xff] }
 0x2d6   :  { %2561 = vmatprep.subr.mxu1 %v23168_v12  ;;  %2425 = vmatpush1.msra.mxu0 %v23183_v47  ;;  %v2641_v47 = vld [vmem:[#allocation11 + $0xc8] sm:$0xff] }
 0x2d7   :  { %2563 = vmatpush1.msra.mxu1 %v17834_v8  ;;  %2426 = vmatprep.subr.mxu0 %v23168_v12  ;;  %v18213_v8 = vand.u32 4294901760, %v2651_v46 }
 0x2d8   :  { %2564 = vmatprep.subr.mxu1 %v23168_v12  ;;  %2430 = vmatpush1.msra.mxu0 %v23184_v13 }
 0x2d9   :  { %2566 = vmatpush1.msra.mxu1 %v17850_v55  ;;  %2431 = vmatprep.subr.mxu0 %v23168_v12  ;;  %v23189_v55 = vand.u32 4294901760, %v17892_v44  ;;  %v23191_v44 = vand.u32 4294901760, %v17929_v15 }
 0x2da   :  { %2567 = vmatprep.subr.mxu1 %v23168_v12  ;;  %2435 = vmatpush1.msra.mxu0 %v23185_v61  ;;  %v22920_v61 = vand.u32 4294901760, %v18293_v5 }
 0x2db   :  { %2569 = vmatpush1.msra.mxu1 %v17883_v21  ;;  %2436 = vmatprep.subr.mxu0 %v23168_v12  ;;  %v18228_v21 = vsub.f32 %v2651_v46, %v18213_v8  ;;  %v18322_v46 = vand.u32 4294901760, %v2642_v42 }
 0x2dc   :  { %2570 = vmatprep.subr.mxu1 %v23168_v12  ;;  %2440 = vmatpush1.msra.mxu0 %v23186_v37  ;;  %v18320_v37 = vsub.f32 %v2644_v32, %v18295_v29 }
 0x2dd   :  { %2572 = vmatpush1.msra.mxu1 %v17916_v6  ;;  %2441 = vmatprep.subr.mxu0 %v23168_v12  ;;  %v23190_v6 = vand.u32 4294901760, %v17920_v43  ;;  %v2767_v43 = vand.u32 4294901760, %v18228_v21 }
 0x2de   :  { %2573 = vmatprep.subr.mxu1 %v23168_v12  ;;  %2445 = vmatpush1.msra.mxu0 %v23187_v60  ;;  %v2640_v60 = vld [vmem:[#allocation11 + $0xc0] sm:$0xff]  ;;  %v22916_v16 = vand.u32 4294901760, %v18320_v37 }
 0x2df   :  { %2575 = vmatpush1.msra.mxu1 %v17922_v4  ;;  %2446 = vmatprep.subr.mxu0 %v23168_v12  ;;  %v18233_v4 = vand.u32 4294901760, %v2649_v28 }
 0x2e0   :  { %2576 = vmatprep.subr.mxu1 %v23168_v12  ;;  %2450 = vmatpush1.msra.mxu0 %v23188_v63  ;;  %v18326_v63 = vand.u32 4294901760, %v2641_v47 }
 0x2e1   :  { %2578 = vmatpush1.msra.mxu1 %v17931_v11  ;;  %2451 = vmatprep.subr.mxu0 %v23168_v12  ;;  %v18241_v11 = vsub.f32 %v2650_v45, %v18223_v24  ;;  %v18252_v15 = vsub.f32 %v2649_v28, %v18233_v4 }
 0x2e2   :  { %2579 = vmatprep.subr.mxu1 %v23168_v12  ;;  %2455 = vmatpush1.msra.mxu0 %v23189_v55  ;;  %v22917_v55 = vand.u32 4294901760, %v18307_v31  ;;  %v18353_v14 = vsub.f32 %v2641_v47, %v18326_v63 }
 0x2e3   :  { %2581 = vmatpush1.msra.mxu1 %v17943_v38  ;;  %2456 = vmatprep.subr.mxu0 %v23168_v12  ;;  %v18243_v38 = vand.u32 4294901760, %v2648_v59  ;;  %v2774_v3 = vand.u32 4294901760, %v18241_v11  ;;  %v2781_v10 = vand.u32 4294901760, %v18252_v15 }
 0x2e4   :  { %2582 = vmatprep.subr.mxu1 %v23168_v12  ;;  %2460 = vmatpush1.msra.mxu0 %v23190_v6  ;;  %v2810_v32 = vsub.f32 %v18307_v31, %v22917_v55  ;;  %v22913_v47 = vand.u32 4294901760, %v18353_v14  ;;  %v2652_v55 = vld [vmem:[#allocation11 + $0x120] sm:$0xff] }
 0x2e5   :  { %2584 = vmatpush1.msra.mxu1 %v17956_v30  ;;  %2461 = vmatprep.subr.mxu0 %v23168_v12  ;;  %v23192_v30 = vand.u32 4294901760, %v17941_v62  ;;  %v18263_v62 = vsub.f32 %v2648_v59, %v18243_v38  ;;  %v2782_v41 = vsub.f32 %v18252_v15, %v2781_v10  ;;  %v18336_v59 = vsub.f32 %v2643_v36, %v18309_v33 }
 0x2e6   :  { %2585 = vmatprep.subr.mxu1 %v23168_v12  ;;  %2465 = vmatpush1.msra.mxu0 %v23191_v44  ;;  %v18339_v44 = vand.u32 4294901760, %v2640_v60 }
 0x2e7   :  { %2587 = vmatpush1.msra.mxu1 %v17963_v20  ;;  %2466 = vmatprep.subr.mxu0 %v23168_v12  ;;  %v23193_v20 = vand.u32 4294901760, %v17953_v23  ;;  %v23194_v23 = vand.u32 4294901760, %v17967_v35  ;;  %v2775_v35 = vsub.f32 %v18241_v11, %v2774_v3  ;;  %v2788_v51 = vand.u32 4294901760, %v18263_v62 }
 0x2e8   :  { %2588 = vmatprep.subr.mxu1 %v23168_v12  ;;  %2470 = vmatpush1.msra.mxu0 %v23192_v30  ;;  %v2783_v45 = vand.u32 4294901760, %v2782_v41  ;;  %v2803_v30 = vsub.f32 %v18293_v5, %v22920_v61  ;;  %v18366_v36 = vsub.f32 %v2640_v60, %v18339_v44 }
 0x2e9   :  { %2590 = vmatpush1.msra.mxu1 %v17976_v57  ;;  %2471 = vmatprep.subr.mxu0 %v23168_v12  ;;  %v2768_v57 = vsub.f32 %v18228_v21, %v2767_v43  ;;  %v2776_v58 = vand.u32 4294901760, %v2775_v35  ;;  %v2789_v13 = vsub.f32 %v18263_v62, %v2788_v51 }
 0x2ea   :  { %2615 = vmatprep.subr.mxu1 %v23168_v12  ;;  %2475 = vmatpush1.msra.mxu0 %v23193_v20  ;;  %v18349_v20 = vsub.f32 %v2642_v42, %v18322_v46 }
 0x2eb   :  { %2617 = vmatpush2.msra.mxu1 %v17986_v17  ;;  %2476 = vmatprep.subr.mxu0 %v23168_v12  ;;  %v18279_v17 = vsub.f32 %v2647_v9, %v18256_v54  ;;  %v2790_v6 = vand.u32 4294901760, %v2789_v13  ;;  %v2639_v9 = vld [vmem:[#allocation11 + $0xb8] sm:$0xff]  ;;  %v2811_v13 = vand.u32 4294901760, %v2810_v32 }
 0x2ec   :  { %2618 = vmatprep.subr.mxu1 %v23168_v12  ;;  %2480 = vmatpush1.msra.mxu0 %v23194_v23  ;;  %v18362_v35 = vand.u32 4294901760, %v2639_v9  ;;  %v22914_v41 = vand.u32 4294901760, %v18349_v20 }
 0x2ed   :  { %2620 = vmatpush2.msra.mxu1 %v18001_v25  ;;  %2481 = vmatprep.subr.mxu0 %v23168_v12  ;;  %v2769_v25 = vand.u32 4294901760, %v2768_v57  ;;  %v2638_v57 = vld [vmem:[#allocation11 + $0xb0] sm:$0xff] }
 0x2ee   :  { %2621 = vmatprep.subr.mxu1 %v23168_v12  ;;  %2485 = vmatpush1.msra.mxu0 %v23195_v19  ;;  %v22915_v19 = vand.u32 4294901760, %v18336_v59  ;;  %v18374_v42 = vand.u32 4294901760, %v2638_v57  ;;  %v18384_v60 = vsub.f32 %v2639_v9, %v18362_v35 }
 0x2ef   :  { %2623 = vmatpush2.msra.mxu1 %v18014_v40  ;;  %2486 = vmatprep.subr.mxu0 %v23168_v12  ;;  %v22922_v40 = vand.u32 4294901760, %v18279_v17 }
 0x2f0   :  { %2624 = vmatprep.subr.mxu1 %v23168_v12  ;;  %2490 = vmatpush1.msra.mxu0 %v23196_v56  ;;  %v2817_v56 = vsub.f32 %v18320_v37, %v22916_v16  ;;  %v18396_v9 = vsub.f32 %v2638_v57, %v18374_v42 }
 0x2f1   :  { %2626 = vmatpush2.msra.mxu1 %v18022_v18  ;;  %2515 = vmatprep.subr.mxu0 %v23168_v12  ;;  %v23197_v18 = vand.u32 4294901760, %v17999_v53  ;;  %v23198_v53 = vand.u32 4294901760, %v18011_v27  ;;  %v2796_v28 = vsub.f32 %v18279_v17, %v22922_v40  ;;  %v23199_v27 = vand.u32 4294901760, %v23179_v0 }
 0x2f2   :  { %2630 = vmatmul.mubr.f32.vlgmr.msra.gmra.mxu1 %v18056_v1  ;;  %2764 = vmatprep.subr.mxu1 %v23168_v12  ;;  %v23200_v0 = vand.u32 4294901760, %v23180_v26  ;;  %v2804_v26 = vand.u32 4294901760, %v2803_v30 }
 0x2f3   :  { %2519 = vmatpush2.msra.mxu0 %v23197_v18  ;;  %2770 = vmatpush1.msra.mxu1 %v2769_v25  ;;  %v2797_v23 = vand.u32 4294901760, %v2796_v28  ;;  %v2637_v25 = vld [vmem:[#allocation11 + $0xa8] sm:$0xff]  ;;  %v2824_v18 = vsub.f32 %v18336_v59, %v22915_v19  ;;  %v2655_v28 = vld [vmem:[#allocation11 + $0x138] sm:$0xff] }
 0x2f4   :  { %2929 = vmatprep.mubr.f32.mxu1 %v18062_v52  ;;  %2520 = vmatprep.subr.mxu0 %v23168_v12 }
 0x2f5   :  { %2771 = vmatprep.subr.mxu1 %v23168_v12  ;;  %2524 = vmatpush2.msra.mxu0 %v23198_v53  ;;  %v22918_v53 = vand.u32 4294901760, %v18366_v36  ;;  %v2825_v32 = vand.u32 4294901760, %v2824_v18  ;;  %v22921_v18 = vand.u32 4294901760, %v18396_v9 }
 0x2f6   :  { %2777 = vmatpush1.msra.mxu1 %v2776_v58  ;;  %2525 = vmatprep.subr.mxu0 %v23168_v12  ;;  %v2636_v58 = vld [vmem:[#allocation11 + $0xa0] sm:$0xff] }
 0x2f7   :  { %2778 = vmatprep.subr.mxu1 %v23168_v12  ;;  %2529 = vmatpush2.msra.mxu0 %v23199_v27  ;;  %v2831_v27 = vsub.f32 %v18349_v20, %v22914_v41  ;;  %v18398_v30 = vand.u32 4294901760, %v2636_v58  ;;  %v2653_v41 = vld [vmem:[#allocation11 + $0x128] sm:$0xff] }
 0x2f8   :  { %2784 = vmatpush1.msra.mxu1 %v2783_v45  ;;  %2530 = vmatprep.subr.mxu0 %v23168_v12  ;;  %v18386_v45 = vand.u32 4294901760, %v2637_v25 }
 0x2f9   :  { %2785 = vmatprep.subr.mxu1 %v23168_v12  ;;  %2534 = vmatpush2.msra.mxu0 %v23200_v0  ;;  %v2838_v0 = vsub.f32 %v18353_v14, %v22913_v47  ;;  %v2845_v47 = vsub.f32 %v18366_v36, %v22918_v53  ;;  %v18434_v53 = vand.u32 4294901760, %v2653_v41 }
 0x2fa   :  { %2791 = vmatpush1.msra.mxu1 %v2790_v6  ;;  %2538 = vmatmul.mubr.f32.vlgmr.msra.gmra.mxu0 %v18056_v1  ;;  %v2818_v6 = vand.u32 4294901760, %v2817_v56  ;;  %v18408_v57 = vsub.f32 %v2637_v25, %v18386_v45  ;;  %v18410_v56 = vand.u32 4294901760, %v2655_v28  ;;  %v18420_v25 = vsub.f32 %v2636_v58, %v18398_v30 }
 0x2fb   :  { %2664 = vmatprep.subr.mxu0 %v23168_v12  ;;  %2792 = vmatprep.subr.mxu1 %v23168_v12  ;;  %v2839_v16 = vand.u32 4294901760, %v2838_v0  ;;  %v2846_v0 = vand.u32 4294901760, %v2845_v47  ;;  %v18456_v40 = vsub.f32 %v2653_v41, %v18434_v53 }
 0x2fc   :  { %2666 = vmatpush1.msra.mxu0 %v18213_v8  ;;  %2753 = vmatprep.mubr.f32.mxu0 %v18085_v7  ;;  %v18432_v58 = vsub.f32 %v2655_v28, %v18410_v56  ;;  %v18446_v28 = vand.u32 4294901760, %v2652_v55 }
 0x2fd   :  { %2798 = vmatpush1.msra.mxu1 %v2797_v23  ;;  %2667 = vmatprep.subr.mxu0 %v23168_v12  ;;  %v2654_v23 = vld [vmem:[#allocation11 + $0x130] sm:$0xff] }
 0x2fe   :  { %2799 = vmatprep.subr.mxu1 %v23168_v12  ;;  %2669 = vmatpush1.msra.mxu0 %v18223_v24  ;;  %v18422_v19 = vand.u32 4294901760, %v2654_v23 }
 0x2ff   :  { %2805 = vmatpush1.msra.mxu1 %v2804_v26  ;;  %2670 = vmatprep.subr.mxu0 %v23168_v12  ;;  %v22919_v26 = vand.u32 4294901760, %v18384_v60 }
 0x300   :  { %2806 = vmatprep.subr.mxu1 %v23168_v12  ;;  %2672 = vmatpush1.msra.mxu0 %v18233_v4  ;;  %v18444_v61 = vsub.f32 %v2654_v23, %v18422_v19 }
 0x301   :  { %2812 = vmatpush1.msra.mxu1 %v2811_v13  ;;  %2673 = vmatprep.subr.mxu0 %v23168_v12  ;;  %v2832_v13 = vand.u32 4294901760, %v2831_v27  ;;  %v22923_v27 = vand.u32 4294901760, %v18408_v57 }
 0x302   :  { %2813 = vmatprep.subr.mxu1 %v23168_v12  ;;  %2675 = vmatpush1.msra.mxu0 %v18243_v38 }
 0x303   :  { %2819 = vmatpush1.msra.mxu1 %v2818_v6  ;;  %2676 = vmatprep.subr.mxu0 %v23168_v12  ;;  %v2852_v6 = vsub.f32 %v18384_v60, %v22919_v26  ;;  %v2872_v26 = vand.u32 4294901760, %v18420_v25 }
 0x304   :  { %2820 = vmatprep.subr.mxu1 %v23168_v12  ;;  %2678 = vmatpush1.msra.mxu0 %v18256_v54 }
 0x305   :  { %2826 = vmatpush1.msra.mxu1 %v2825_v32  ;;  %2679 = vmatprep.subr.mxu0 %v23168_v12  ;;  %v2859_v32 = vsub.f32 %v18396_v9, %v22921_v18  ;;  %v2853_v47 = vand.u32 4294901760, %v2852_v6  ;;  %v22924_v18 = vand.u32 4294901760, %v18432_v58  ;;  %v2873_v23 = vsub.f32 %v18420_v25, %v2872_v26 }
 0x306   :  { %2827 = vmatprep.subr.mxu1 %v23168_v12  ;;  %2681 = vmatpush1.msra.mxu0 %v18270_v2  ;;  %v22925_v6 = vand.u32 4294901760, %v18444_v61 }
 0x307   :  { %2833 = vmatpush1.msra.mxu1 %v2832_v13  ;;  %2682 = vmatprep.subr.mxu0 %v23168_v12  ;;  %v2866_v13 = vsub.f32 %v18408_v57, %v22923_v27  ;;  %v18466_v27 = vsub.f32 %v2652_v55, %v18446_v28  ;;  %v2874_v55 = vand.u32 4294901760, %v2873_v23 }
 0x308   :  { %2834 = vmatprep.subr.mxu1 %v23168_v12  ;;  %2684 = vmatpush1.msra.mxu0 %v18281_v49 }
 0x309   :  { %2840 = vmatpush1.msra.mxu1 %v2839_v16  ;;  %2685 = vmatprep.subr.mxu0 %v23168_v12  ;;  %v2860_v16 = vand.u32 4294901760, %v2859_v32  ;;  %v2867_v41 = vand.u32 4294901760, %v2866_v13  ;;  %v2917_v32 = vand.u32 4294901760, %v18456_v40  ;;  %v2924_v13 = vand.u32 4294901760, %v18466_v27 }
 0x30a   :  { %2841 = vmatprep.subr.mxu1 %v23168_v12  ;;  %2687 = vmatpush1.msra.mxu0 %v18295_v29 }
 0x30b   :  { %2847 = vmatpush1.msra.mxu1 %v2846_v0  ;;  %2688 = vmatprep.subr.mxu0 %v23168_v12  ;;  %v2904_v0 = vsub.f32 %v18432_v58, %v22924_v18 }
 0x30c   :  { %2848 = vmatprep.subr.mxu1 %v23168_v12  ;;  %2690 = vmatpush1.msra.mxu0 %v18309_v33 }
 0x30d   :  { %2854 = vmatpush1.msra.mxu1 %v2853_v47  ;;  %2691 = vmatprep.subr.mxu0 %v23168_v12  ;;  %v2911_v47 = vsub.f32 %v18444_v61, %v22925_v6  ;;  %v2905_v18 = vand.u32 4294901760, %v2904_v0  ;;  %v2925_v6 = vsub.f32 %v18466_v27, %v2924_v13 }
 0x30e   :  { %2855 = vmatprep.subr.mxu1 %v23168_v12  ;;  %2693 = vmatpush1.msra.mxu0 %v18322_v46 }
 0x30f   :  { %2861 = vmatpush1.msra.mxu1 %v2860_v16  ;;  %2694 = vmatprep.subr.mxu0 %v23168_v12  ;;  %v2918_v16 = vsub.f32 %v18456_v40, %v2917_v32  ;;  %v2912_v23 = vand.u32 4294901760, %v2911_v47  ;;  %v2926_v0 = vand.u32 4294901760, %v2925_v6 }
 0x310   :  { %2862 = vmatprep.subr.mxu1 %v23168_v12  ;;  %2696 = vmatpush1.msra.mxu0 %v18326_v63 }
 0x311   :  { %2868 = vmatpush1.msra.mxu1 %v2867_v41  ;;  %2697 = vmatprep.subr.mxu0 %v23168_v12  ;;  %v2919_v41 = vand.u32 4294901760, %v2918_v16  ;;  %v3379_v16 = vld [vmem:[#allocation11 + $0x180] sm:$0xff] }
 0x312   :  { %2869 = vmatprep.subr.mxu1 %v23168_v12  ;;  %2699 = vmatpush1.msra.mxu0 %v18339_v44 }
 0x313   :  { %2875 = vmatpush1.msra.mxu1 %v2874_v55  ;;  %2700 = vmatprep.subr.mxu0 %v23168_v12 }
 0x314   :  { %2900 = vmatprep.subr.mxu1 %v23168_v12  ;;  %2702 = vmatpush1.msra.mxu0 %v18362_v35 }
 0x315   :  { %2906 = vmatpush2.msra.mxu1 %v2905_v18  ;;  %2703 = vmatprep.subr.mxu0 %v23168_v12  ;;  %v3380_v18 = vld [vmem:[#allocation11 + $0x188] sm:$0xff] }
 0x316   :  { %2907 = vmatprep.subr.mxu1 %v23168_v12  ;;  %2705 = vmatpush1.msra.mxu0 %v18374_v42 }
 0x317   :  { %2913 = vmatpush2.msra.mxu1 %v2912_v23  ;;  %2706 = vmatprep.subr.mxu0 %v23168_v12 }
 0x318   :  { %2914 = vmatprep.subr.mxu1 %v23168_v12  ;;  %2708 = vmatpush1.msra.mxu0 %v18386_v45 }
 0x319   :  { %2920 = vmatpush2.msra.mxu1 %v2919_v41  ;;  %2709 = vmatprep.subr.mxu0 %v23168_v12  ;;  %v18715_v41 = vand.u32 4294901760, %v3380_v18 }
 0x31a   :  { %2921 = vmatprep.subr.mxu1 %v23168_v12  ;;  %2711 = vmatpush1.msra.mxu0 %v18398_v30 }
 0x31b   :  { %2927 = vmatpush2.msra.mxu1 %v2926_v0  ;;  %2736 = vmatprep.subr.mxu0 %v23168_v12  ;;  %v23211_v0 = vand.u32 4294901760, %v18408_v57 }
 0x31c   :  { %2931 = vmatmul.mubr.f32.vlgmr.msra.gmra.mxu1 %v18056_v1  ;;  %3050 = vmatprep.subr.mxu1 %v23168_v12 }
 0x31d   :  { %2738 = vmatpush2.msra.mxu0 %v18410_v56  ;;  %3052 = vmatpush1.msra.mxu1 %v18213_v8 }
 0x31e   :  { %3137 = vmatprep.mubr.f32.mxu1 %v18074_v22  ;;  %2739 = vmatprep.subr.mxu0 %v23168_v12 }
 0x31f   :  { %3053 = vmatprep.subr.mxu1 %v23168_v12  ;;  %2741 = vmatpush2.msra.mxu0 %v18422_v19 }
 0x320   :  { %3055 = vmatpush1.msra.mxu1 %v18223_v24  ;;  %2742 = vmatprep.subr.mxu0 %v23168_v12 }
 0x321   :  { %3056 = vmatprep.subr.mxu1 %v23168_v12  ;;  %2744 = vmatpush2.msra.mxu0 %v18434_v53 }
 0x322   :  { %3058 = vmatpush1.msra.mxu1 %v18233_v4  ;;  %2745 = vmatprep.subr.mxu0 %v23168_v12 }
 0x323   :  { %3059 = vmatprep.subr.mxu1 %v23168_v12  ;;  %2747 = vmatpush2.msra.mxu0 %v18446_v28 }
 0x324   :  { %3061 = vmatpush1.msra.mxu1 %v18243_v38  ;;  %2759 = vmatmul.mubr.f32.vlgmr.msra.gmra.mxu0 %v18088_v48 }
 0x325   :  { %2936 = vmatprep.subr.mxu0 %v23168_v12  ;;  %3062 = vmatprep.subr.mxu1 %v23168_v12 }
 0x326   :  { %2939 = vmatpush1.msra.mxu0 %v18228_v21  ;;  %3042 = vmatprep.mubr.f32.mxu0 %v18068_v34  ;;  %v3386_v21 = vld [vmem:[#allocation11 + $0x1b8] sm:$0xff] }
 0x327   :  { %3064 = vmatpush1.msra.mxu1 %v18256_v54  ;;  %2940 = vmatprep.subr.mxu0 %v23168_v12 }
 0x328   :  { %3065 = vmatprep.subr.mxu1 %v23168_v12  ;;  %2943 = vmatpush1.msra.mxu0 %v18241_v11  ;;  %v18645_v11 = vand.u32 4294901760, %v3386_v21 }
 0x329   :  { %3067 = vmatpush1.msra.mxu1 %v18270_v2  ;;  %2944 = vmatprep.subr.mxu0 %v23168_v12 }
 0x32a   :  { %3068 = vmatprep.subr.mxu1 %v23168_v12  ;;  %2947 = vmatpush1.msra.mxu0 %v18252_v15 }
 0x32b   :  { %3070 = vmatpush1.msra.mxu1 %v18281_v49  ;;  %2948 = vmatprep.subr.mxu0 %v23168_v12 }
 0x32c   :  { %3071 = vmatprep.subr.mxu1 %v23168_v12  ;;  %2951 = vmatpush1.msra.mxu0 %v18263_v62 }
 0x32d   :  { %3073 = vmatpush1.msra.mxu1 %v18295_v29  ;;  %2952 = vmatprep.subr.mxu0 %v23168_v12 }
 0x32e   :  { %3074 = vmatprep.subr.mxu1 %v23168_v12  ;;  %2955 = vmatpush1.msra.mxu0 %v18279_v17 }
 0x32f   :  { %3076 = vmatpush1.msra.mxu1 %v18309_v33  ;;  %2956 = vmatprep.subr.mxu0 %v23168_v12 }
 0x330   :  { %3077 = vmatprep.subr.mxu1 %v23168_v12  ;;  %2959 = vmatpush1.msra.mxu0 %v18293_v5 }
 0x331   :  { %3079 = vmatpush1.msra.mxu1 %v18322_v46  ;;  %2960 = vmatprep.subr.mxu0 %v23168_v12 }
 0x332   :  { %3080 = vmatprep.subr.mxu1 %v23168_v12  ;;  %2963 = vmatpush1.msra.mxu0 %v18307_v31 }
 0x333   :  { %3082 = vmatpush1.msra.mxu1 %v18326_v63  ;;  %2964 = vmatprep.subr.mxu0 %v23168_v12 }
 0x334   :  { %3083 = vmatprep.subr.mxu1 %v23168_v12  ;;  %2967 = vmatpush1.msra.mxu0 %v18320_v37 }
 0x335   :  { %3085 = vmatpush1.msra.mxu1 %v18339_v44  ;;  %2968 = vmatprep.subr.mxu0 %v23168_v12 }
 0x336   :  { %3086 = vmatprep.subr.mxu1 %v23168_v12  ;;  %2971 = vmatpush1.msra.mxu0 %v18336_v59 }
 0x337   :  { %3088 = vmatpush1.msra.mxu1 %v18362_v35  ;;  %2972 = vmatprep.subr.mxu0 %v23168_v12 }
 0x338   :  { %3089 = vmatprep.subr.mxu1 %v23168_v12  ;;  %2975 = vmatpush1.msra.mxu0 %v18349_v20 }
 0x339   :  { %3091 = vmatpush1.msra.mxu1 %v18374_v42  ;;  %2976 = vmatprep.subr.mxu0 %v23168_v12 }
 0x33a   :  { %3092 = vmatprep.subr.mxu1 %v23168_v12  ;;  %2979 = vmatpush1.msra.mxu0 %v18353_v14 }
 0x33b   :  { %3094 = vmatpush1.msra.mxu1 %v18386_v45  ;;  %2980 = vmatprep.subr.mxu0 %v23168_v12 }
 0x33c   :  { %3095 = vmatprep.subr.mxu1 %v23168_v12  ;;  %2983 = vmatpush1.msra.mxu0 %v18366_v36 }
 0x33d   :  { %3097 = vmatpush1.msra.mxu1 %v18398_v30  ;;  %2984 = vmatprep.subr.mxu0 %v23168_v12 }
 0x33e   :  { %3122 = vmatprep.subr.mxu1 %v23168_v12  ;;  %2987 = vmatpush1.msra.mxu0 %v18384_v60 }
 0x33f   :  { %3124 = vmatpush2.msra.mxu1 %v18410_v56  ;;  %2988 = vmatprep.subr.mxu0 %v23168_v12 }
 0x340   :  { %3125 = vmatprep.subr.mxu1 %v23168_v12  ;;  %2991 = vmatpush1.msra.mxu0 %v18396_v9 }
 0x341   :  { %3127 = vmatpush2.msra.mxu1 %v18422_v19  ;;  %2992 = vmatprep.subr.mxu0 %v23168_v12 }
 0x342   :  { %3128 = vmatprep.subr.mxu1 %v23168_v12  ;;  %2995 = vmatpush1.msra.mxu0 %v18408_v57 }
 0x343   :  { %3130 = vmatpush2.msra.mxu1 %v18434_v53  ;;  %2996 = vmatprep.subr.mxu0 %v23168_v12 }
 0x344   :  { %3131 = vmatprep.subr.mxu1 %v23168_v12  ;;  %2999 = vmatpush1.msra.mxu0 %v18420_v25 }
 0x345   :  { %3133 = vmatpush2.msra.mxu1 %v18446_v28  ;;  %3024 = vmatprep.subr.mxu0 %v23168_v12 }
 0x346   :  { %3141 = vmatmul.mubr.f32.vlgmr.msra.gmra.mxu1 %v18065_v39  ;;  %3278 = vmatprep.subr.mxu1 %v23168_v12 }
 0x347   :  { %3027 = vmatpush2.msra.mxu0 %v18432_v58  ;;  %3280 = vmatpush1.msra.mxu1 %v18213_v8  ;;  %v23201_v8 = vand.u32 4294901760, %v18279_v17  ;;  %v3383_v17 = vld [vmem:[#allocation11 + $0x1a0] sm:$0xff] }
 0x348   :  { %3363 = vmatprep.mubr.f32.mxu1 %v18062_v52  ;;  %3028 = vmatprep.subr.mxu0 %v23168_v12 }
 0x349   :  { %3281 = vmatprep.subr.mxu1 %v23168_v12  ;;  %3031 = vmatpush2.msra.mxu0 %v18444_v61 }
 0x34a   :  { %3283 = vmatpush1.msra.mxu1 %v18223_v24  ;;  %3032 = vmatprep.subr.mxu0 %v23168_v12  ;;  %v23202_v24 = vand.u32 4294901760, %v18293_v5  ;;  %v23207_v5 = vand.u32 4294901760, %v18353_v14 }
 0x34b   :  { %3284 = vmatprep.subr.mxu1 %v23168_v12  ;;  %3035 = vmatpush2.msra.mxu0 %v18456_v40 }
 0x34c   :  { %3286 = vmatpush1.msra.mxu1 %v18233_v4  ;;  %3036 = vmatprep.subr.mxu0 %v23168_v12  ;;  %v23203_v4 = vand.u32 4294901760, %v18307_v31  ;;  %v18675_v31 = vand.u32 4294901760, %v3383_v17 }
 0x34d   :  { %3287 = vmatprep.subr.mxu1 %v23168_v12  ;;  %3039 = vmatpush2.msra.mxu0 %v18466_v27 }
 0x34e   :  { %3289 = vmatpush1.msra.mxu1 %v18243_v38  ;;  %3045 = vmatmul.mubr.f32.vlgmr.msra.gmra.mxu0 %v18059_v50  ;;  %v3385_v38 = vld [vmem:[#allocation11 + $0x1b0] sm:$0xff] }
 0x34f   :  { %3146 = vmatprep.subr.mxu0 %v23168_v12  ;;  %3290 = vmatprep.subr.mxu1 %v23168_v12  ;;  %v18655_v62 = vand.u32 4294901760, %v3385_v38 }
 0x350   :  { %3150 = vmatpush1.msra.mxu0 %v2767_v43  ;;  %3271 = vmatprep.mubr.f32.mxu0 %v18062_v52  ;;  %v23204_v43 = vand.u32 4294901760, %v18320_v37  ;;  %v12804_v37 = vld [vmem:[#allocation13] ss:$0 sm:$0xff] }
 0x351   :  { %3292 = vmatpush1.msra.mxu1 %v18256_v54  ;;  %3151 = vmatprep.subr.mxu0 %v23168_v12  ;;  %v3384_v54 = vld [vmem:[#allocation11 + $0x1a8] sm:$0xff] }
 0x352   :  { %3293 = vmatprep.subr.mxu1 %v23168_v12  ;;  %3155 = vmatpush1.msra.mxu0 %v2774_v3  ;;  %v23205_v3 = vand.u32 4294901760, %v18336_v59 }
 0x353   :  { %3295 = vmatpush1.msra.mxu1 %v18270_v2  ;;  %3156 = vmatprep.subr.mxu0 %v23168_v12 }
 0x354   :  { %3296 = vmatprep.subr.mxu1 %v23168_v12  ;;  %3160 = vmatpush1.msra.mxu0 %v2781_v10  ;;  %v18660_v10 = vsub.f32 %v3386_v21, %v18645_v11 }
 0x355   :  { %3298 = vmatpush1.msra.mxu1 %v18281_v49  ;;  %3161 = vmatprep.subr.mxu0 %v23168_v12  ;;  %v23206_v49 = vand.u32 4294901760, %v18349_v20 }
 0x356   :  { %3299 = vmatprep.subr.mxu1 %v23168_v12  ;;  %3165 = vmatpush1.msra.mxu0 %v2788_v51  ;;  %v18665_v51 = vand.u32 4294901760, %v3384_v54 }
 0x357   :  { %3301 = vmatpush1.msra.mxu1 %v18295_v29  ;;  %3166 = vmatprep.subr.mxu0 %v23168_v12  ;;  %v18673_v29 = vsub.f32 %v3385_v38, %v18655_v62  ;;  %v3377_v38 = vld [vmem:[#allocation11 + $0x170] sm:$0xff] }
 0x358   :  { %3302 = vmatprep.subr.mxu1 %v23168_v12  ;;  %3170 = vmatpush1.msra.mxu0 %v23201_v8  ;;  %v18684_v59 = vsub.f32 %v3384_v54, %v18665_v51  ;;  %v3376_v54 = vld [vmem:[#allocation11 + $0x168] sm:$0xff] }
 0x359   :  { %3304 = vmatpush1.msra.mxu1 %v18309_v33  ;;  %3171 = vmatprep.subr.mxu0 %v23168_v12  ;;  %v3382_v33 = vld [vmem:[#allocation11 + $0x198] sm:$0xff] }
 0x35a   :  { %3305 = vmatprep.subr.mxu1 %v23168_v12  ;;  %3175 = vmatpush1.msra.mxu0 %v23202_v24  ;;  %v18688_v14 = vand.u32 4294901760, %v3382_v33  ;;  %v3516_v47 = vand.u32 4294901760, %v18684_v59  ;;  %v3378_v24 = vld [vmem:[#allocation11 + $0x178] sm:$0xff] }
 0x35b   :  { %3307 = vmatpush1.msra.mxu1 %v18322_v46  ;;  %3176 = vmatprep.subr.mxu0 %v23168_v12  ;;  %v3502_v46 = vand.u32 4294901760, %v18660_v10 }
 0x35c   :  { %3308 = vmatprep.subr.mxu1 %v23168_v12  ;;  %3180 = vmatpush1.msra.mxu0 %v23203_v4  ;;  %v18729_v4 = vand.u32 4294901760, %v3379_v16  ;;  %v3517_v57 = vsub.f32 %v18684_v59, %v3516_v47 }
 0x35d   :  { %3310 = vmatpush1.msra.mxu1 %v18326_v63  ;;  %3181 = vmatprep.subr.mxu0 %v23168_v12  ;;  %v23208_v63 = vand.u32 4294901760, %v18366_v36  ;;  %v3509_v36 = vand.u32 4294901760, %v18673_v29 }
 0x35e   :  { %3311 = vmatprep.subr.mxu1 %v23168_v12  ;;  %3185 = vmatpush1.msra.mxu0 %v23204_v43  ;;  %v18741_v43 = vsub.f32 %v3380_v18, %v18715_v41 }
 0x35f   :  { %3313 = vmatpush1.msra.mxu1 %v18339_v44  ;;  %3186 = vmatprep.subr.mxu0 %v23168_v12  ;;  %v2197_v15 = vpop.f32.mrf.mxu1  ;;  %v3381_v44 = vld [vmem:[#allocation11 + $0x190] sm:$0xff] }
 0x360   :  { %3314 = vmatprep.subr.mxu1 %v23168_v12  ;;  %3190 = vmatpush1.msra.mxu0 %v23205_v3  ;;  %v18702_v55 = vand.u32 4294901760, %v3381_v44 }
 0x361   :  { %3316 = vmatpush1.msra.mxu1 %v18362_v35  ;;  %3191 = vmatprep.subr.mxu0 %v23168_v12  ;;  %v2199_v2 = vpop.f32.mrf.mxu1  ;;  %v23209_v35 = vand.u32 4294901760, %v18384_v60  ;;  %v23210_v60 = vand.u32 4294901760, %v18396_v9  ;;  %v3510_v9 = vsub.f32 %v18673_v29, %v3509_v36 }
 0x362   :  { %3317 = vmatprep.subr.mxu1 %v23168_v12  ;;  %3195 = vmatpush1.msra.mxu0 %v23206_v49  ;;  %v18727_v21 = vsub.f32 %v3381_v44, %v18702_v55  ;;  %v18754_v2 = vsub.f32 %v3379_v16, %v18729_v4  ;;  %v3375_v49 = vld [vmem:[#allocation11 + $0x160] sm:$0xff] }
 0x363   :  { %3319 = vmatpush1.msra.mxu1 %v18374_v42  ;;  %3196 = vmatprep.subr.mxu0 %v23168_v12 }
 0x364   :  { %3320 = vmatprep.subr.mxu1 %v23168_v12  ;;  %3200 = vmatpush1.msra.mxu0 %v23207_v5  ;;  %v22933_v3 = vand.u32 4294901760, %v18727_v21  ;;  %v3518_v5 = vand.u32 4294901760, %v3517_v57  ;;  %v22929_v18 = vand.u32 4294901760, %v18754_v2 }
 0x365   :  { %3322 = vmatpush1.msra.mxu1 %v18386_v45  ;;  %3201 = vmatprep.subr.mxu0 %v23168_v12  ;;  %v18695_v45 = vsub.f32 %v3383_v17, %v18675_v31  ;;  %v18756_v17 = vand.u32 4294901760, %v3377_v38 }
 0x366   :  { %3323 = vmatprep.subr.mxu1 %v23168_v12  ;;  %3205 = vmatpush1.msra.mxu0 %v23208_v63  ;;  %v22930_v63 = vand.u32 4294901760, %v18741_v43 }
 0x367   :  { %3325 = vmatpush1.msra.mxu1 %v18398_v30  ;;  %3206 = vmatprep.subr.mxu0 %v23168_v12  ;;  %v2025_v20 = vpop.f32.mrf.mxu0  ;;  %v3503_v30 = vsub.f32 %v18660_v10, %v3502_v46  ;;  %v22937_v8 = vand.u32 4294901760, %v18695_v45 }
 0x368   :  { %3350 = vmatprep.subr.mxu1 %v23168_v12  ;;  %3210 = vmatpush1.msra.mxu0 %v23209_v35  ;;  %v2026_v42 = vadd.f32 %v12804_v37, %v2025_v20  ;;  %v18773_v35 = vand.u32 4294901760, %v3375_v49 }
 0x369   :  { %3352 = vmatpush2.msra.mxu1 %v18410_v56  ;;  %3211 = vmatprep.subr.mxu0 %v23168_v12  ;;  %v2027_v6 = vpop.f32.mrf.mxu0  ;;  %v18713_v56 = vsub.f32 %v3382_v33, %v18688_v14  ;;  %v3524_v25 = vsub.f32 %v18695_v45, %v22937_v8  ;;  %v18760_v33 = vand.u32 4294901760, %v3376_v54 }
 0x36a   :  { %3353 = vmatprep.subr.mxu1 %v23168_v12  ;;  %3215 = vmatpush1.msra.mxu0 %v23210_v60  ;;  %v18708_v23 = vadd.f32 %v2197_v15, %v2026_v42  ;;  %v18743_v15 = vand.u32 4294901760, %v3378_v24  ;;  %v3374_v42 = vld [vmem:[#allocation11 + $0x158] sm:$0xff]  ;;  %v3373_v60 = vld [vmem:[#allocation11 + $0x150] sm:$0xff] }
 0x36b   :  { %3355 = vmatpush2.msra.mxu1 %v18422_v19  ;;  %3216 = vmatprep.subr.mxu0 %v23168_v12  ;;  %v3504_v19 = vand.u32 4294901760, %v3503_v30  ;;  %v3525_v20 = vand.u32 4294901760, %v3524_v25  ;;  %v18783_v30 = vsub.f32 %v3377_v38, %v18756_v17  ;;  %v18787_v6 = vsub.f32 %v3376_v54, %v18760_v33  ;;  %v3371_v54 = vld [vmem:[#allocation11 + $0x140] sm:$0xff] }
 0x36c   :  { %3356 = vmatprep.subr.mxu1 %v23168_v12  ;;  %3220 = vmatpush1.msra.mxu0 %v23211_v0  ;;  %v18770_v44 = vsub.f32 %v3378_v24, %v18743_v15  ;;  %v18796_v0 = vand.u32 4294901760, %v3374_v42  ;;  %v3372_v24 = vld [vmem:[#allocation11 + $0x148] sm:$0xff]  ;;  %v18808_v57 = vand.u32 4294901760, %v3373_v60 }
 0x36d   :  { %3358 = vmatpush2.msra.mxu1 %v18434_v53  ;;  %3221 = vmatprep.subr.mxu0 %v23168_v12  ;;  %v22935_v53 = vand.u32 4294901760, %v18713_v56  ;;  %v22926_v38 = vand.u32 4294901760, %v18787_v6 }
 0x36e   :  { %3359 = vmatprep.subr.mxu1 %v23168_v12  ;;  %3225 = vmatpush1.msra.mxu0 %v2872_v26  ;;  %v3511_v26 = vand.u32 4294901760, %v3510_v9  ;;  %v22928_v16 = vand.u32 4294901760, %v18770_v44  ;;  %v18800_v9 = vsub.f32 %v3375_v49, %v18773_v35  ;;  %v18820_v49 = vand.u32 4294901760, %v3372_v24 }
 0x36f   :  { %3361 = vmatpush2.msra.mxu1 %v18446_v28  ;;  %3250 = vmatprep.subr.mxu0 %v23168_v12  ;;  %v23212_v28 = vand.u32 4294901760, %v18432_v58  ;;  %v23213_v58 = vand.u32 4294901760, %v18444_v61  ;;  %v3531_v37 = vsub.f32 %v18713_v56, %v22935_v53  ;;  %v3538_v61 = vsub.f32 %v18727_v21, %v22933_v3 }
 0x370   :  { %3365 = vmatmul.mubr.f32.vlgmr.msra.gmra.mxu1 %v18056_v1  ;;  %3499 = vmatprep.subr.mxu1 %v23168_v12  ;;  %v3559_v25 = vsub.f32 %v18770_v44, %v22928_v16 }
 0x371   :  { %3254 = vmatpush2.msra.mxu0 %v23212_v28  ;;  %3505 = vmatpush1.msra.mxu1 %v3504_v19  ;;  %v3532_v40 = vand.u32 4294901760, %v3531_v37  ;;  %v3539_v27 = vand.u32 4294901760, %v3538_v61  ;;  %v22927_v19 = vand.u32 4294901760, %v18783_v30  ;;  %v18818_v28 = vsub.f32 %v3374_v42, %v18796_v0 }
 0x372   :  { %3664 = vmatprep.mubr.f32.mxu1 %v18062_v52  ;;  %3255 = vmatprep.subr.mxu0 %v23168_v12  ;;  %v18832_v42 = vand.u32 4294901760, %v3371_v54  ;;  %v3573_v61 = vsub.f32 %v18787_v6, %v22926_v38 }
 0x373   :  { %3506 = vmatprep.subr.mxu1 %v23168_v12  ;;  %3259 = vmatpush2.msra.mxu0 %v23213_v58  ;;  %v3566_v37 = vsub.f32 %v18783_v30, %v22927_v19  ;;  %v3388_v19 = vld [vmem:[#allocation11 + $0x1c8] sm:$0xff] }
 0x374   :  { %3512 = vmatpush1.msra.mxu1 %v3511_v26  ;;  %3260 = vmatprep.subr.mxu0 %v23168_v12 }
 0x375   :  { %3513 = vmatprep.subr.mxu1 %v23168_v12  ;;  %3264 = vmatpush2.msra.mxu0 %v2917_v32  ;;  %v3545_v32 = vsub.f32 %v18741_v43, %v22930_v63  ;;  %v3387_v63 = vld [vmem:[#allocation11 + $0x1c0] sm:$0xff] }
 0x376   :  { %3519 = vmatpush1.msra.mxu1 %v3518_v5  ;;  %3265 = vmatprep.subr.mxu0 %v23168_v12  ;;  %v3390_v5 = vld [vmem:[#allocation11 + $0x1d8] sm:$0xff] }
 0x377   :  { %3520 = vmatprep.subr.mxu1 %v23168_v12  ;;  %3269 = vmatpush2.msra.mxu0 %v2924_v13  ;;  %v3552_v13 = vsub.f32 %v18754_v2, %v22929_v18  ;;  %v3546_v26 = vand.u32 4294901760, %v3545_v32  ;;  %v3560_v32 = vand.u32 4294901760, %v3559_v25  ;;  %v3574_v18 = vand.u32 4294901760, %v3573_v61 }
 0x378   :  { %3526 = vmatpush1.msra.mxu1 %v3525_v20  ;;  %3273 = vmatmul.mubr.f32.vlgmr.msra.gmra.mxu0 %v18056_v1  ;;  %v18830_v20 = vsub.f32 %v3373_v60, %v18808_v57  ;;  %v18842_v60 = vsub.f32 %v3372_v24, %v18820_v49  ;;  %v18854_v24 = vsub.f32 %v3371_v54, %v18832_v42 }
 0x379   :  { %3399 = vmatprep.subr.mxu0 %v23168_v12  ;;  %3527 = vmatprep.subr.mxu1 %v23168_v12  ;;  %v3553_v58 = vand.u32 4294901760, %v3552_v13  ;;  %v18844_v13 = vand.u32 4294901760, %v3390_v5 }
 0x37a   :  { %3401 = vmatpush1.msra.mxu0 %v18645_v11  ;;  %3488 = vmatprep.mubr.f32.mxu0 %v18085_v7  ;;  %v22931_v7 = vand.u32 4294901760, %v18800_v9  ;;  %v22934_v25 = vand.u32 4294901760, %v18830_v20 }
 0x37b   :  { %3533 = vmatpush1.msra.mxu1 %v3532_v40  ;;  %3402 = vmatprep.subr.mxu0 %v23168_v12  ;;  %v3389_v40 = vld [vmem:[#allocation11 + $0x1d0] sm:$0xff]  ;;  %v18866_v54 = vsub.f32 %v3390_v5, %v18844_v13  ;;  %v18880_v5 = vand.u32 4294901760, %v3387_v63 }
 0x37c   :  { %3534 = vmatprep.subr.mxu1 %v23168_v12  ;;  %3404 = vmatpush1.msra.mxu0 %v18655_v62  ;;  %v3580_v38 = vsub.f32 %v18800_v9, %v22931_v7  ;;  %v18856_v16 = vand.u32 4294901760, %v3389_v40  ;;  %v18868_v7 = vand.u32 4294901760, %v3388_v19 }
 0x37d   :  { %3540 = vmatpush1.msra.mxu1 %v3539_v27  ;;  %3405 = vmatprep.subr.mxu0 %v23168_v12  ;;  %v22932_v27 = vand.u32 4294901760, %v18818_v28  ;;  %v18902_v8 = vsub.f32 %v3387_v63, %v18880_v5 }
 0x37e   :  { %3541 = vmatprep.subr.mxu1 %v23168_v12  ;;  %3407 = vmatpush1.msra.mxu0 %v18665_v51  ;;  %v3581_v61 = vand.u32 4294901760, %v3580_v38  ;;  %v18878_v3 = vsub.f32 %v3389_v40, %v18856_v16  ;;  %v18890_v53 = vsub.f32 %v3388_v19, %v18868_v7 }
 0x37f   :  { %3547 = vmatpush1.msra.mxu1 %v3546_v26  ;;  %3408 = vmatprep.subr.mxu0 %v23168_v12  ;;  %v3567_v26 = vand.u32 4294901760, %v3566_v37  ;;  %v22936_v37 = vand.u32 4294901760, %v18842_v60 }
 0x380   :  { %3548 = vmatprep.subr.mxu1 %v23168_v12  ;;  %3410 = vmatpush1.msra.mxu0 %v18675_v31 }
 0x381   :  { %3554 = vmatpush1.msra.mxu1 %v3553_v58  ;;  %3411 = vmatprep.subr.mxu0 %v23168_v12  ;;  %v3587_v58 = vsub.f32 %v18818_v28, %v22932_v27  ;;  %v22938_v27 = vand.u32 4294901760, %v18854_v24 }
 0x382   :  { %3555 = vmatprep.subr.mxu1 %v23168_v12  ;;  %3413 = vmatpush1.msra.mxu0 %v18688_v14 }
 0x383   :  { %3561 = vmatpush1.msra.mxu1 %v3560_v32  ;;  %3414 = vmatprep.subr.mxu0 %v23168_v12  ;;  %v3594_v32 = vsub.f32 %v18830_v20, %v22934_v25  ;;  %v3588_v38 = vand.u32 4294901760, %v3587_v58  ;;  %v3638_v25 = vand.u32 4294901760, %v18866_v54  ;;  %v3608_v58 = vsub.f32 %v18854_v24, %v22938_v27 }
 0x384   :  { %3562 = vmatprep.subr.mxu1 %v23168_v12  ;;  %3416 = vmatpush1.msra.mxu0 %v18702_v55  ;;  %v22940_v27 = vand.u32 4294901760, %v18890_v53 }
 0x385   :  { %3568 = vmatpush1.msra.mxu1 %v3567_v26  ;;  %3417 = vmatprep.subr.mxu0 %v23168_v12  ;;  %v3601_v26 = vsub.f32 %v18842_v60, %v22936_v37  ;;  %v22939_v37 = vand.u32 4294901760, %v18878_v3  ;;  %v3609_v63 = vand.u32 4294901760, %v3608_v58 }
 0x386   :  { %3569 = vmatprep.subr.mxu1 %v23168_v12  ;;  %3419 = vmatpush1.msra.mxu0 %v18715_v41 }
 0x387   :  { %3575 = vmatpush1.msra.mxu1 %v3574_v18  ;;  %3420 = vmatprep.subr.mxu0 %v23168_v12  ;;  %v3595_v18 = vand.u32 4294901760, %v3594_v32  ;;  %v3639_v32 = vsub.f32 %v18866_v54, %v3638_v25 }
 0x388   :  { %3576 = vmatprep.subr.mxu1 %v23168_v12  ;;  %3422 = vmatpush1.msra.mxu0 %v18729_v4  ;;  %v18894_v40 = vpop.f32.mrf.mxu1 }
 0x389   :  { %3582 = vmatpush1.msra.mxu1 %v3581_v61  ;;  %3423 = vmatprep.subr.mxu0 %v23168_v12  ;;  %v3602_v61 = vand.u32 4294901760, %v3601_v26  ;;  %v3659_v26 = vand.u32 4294901760, %v18902_v8 }
 0x38a   :  { %3583 = vmatprep.subr.mxu1 %v23168_v12  ;;  %3425 = vmatpush1.msra.mxu0 %v18743_v15  ;;  %v2409_v19 = vpop.f32.mrf.mxu1 }
 0x38b   :  { %3589 = vmatpush1.msra.mxu1 %v3588_v38  ;;  %3426 = vmatprep.subr.mxu0 %v23168_v12  ;;  %v3646_v38 = vsub.f32 %v18878_v3, %v22939_v37  ;;  %v3640_v19 = vand.u32 4294901760, %v3639_v32 }
 0x38c   :  { %3590 = vmatprep.subr.mxu1 %v23168_v12  ;;  %3428 = vmatpush1.msra.mxu0 %v18756_v17 }
 0x38d   :  { %3596 = vmatpush1.msra.mxu1 %v3595_v18  ;;  %3429 = vmatprep.subr.mxu0 %v23168_v12  ;;  %v3653_v18 = vsub.f32 %v18890_v53, %v22940_v27  ;;  %v3647_v37 = vand.u32 4294901760, %v3646_v38 }
 0x38e   :  { %3597 = vmatprep.subr.mxu1 %v23168_v12  ;;  %3431 = vmatpush1.msra.mxu0 %v18760_v33 }
 0x38f   :  { %3603 = vmatpush1.msra.mxu1 %v3602_v61  ;;  %3432 = vmatprep.subr.mxu0 %v23168_v12  ;;  %v3660_v61 = vsub.f32 %v18902_v8, %v3659_v26  ;;  %v3654_v27 = vand.u32 4294901760, %v3653_v18 }
 0x390   :  { %3604 = vmatprep.subr.mxu1 %v23168_v12  ;;  %3434 = vmatpush1.msra.mxu0 %v18773_v35  ;;  %v18926_v58 = vpop.f32.mrf.mxu0 }
 0x391   :  { %3610 = vmatpush1.msra.mxu1 %v3609_v63  ;;  %3435 = vmatprep.subr.mxu0 %v23168_v12  ;;  %v3661_v63 = vand.u32 4294901760, %v3660_v61  ;;  %v23223_v61 = vand.u32 4294901760, %v18818_v28 }
 0x392   :  { %3635 = vmatprep.subr.mxu1 %v23168_v12  ;;  %3437 = vmatpush1.msra.mxu0 %v18796_v0  ;;  %v2313_v32 = vpop.f32.mrf.mxu0 }
 0x393   :  { %3641 = vmatpush2.msra.mxu1 %v3640_v19  ;;  %3438 = vmatprep.subr.mxu0 %v23168_v12  ;;  %v4128_v32 = vld [vmem:[#allocation14 + $0xb0] sm:$0xff] }
 0x394   :  { %3642 = vmatprep.subr.mxu1 %v23168_v12  ;;  %3440 = vmatpush1.msra.mxu0 %v18808_v57 }
 0x395   :  { %3648 = vmatpush2.msra.mxu1 %v3647_v37  ;;  %3441 = vmatprep.subr.mxu0 %v23168_v12 }
 0x396   :  { %3649 = vmatprep.subr.mxu1 %v23168_v12  ;;  %3443 = vmatpush1.msra.mxu0 %v18820_v49 }
 0x397   :  { %3655 = vmatpush2.msra.mxu1 %v3654_v27  ;;  %3444 = vmatprep.subr.mxu0 %v23168_v12 }
 0x398   :  { %3656 = vmatprep.subr.mxu1 %v23168_v12  ;;  %3446 = vmatpush1.msra.mxu0 %v18832_v42 }
 0x399   :  { %3662 = vmatpush2.msra.mxu1 %v3661_v63  ;;  %3471 = vmatprep.subr.mxu0 %v23168_v12 }
 0x39a   :  { %3666 = vmatmul.mubr.f32.vlgmr.msra.gmra.mxu1 %v18056_v1  ;;  %3785 = vmatprep.subr.mxu1 %v23168_v12 }
 0x39b   :  { %3473 = vmatpush2.msra.mxu0 %v18844_v13  ;;  %3787 = vmatpush1.msra.mxu1 %v18645_v11 }
 0x39c   :  { %3872 = vmatprep.mubr.f32.mxu1 %v18074_v22  ;;  %3474 = vmatprep.subr.mxu0 %v23168_v12 }
 0x39d   :  { %3788 = vmatprep.subr.mxu1 %v23168_v12  ;;  %3476 = vmatpush2.msra.mxu0 %v18856_v16 }
 0x39e   :  { %3790 = vmatpush1.msra.mxu1 %v18655_v62  ;;  %3477 = vmatprep.subr.mxu0 %v23168_v12 }
 0x39f   :  { %3791 = vmatprep.subr.mxu1 %v23168_v12  ;;  %3479 = vmatpush2.msra.mxu0 %v18868_v7 }
 0x3a0   :  { %3793 = vmatpush1.msra.mxu1 %v18665_v51  ;;  %3480 = vmatprep.subr.mxu0 %v23168_v12 }
 0x3a1   :  { %3794 = vmatprep.subr.mxu1 %v23168_v12  ;;  %3482 = vmatpush2.msra.mxu0 %v18880_v5 }
 0x3a2   :  { %3796 = vmatpush1.msra.mxu1 %v18675_v31  ;;  %3494 = vmatmul.mubr.f32.vlgmr.msra.gmra.mxu0 %v18088_v48  ;;  %v2312_v48 = vadd.f32 %v18926_v58, %v18708_v23 }
 0x3a3   :  { %3671 = vmatprep.subr.mxu0 %v23168_v12  ;;  %3797 = vmatprep.subr.mxu1 %v23168_v12 }
 0x3a4   :  { %3674 = vmatpush1.msra.mxu0 %v18660_v10  ;;  %3777 = vmatprep.mubr.f32.mxu0 %v18068_v34  ;;  %v2408_v23 = vadd.f32 %v18894_v40, %v2312_v48  ;;  %v23217_v10 = vand.u32 4294901760, %v18741_v43  ;;  %v4127_v48 = vld [vmem:[#allocation14 + $0xa8] sm:$0xff] }
 0x3a5   :  { %3799 = vmatpush1.msra.mxu1 %v18688_v14  ;;  %3675 = vmatprep.subr.mxu0 %v23168_v12 }
 0x3a6   :  { %3800 = vmatprep.subr.mxu1 %v23168_v12  ;;  %3678 = vmatpush1.msra.mxu0 %v18673_v29 }
 0x3a7   :  { %3802 = vmatpush1.msra.mxu1 %v18702_v55  ;;  %3679 = vmatprep.subr.mxu0 %v23168_v12 }
 0x3a8   :  { %3803 = vmatprep.subr.mxu1 %v23168_v12  ;;  %3682 = vmatpush1.msra.mxu0 %v18684_v59  ;;  %v4133_v59 = vld [vmem:[#allocation14 + $0xd8] sm:$0xff] }
 0x3a9   :  { %3805 = vmatpush1.msra.mxu1 %v18715_v41  ;;  %3683 = vmatprep.subr.mxu0 %v23168_v12 }
 0x3aa   :  { %3806 = vmatprep.subr.mxu1 %v23168_v12  ;;  %3686 = vmatpush1.msra.mxu0 %v18695_v45 }
 0x3ab   :  { %3808 = vmatpush1.msra.mxu1 %v18729_v4  ;;  %3687 = vmatprep.subr.mxu0 %v23168_v12 }
 0x3ac   :  { %3809 = vmatprep.subr.mxu1 %v23168_v12  ;;  %3690 = vmatpush1.msra.mxu0 %v18713_v56 }
 0x3ad   :  { %3811 = vmatpush1.msra.mxu1 %v18743_v15  ;;  %3691 = vmatprep.subr.mxu0 %v23168_v12 }
 0x3ae   :  { %3812 = vmatprep.subr.mxu1 %v23168_v12  ;;  %3694 = vmatpush1.msra.mxu0 %v18727_v21 }
 0x3af   :  { %3814 = vmatpush1.msra.mxu1 %v18756_v17  ;;  %3695 = vmatprep.subr.mxu0 %v23168_v12 }
 0x3b0   :  { %3815 = vmatprep.subr.mxu1 %v23168_v12  ;;  %3698 = vmatpush1.msra.mxu0 %v18741_v43 }
 0x3b1   :  { %3817 = vmatpush1.msra.mxu1 %v18760_v33  ;;  %3699 = vmatprep.subr.mxu0 %v23168_v12 }
 0x3b2   :  { %3818 = vmatprep.subr.mxu1 %v23168_v12  ;;  %3702 = vmatpush1.msra.mxu0 %v18754_v2  ;;  %v2631_v34 = vpop.f32.mrf.mxu1 }
 0x3b3   :  { %3820 = vmatpush1.msra.mxu1 %v18773_v35  ;;  %3703 = vmatprep.subr.mxu0 %v23168_v12 }
 0x3b4   :  { %3821 = vmatprep.subr.mxu1 %v23168_v12  ;;  %3706 = vmatpush1.msra.mxu0 %v18770_v44  ;;  %v2633_v22 = vpop.f32.mrf.mxu1 }
 0x3b5   :  { %3823 = vmatpush1.msra.mxu1 %v18796_v0  ;;  %3707 = vmatprep.subr.mxu0 %v23168_v12 }
 0x3b6   :  { %3824 = vmatprep.subr.mxu1 %v23168_v12  ;;  %3710 = vmatpush1.msra.mxu0 %v18783_v30 }
 0x3b7   :  { %3826 = vmatpush1.msra.mxu1 %v18808_v57  ;;  %3711 = vmatprep.subr.mxu0 %v23168_v12 }
 0x3b8   :  { %3827 = vmatprep.subr.mxu1 %v23168_v12  ;;  %3714 = vmatpush1.msra.mxu0 %v18787_v6 }
 0x3b9   :  { %3829 = vmatpush1.msra.mxu1 %v18820_v49  ;;  %3715 = vmatprep.subr.mxu0 %v23168_v12 }
 0x3ba   :  { %3830 = vmatprep.subr.mxu1 %v23168_v12  ;;  %3718 = vmatpush1.msra.mxu0 %v18800_v9  ;;  %v2539_v27 = vpop.f32.mrf.mxu0 }
 0x3bb   :  { %3832 = vmatpush1.msra.mxu1 %v18832_v42  ;;  %3719 = vmatprep.subr.mxu0 %v23168_v12  ;;  %v2540_v38 = vadd.f32 %v2539_v27, %v2408_v23  ;;  %v19176_v23 = vand.u32 4294901760, %v4128_v32 }
 0x3bc   :  { %3857 = vmatprep.subr.mxu1 %v23168_v12  ;;  %3722 = vmatpush1.msra.mxu0 %v18818_v28  ;;  %v2541_v37 = vpop.f32.mrf.mxu0 }
 0x3bd   :  { %3859 = vmatpush2.msra.mxu1 %v18844_v13  ;;  %3723 = vmatprep.subr.mxu0 %v23168_v12  ;;  %v19033_v40 = vadd.f32 %v2631_v34, %v2540_v38  ;;  %v4126_v38 = vld [vmem:[#allocation14 + $0xa0] sm:$0xff] }
 0x3be   :  { %3860 = vmatprep.subr.mxu1 %v23168_v12  ;;  %3726 = vmatpush1.msra.mxu0 %v18830_v20 }
 0x3bf   :  { %3862 = vmatpush2.msra.mxu1 %v18856_v16  ;;  %3727 = vmatprep.subr.mxu0 %v23168_v12 }
 0x3c0   :  { %3863 = vmatprep.subr.mxu1 %v23168_v12  ;;  %3730 = vmatpush1.msra.mxu0 %v18842_v60 }
 0x3c1   :  { %3865 = vmatpush2.msra.mxu1 %v18868_v7  ;;  %3731 = vmatprep.subr.mxu0 %v23168_v12 }
 0x3c2   :  { %3866 = vmatprep.subr.mxu1 %v23168_v12  ;;  %3734 = vmatpush1.msra.mxu0 %v18854_v24 }
 0x3c3   :  { %3868 = vmatpush2.msra.mxu1 %v18880_v5  ;;  %3759 = vmatprep.subr.mxu0 %v23168_v12 }
 0x3c4   :  { %3876 = vmatmul.mubr.f32.vlgmr.msra.gmra.mxu1 %v18065_v39  ;;  %4013 = vmatprep.subr.mxu1 %v23168_v12  ;;  %v4188_v39 = vsel %vm4187_vm7, %v19033_v40, -inf }
 0x3c5   :  { %3762 = vmatpush2.msra.mxu0 %v18866_v54  ;;  %4015 = vmatpush1.msra.mxu1 %v18645_v11  ;;  %v23216_v11 = vand.u32 4294901760, %v18727_v21  ;;  %v4131_v21 = vld [vmem:[#allocation14 + $0xc8] sm:$0xff] }
 0x3c6   :  { %4098 = vmatprep.mubr.f32.mxu1 %v18062_v52  ;;  %3763 = vmatprep.subr.mxu0 %v23168_v12 }
 0x3c7   :  { %4016 = vmatprep.subr.mxu1 %v23168_v12  ;;  %3766 = vmatpush2.msra.mxu0 %v18878_v3 }
 0x3c8   :  { %4018 = vmatpush1.msra.mxu1 %v18655_v62  ;;  %3767 = vmatprep.subr.mxu0 %v23168_v12  ;;  %v4135_v62 = vld [vmem:[#allocation14 + $0xe8] sm:$0xff] }
 0x3c9   :  { %4019 = vmatprep.subr.mxu1 %v23168_v12  ;;  %3770 = vmatpush2.msra.mxu0 %v18890_v53 }
 0x3ca   :  { %4021 = vmatpush1.msra.mxu1 %v18665_v51  ;;  %3771 = vmatprep.subr.mxu0 %v23168_v12  ;;  %v4134_v51 = vld [vmem:[#allocation14 + $0xe0] sm:$0xff] }
 0x3cb   :  { %4022 = vmatprep.subr.mxu1 %v23168_v12  ;;  %4189 = vmax.xlane.f32.xlu0 %v4188_v39 }
 0x3cc   :  { %3774 = vmatpush2.msra.mxu0 %v18902_v8  ;;  %4024 = vmatpush1.msra.mxu1 %v18675_v31  ;;  %v19091_v31 = vand.u32 4294901760, %v4135_v62 }
 0x3cd   :  { %3780 = vmatmul.mubr.f32.vlgmr.msra.gmra.mxu0 %v18059_v50  ;;  %3881 = vmatprep.subr.mxu0 %v23168_v12  ;;  %v23214_v50 = vand.u32 4294901760, %v18695_v45  ;;  %v23219_v45 = vand.u32 4294901760, %v18770_v44 }
 0x3ce   :  { %4025 = vmatprep.subr.mxu1 %v23168_v12  ;;  %3885 = vmatpush1.msra.mxu0 %v3502_v46  ;;  %v23218_v46 = vand.u32 4294901760, %v18754_v2  ;;  %v4130_v2 = vld [vmem:[#allocation14 + $0xc0] sm:$0xff] }
 0x3cf   :  { %4006 = vmatprep.mubr.f32.mxu0 %v18062_v52  ;;  %4027 = vmatpush1.msra.mxu1 %v18688_v14  ;;  %v23215_v52 = vand.u32 4294901760, %v18713_v56  ;;  %v19108_v56 = vand.u32 4294901760, %v4133_v59 }
 0x3d0   :  { %3886 = vmatprep.subr.mxu0 %v23168_v12  ;;  %4028 = vmatprep.subr.mxu1 %v23168_v12 }
 0x3d1   :  { %3890 = vmatpush1.msra.mxu0 %v3509_v36  ;;  %4030 = vmatpush1.msra.mxu1 %v18702_v55  ;;  %v19098_v36 = vand.u32 4294901760, %v4134_v51  ;;  %v4132_v55 = vld [vmem:[#allocation14 + $0xd0] sm:$0xff] }
 0x3d2   :  { %3891 = vmatprep.subr.mxu0 %v23168_v12  ;;  %4031 = vmatprep.subr.mxu1 %v23168_v12 }
 0x3d3   :  { %3895 = vmatpush1.msra.mxu0 %v3516_v47  ;;  %4033 = vmatpush1.msra.mxu1 %v18715_v41  ;;  %v19106_v47 = vsub.f32 %v4135_v62, %v19091_v31  ;;  %v23220_v41 = vand.u32 4294901760, %v18783_v30  ;;  %v19116_v43 = vsub.f32 %v4134_v51, %v19098_v36  ;;  %v19131_v30 = vand.u32 4294901760, %v4131_v21  ;;  %v4125_v62 = vld [vmem:[#allocation14 + $0x98] sm:$0xff] }
 0x3d4   :  { %3896 = vmatprep.subr.mxu0 %v23168_v12  ;;  %4034 = vmatprep.subr.mxu1 %v23168_v12  ;;  %v19227_v54 = vand.u32 4294901760, %v4125_v62 }
 0x3d5   :  { %3900 = vmatpush1.msra.mxu0 %v23214_v50  ;;  %4036 = vmatpush1.msra.mxu1 %v18729_v4  ;;  %v12805_v4 = vld [vmem:[#allocation13 + $0x1] ss:$0 sm:$0xff]  ;;  %v19126_v44 = vand.u32 4294901760, %v19106_v47  ;;  %v19141_v18 = vand.u32 4294901760, %v19116_v43  ;;  %v19161_v28 = vsub.f32 %v4131_v21, %v19131_v30 }
 0x3d6   :  { %3901 = vmatprep.subr.mxu0 %v23168_v12  ;;  %4037 = vmatprep.subr.mxu1 %v23168_v12 }
 0x3d7   :  { %3905 = vmatpush1.msra.mxu0 %v23215_v52  ;;  %4039 = vmatpush1.msra.mxu1 %v18743_v15  ;;  %v19118_v15 = vand.u32 4294901760, %v4132_v55  ;;  %v4293_v63 = vsub.f32 %v19106_v47, %v19126_v44  ;;  %v4300_v27 = vsub.f32 %v19116_v43, %v19141_v18  ;;  %v19191_v52 = vand.u32 4294901760, %v19161_v28 }
 0x3d8   :  { %3906 = vmatprep.subr.mxu0 %v23168_v12  ;;  %4040 = vmatprep.subr.mxu1 %v23168_v12 }
 0x3d9   :  { %3910 = vmatpush1.msra.mxu0 %v23216_v11  ;;  %4042 = vmatpush1.msra.mxu1 %v18756_v17  ;;  %v23221_v17 = vand.u32 4294901760, %v18787_v6  ;;  %v19144_v58 = vsub.f32 %v4132_v55, %v19118_v15  ;;  %v19186_v39 = vand.u32 4294901760, %v4293_v63 }
 0x3da   :  { %3911 = vmatprep.subr.mxu0 %v23168_v12  ;;  %4043 = vmatprep.subr.mxu1 %v23168_v12 }
 0x3db   :  { %3915 = vmatpush1.msra.mxu0 %v23217_v10  ;;  %4045 = vmatpush1.msra.mxu1 %v18760_v33  ;;  %v19174_v37 = vand.u32 4294901760, %v19144_v58  ;;  %v19203_v10 = vand.u32 4294901760, %v4300_v27 }
 0x3dc   :  { %3916 = vmatprep.subr.mxu0 %v23168_v12  ;;  %4046 = vmatprep.subr.mxu1 %v23168_v12  ;;  %v2932_v29 = vpop.f32.mrf.mxu1 }
 0x3dd   :  { %3920 = vmatpush1.msra.mxu0 %v23218_v46  ;;  %4048 = vmatpush1.msra.mxu1 %v18773_v35  ;;  %v19129_v35 = vsub.f32 %v4133_v59, %v19108_v56  ;;  %23227 = vst [vmem:[#allocation26_spill] sm:$0xff] %v19203_v10  ;;  %v4314_v51 = vsub.f32 %v19144_v58, %v19174_v37  ;;  %v4124_v46 = vld [vmem:[#allocation14 + $0x90] sm:$0xff] }
 0x3de   :  { %3921 = vmatprep.subr.mxu0 %v23168_v12  ;;  %4049 = vmatprep.subr.mxu1 %v23168_v12  ;;  %v2934_v14 = vpop.f32.mrf.mxu1 }
 0x3df   :  { %3925 = vmatpush1.msra.mxu0 %v23219_v45  ;;  %4051 = vmatpush1.msra.mxu1 %v18796_v0  ;;  %v4129_v0 = vld [vmem:[#allocation14 + $0xb8] sm:$0xff]  ;;  %v19158_v34 = vand.u32 4294901760, %v19129_v35  ;;  %v4321_v14 = vsub.f32 %v19161_v28, %v19191_v52  ;;  %v19236_v21 = vand.u32 4294901760, %v4314_v51 }
 0x3e0   :  { %3926 = vmatprep.subr.mxu0 %v23168_v12  ;;  %4052 = vmatprep.subr.mxu1 %v23168_v12 }
 0x3e1   :  { %3930 = vmatpush1.msra.mxu0 %v23220_v41  ;;  %4054 = vmatpush1.msra.mxu1 %v18808_v57  ;;  %v23222_v57 = vand.u32 4294901760, %v18800_v9  ;;  %v4307_v50 = vsub.f32 %v19129_v35, %v19158_v34  ;;  %v4123_v41 = vld [vmem:[#allocation14 + $0x88] sm:$0xff]  ;;  %23230 = vst [vmem:[#allocation27_spill] sm:$0xff] %v19236_v21 }
 0x3e2   :  { %3931 = vmatprep.subr.mxu0 %v23168_v12  ;;  %4055 = vmatprep.subr.mxu1 %v23168_v12 }
 0x3e3   :  { %3935 = vmatpush1.msra.mxu0 %v23221_v17  ;;  %4057 = vmatpush1.msra.mxu1 %v18820_v49  ;;  %v19136_v49 = vand.u32 4294901760, %v4130_v2  ;;  %v19220_v59 = vand.u32 4294901760, %v4307_v50  ;;  %v23231_v17 = vand.u32 4294901760, %v18890_v53  ;;  %v19261_v53 = vand.u32 4294901760, %v4123_v41 }
 0x3e4   :  { %3936 = vmatprep.subr.mxu0 %v23168_v12  ;;  %4058 = vmatprep.subr.mxu1 %v23168_v12  ;;  %v2760_v33 = vpop.f32.mrf.mxu0 }
 0x3e5   :  { %3940 = vmatpush1.msra.mxu0 %v23222_v57  ;;  %4060 = vmatpush1.msra.mxu1 %v18832_v42  ;;  %v2761_v6 = vadd.f32 %v12805_v4, %v2760_v33  ;;  %v19151_v42 = vand.u32 4294901760, %v4129_v0  ;;  %v19167_v22 = vsub.f32 %v4130_v2, %v19136_v49  ;;  %23228 = vst [vmem:[#allocation34_spill] sm:$0xff] %v19220_v59  ;;  %v19253_v57 = vand.u32 4294901760, %v4321_v14 }
 0x3e6   :  { %3941 = vmatprep.subr.mxu0 %v23168_v12  ;;  %4085 = vmatprep.subr.mxu1 %v23168_v12  ;;  %v2762_v19 = vpop.f32.mrf.mxu0 }
 0x3e7   :  { %3945 = vmatpush1.msra.mxu0 %v23223_v61  ;;  %4087 = vmatpush2.msra.mxu1 %v18844_v13  ;;  %v19149_v9 = vadd.f32 %v2932_v29, %v2761_v6  ;;  %v23224_v13 = vand.u32 4294901760, %v18830_v20  ;;  %v23225_v20 = vand.u32 4294901760, %v18842_v60  ;;  %v19193_v60 = vand.u32 4294901760, %v4127_v48  ;;  %23232 = vst [vmem:[#allocation36_spill] sm:$0xff] %v19253_v57 }
 0x3e8   :  { %3946 = vmatprep.subr.mxu0 %v23168_v12  ;;  %4088 = vmatprep.subr.mxu1 %v23168_v12  ;;  %v19199_v11 = vand.u32 4294901760, %v19167_v22  ;;  %v19208_v29 = vsub.f32 %v4128_v32, %v19176_v23  ;;  %v19259_v19 = vsub.f32 %v4125_v62, %v19227_v54  ;;  %v4121_v32 = vld [vmem:[#allocation14 + $0x78] sm:$0xff] }
 0x3e9   :  { %3950 = vmatpush1.msra.mxu0 %v23224_v13  ;;  %4090 = vmatpush2.msra.mxu1 %v18856_v16  ;;  %v19182_v16 = vsub.f32 %v4129_v0, %v19151_v42  ;;  %v19225_v45 = vsub.f32 %v4127_v48, %v19193_v60  ;;  %v4122_v0 = vld [vmem:[#allocation14 + $0x80] sm:$0xff] }
 0x3ea   :  { %3951 = vmatprep.subr.mxu0 %v23168_v12  ;;  %4091 = vmatprep.subr.mxu1 %v23168_v12  ;;  %v4328_v55 = vsub.f32 %v19167_v22, %v19199_v11  ;;  %v19239_v4 = vand.u32 4294901760, %v19208_v29  ;;  %v19278_v8 = vand.u32 4294901760, %v4122_v0  ;;  %v19289_v27 = vand.u32 4294901760, %v19259_v19 }
 0x3eb   :  { %3955 = vmatpush1.msra.mxu0 %v23225_v20  ;;  %4093 = vmatpush2.msra.mxu1 %v18868_v7  ;;  %v23226_v7 = vand.u32 4294901760, %v18854_v24  ;;  %v19210_v24 = vand.u32 4294901760, %v4126_v38  ;;  %v19256_v6 = vand.u32 4294901760, %v19225_v45  ;;  %v19292_v20 = vsub.f32 %v4123_v41, %v19261_v53 }
 0x3ec   :  { %3956 = vmatprep.subr.mxu0 %v23168_v12  ;;  %4094 = vmatprep.subr.mxu1 %v23168_v12  ;;  %v19266_v61 = vand.u32 4294901760, %v4328_v55  ;;  %v4342_v63 = vsub.f32 %v19208_v29, %v19239_v4  ;;  %v19308_v51 = vsub.f32 %v4122_v0, %v19278_v8  ;;  %v4363_v14 = vsub.f32 %v19259_v19, %v19289_v27 }
 0x3ed   :  { %3960 = vmatpush1.msra.mxu0 %v23226_v7  ;;  %4096 = vmatpush2.msra.mxu1 %v18880_v5  ;;  %v19216_v5 = vand.u32 4294901760, %v19182_v16  ;;  %v19242_v2 = vsub.f32 %v4126_v38, %v19210_v24  ;;  %v19294_v38 = vand.u32 4294901760, %v4121_v32 }
 0x3ee   :  { %3985 = vmatprep.subr.mxu0 %v23168_v12  ;;  %4100 = vmatmul.mubr.f32.vlgmr.msra.gmra.mxu1 %v18056_v1  ;;  %23233 = vst [vmem:[#allocation28_spill] sm:$0xff] %v19266_v61  ;;  %v19300_v50 = vand.u32 4294901760, %v4342_v63  ;;  %v19339_v0 = vand.u32 4294901760, %v4363_v14 }
 0x3ef   :  { %3989 = vmatpush2.msra.mxu0 %v3638_v25  ;;  %14032 = vmatprep.subr.mxu1 %v23168_v12  ;;  %v23229_v25 = vand.u32 4294901760, %v18878_v3  ;;  %v19244_v3 = vand.u32 4294901760, %v4124_v46  ;;  %v4335_v33 = vsub.f32 %v19182_v16, %v19216_v5  ;;  %v19273_v13 = vand.u32 4294901760, %v19242_v2 }
 0x3f0   :  { %3990 = vmatprep.subr.mxu0 %v23168_v12  ;;  %14033 = vmatpush3.msra.mxu1 %v19186_v39  ;;  %23235 = vst [vmem:[#allocation29_spill] sm:$0xff] %v19300_v50  ;;  %v19322_v55 = vsub.f32 %v4121_v32, %v19294_v38  ;;  %23239 = vst [vmem:[#allocation31_spill] sm:$0xff] %v19339_v0 }
 0x3f1   :  { %3994 = vmatpush2.msra.mxu0 %v23229_v25  ;;  %14034 = vmatprep.subr.mxu1 %v23168_v12  ;;  %v19276_v48 = vsub.f32 %v4124_v46, %v19244_v3  ;;  %v4356_v7 = vsub.f32 %v19242_v2, %v19273_v13  ;;  %v19319_v25 = vand.u32 4294901760, %v19292_v20 }
 0x3f2   :  { %3995 = vmatprep.subr.mxu0 %v23168_v12  ;;  %14035 = vmatpush3.msra.mxu1 %v19203_v10  ;;  %v19344_v63 = vand.u32 4294901760, %v19322_v55 }
 0x3f3   :  { %3999 = vmatpush2.msra.mxu0 %v23231_v17  ;;  %14036 = vmatprep.subr.mxu1 %v23168_v12  ;;  %v19305_v62 = vand.u32 4294901760, %v19276_v48  ;;  %v19328_v41 = vand.u32 4294901760, %v4356_v7  ;;  %v4377_v32 = vsub.f32 %v19292_v20, %v19319_v25 }
 0x3f4   :  { %4000 = vmatprep.subr.mxu0 %v23168_v12  ;;  %14037 = vmatpush3.msra.mxu1 %v19220_v59  ;;  %23240 = vst [vmem:[#allocation41_spill] sm:$0xff] %v19344_v63 }
 0x3f5   :  { %4004 = vmatpush2.msra.mxu0 %v3659_v26  ;;  %14038 = vmatprep.subr.mxu1 %v23168_v12  ;;  %v19282_v26 = vand.u32 4294901760, %v4335_v33  ;;  %23237 = vst [vmem:[#allocation30_spill] sm:$0xff] %v19328_v41  ;;  %v4370_v17 = vsub.f32 %v19276_v48, %v19305_v62  ;;  %v19333_v33 = vand.u32 4294901760, %v19308_v51  ;;  %v19358_v14 = vand.u32 4294901760, %v4377_v32 }
 0x3f6   :  { %4008 = vmatmul.mubr.f32.vlgmr.msra.gmra.mxu0 %v18056_v1  ;;  %14039 = vmatpush3.msra.mxu1 %v19236_v21  ;;  %v4349_v1 = vsub.f32 %v19225_v45, %v19256_v6 }
 0x3f7   :  { %13999 = vmatprep.subr.mxu0 %v23168_v12  ;;  %14040 = vmatprep.subr.mxu1 %v23168_v12  ;;  %23234 = vst [vmem:[#allocation38_spill] sm:$0xff] %v19282_v26  ;;  %23238 = vst [vmem:[#allocation42_spill] sm:$0xff] %v19333_v33  ;;  %v4384_v7 = vsub.f32 %v19308_v51, %v19333_v33 }
 0x3f8   :  { %14000 = vmatpush3.msra.mxu0 %v19091_v31  ;;  %14041 = vmatpush3.msra.mxu1 %v19253_v57  ;;  %v19314_v46 = vand.u32 4294901760, %v4349_v1  ;;  %v19350_v1 = vand.u32 4294901760, %v4370_v17  ;;  %23242 = vst [vmem:[#allocation58_spill] sm:$0xff] %v19358_v14 }
 0x3f9   :  { %14001 = vmatprep.subr.mxu0 %v23168_v12  ;;  %14042 = vmatprep.subr.mxu1 %v23168_v12 }
 0x3fa   :  { %14002 = vmatpush3.msra.mxu0 %v19098_v36  ;;  %14043 = vmatpush3.msra.mxu1 %v19266_v61  ;;  %23236 = vst [vmem:[#allocation40_spill] sm:$0xff] %v19314_v46  ;;  %23241 = vst [vmem:[#allocation45_spill] sm:$0xff] %v19350_v1 }
 0x3fb   :  { %14003 = vmatprep.subr.mxu0 %v23168_v12  ;;  %14044 = vmatprep.subr.mxu1 %v23168_v12 }
 0x3fc   :  { %14004 = vmatpush3.msra.mxu0 %v19108_v56  ;;  %14045 = vmatpush3.msra.mxu1 %v19282_v26 }
 0x3fd   :  { %14005 = vmatprep.subr.mxu0 %v23168_v12  ;;  %14046 = vmatprep.subr.mxu1 %v23168_v12 }
 0x3fe   :  { %14006 = vmatpush3.msra.mxu0 %v19118_v15  ;;  %14047 = vmatpush3.msra.mxu1 %v19300_v50 }
 0x3ff   :  { %14007 = vmatprep.subr.mxu0 %v23168_v12  ;;  %14048 = vmatprep.subr.mxu1 %v23168_v12 }
 0x400   :  { %14008 = vmatpush3.msra.mxu0 %v19131_v30  ;;  %14049 = vmatpush3.msra.mxu1 %v19314_v46  ;;  %v4391_v46 = vsub.f32 %v19322_v55, %v19344_v63 }
 0x401   :  { %14009 = vmatprep.subr.mxu0 %v23168_v12  ;;  %14050 = vmatprep.subr.mxu1 %v23168_v12 }
 0x402   :  { %14010 = vmatpush3.msra.mxu0 %v19136_v49  ;;  %14051 = vmatpush3.msra.mxu1 %v19328_v41  ;;  %v19366_v41 = vand.u32 4294901760, %v4384_v7 }
 0x403   :  { %14011 = vmatprep.subr.mxu0 %v23168_v12  ;;  %14052 = vmatprep.subr.mxu1 %v23168_v12 }
 0x404   :  { %14012 = vmatpush3.msra.mxu0 %v19151_v42  ;;  %14053 = vmatpush3.msra.mxu1 %v19339_v0  ;;  %23243 = vst [vmem:[#allocation61_spill] sm:$0xff] %v19366_v41  ;;  %v19372_v0 = vand.u32 4294901760, %v4391_v46 }
 0x405   :  { %14013 = vmatprep.subr.mxu0 %v23168_v12  ;;  %14054 = vmatprep.subr.mxu1 %v23168_v12 }
 0x406   :  { %v3142_v17 = vpop.f32.mrf.mxu1  ;;  %14014 = vmatpush3.msra.mxu0 %v19176_v23  ;;  %14055 = vmatpush3.msra.mxu1 %v19350_v1  ;;  %23244 = vst [vmem:[#allocation62_spill] sm:$0xff] %v19372_v0 }
 0x407   :  { %14015 = vmatprep.subr.mxu0 %v23168_v12  ;;  %14056 = vmatprep.subr.mxu1 %v23168_v12 }
 0x408   :  { %v3144_v32 = vpop.f32.mrf.mxu1  ;;  %14016 = vmatpush3.msra.mxu0 %v19193_v60  ;;  %14057 = vmatpush3.msra.mxu1 %v19358_v14 }
 0x409   :  { %14017 = vmatprep.subr.mxu0 %v23168_v12  ;;  %14058 = vmatprep.subr.mxu1 %v23168_v12 }
 0x40a   :  { %14018 = vmatpush3.msra.mxu0 %v19210_v24  ;;  %14059 = vmatpush3.msra.mxu1 %v19366_v41 }
 0x40b   :  { %14019 = vmatprep.subr.mxu0 %v23168_v12  ;;  %14060 = vmatprep.subr.mxu1 %v23168_v12 }
 0x40c   :  { %14020 = vmatpush3.msra.mxu0 %v19227_v54  ;;  %14061 = vmatpush3.msra.mxu1 %v19372_v0 }
 0x40d   :  { %14021 = vmatprep.subr.mxu0 %v23168_v12  ;;  %14062 = vmatprep.mubr.msk.f32.mxu1 %vm16701_vm8, %v23168_v12 }
 0x40e   :  { %v3046_v46 = vpop.f32.mrf.mxu0  ;;  %14098 = vmatprep.subr.mxu1 %v23168_v12  ;;  %14022 = vmatpush3.msra.mxu0 %v19244_v3 }
 0x40f   :  { %14023 = vmatprep.subr.mxu0 %v23168_v12  ;;  %14029 = vmatprep.mubr.msk.f32.mxu0 %vm16701_vm8, %v23168_v12  ;;  %v3047_v41 = vadd.f32 %v3046_v46, %v19149_v9 }
 0x410   :  { %v3048_v7 = vpop.f32.mrf.mxu0  ;;  %14024 = vmatpush3.msra.mxu0 %v19261_v53 }
 0x411   :  { %14025 = vmatprep.subr.mxu0 %v23168_v12  ;;  %v3143_v14 = vadd.f32 %v3142_v17, %v3047_v41 }
 0x412   :  { %14026 = vmatpush3.msra.mxu0 %v19278_v8 }
 0x413   :  { %14027 = vmatprep.subr.mxu0 %v23168_v12 }
 0x414   :  { %14028 = vmatpush3.msra.mxu0 %v19294_v38 }
 0x415   :  { %14065 = vmatprep.subr.mxu0 %v23168_v12 }
 0x430   :  { %v3366_v32 = vpop.f32.mrf.mxu1 }
 0x432   :  { %v3368_v0 = vpop.f32.mrf.mxu1 }
 0x433   :  { %v12806_v0 = vld [vmem:[#allocation13 + $0x2] ss:$0 sm:$0xff] }
 0x438   :  { %v3274_v1 = vpop.f32.mrf.mxu0 }
 0x439   :  { %v3275_v50 = vadd.f32 %v3274_v1, %v3143_v14 }
 0x43a   :  { %v3276_v7 = vpop.f32.mrf.mxu0 }
 0x43b   :  { %v19397_v26 = vadd.f32 %v3366_v32, %v3275_v50  ;;  %v23245_v7 = vld [vmem:[#allocation42_spill] sm:$0xff] }
 0x43d   :  { %v4830_v61 = vsel %vm4187_vm7, %v19397_v26, -inf }
 0x43e   :  { %4831 = vmax.xlane.f32.xlu0 %v4830_v61 }
 0x454   :  { %v4190_v57 = vpop.xlane.xlu0 %4189 }
 0x455   :  { %v4191_v21 = vsub.f32 %v19033_v40, %v4190_v57 }
 0x457   :  { %v4192_v59 = vmul.f32 1.442695, %v4191_v21 }
 0x459   :  { %16476 = vpow2.f32 %v4192_v59 }
 0x45a   :  { %v3667_v63 = vpop.f32.mrf.mxu1 }
 0x45c   :  { %v3669_v10 = vpop.f32.mrf.mxu1 }
 0x462   :  { %v3495_v33 = vpop.f32.mrf.mxu0 }
 0x463   :  { %v3496_v9 = vadd.f32 %v12806_v0, %v3495_v33  ;;  %v23246_v0 = vld [vmem:[#allocation26_spill] sm:$0xff] }
 0x464   :  { %v3497_v41 = vpop.f32.mrf.mxu0 }
 0x465   :  { %v19402_v17 = vadd.f32 %v3667_v63, %v3496_v9  ;;  %v23247_v41 = vld [vmem:[#allocation41_spill] sm:$0xff] }
 0x466   :  { %v19404_v1 = vpop.eup %16476 }
 0x467   :  { %v4195_v50 = vsel %vm4187_vm7, %v19404_v1, 0 }
 0x468   :  { %v19408_v14 = vand.u32 4294901760, %v4195_v50 }
 0x46a   :  { %v19411_v61 = vsub.f32 %v4195_v50, %v19408_v14  ;;  %14063 = vmatmul.mubr.f32.vlgmr.msra.gmra.mxu1 %v19408_v14  ;;  %v23249_v50 = vld [vmem:[#allocation27_spill] sm:$0xff] }
 0x46b   :  { %14099 = vmatpush3.msra.mxu1 %v19091_v31  ;;  %14128 = vmatprep.mubr.msk.f32.mxu1 %vm16701_vm8, %v23168_v12 }
 0x46c   :  { %14100 = vmatprep.subr.mxu1 %v23168_v12  ;;  %v4279_v40 = vand.u32 4294901760, %v19411_v61 }
 0x46d   :  { %14101 = vmatpush3.msra.mxu1 %v19098_v36 }
 0x46e   :  { %14102 = vmatprep.subr.mxu1 %v23168_v12  ;;  %v4280_v10 = vsub.f32 %v19411_v61, %v4279_v40 }
 0x46f   :  { %14103 = vmatpush3.msra.mxu1 %v19108_v56 }
 0x470   :  { %14104 = vmatprep.subr.mxu1 %v23168_v12  ;;  %v4281_v59 = vand.u32 4294901760, %v4280_v10 }
 0x471   :  { %14105 = vmatpush3.msra.mxu1 %v19118_v15 }
 0x472   :  { %14106 = vmatprep.subr.mxu1 %v23168_v12  ;;  %14030 = vmatmul.mubr.f32.vlgmr.msra.gmra.mxu0 %v4281_v59  ;;  %v23252_v59 = vld [vmem:[#allocation38_spill] sm:$0xff] }
 0x473   :  { %14066 = vmatpush3.msra.mxu0 %v19106_v47  ;;  %14107 = vmatpush3.msra.mxu1 %v19131_v30 }
 0x474   :  { %14067 = vmatprep.subr.mxu0 %v23168_v12  ;;  %14108 = vmatprep.subr.mxu1 %v23168_v12 }
 0x475   :  { %14068 = vmatpush3.msra.mxu0 %v19116_v43  ;;  %14109 = vmatpush3.msra.mxu1 %v19136_v49 }
 0x476   :  { %14069 = vmatprep.subr.mxu0 %v23168_v12  ;;  %14110 = vmatprep.subr.mxu1 %v23168_v12 }
 0x477   :  { %14070 = vmatpush3.msra.mxu0 %v19129_v35  ;;  %14111 = vmatpush3.msra.mxu1 %v19151_v42 }
 0x478   :  { %14071 = vmatprep.subr.mxu0 %v23168_v12  ;;  %14112 = vmatprep.subr.mxu1 %v23168_v12 }
 0x479   :  { %14072 = vmatpush3.msra.mxu0 %v19144_v58  ;;  %14113 = vmatpush3.msra.mxu1 %v19176_v23 }
 0x47a   :  { %14073 = vmatprep.subr.mxu0 %v23168_v12  ;;  %14114 = vmatprep.subr.mxu1 %v23168_v12 }
 0x47b   :  { %14074 = vmatpush3.msra.mxu0 %v19161_v28  ;;  %14115 = vmatpush3.msra.mxu1 %v19193_v60 }
 0x47c   :  { %14075 = vmatprep.subr.mxu0 %v23168_v12  ;;  %14116 = vmatprep.subr.mxu1 %v23168_v12 }
 0x47d   :  { %14076 = vmatpush3.msra.mxu0 %v19167_v22  ;;  %14117 = vmatpush3.msra.mxu1 %v19210_v24 }
 0x47e   :  { %14077 = vmatprep.subr.mxu0 %v23168_v12  ;;  %14118 = vmatprep.subr.mxu1 %v23168_v12 }
 0x47f   :  { %14078 = vmatpush3.msra.mxu0 %v19182_v16  ;;  %14119 = vmatpush3.msra.mxu1 %v19227_v54 }
 0x480   :  { %14079 = vmatprep.subr.mxu0 %v23168_v12  ;;  %14120 = vmatprep.subr.mxu1 %v23168_v12 }
 0x481   :  { %14080 = vmatpush3.msra.mxu0 %v19208_v29  ;;  %14121 = vmatpush3.msra.mxu1 %v19244_v3 }
 0x482   :  { %14081 = vmatprep.subr.mxu0 %v23168_v12  ;;  %14122 = vmatprep.subr.mxu1 %v23168_v12 }
 0x483   :  { %14082 = vmatpush3.msra.mxu0 %v19225_v45  ;;  %14123 = vmatpush3.msra.mxu1 %v19261_v53 }
 0x484   :  { %14083 = vmatprep.subr.mxu0 %v23168_v12  ;;  %14124 = vmatprep.subr.mxu1 %v23168_v12  ;;  %v3877_v21 = vpop.f32.mrf.mxu1 }
 0x485   :  { %14084 = vmatpush3.msra.mxu0 %v19242_v2  ;;  %14125 = vmatpush3.msra.mxu1 %v19278_v8 }
 0x486   :  { %14085 = vmatprep.subr.mxu0 %v23168_v12  ;;  %14126 = vmatprep.subr.mxu1 %v23168_v12  ;;  %v3879_v57 = vpop.f32.mrf.mxu1 }
 0x487   :  { %14086 = vmatpush3.msra.mxu0 %v19259_v19  ;;  %14127 = vmatpush3.msra.mxu1 %v19294_v38 }
 0x488   :  { %14087 = vmatprep.subr.mxu0 %v23168_v12  ;;  %14129 = vmatmul.mubr.f32.vlgmr.msra.gmra.mxu1 %v4279_v40 }
 0x489   :  { %14164 = vmatprep.subr.mxu1 %v23168_v12  ;;  %14088 = vmatpush3.msra.mxu0 %v19276_v48 }
 0x48a   :  { %14165 = vmatpush3.msra.mxu1 %v19091_v31  ;;  %14089 = vmatprep.subr.mxu0 %v23168_v12 }
 0x48b   :  { %14166 = vmatprep.subr.mxu1 %v23168_v12  ;;  %14090 = vmatpush3.msra.mxu0 %v19292_v20 }
 0x48c   :  { %14167 = vmatpush3.msra.mxu1 %v19098_v36  ;;  %14091 = vmatprep.subr.mxu0 %v23168_v12 }
 0x48d   :  { %14168 = vmatprep.subr.mxu1 %v23168_v12  ;;  %14092 = vmatpush3.msra.mxu0 %v19308_v51  ;;  %v3781_v33 = vpop.f32.mrf.mxu0 }
 0x48e   :  { %14169 = vmatpush3.msra.mxu1 %v19108_v56  ;;  %v3782_v63 = vadd.f32 %v3781_v33, %v19402_v17  ;;  %14093 = vmatprep.subr.mxu0 %v23168_v12  ;;  %v23248_v17 = vld [vmem:[#allocation34_spill] sm:$0xff]  ;;  %v23254_v33 = vld [vmem:[#allocation29_spill] sm:$0xff] }
 0x48f   :  { %14170 = vmatprep.subr.mxu1 %v23168_v12  ;;  %14094 = vmatpush3.msra.mxu0 %v19322_v55  ;;  %v3783_v46 = vpop.f32.mrf.mxu0 }
 0x490   :  { %14095 = vmatprep.mubr.msk.f32.mxu0 %vm16701_vm8, %v23168_v12  ;;  %14171 = vmatpush3.msra.mxu1 %v19118_v15  ;;  %v19487_v32 = vadd.f32 %v3877_v21, %v3782_v63  ;;  %v23255_v63 = vld [vmem:[#allocation40_spill] sm:$0xff]  ;;  %v23256_v46 = vld [vmem:[#allocation30_spill] sm:$0xff] }
 0x491   :  { %14096 = vmatmul.mubr.f32.vlgmr.msra.gmra.mxu0 %v19411_v61  ;;  %14131 = vmatprep.subr.mxu0 %v23168_v12  ;;  %v23250_v61 = vld [vmem:[#allocation36_spill] sm:$0xff] }
 0x492   :  { %14172 = vmatprep.subr.mxu1 %v23168_v12  ;;  %14132 = vmatpush3.msra.mxu0 %v19126_v44 }
 0x493   :  { %14173 = vmatpush3.msra.mxu1 %v19131_v30  ;;  %14133 = vmatprep.subr.mxu0 %v23168_v12 }
 0x494   :  { %14174 = vmatprep.subr.mxu1 %v23168_v12  ;;  %14134 = vmatpush3.msra.mxu0 %v19141_v18 }
 0x495   :  { %14175 = vmatpush3.msra.mxu1 %v19136_v49  ;;  %14135 = vmatprep.subr.mxu0 %v23168_v12 }
 0x496   :  { %14176 = vmatprep.subr.mxu1 %v23168_v12  ;;  %14136 = vmatpush3.msra.mxu0 %v19158_v34 }
 0x497   :  { %14177 = vmatpush3.msra.mxu1 %v19151_v42  ;;  %14137 = vmatprep.subr.mxu0 %v23168_v12 }
 0x498   :  { %14178 = vmatprep.subr.mxu1 %v23168_v12  ;;  %14138 = vmatpush3.msra.mxu0 %v19174_v37 }
 0x499   :  { %14179 = vmatpush3.msra.mxu1 %v19176_v23  ;;  %14139 = vmatprep.subr.mxu0 %v23168_v12 }
 0x49a   :  { %14180 = vmatprep.subr.mxu1 %v23168_v12  ;;  %14140 = vmatpush3.msra.mxu0 %v19191_v52 }
 0x49b   :  { %14181 = vmatpush3.msra.mxu1 %v19193_v60  ;;  %14141 = vmatprep.subr.mxu0 %v23168_v12 }
 0x49c   :  { %14182 = vmatprep.subr.mxu1 %v23168_v12  ;;  %14142 = vmatpush3.msra.mxu0 %v19199_v11 }
 0x49d   :  { %14183 = vmatpush3.msra.mxu1 %v19210_v24  ;;  %14143 = vmatprep.subr.mxu0 %v23168_v12 }
 0x49e   :  { %14184 = vmatprep.subr.mxu1 %v23168_v12  ;;  %14144 = vmatpush3.msra.mxu0 %v19216_v5 }
 0x49f   :  { %14185 = vmatpush3.msra.mxu1 %v19227_v54  ;;  %14145 = vmatprep.subr.mxu0 %v23168_v12 }
 0x4a0   :  { %14186 = vmatprep.subr.mxu1 %v23168_v12  ;;  %14146 = vmatpush3.msra.mxu0 %v19239_v4 }
 0x4a1   :  { %14187 = vmatpush3.msra.mxu1 %v19244_v3  ;;  %14147 = vmatprep.subr.mxu0 %v23168_v12 }
 0x4a2   :  { %14188 = vmatprep.subr.mxu1 %v23168_v12  ;;  %14148 = vmatpush3.msra.mxu0 %v19256_v6 }
 0x4a3   :  { %14189 = vmatpush3.msra.mxu1 %v19261_v53  ;;  %14149 = vmatprep.subr.mxu0 %v23168_v12 }
 0x4a4   :  { %14190 = vmatprep.subr.mxu1 %v23168_v12  ;;  %14150 = vmatpush3.msra.mxu0 %v19273_v13 }
 0x4a5   :  { %14191 = vmatpush3.msra.mxu1 %v19278_v8  ;;  %14151 = vmatprep.subr.mxu0 %v23168_v12 }
 0x4a6   :  { %14192 = vmatprep.subr.mxu1 %v23168_v12  ;;  %14152 = vmatpush3.msra.mxu0 %v19289_v27 }
 0x4a7   :  { %14193 = vmatpush3.msra.mxu1 %v19294_v38  ;;  %14194 = vmatprep.mubr.msk.f32.mxu1 %vm16701_vm8, %v23168_v12 }
 0x4a8   :  { %14153 = vmatprep.subr.mxu0 %v23168_v12  ;;  %14195 = vmatmul.mubr.f32.vlgmr.msra.gmra.mxu1 %v19408_v14 }
 0x4a9   :  { %14154 = vmatpush3.msra.mxu0 %v19305_v62  ;;  %14161 = vmatprep.mubr.msk.f32.mxu0 %vm16701_vm8, %v23168_v12 }
 0x4aa   :  { %14155 = vmatprep.subr.mxu0 %v23168_v12  ;;  %14230 = vmatprep.subr.mxu1 %v23168_v12 }
 0x4ab   :  { %14156 = vmatpush3.msra.mxu0 %v19319_v25  ;;  %14231 = vmatpush3.msra.mxu1 %v19186_v39 }
 0x4ac   :  { %14157 = vmatprep.subr.mxu0 %v23168_v12  ;;  %14232 = vmatprep.subr.mxu1 %v23168_v12 }
 0x4ad   :  { %14158 = vmatpush3.msra.mxu0 %v23245_v7  ;;  %14233 = vmatpush3.msra.mxu1 %v23246_v0  ;;  %v23258_v0 = vld [vmem:[#allocation45_spill] sm:$0xff] }
 0x4ae   :  { %14159 = vmatprep.subr.mxu0 %v23168_v12  ;;  %v4101_v9 = vpop.f32.mrf.mxu1  ;;  %14234 = vmatprep.subr.mxu1 %v23168_v12 }
 0x4af   :  { %14160 = vmatpush3.msra.mxu0 %v23247_v41  ;;  %14235 = vmatpush3.msra.mxu1 %v23248_v17  ;;  %v23260_v17 = vld [vmem:[#allocation61_spill] sm:$0xff] }
 0x4b0   :  { %14162 = vmatmul.mubr.f32.vlgmr.msra.gmra.mxu0 %v19408_v14  ;;  %v4103_v39 = vpop.f32.mrf.mxu1  ;;  %14236 = vmatprep.subr.mxu1 %v23168_v12  ;;  %v23251_v14 = vld [vmem:[#allocation28_spill] sm:$0xff] }
 0x4b1   :  { %14237 = vmatpush3.msra.mxu1 %v23249_v50  ;;  %14197 = vmatprep.subr.mxu0 %v23168_v12  ;;  %v23261_v50 = vld [vmem:[#allocation62_spill] sm:$0xff] }
 0x4b2   :  { %14238 = vmatprep.subr.mxu1 %v23168_v12  ;;  %14198 = vmatpush3.msra.mxu0 %v19091_v31 }
 0x4b3   :  { %14239 = vmatpush3.msra.mxu1 %v23250_v61  ;;  %14199 = vmatprep.subr.mxu0 %v23168_v12 }
 0x4b4   :  { %14240 = vmatprep.subr.mxu1 %v23168_v12  ;;  %14200 = vmatpush3.msra.mxu0 %v19098_v36 }
 0x4b5   :  { %14241 = vmatpush3.msra.mxu1 %v23251_v14  ;;  %14201 = vmatprep.subr.mxu0 %v23168_v12 }
 0x4b6   :  { %v4009_v40 = vpop.f32.mrf.mxu0  ;;  %14242 = vmatprep.subr.mxu1 %v23168_v12  ;;  %14202 = vmatpush3.msra.mxu0 %v19108_v56 }
 0x4b7   :  { %v4010_v10 = vadd.f32 %v4009_v40, %v19487_v32  ;;  %14243 = vmatpush3.msra.mxu1 %v23252_v59  ;;  %14203 = vmatprep.subr.mxu0 %v23168_v12  ;;  %v23257_v32 = vld [vmem:[#allocation31_spill] sm:$0xff] }
 0x4b8   :  { %v4011_v21 = vpop.f32.mrf.mxu0  ;;  %14244 = vmatprep.subr.mxu1 %v23168_v12  ;;  %14204 = vmatpush3.msra.mxu0 %v19118_v15 }
 0x4b9   :  { %v19572_v57 = vadd.f32 %v4101_v9, %v4010_v10  ;;  %14245 = vmatpush3.msra.mxu1 %v23254_v33  ;;  %14205 = vmatprep.subr.mxu0 %v23168_v12  ;;  %v23259_v9 = vld [vmem:[#allocation58_spill] sm:$0xff] }
 0x4ba   :  { %14246 = vmatprep.subr.mxu1 %v23168_v12  ;;  %14206 = vmatpush3.msra.mxu0 %v19131_v30 }
 0x4bb   :  { %23253 = vst [vmem:[#allocation23_spill] sm:$0xff] %v19572_v57  ;;  %14247 = vmatpush3.msra.mxu1 %v23255_v63  ;;  %14207 = vmatprep.subr.mxu0 %v23168_v12 }
 0x4bc   :  { %14248 = vmatprep.subr.mxu1 %v23168_v12  ;;  %14208 = vmatpush3.msra.mxu0 %v19136_v49 }
 0x4bd   :  { %14249 = vmatpush3.msra.mxu1 %v23256_v46  ;;  %14209 = vmatprep.subr.mxu0 %v23168_v12 }
 0x4be   :  { %14250 = vmatprep.subr.mxu1 %v23168_v12  ;;  %14210 = vmatpush3.msra.mxu0 %v19151_v42 }
 0x4bf   :  { %14251 = vmatpush3.msra.mxu1 %v23257_v32  ;;  %14211 = vmatprep.subr.mxu0 %v23168_v12 }
 0x4c0   :  { %14252 = vmatprep.subr.mxu1 %v23168_v12  ;;  %14212 = vmatpush3.msra.mxu0 %v19176_v23 }
 0x4c1   :  { %14253 = vmatpush3.msra.mxu1 %v23258_v0  ;;  %14213 = vmatprep.subr.mxu0 %v23168_v12 }
 0x4c2   :  { %14254 = vmatprep.subr.mxu1 %v23168_v12  ;;  %14214 = vmatpush3.msra.mxu0 %v19193_v60 }
 0x4c3   :  { %14255 = vmatpush3.msra.mxu1 %v23259_v9  ;;  %14215 = vmatprep.subr.mxu0 %v23168_v12 }
 0x4c4   :  { %14256 = vmatprep.subr.mxu1 %v23168_v12  ;;  %14216 = vmatpush3.msra.mxu0 %v19210_v24 }
 0x4c5   :  { %14257 = vmatpush3.msra.mxu1 %v23260_v17  ;;  %14217 = vmatprep.subr.mxu0 %v23168_v12 }
 0x4c6   :  { %14258 = vmatprep.subr.mxu1 %v23168_v12  ;;  %14218 = vmatpush3.msra.mxu0 %v19227_v54 }
 0x4c7   :  { %v4832_v39 = vpop.xlane.xlu0 %4831  ;;  %14259 = vmatpush3.msra.mxu1 %v23261_v50  ;;  %14219 = vmatprep.subr.mxu0 %v23168_v12 }
 0x4c8   :  { %v4833_v61 = vsub.f32 %v19397_v26, %v4832_v39  ;;  %14260 = vmatprep.mubr.msk.f32.mxu1 %vm16701_vm8, %v23168_v12  ;;  %14296 = vmatprep.subr.mxu1 %v23168_v12 }
 0x4c9   :  { %14220 = vmatpush3.msra.mxu0 %v19244_v3  ;;  %14227 = vmatprep.mubr.msk.f32.mxu0 %vm16701_vm8, %v23168_v12 }
 0x4ca   :  { %v4834_v14 = vmul.f32 1.442695, %v4833_v61  ;;  %14221 = vmatprep.subr.mxu0 %v23168_v12 }
 0x4cb   :  { %14222 = vmatpush3.msra.mxu0 %v19261_v53 }
 0x4cc   :  { %16478 = vpow2.f32 %v4834_v14  ;;  %14223 = vmatprep.subr.mxu0 %v23168_v12 }
 0x4cd   :  { %14224 = vmatpush3.msra.mxu0 %v19278_v8 }
 0x4ce   :  { %14225 = vmatprep.subr.mxu0 %v23168_v12 }
 0x4cf   :  { %14226 = vmatpush3.msra.mxu0 %v19294_v38 }
 0x4d0   :  { %14263 = vmatprep.subr.mxu0 %v23168_v12 }
 0x4d9   :  { %v19618_v26 = vpop.eup %16478 }
 0x4da   :  { %23262 = vst [vmem:[#allocation53_spill] sm:$0xff] %v19618_v26  ;;  %v4837_v40 = vsel %vm4187_vm7, %v19618_v26, 0 }
 0x4db   :  { %v19622_v10 = vand.u32 4294901760, %v4837_v40 }
 0x4dd   :  { %v19625_v59 = vsub.f32 %v4837_v40, %v19622_v10  ;;  %14261 = vmatmul.mubr.f32.vlgmr.msra.gmra.mxu1 %v19622_v10 }
 0x4de   :  { %14297 = vmatpush3.msra.mxu1 %v19091_v31  ;;  %14326 = vmatprep.mubr.msk.f32.mxu1 %vm16701_vm8, %v23168_v12 }
 0x4df   :  { %14298 = vmatprep.subr.mxu1 %v23168_v12  ;;  %v4921_v21 = vand.u32 4294901760, %v19625_v59 }
 0x4e0   :  { %14299 = vmatpush3.msra.mxu1 %v19098_v36 }
 0x4e1   :  { %14300 = vmatprep.subr.mxu1 %v23168_v12  ;;  %v4922_v33 = vsub.f32 %v19625_v59, %v4921_v21 }
 0x4e2   :  { %14301 = vmatpush3.msra.mxu1 %v19108_v56 }
 0x4e3   :  { %14302 = vmatprep.subr.mxu1 %v23168_v12  ;;  %v4923_v63 = vand.u32 4294901760, %v4922_v33 }
 0x4e4   :  { %14303 = vmatpush3.msra.mxu1 %v19118_v15 }
 0x4e5   :  { %14304 = vmatprep.subr.mxu1 %v23168_v12  ;;  %14228 = vmatmul.mubr.f32.vlgmr.msra.gmra.mxu0 %v4923_v63 }
 0x4e6   :  { %14264 = vmatpush3.msra.mxu0 %v19106_v47  ;;  %14305 = vmatpush3.msra.mxu1 %v19131_v30 }
 0x4e7   :  { %14265 = vmatprep.subr.mxu0 %v23168_v12  ;;  %14306 = vmatprep.subr.mxu1 %v23168_v12 }
 0x4e8   :  { %14266 = vmatpush3.msra.mxu0 %v19116_v43  ;;  %14307 = vmatpush3.msra.mxu1 %v19136_v49 }
 0x4e9   :  { %14267 = vmatprep.subr.mxu0 %v23168_v12  ;;  %14308 = vmatprep.subr.mxu1 %v23168_v12 }
 0x4ea   :  { %14268 = vmatpush3.msra.mxu0 %v19129_v35  ;;  %14309 = vmatpush3.msra.mxu1 %v19151_v42 }
 0x4eb   :  { %14269 = vmatprep.subr.mxu0 %v23168_v12  ;;  %14310 = vmatprep.subr.mxu1 %v23168_v12 }
 0x4ec   :  { %14270 = vmatpush3.msra.mxu0 %v19144_v58  ;;  %14311 = vmatpush3.msra.mxu1 %v19176_v23  ;;  %v4114_v58 = vld [vmem:[#allocation14 + $0x48] sm:$0xff] }
 0x4ed   :  { %14271 = vmatprep.subr.mxu0 %v23168_v12  ;;  %14312 = vmatprep.subr.mxu1 %v23168_v12 }
 0x4ee   :  { %14272 = vmatpush3.msra.mxu0 %v19161_v28  ;;  %14313 = vmatpush3.msra.mxu1 %v19193_v60 }
 0x4ef   :  { %14273 = vmatprep.subr.mxu0 %v23168_v12  ;;  %14314 = vmatprep.subr.mxu1 %v23168_v12 }
 0x4f0   :  { %14274 = vmatpush3.msra.mxu0 %v19167_v22  ;;  %14315 = vmatpush3.msra.mxu1 %v19210_v24  ;;  %v4113_v22 = vld [vmem:[#allocation14 + $0x40] sm:$0xff] }
 0x4f1   :  { %14275 = vmatprep.subr.mxu0 %v23168_v12  ;;  %14316 = vmatprep.subr.mxu1 %v23168_v12 }
 0x4f2   :  { %14276 = vmatpush3.msra.mxu0 %v19182_v16  ;;  %14317 = vmatpush3.msra.mxu1 %v19227_v54 }
 0x4f3   :  { %14277 = vmatprep.subr.mxu0 %v23168_v12  ;;  %14318 = vmatprep.subr.mxu1 %v23168_v12 }
 0x4f4   :  { %14278 = vmatpush3.msra.mxu0 %v19208_v29  ;;  %14319 = vmatpush3.msra.mxu1 %v19244_v3 }
 0x4f5   :  { %14279 = vmatprep.subr.mxu0 %v23168_v12  ;;  %14320 = vmatprep.subr.mxu1 %v23168_v12 }
 0x4f6   :  { %14280 = vmatpush3.msra.mxu0 %v19225_v45  ;;  %14321 = vmatpush3.msra.mxu1 %v19261_v53  ;;  %v4111_v45 = vld [vmem:[#allocation14 + $0x30] sm:$0xff] }
 0x4f7   :  { %14281 = vmatprep.subr.mxu0 %v23168_v12  ;;  %14322 = vmatprep.subr.mxu1 %v23168_v12 }
 0x4f8   :  { %14282 = vmatpush3.msra.mxu0 %v19242_v2  ;;  %14323 = vmatpush3.msra.mxu1 %v19278_v8 }
 0x4f9   :  { %14283 = vmatprep.subr.mxu0 %v23168_v12  ;;  %14324 = vmatprep.subr.mxu1 %v23168_v12 }
 0x4fa   :  { %14284 = vmatpush3.msra.mxu0 %v19259_v19  ;;  %14325 = vmatpush3.msra.mxu1 %v19294_v38 }
 0x4fb   :  { %14285 = vmatprep.subr.mxu0 %v23168_v12  ;;  %14327 = vmatmul.mubr.f32.vlgmr.msra.gmra.mxu1 %v4921_v21 }
 0x4fc   :  { %14362 = vmatprep.subr.mxu1 %v23168_v12  ;;  %14286 = vmatpush3.msra.mxu0 %v19276_v48  ;;  %v19807_v48 = vand.u32 4294901760, %v4111_v45 }
 0x4fd   :  { %14363 = vmatpush3.msra.mxu1 %v19091_v31  ;;  %14287 = vmatprep.subr.mxu0 %v23168_v12  ;;  %v4119_v31 = vld [vmem:[#allocation14 + $0x70] sm:$0xff] }
 0x4fe   :  { %14364 = vmatprep.subr.mxu1 %v23168_v12  ;;  %14288 = vmatpush3.msra.mxu0 %v19292_v20  ;;  %v19714_v47 = vand.u32 4294901760, %v4119_v31  ;;  %v19838_v9 = vsub.f32 %v4111_v45, %v19807_v48 }
 0x4ff   :  { %14365 = vmatpush3.msra.mxu1 %v19098_v36  ;;  %14289 = vmatprep.subr.mxu0 %v23168_v12  ;;  %v4118_v36 = vld [vmem:[#allocation14 + $0x68] sm:$0xff] }
 0x500   :  { %14366 = vmatprep.subr.mxu1 %v23168_v12  ;;  %14290 = vmatpush3.msra.mxu0 %v19308_v51  ;;  %v19720_v43 = vand.u32 4294901760, %v4118_v36  ;;  %v19867_v33 = vand.u32 4294901760, %v19838_v9 }
 0x501   :  { %14367 = vmatpush3.msra.mxu1 %v19108_v56  ;;  %14291 = vmatprep.subr.mxu0 %v23168_v12  ;;  %v4117_v56 = vld [vmem:[#allocation14 + $0x60] sm:$0xff] }
 0x502   :  { %14368 = vmatprep.subr.mxu1 %v23168_v12  ;;  %14292 = vmatpush3.msra.mxu0 %v19322_v55  ;;  %v19729_v35 = vand.u32 4294901760, %v4117_v56 }
 0x503   :  { %14293 = vmatprep.mubr.msk.f32.mxu0 %vm16701_vm8, %v23168_v12  ;;  %14369 = vmatpush3.msra.mxu1 %v19118_v15  ;;  %v4116_v15 = vld [vmem:[#allocation14 + $0x58] sm:$0xff] }
 0x504   :  { %14294 = vmatmul.mubr.f32.vlgmr.msra.gmra.mxu0 %v19625_v59  ;;  %14329 = vmatprep.subr.mxu0 %v23168_v12 }
 0x505   :  { %14370 = vmatprep.subr.mxu1 %v23168_v12  ;;  %14330 = vmatpush3.msra.mxu0 %v19126_v44  ;;  %v19727_v44 = vsub.f32 %v4119_v31, %v19714_v47 }
 0x506   :  { %14371 = vmatpush3.msra.mxu1 %v19131_v30  ;;  %14331 = vmatprep.subr.mxu0 %v23168_v12  ;;  %v4115_v30 = vld [vmem:[#allocation14 + $0x50] sm:$0xff] }
 0x507   :  { %14372 = vmatprep.subr.mxu1 %v23168_v12  ;;  %14332 = vmatpush3.msra.mxu0 %v19141_v18  ;;  %v19738_v18 = vand.u32 4294901760, %v4116_v15  ;;  %v19750_v28 = vand.u32 4294901760, %v4115_v30 }
 0x508   :  { %14373 = vmatpush3.msra.mxu1 %v19136_v49  ;;  %14333 = vmatprep.subr.mxu0 %v23168_v12  ;;  %v19736_v49 = vsub.f32 %v4118_v36, %v19720_v43 }
 0x509   :  { %14374 = vmatprep.subr.mxu1 %v23168_v12  ;;  %14334 = vmatpush3.msra.mxu0 %v19158_v34  ;;  %v19748_v34 = vsub.f32 %v4117_v56, %v19729_v35  ;;  %v19762_v16 = vsub.f32 %v4116_v15, %v19738_v18  ;;  %v4105_v56 = vld [vmem:[#allocation14] sm:$0xff] }
 0x50a   :  { %14375 = vmatpush3.msra.mxu1 %v19151_v42  ;;  %14335 = vmatprep.subr.mxu0 %v23168_v12  ;;  %v19745_v42 = vand.u32 4294901760, %v19727_v44  ;;  %v19904_v45 = vand.u32 4294901760, %v4105_v56 }
 0x50b   :  { %14376 = vmatprep.subr.mxu1 %v23168_v12  ;;  %14336 = vmatpush3.msra.mxu0 %v19174_v37  ;;  %v19754_v37 = vand.u32 4294901760, %v4114_v58  ;;  %v19773_v29 = vand.u32 4294901760, %v19748_v34 }
 0x50c   :  { %14377 = vmatpush3.msra.mxu1 %v19176_v23  ;;  %14337 = vmatprep.subr.mxu0 %v23168_v12  ;;  %v19759_v23 = vand.u32 4294901760, %v19736_v49 }
 0x50d   :  { %14378 = vmatprep.subr.mxu1 %v23168_v12  ;;  %14338 = vmatpush3.msra.mxu0 %v19191_v52  ;;  %v19766_v52 = vand.u32 4294901760, %v4113_v22 }
 0x50e   :  { %14379 = vmatpush3.msra.mxu1 %v19193_v60  ;;  %14339 = vmatprep.subr.mxu0 %v23168_v12  ;;  %v4112_v60 = vld [vmem:[#allocation14 + $0x38] sm:$0xff] }
 0x50f   :  { %14380 = vmatprep.subr.mxu1 %v23168_v12  ;;  %14340 = vmatpush3.msra.mxu0 %v19199_v11  ;;  %v5573_v11 = vsub.f32 %v19727_v44, %v19745_v42  ;;  %v19790_v2 = vand.u32 4294901760, %v4112_v60 }
 0x510   :  { %14381 = vmatpush3.msra.mxu1 %v19210_v24  ;;  %14341 = vmatprep.subr.mxu0 %v23168_v12  ;;  %v19776_v24 = vsub.f32 %v4115_v30, %v19750_v28 }
 0x511   :  { %14382 = vmatprep.subr.mxu1 %v23168_v12  ;;  %14342 = vmatpush3.msra.mxu0 %v19216_v5  ;;  %v19781_v5 = vsub.f32 %v4114_v58, %v19754_v37  ;;  %v19800_v19 = vand.u32 4294901760, %v5573_v11  ;;  %v19822_v51 = vsub.f32 %v4112_v60, %v19790_v2 }
 0x512   :  { %14383 = vmatpush3.msra.mxu1 %v19227_v54  ;;  %14343 = vmatprep.subr.mxu0 %v23168_v12  ;;  %v5580_v54 = vsub.f32 %v19736_v49, %v19759_v23 }
 0x513   :  { %14384 = vmatprep.subr.mxu1 %v23168_v12  ;;  %14344 = vmatpush3.msra.mxu0 %v19239_v4  ;;  %v19788_v4 = vand.u32 4294901760, %v19762_v16  ;;  %23263 = vst [vmem:[#allocation55_spill] sm:$0xff] %v19800_v19  ;;  %v19851_v61 = vand.u32 4294901760, %v19822_v51 }
 0x514   :  { %14385 = vmatpush3.msra.mxu1 %v19244_v3  ;;  %14345 = vmatprep.subr.mxu0 %v23168_v12  ;;  %v19795_v3 = vsub.f32 %v4113_v22, %v19766_v52  ;;  %v19817_v20 = vand.u32 4294901760, %v5580_v54  ;;  %v5629_v22 = vsub.f32 %v19838_v9, %v19867_v33 }
 0x515   :  { %14386 = vmatprep.subr.mxu1 %v23168_v12  ;;  %14346 = vmatpush3.msra.mxu0 %v19256_v6  ;;  %v4110_v6 = vld [vmem:[#allocation14 + $0x28] sm:$0xff] }
 0x516   :  { %14387 = vmatpush3.msra.mxu1 %v19261_v53  ;;  %14347 = vmatprep.subr.mxu0 %v23168_v12  ;;  %v5587_v53 = vsub.f32 %v19748_v34, %v19773_v29  ;;  %23264 = vst [vmem:[#allocation57_spill] sm:$0xff] %v19817_v20  ;;  %v19824_v55 = vand.u32 4294901760, %v4110_v6  ;;  %v19829_v46 = vand.u32 4294901760, %v19795_v3 }
 0x517   :  { %14388 = vmatprep.subr.mxu1 %v23168_v12  ;;  %14348 = vmatpush3.msra.mxu0 %v19273_v13  ;;  %v19805_v13 = vand.u32 4294901760, %v19776_v24 }
 0x518   :  { %14389 = vmatpush3.msra.mxu1 %v19278_v8  ;;  %14349 = vmatprep.subr.mxu0 %v23168_v12  ;;  %v19812_v8 = vand.u32 4294901760, %v19781_v5  ;;  %v19833_v32 = vand.u32 4294901760, %v5587_v53  ;;  %v19854_v14 = vsub.f32 %v4110_v6, %v19824_v55  ;;  %v5615_v59 = vsub.f32 %v19795_v3, %v19829_v46 }
 0x519   :  { %14390 = vmatprep.subr.mxu1 %v23168_v12  ;;  %14350 = vmatpush3.msra.mxu0 %v19289_v27  ;;  %v4109_v27 = vld [vmem:[#allocation14 + $0x20] sm:$0xff]  ;;  %v5601_v0 = vsub.f32 %v19776_v24, %v19805_v13 }
 0x51a   :  { %14391 = vmatpush3.msra.mxu1 %v19294_v38  ;;  %14392 = vmatprep.mubr.msk.f32.mxu1 %vm16701_vm8, %v23168_v12  ;;  %v5594_v38 = vsub.f32 %v19762_v16, %v19788_v4  ;;  %23265 = vst [vmem:[#allocation59_spill] sm:$0xff] %v19833_v32  ;;  %v19840_v17 = vand.u32 4294901760, %v4109_v27  ;;  %v5608_v39 = vsub.f32 %v19781_v5, %v19812_v8  ;;  %v19883_v15 = vand.u32 4294901760, %v19854_v14 }
 0x51b   :  { %14351 = vmatprep.subr.mxu0 %v23168_v12  ;;  %14393 = vmatmul.mubr.f32.vlgmr.msra.gmra.mxu1 %v19622_v10  ;;  %v19864_v21 = vand.u32 4294901760, %v5601_v0 }
 0x51c   :  { %14352 = vmatpush3.msra.mxu0 %v19305_v62  ;;  %14359 = vmatprep.mubr.msk.f32.mxu0 %vm16701_vm8, %v23168_v12  ;;  %v4108_v62 = vld [vmem:[#allocation14 + $0x18] sm:$0xff]  ;;  %v19848_v50 = vand.u32 4294901760, %v5594_v38  ;;  %v19870_v63 = vsub.f32 %v4109_v27, %v19840_v17  ;;  %v19876_v36 = vand.u32 4294901760, %v5608_v39  ;;  %v5636_v6 = vsub.f32 %v19854_v14, %v19883_v15 }
 0x51d   :  { %14353 = vmatprep.subr.mxu0 %v23168_v12  ;;  %14428 = vmatprep.subr.mxu1 %v23168_v12  ;;  %v19856_v40 = vand.u32 4294901760, %v4108_v62  ;;  %23267 = vst [vmem:[#allocation63_spill] sm:$0xff] %v19864_v21 }
 0x51e   :  { %14354 = vmatpush3.msra.mxu0 %v19319_v25  ;;  %14429 = vmatpush3.msra.mxu1 %v19800_v19  ;;  %v4107_v25 = vld [vmem:[#allocation14 + $0x10] sm:$0xff]  ;;  %23266 = vst [vmem:[#allocation60_spill] sm:$0xff] %v19848_v50  ;;  %23268 = vst [vmem:[#allocation64_spill] sm:$0xff] %v19876_v36  ;;  %v19899_v60 = vand.u32 4294901760, %v19870_v63 }
 0x51f   :  { %14355 = vmatprep.subr.mxu0 %v23168_v12  ;;  %14430 = vmatprep.subr.mxu1 %v23168_v12  ;;  %v19872_v31 = vand.u32 4294901760, %v4107_v25  ;;  %v19886_v30 = vsub.f32 %v4108_v62, %v19856_v40  ;;  %v19926_v62 = vand.u32 4294901760, %v5629_v22 }
 0x520   :  { %14356 = vmatpush3.msra.mxu0 %v23245_v7  ;;  %14431 = vmatpush3.msra.mxu1 %v19817_v20  ;;  %v4106_v7 = vld [vmem:[#allocation14 + $0x8] sm:$0xff]  ;;  %v5643_v0 = vsub.f32 %v19870_v63, %v19899_v60 }
 0x521   :  { %14357 = vmatprep.subr.mxu0 %v23168_v12  ;;  %14432 = vmatprep.subr.mxu1 %v23168_v12  ;;  %v19888_v58 = vand.u32 4294901760, %v4106_v7  ;;  %v19902_v11 = vsub.f32 %v4107_v25, %v19872_v31  ;;  %v19915_v53 = vand.u32 4294901760, %v19886_v30  ;;  %23271 = vst [vmem:[#allocation32_spill] sm:$0xff] %v19926_v62  ;;  %v19934_v25 = vsub.f32 %v4105_v56, %v19904_v45 }
 0x522   :  { %14358 = vmatpush3.msra.mxu0 %v23247_v41  ;;  %14433 = vmatpush3.msra.mxu1 %v19833_v32  ;;  %v5622_v41 = vsub.f32 %v19822_v51, %v19851_v61  ;;  %v19951_v56 = vand.u32 4294901760, %v5643_v0 }
 0x523   :  { %14360 = vmatmul.mubr.f32.vlgmr.msra.gmra.mxu0 %v19622_v10  ;;  %14434 = vmatprep.subr.mxu1 %v23168_v12  ;;  %v19892_v10 = vand.u32 4294901760, %v5615_v59  ;;  %v19918_v27 = vsub.f32 %v4106_v7, %v19888_v58  ;;  %v19931_v39 = vand.u32 4294901760, %v19902_v11  ;;  %v19940_v7 = vand.u32 4294901760, %v5636_v6 }
 0x524   :  { %14435 = vmatpush3.msra.mxu1 %v19848_v50  ;;  %14395 = vmatprep.subr.mxu0 %v23168_v12  ;;  %v19910_v54 = vand.u32 4294901760, %v5622_v41  ;;  %v5650_v41 = vsub.f32 %v19886_v30, %v19915_v53  ;;  %23275 = vst [vmem:[#allocation37_spill] sm:$0xff] %v19951_v56 }
 0x525   :  { %14436 = vmatprep.subr.mxu1 %v23168_v12  ;;  %14396 = vmatpush3.msra.mxu0 %v19714_v47  ;;  %23269 = vst [vmem:[#allocation24_spill] sm:$0xff] %v19892_v10  ;;  %23272 = vst [vmem:[#allocation46_spill] sm:$0xff] %v19931_v39  ;;  %v19945_v22 = vand.u32 4294901760, %v19918_v27  ;;  %v5657_v6 = vsub.f32 %v19902_v11, %v19931_v39 }
 0x526   :  { %14437 = vmatpush3.msra.mxu1 %v19864_v21  ;;  %14397 = vmatprep.subr.mxu0 %v23168_v12  ;;  %23270 = vst [vmem:[#allocation44_spill] sm:$0xff] %v19910_v54  ;;  %23273 = vst [vmem:[#allocation35_spill] sm:$0xff] %v19940_v7  ;;  %v19962_v57 = vand.u32 4294901760, %v5650_v41 }
 0x527   :  { %14438 = vmatprep.subr.mxu1 %v23168_v12  ;;  %14398 = vmatpush3.msra.mxu0 %v19720_v43  ;;  %23274 = vst [vmem:[#allocation49_spill] sm:$0xff] %v19945_v22  ;;  %v5664_v0 = vsub.f32 %v19918_v27, %v19945_v22 }
 0x528   :  { %14439 = vmatpush3.msra.mxu1 %v19876_v36  ;;  %14399 = vmatprep.subr.mxu0 %v23168_v12  ;;  %23277 = vst [vmem:[#allocation39_spill] sm:$0xff] %v19962_v57 }
 0x529   :  { %14440 = vmatprep.subr.mxu1 %v23168_v12  ;;  %14400 = vmatpush3.msra.mxu0 %v19729_v35 }
 0x52a   :  { %v19922_v38 = vpop.f32.mrf.mxu1  ;;  %14441 = vmatpush3.msra.mxu1 %v19892_v10  ;;  %14401 = vmatprep.subr.mxu0 %v23168_v12 }
 0x52b   :  { %14442 = vmatprep.subr.mxu1 %v23168_v12  ;;  %14402 = vmatpush3.msra.mxu0 %v19738_v18 }
 0x52c   :  { %v14064_v59 = vpop.f32.mrf.mxu1  ;;  %14443 = vmatpush3.msra.mxu1 %v19910_v54  ;;  %14403 = vmatprep.subr.mxu0 %v23168_v12  ;;  %v19978_v54 = vand.u32 4294901760, %v5664_v0 }
 0x52d   :  { %14444 = vmatprep.subr.mxu1 %v23168_v12  ;;  %14404 = vmatpush3.msra.mxu0 %v19750_v28  ;;  %v19956_v59 = vand.u32 4294901760, %v19934_v25 }
 0x52e   :  { %14445 = vmatpush3.msra.mxu1 %v19926_v62  ;;  %14405 = vmatprep.subr.mxu0 %v23168_v12  ;;  %v19970_v62 = vand.u32 4294901760, %v5657_v6  ;;  %23279 = vst [vmem:[#allocation54_spill] sm:$0xff] %v19978_v54 }
 0x52f   :  { %23276 = vst [vmem:[#allocation50_spill] sm:$0xff] %v19956_v59  ;;  %14446 = vmatprep.subr.mxu1 %v23168_v12  ;;  %14406 = vmatpush3.msra.mxu0 %v19754_v37 }
 0x530   :  { %14447 = vmatpush3.msra.mxu1 %v19940_v7  ;;  %14407 = vmatprep.subr.mxu0 %v23168_v12  ;;  %23278 = vst [vmem:[#allocation52_spill] sm:$0xff] %v19970_v62  ;;  %v5671_v7 = vsub.f32 %v19934_v25, %v19956_v59 }
 0x531   :  { %14448 = vmatprep.subr.mxu1 %v23168_v12  ;;  %14408 = vmatpush3.msra.mxu0 %v19766_v52 }
 0x532   :  { %v4283_v26 = vpop.f32.mrf.mxu0  ;;  %14449 = vmatpush3.msra.mxu1 %v19951_v56  ;;  %14409 = vmatprep.subr.mxu0 %v23168_v12  ;;  %v19984_v6 = vand.u32 4294901760, %v5671_v7 }
 0x533   :  { %14450 = vmatprep.subr.mxu1 %v23168_v12  ;;  %14410 = vmatpush3.msra.mxu0 %v19790_v2 }
 0x534   :  { %v14031_v41 = vpop.f32.mrf.mxu0  ;;  %14451 = vmatpush3.msra.mxu1 %v19962_v57  ;;  %14411 = vmatprep.subr.mxu0 %v23168_v12  ;;  %23280 = vst [vmem:[#allocation43_spill] sm:$0xff] %v19984_v6 }
 0x535   :  { %14452 = vmatprep.subr.mxu1 %v23168_v12  ;;  %14412 = vmatpush3.msra.mxu0 %v19807_v48 }
 0x536   :  { %14453 = vmatpush3.msra.mxu1 %v19970_v62  ;;  %14413 = vmatprep.subr.mxu0 %v23168_v12  ;;  %v4430_v62 = vadd.f32 %v19922_v38, %v4283_v26 }
 0x537   :  { %14454 = vmatprep.subr.mxu1 %v23168_v12  ;;  %14414 = vmatpush3.msra.mxu0 %v19824_v55 }
 0x538   :  { %14455 = vmatpush3.msra.mxu1 %v19978_v54  ;;  %14415 = vmatprep.subr.mxu0 %v23168_v12 }
 0x539   :  { %14456 = vmatprep.subr.mxu1 %v23168_v12  ;;  %14416 = vmatpush3.msra.mxu0 %v19840_v17 }
 0x53a   :  { %14457 = vmatpush3.msra.mxu1 %v19984_v6  ;;  %14417 = vmatprep.subr.mxu0 %v23168_v12 }
 0x53b   :  { %14458 = vmatprep.mubr.msk.f32.mxu1 %vm16701_vm8, %v23168_v12  ;;  %14494 = vmatprep.subr.mxu1 %v23168_v12 }
 0x53c   :  { %14418 = vmatpush3.msra.mxu0 %v19856_v40  ;;  %14425 = vmatprep.mubr.msk.f32.mxu0 %vm16701_vm8, %v23168_v12 }
 0x53d   :  { %14419 = vmatprep.subr.mxu0 %v23168_v12 }
 0x53e   :  { %14420 = vmatpush3.msra.mxu0 %v19872_v31 }
 0x53f   :  { %14421 = vmatprep.subr.mxu0 %v23168_v12 }
 0x540   :  { %14422 = vmatpush3.msra.mxu0 %v19888_v58 }
 0x541   :  { %14423 = vmatprep.subr.mxu0 %v23168_v12 }
 0x542   :  { %14424 = vmatpush3.msra.mxu0 %v19904_v45 }
 0x543   :  { %14461 = vmatprep.subr.mxu0 %v23168_v12 }
 0x548   :  { %v4619_v7 = vpop.f32.mrf.mxu1 }
 0x54a   :  { %v14130_v0 = vpop.f32.mrf.mxu1 }
 0x551   :  { %v4531_v41 = vpop.f32.mrf.mxu0 }
 0x552   :  { %v4532_v56 = vadd.f32 %v4531_v41, %v4430_v62  ;;  %v23281_v62 = vld [vmem:[#allocation46_spill] sm:$0xff]  ;;  %v23286_v41 = vld [vmem:[#allocation59_spill] sm:$0xff] }
 0x553   :  { %v14097_v6 = vpop.f32.mrf.mxu0 }
 0x554   :  { %v4620_v10 = vadd.f32 %v4619_v7, %v4532_v56  ;;  %v23283_v56 = vld [vmem:[#allocation49_spill] sm:$0xff]  ;;  %v23285_v7 = vld [vmem:[#allocation50_spill] sm:$0xff] }
 0x568   :  { %v4821_v54 = vpop.f32.mrf.mxu1 }
 0x56a   :  { %v14196_v57 = vpop.f32.mrf.mxu1 }
 0x570   :  { %v4735_v36 = vpop.f32.mrf.mxu0 }
 0x571   :  { %v4736_v21 = vadd.f32 %v4735_v36, %v4620_v10 }
 0x572   :  { %v14163_v50 = vpop.f32.mrf.mxu0 }
 0x573   :  { %v4822_v32 = vadd.f32 %v4821_v54, %v4736_v21 }
 0x575   :  { %v4825_v59 = vmax.f32 %v4822_v32, 1e-30 }
 0x577   :  { %16480 = vrcp.f32 %v4825_v59  ;;  %v23284_v59 = vld [vmem:[#allocation57_spill] sm:$0xff] }
 0x584   :  { %v16481_v20 = vpop.eup %16480 }
 0x585   :  { %v4827_v22 = vmul.f32 %v16481_v20, %v19404_v1 }
 0x587   :  { %v4828_v19 = vmul.f32 0.992, %v4827_v22  ;;  %v23282_v22 = vld [vmem:[#allocation55_spill] sm:$0xff] }
 0x589   :  { %v20009_v39 = vadd.f32 0.001, %v4828_v19 }
 0x58b   :  { %v5475_v6 = vsel %vm4187_vm7, %v20009_v39, 0 }
 0x58c   :  { %v20013_v0 = vand.u32 4294901760, %v5475_v6 }
 0x58e   :  { %v20016_v57 = vsub.f32 %v5475_v6, %v20013_v0  ;;  %14459 = vmatmul.mubr.f32.vlgmr.msra.gmra.mxu1 %v20013_v0  ;;  %v23287_v6 = vld [vmem:[#allocation60_spill] sm:$0xff] }
 0x58f   :  { %14495 = vmatpush3.msra.mxu1 %v19714_v47  ;;  %14524 = vmatprep.mubr.msk.f32.mxu1 %vm16701_vm8, %v23168_v12 }
 0x590   :  { %14496 = vmatprep.subr.mxu1 %v23168_v12  ;;  %v5559_v1 = vand.u32 4294901760, %v20016_v57 }
 0x591   :  { %14497 = vmatpush3.msra.mxu1 %v19720_v43 }
 0x592   :  { %14498 = vmatprep.subr.mxu1 %v23168_v12  ;;  %v5560_v26 = vsub.f32 %v20016_v57, %v5559_v1 }
 0x593   :  { %14499 = vmatpush3.msra.mxu1 %v19729_v35 }
 0x594   :  { %14500 = vmatprep.subr.mxu1 %v23168_v12  ;;  %v5561_v19 = vand.u32 4294901760, %v5560_v26  ;;  %v23290_v26 = vld [vmem:[#allocation24_spill] sm:$0xff] }
 0x595   :  { %14501 = vmatpush3.msra.mxu1 %v19738_v18 }
 0x596   :  { %14502 = vmatprep.subr.mxu1 %v23168_v12  ;;  %14426 = vmatmul.mubr.f32.vlgmr.msra.gmra.mxu0 %v5561_v19 }
 0x597   :  { %14462 = vmatpush3.msra.mxu0 %v19727_v44  ;;  %14503 = vmatpush3.msra.mxu1 %v19750_v28 }
 0x598   :  { %14463 = vmatprep.subr.mxu0 %v23168_v12  ;;  %14504 = vmatprep.subr.mxu1 %v23168_v12 }
 0x599   :  { %14464 = vmatpush3.msra.mxu0 %v19736_v49  ;;  %14505 = vmatpush3.msra.mxu1 %v19754_v37 }
 0x59a   :  { %14465 = vmatprep.subr.mxu0 %v23168_v12  ;;  %14506 = vmatprep.subr.mxu1 %v23168_v12 }
 0x59b   :  { %14466 = vmatpush3.msra.mxu0 %v19748_v34  ;;  %14507 = vmatpush3.msra.mxu1 %v19766_v52 }
 0x59c   :  { %14467 = vmatprep.subr.mxu0 %v23168_v12  ;;  %14508 = vmatprep.subr.mxu1 %v23168_v12 }
 0x59d   :  { %14468 = vmatpush3.msra.mxu0 %v19762_v16  ;;  %14509 = vmatpush3.msra.mxu1 %v19790_v2  ;;  %v20045_v20 = vpop.f32.mrf.mxu1 }
 0x59e   :  { %14469 = vmatprep.subr.mxu0 %v23168_v12  ;;  %14510 = vmatprep.subr.mxu1 %v23168_v12 }
 0x59f   :  { %14470 = vmatpush3.msra.mxu0 %v19776_v24  ;;  %14511 = vmatpush3.msra.mxu1 %v19807_v48  ;;  %v14262_v32 = vpop.f32.mrf.mxu1 }
 0x5a0   :  { %14471 = vmatprep.subr.mxu0 %v23168_v12  ;;  %14512 = vmatprep.subr.mxu1 %v23168_v12 }
 0x5a1   :  { %14472 = vmatpush3.msra.mxu0 %v19781_v5  ;;  %14513 = vmatpush3.msra.mxu1 %v19824_v55 }
 0x5a2   :  { %14473 = vmatprep.subr.mxu0 %v23168_v12  ;;  %14514 = vmatprep.subr.mxu1 %v23168_v12 }
 0x5a3   :  { %14474 = vmatpush3.msra.mxu0 %v19795_v3  ;;  %14515 = vmatpush3.msra.mxu1 %v19840_v17 }
 0x5a4   :  { %14475 = vmatprep.subr.mxu0 %v23168_v12  ;;  %14516 = vmatprep.subr.mxu1 %v23168_v12 }
 0x5a5   :  { %14476 = vmatpush3.msra.mxu0 %v19822_v51  ;;  %14517 = vmatpush3.msra.mxu1 %v19856_v40  ;;  %v20063_v50 = vpop.f32.mrf.mxu0 }
 0x5a6   :  { %14477 = vmatprep.subr.mxu0 %v23168_v12  ;;  %14518 = vmatprep.subr.mxu1 %v23168_v12  ;;  %v5072_v19 = vadd.f32 %v20045_v20, %v20063_v50  ;;  %v23293_v20 = vld [vmem:[#allocation35_spill] sm:$0xff] }
 0x5a7   :  { %14478 = vmatpush3.msra.mxu0 %v19838_v9  ;;  %14519 = vmatpush3.msra.mxu1 %v19872_v31  ;;  %v14229_v21 = vpop.f32.mrf.mxu0 }
 0x5a8   :  { %14479 = vmatprep.subr.mxu0 %v23168_v12  ;;  %14520 = vmatprep.subr.mxu1 %v23168_v12  ;;  %v23291_v21 = vld [vmem:[#allocation44_spill] sm:$0xff] }
 0x5a9   :  { %14480 = vmatpush3.msra.mxu0 %v19854_v14  ;;  %14521 = vmatpush3.msra.mxu1 %v19888_v58 }
 0x5aa   :  { %14481 = vmatprep.subr.mxu0 %v23168_v12  ;;  %14522 = vmatprep.subr.mxu1 %v23168_v12 }
 0x5ab   :  { %14482 = vmatpush3.msra.mxu0 %v19870_v63  ;;  %14523 = vmatpush3.msra.mxu1 %v19904_v45 }
 0x5ac   :  { %14483 = vmatprep.subr.mxu0 %v23168_v12  ;;  %14525 = vmatmul.mubr.f32.vlgmr.msra.gmra.mxu1 %v5559_v1  ;;  %v23289_v1 = vld [vmem:[#allocation64_spill] sm:$0xff] }
 0x5ad   :  { %14560 = vmatprep.subr.mxu1 %v23168_v12  ;;  %14484 = vmatpush3.msra.mxu0 %v19886_v30 }
 0x5ae   :  { %14561 = vmatpush3.msra.mxu1 %v19714_v47  ;;  %14485 = vmatprep.subr.mxu0 %v23168_v12 }
 0x5af   :  { %14562 = vmatprep.subr.mxu1 %v23168_v12  ;;  %14486 = vmatpush3.msra.mxu0 %v19902_v11 }
 0x5b0   :  { %14563 = vmatpush3.msra.mxu1 %v19720_v43  ;;  %14487 = vmatprep.subr.mxu0 %v23168_v12 }
 0x5b1   :  { %14564 = vmatprep.subr.mxu1 %v23168_v12  ;;  %14488 = vmatpush3.msra.mxu0 %v19918_v27 }
 0x5b2   :  { %14565 = vmatpush3.msra.mxu1 %v19729_v35  ;;  %14489 = vmatprep.subr.mxu0 %v23168_v12 }
 0x5b3   :  { %14566 = vmatprep.subr.mxu1 %v23168_v12  ;;  %14490 = vmatpush3.msra.mxu0 %v19934_v25 }
 0x5b4   :  { %14491 = vmatprep.mubr.msk.f32.mxu0 %vm16701_vm8, %v23168_v12  ;;  %14567 = vmatpush3.msra.mxu1 %v19738_v18 }
 0x5b5   :  { %14492 = vmatmul.mubr.f32.vlgmr.msra.gmra.mxu0 %v20016_v57  ;;  %14527 = vmatprep.subr.mxu0 %v23168_v12  ;;  %v23288_v57 = vld [vmem:[#allocation63_spill] sm:$0xff] }
 0x5b6   :  { %14568 = vmatprep.subr.mxu1 %v23168_v12  ;;  %14528 = vmatpush3.msra.mxu0 %v19745_v42 }
 0x5b7   :  { %14569 = vmatpush3.msra.mxu1 %v19750_v28  ;;  %14529 = vmatprep.subr.mxu0 %v23168_v12 }
 0x5b8   :  { %14570 = vmatprep.subr.mxu1 %v23168_v12  ;;  %14530 = vmatpush3.msra.mxu0 %v19759_v23 }
 0x5b9   :  { %14571 = vmatpush3.msra.mxu1 %v19754_v37  ;;  %14531 = vmatprep.subr.mxu0 %v23168_v12 }
 0x5ba   :  { %14572 = vmatprep.subr.mxu1 %v23168_v12  ;;  %14532 = vmatpush3.msra.mxu0 %v19773_v29 }
 0x5bb   :  { %14573 = vmatpush3.msra.mxu1 %v19766_v52  ;;  %14533 = vmatprep.subr.mxu0 %v23168_v12  ;;  %v20109_v36 = vpop.f32.mrf.mxu1 }
 0x5bc   :  { %14574 = vmatprep.subr.mxu1 %v23168_v12  ;;  %14534 = vmatpush3.msra.mxu0 %v19788_v4 }
 0x5bd   :  { %14575 = vmatpush3.msra.mxu1 %v19790_v2  ;;  %14535 = vmatprep.subr.mxu0 %v23168_v12  ;;  %v14328_v10 = vpop.f32.mrf.mxu1 }
 0x5be   :  { %14576 = vmatprep.subr.mxu1 %v23168_v12  ;;  %14536 = vmatpush3.msra.mxu0 %v19805_v13 }
 0x5bf   :  { %14577 = vmatpush3.msra.mxu1 %v19807_v48  ;;  %14537 = vmatprep.subr.mxu0 %v23168_v12 }
 0x5c0   :  { %14578 = vmatprep.subr.mxu1 %v23168_v12  ;;  %14538 = vmatpush3.msra.mxu0 %v19812_v8 }
 0x5c1   :  { %14579 = vmatpush3.msra.mxu1 %v19824_v55  ;;  %14539 = vmatprep.subr.mxu0 %v23168_v12 }
 0x5c2   :  { %14580 = vmatprep.subr.mxu1 %v23168_v12  ;;  %14540 = vmatpush3.msra.mxu0 %v19829_v46 }
 0x5c3   :  { %14581 = vmatpush3.msra.mxu1 %v19840_v17  ;;  %14541 = vmatprep.subr.mxu0 %v23168_v12 }
 0x5c4   :  { %14582 = vmatprep.subr.mxu1 %v23168_v12  ;;  %14542 = vmatpush3.msra.mxu0 %v19851_v61  ;;  %v5173_v54 = vpop.f32.mrf.mxu0 }
 0x5c5   :  { %14583 = vmatpush3.msra.mxu1 %v19856_v40  ;;  %14543 = vmatprep.subr.mxu0 %v23168_v12  ;;  %v5174_v10 = vadd.f32 %v5173_v54, %v5072_v19 }
 0x5c6   :  { %14584 = vmatprep.subr.mxu1 %v23168_v12  ;;  %14544 = vmatpush3.msra.mxu0 %v19867_v33  ;;  %v14295_v38 = vpop.f32.mrf.mxu0 }
 0x5c7   :  { %14585 = vmatpush3.msra.mxu1 %v19872_v31  ;;  %14545 = vmatprep.subr.mxu0 %v23168_v12  ;;  %v23292_v38 = vld [vmem:[#allocation32_spill] sm:$0xff]  ;;  %v5262_v50 = vadd.f32 %v20109_v36, %v5174_v10 }
 0x5c8   :  { %14586 = vmatprep.subr.mxu1 %v23168_v12  ;;  %14546 = vmatpush3.msra.mxu0 %v19883_v15 }
 0x5c9   :  { %14587 = vmatpush3.msra.mxu1 %v19888_v58  ;;  %14547 = vmatprep.subr.mxu0 %v23168_v12 }
 0x5ca   :  { %14588 = vmatprep.subr.mxu1 %v23168_v12  ;;  %14548 = vmatpush3.msra.mxu0 %v19899_v60 }
 0x5cb   :  { %14589 = vmatpush3.msra.mxu1 %v19904_v45  ;;  %14590 = vmatprep.mubr.msk.f32.mxu1 %vm16701_vm8, %v23168_v12 }
 0x5cc   :  { %14549 = vmatprep.subr.mxu0 %v23168_v12  ;;  %14591 = vmatmul.mubr.f32.vlgmr.msra.gmra.mxu1 %v20013_v0 }
 0x5cd   :  { %14550 = vmatpush3.msra.mxu0 %v19915_v53  ;;  %14557 = vmatprep.mubr.msk.f32.mxu0 %vm16701_vm8, %v23168_v12 }
 0x5ce   :  { %14551 = vmatprep.subr.mxu0 %v23168_v12  ;;  %14626 = vmatprep.subr.mxu1 %v23168_v12 }
 0x5cf   :  { %14552 = vmatpush3.msra.mxu0 %v23281_v62  ;;  %14627 = vmatpush3.msra.mxu1 %v23282_v22  ;;  %v23294_v22 = vld [vmem:[#allocation37_spill] sm:$0xff] }
 0x5d0   :  { %14553 = vmatprep.subr.mxu0 %v23168_v12  ;;  %14628 = vmatprep.subr.mxu1 %v23168_v12 }
 0x5d1   :  { %14554 = vmatpush3.msra.mxu0 %v23283_v56  ;;  %14629 = vmatpush3.msra.mxu1 %v23284_v59 }
 0x5d2   :  { %14555 = vmatprep.subr.mxu0 %v23168_v12  ;;  %14630 = vmatprep.subr.mxu1 %v23168_v12 }
 0x5d3   :  { %14556 = vmatpush3.msra.mxu0 %v23285_v7  ;;  %14631 = vmatpush3.msra.mxu1 %v23286_v41 }
 0x5d4   :  { %14558 = vmatmul.mubr.f32.vlgmr.msra.gmra.mxu0 %v20013_v0  ;;  %14632 = vmatprep.subr.mxu1 %v23168_v12 }
 0x5d5   :  { %14633 = vmatpush3.msra.mxu1 %v23287_v6  ;;  %14593 = vmatprep.subr.mxu0 %v23168_v12  ;;  %v23295_v6 = vld [vmem:[#allocation39_spill] sm:$0xff] }
 0x5d6   :  { %14634 = vmatprep.subr.mxu1 %v23168_v12  ;;  %14594 = vmatpush3.msra.mxu0 %v19714_v47 }
 0x5d7   :  { %14635 = vmatpush3.msra.mxu1 %v23288_v57  ;;  %14595 = vmatprep.subr.mxu0 %v23168_v12  ;;  %v23296_v57 = vld [vmem:[#allocation52_spill] sm:$0xff] }
 0x5d8   :  { %14636 = vmatprep.subr.mxu1 %v23168_v12  ;;  %14596 = vmatpush3.msra.mxu0 %v19720_v43 }
 0x5d9   :  { %14637 = vmatpush3.msra.mxu1 %v23289_v1  ;;  %14597 = vmatprep.subr.mxu0 %v23168_v12 }
 0x5da   :  { %14638 = vmatprep.subr.mxu1 %v23168_v12  ;;  %14598 = vmatpush3.msra.mxu0 %v19729_v35 }
 0x5db   :  { %v5463_v0 = vpop.f32.mrf.mxu1  ;;  %14639 = vmatpush3.msra.mxu1 %v23290_v26  ;;  %14599 = vmatprep.subr.mxu0 %v23168_v12  ;;  %v23297_v26 = vld [vmem:[#allocation54_spill] sm:$0xff] }
 0x5dc   :  { %14640 = vmatprep.subr.mxu1 %v23168_v12  ;;  %14600 = vmatpush3.msra.mxu0 %v19738_v18 }
 0x5dd   :  { %v14394_v32 = vpop.f32.mrf.mxu1  ;;  %14641 = vmatpush3.msra.mxu1 %v23291_v21  ;;  %14601 = vmatprep.subr.mxu0 %v23168_v12 }
 0x5de   :  { %14642 = vmatprep.subr.mxu1 %v23168_v12  ;;  %14602 = vmatpush3.msra.mxu0 %v19750_v28  ;;  %v23299_v32 = vld [vmem:[#allocation53_spill] sm:$0xff] }
 0x5df   :  { %14643 = vmatpush3.msra.mxu1 %v23292_v38  ;;  %14603 = vmatprep.subr.mxu0 %v23168_v12 }
 0x5e0   :  { %14644 = vmatprep.subr.mxu1 %v23168_v12  ;;  %14604 = vmatpush3.msra.mxu0 %v19754_v37 }
 0x5e1   :  { %14645 = vmatpush3.msra.mxu1 %v23293_v20  ;;  %14605 = vmatprep.subr.mxu0 %v23168_v12 }
 0x5e2   :  { %14646 = vmatprep.subr.mxu1 %v23168_v12  ;;  %14606 = vmatpush3.msra.mxu0 %v19766_v52 }
 0x5e3   :  { %v5377_v54 = vpop.f32.mrf.mxu0  ;;  %14647 = vmatpush3.msra.mxu1 %v23294_v22  ;;  %14607 = vmatprep.subr.mxu0 %v23168_v12 }
 0x5e4   :  { %v5378_v59 = vadd.f32 %v5377_v54, %v5262_v50  ;;  %14648 = vmatprep.subr.mxu1 %v23168_v12  ;;  %14608 = vmatpush3.msra.mxu0 %v19790_v2 }
 0x5e5   :  { %v14361_v41 = vpop.f32.mrf.mxu0  ;;  %14649 = vmatpush3.msra.mxu1 %v23295_v6  ;;  %14609 = vmatprep.subr.mxu0 %v23168_v12  ;;  %v4148_v6 = vld [vmem:[#allocation14 + $0x148] sm:$0xff] }
 0x5e6   :  { %v5464_v36 = vadd.f32 %v5463_v0, %v5378_v59  ;;  %14650 = vmatprep.subr.mxu1 %v23168_v12  ;;  %14610 = vmatpush3.msra.mxu0 %v19807_v48  ;;  %v23298_v0 = vld [vmem:[#allocation43_spill] sm:$0xff] }
 0x5e7   :  { %14651 = vmatpush3.msra.mxu1 %v23296_v57  ;;  %14611 = vmatprep.subr.mxu0 %v23168_v12  ;;  %v20468_v57 = vand.u32 4294901760, %v4148_v6 }
 0x5e8   :  { %v5467_v1 = vmax.f32 %v5464_v36, 1e-30  ;;  %14652 = vmatprep.subr.mxu1 %v23168_v12  ;;  %14612 = vmatpush3.msra.mxu0 %v19824_v55 }
 0x5e9   :  { %14653 = vmatpush3.msra.mxu1 %v23297_v26  ;;  %14613 = vmatprep.subr.mxu0 %v23168_v12 }
 0x5ea   :  { %16482 = vrcp.f32 %v5467_v1  ;;  %14654 = vmatprep.subr.mxu1 %v23168_v12  ;;  %14614 = vmatpush3.msra.mxu0 %v19840_v17  ;;  %v4147_v1 = vld [vmem:[#allocation14 + $0x140] sm:$0xff] }
 0x5eb   :  { %14655 = vmatpush3.msra.mxu1 %v23298_v0  ;;  %14615 = vmatprep.subr.mxu0 %v23168_v12  ;;  %v20474_v0 = vsub.f32 %v4148_v6, %v20468_v57 }
 0x5ec   :  { %14656 = vmatprep.mubr.msk.f32.mxu1 %vm16701_vm8, %v23168_v12  ;;  %14692 = vmatprep.subr.mxu1 %v23168_v12 }
 0x5ed   :  { %14616 = vmatpush3.msra.mxu0 %v19856_v40  ;;  %14623 = vmatprep.mubr.msk.f32.mxu0 %vm16701_vm8, %v23168_v12 }
 0x5ee   :  { %14617 = vmatprep.subr.mxu0 %v23168_v12 }
 0x5ef   :  { %14618 = vmatpush3.msra.mxu0 %v19872_v31 }
 0x5f0   :  { %14619 = vmatprep.subr.mxu0 %v23168_v12 }
 0x5f1   :  { %14620 = vmatpush3.msra.mxu0 %v19888_v58 }
 0x5f2   :  { %14621 = vmatprep.subr.mxu0 %v23168_v12 }
 0x5f3   :  { %14622 = vmatpush3.msra.mxu0 %v19904_v45 }
 0x5f4   :  { %14659 = vmatprep.subr.mxu0 %v23168_v12 }
 0x5f7   :  { %v16483_v19 = vpop.eup %16482 }
 0x5f8   :  { %v5469_v21 = vmul.f32 %v16483_v19, %v23299_v32  ;;  %v20476_v19 = vand.u32 4294901760, %v4147_v1  ;;  %v4146_v32 = vld [vmem:[#allocation14 + $0x138] sm:$0xff] }
 0x5fa   :  { %v5470_v10 = vmul.f32 0.992, %v5469_v21 }
 0x5fc   :  { %v20226_v38 = vadd.f32 0.001, %v5470_v10  ;;  %v7343_v10 = vand.u32 4294901760, %v20474_v0 }
 0x5fe   :  { %v6107_v20 = vsel %vm4187_vm7, %v20226_v38, 0 }
 0x5ff   :  { %v20230_v50 = vand.u32 4294901760, %v6107_v20 }
 0x601   :  { %v20233_v54 = vsub.f32 %v6107_v20, %v20230_v50  ;;  %14657 = vmatmul.mubr.f32.vlgmr.msra.gmra.mxu1 %v20230_v50  ;;  %v20485_v20 = vsub.f32 %v4147_v1, %v20476_v19 }
 0x602   :  { %14693 = vmatpush3.msra.mxu1 %v19714_v47  ;;  %14722 = vmatprep.mubr.msk.f32.mxu1 %vm16701_vm8, %v23168_v12 }
 0x603   :  { %14694 = vmatprep.subr.mxu1 %v23168_v12  ;;  %v6191_v22 = vand.u32 4294901760, %v20233_v54 }
 0x604   :  { %14695 = vmatpush3.msra.mxu1 %v19720_v43 }
 0x605   :  { %14696 = vmatprep.subr.mxu1 %v23168_v12  ;;  %v6192_v59 = vsub.f32 %v20233_v54, %v6191_v22 }
 0x606   :  { %14697 = vmatpush3.msra.mxu1 %v19729_v35 }
 0x607   :  { %14698 = vmatprep.subr.mxu1 %v23168_v12  ;;  %v6193_v41 = vand.u32 4294901760, %v6192_v59  ;;  %v7344_v59 = vsub.f32 %v20474_v0, %v7343_v10 }
 0x608   :  { %14699 = vmatpush3.msra.mxu1 %v19738_v18 }
 0x609   :  { %14700 = vmatprep.subr.mxu1 %v23168_v12  ;;  %14624 = vmatmul.mubr.f32.vlgmr.msra.gmra.mxu0 %v6193_v41  ;;  %v7350_v41 = vand.u32 4294901760, %v20485_v20 }
 0x60a   :  { %14660 = vmatpush3.msra.mxu0 %v19727_v44  ;;  %14701 = vmatpush3.msra.mxu1 %v19750_v28  ;;  %v4168_v44 = vld [vmem:[%s22752_s9] sm:$0xff] }
 0x60b   :  { %14661 = vmatprep.subr.mxu0 %v23168_v12  ;;  %14702 = vmatprep.subr.mxu1 %v23168_v12 }
 0x60c   :  { %14662 = vmatpush3.msra.mxu0 %v19736_v49  ;;  %14703 = vmatpush3.msra.mxu1 %v19754_v37  ;;  %v20335_v49 = vand.u32 4294901760, %v4168_v44 }
 0x60d   :  { %14663 = vmatprep.subr.mxu0 %v23168_v12  ;;  %14704 = vmatprep.subr.mxu1 %v23168_v12 }
 0x60e   :  { %14664 = vmatpush3.msra.mxu0 %v19748_v34  ;;  %14705 = vmatpush3.msra.mxu1 %v19766_v52  ;;  %v20349_v34 = vsub.f32 %v4168_v44, %v20335_v49  ;;  %v4144_v44 = vld [vmem:[#allocation14 + $0x128] sm:$0xff] }
 0x60f   :  { %14665 = vmatprep.subr.mxu0 %v23168_v12  ;;  %14706 = vmatprep.subr.mxu1 %v23168_v12 }
 0x610   :  { %14666 = vmatpush3.msra.mxu0 %v19762_v16  ;;  %14707 = vmatpush3.msra.mxu1 %v19790_v2  ;;  %v6877_v16 = vand.u32 4294901760, %v20349_v34 }
 0x611   :  { %14667 = vmatprep.subr.mxu0 %v23168_v12  ;;  %14708 = vmatprep.subr.mxu1 %v23168_v12 }
 0x612   :  { %14668 = vmatpush3.msra.mxu0 %v19776_v24  ;;  %14709 = vmatpush3.msra.mxu1 %v19807_v48  ;;  %v6878_v24 = vsub.f32 %v20349_v34, %v6877_v16 }
 0x613   :  { %14669 = vmatprep.subr.mxu0 %v23168_v12  ;;  %14710 = vmatprep.subr.mxu1 %v23168_v12 }
 0x614   :  { %14670 = vmatpush3.msra.mxu0 %v19781_v5  ;;  %14711 = vmatpush3.msra.mxu1 %v19824_v55 }
 0x615   :  { %14671 = vmatprep.subr.mxu0 %v23168_v12  ;;  %14712 = vmatprep.subr.mxu1 %v23168_v12 }
 0x616   :  { %14672 = vmatpush3.msra.mxu0 %v19795_v3  ;;  %14713 = vmatpush3.msra.mxu1 %v19840_v17 }
 0x617   :  { %14673 = vmatprep.subr.mxu0 %v23168_v12  ;;  %14714 = vmatprep.subr.mxu1 %v23168_v12 }
 0x618   :  { %14674 = vmatpush3.msra.mxu0 %v19822_v51  ;;  %14715 = vmatpush3.msra.mxu1 %v19856_v40 }
 0x619   :  { %14675 = vmatprep.subr.mxu0 %v23168_v12  ;;  %14716 = vmatprep.subr.mxu1 %v23168_v12 }
 0x61a   :  { %14676 = vmatpush3.msra.mxu0 %v19838_v9  ;;  %14717 = vmatpush3.msra.mxu1 %v19872_v31  ;;  %v4151_v9 = vld [vmem:[#allocation14 + $0x160] sm:$0xff] }
 0x61b   :  { %14677 = vmatprep.subr.mxu0 %v23168_v12  ;;  %14718 = vmatprep.subr.mxu1 %v23168_v12 }
 0x61c   :  { %14678 = vmatpush3.msra.mxu0 %v19854_v14  ;;  %14719 = vmatpush3.msra.mxu1 %v19888_v58 }
 0x61d   :  { %14679 = vmatprep.subr.mxu0 %v23168_v12  ;;  %14720 = vmatprep.subr.mxu1 %v23168_v12 }
 0x61e   :  { %14680 = vmatpush3.msra.mxu0 %v19870_v63  ;;  %14721 = vmatpush3.msra.mxu1 %v19904_v45 }
 0x61f   :  { %14681 = vmatprep.subr.mxu0 %v23168_v12  ;;  %14723 = vmatmul.mubr.f32.vlgmr.msra.gmra.mxu1 %v6191_v22 }
 0x620   :  { %14758 = vmatprep.subr.mxu1 %v23168_v12  ;;  %14682 = vmatpush3.msra.mxu0 %v19886_v30 }
 0x621   :  { %14759 = vmatpush3.msra.mxu1 %v19714_v47  ;;  %14683 = vmatprep.subr.mxu0 %v23168_v12  ;;  %v4169_v47 = vld [vmem:[%s22752_s9 + $0x8] sm:$0x7f] }
 0x622   :  { %14760 = vmatprep.subr.mxu1 %v23168_v12  ;;  %14684 = vmatpush3.msra.mxu0 %v19902_v11 }
 0x623   :  { %14761 = vmatpush3.msra.mxu1 %v19720_v43  ;;  %14685 = vmatprep.subr.mxu0 %v23168_v12  ;;  %v6760_v43 = vsel %vm6758_vm9, %v4169_v47, 0 }
 0x624   :  { %14762 = vmatprep.subr.mxu1 %v23168_v12  ;;  %14686 = vmatpush3.msra.mxu0 %v19918_v27 }
 0x625   :  { %14763 = vmatpush3.msra.mxu1 %v19729_v35  ;;  %14687 = vmatprep.subr.mxu0 %v23168_v12  ;;  %v20329_v35 = vand.u32 4294901760, %v6760_v43 }
 0x626   :  { %14764 = vmatprep.subr.mxu1 %v23168_v12  ;;  %14688 = vmatpush3.msra.mxu0 %v19934_v25 }
 0x627   :  { %14689 = vmatprep.mubr.msk.f32.mxu0 %vm16701_vm8, %v23168_v12  ;;  %14765 = vmatpush3.msra.mxu1 %v19738_v18  ;;  %v144_v18 = vld [vmem:[#allocation5] sm:$0xff] }
 0x628   :  { %14690 = vmatmul.mubr.f32.vlgmr.msra.gmra.mxu0 %v20233_v54  ;;  %14725 = vmatprep.subr.mxu0 %v23168_v12  ;;  %v4145_v54 = vld [vmem:[#allocation14 + $0x130] sm:$0xff] }
 0x629   :  { %14766 = vmatprep.subr.mxu1 %v23168_v12  ;;  %14726 = vmatpush3.msra.mxu0 %v19745_v42  ;;  %v20342_v42 = vsub.f32 %v6760_v43, %v20329_v35  ;;  %v20499_v43 = vand.u32 4294901760, %v4145_v54 }
 0x62a   :  { %14767 = vmatpush3.msra.mxu1 %v19750_v28  ;;  %14727 = vmatprep.subr.mxu0 %v23168_v12  ;;  %v6756_v28 = vsel %vm6754_vm10, %v144_v18, 0 }
 0x62b   :  { %14768 = vmatprep.subr.mxu1 %v23168_v12  ;;  %14728 = vmatpush3.msra.mxu0 %v19759_v23  ;;  %v20359_v23 = vand.u32 4294901760, %v6756_v28 }
 0x62c   :  { %14769 = vmatpush3.msra.mxu1 %v19754_v37  ;;  %14729 = vmatprep.subr.mxu0 %v23168_v12  ;;  %v6870_v37 = vand.u32 4294901760, %v20342_v42 }
 0x62d   :  { %14770 = vmatprep.subr.mxu1 %v23168_v12  ;;  %14730 = vmatpush3.msra.mxu0 %v19773_v29  ;;  %v6830_v29 = vsub.f32 %v6756_v28, %v20359_v23  ;;  %v4143_v28 = vld [vmem:[#allocation14 + $0x120] sm:$0xff] }
 0x62e   :  { %14771 = vmatpush3.msra.mxu1 %v19766_v52  ;;  %14731 = vmatprep.subr.mxu0 %v23168_v12  ;;  %v6871_v52 = vsub.f32 %v20342_v42, %v6870_v37 }
 0x62f   :  { %14772 = vmatprep.subr.mxu1 %v23168_v12  ;;  %14732 = vmatpush3.msra.mxu0 %v19788_v4  ;;  %v6831_v4 = vand.u32 4294901760, %v6830_v29 }
 0x630   :  { %14773 = vmatpush3.msra.mxu1 %v19790_v2  ;;  %14733 = vmatprep.subr.mxu0 %v23168_v12  ;;  %v6872_v5 = vand.u32 4294901760, %v6871_v52  ;;  %v6879_v2 = vand.u32 4294901760, %v6878_v24  ;;  %v20519_v52 = vand.u32 4294901760, %v4143_v28  ;;  %v4142_v24 = vld [vmem:[#allocation14 + $0x118] sm:$0xff] }
 0x631   :  { %14774 = vmatprep.subr.mxu1 %v23168_v12  ;;  %14734 = vmatpush3.msra.mxu0 %v19805_v13  ;;  %v6832_v3 = vsub.f32 %v6830_v29, %v6831_v4 }
 0x632   :  { %14775 = vmatpush3.msra.mxu1 %v19807_v48  ;;  %14735 = vmatprep.subr.mxu0 %v23168_v12 }
 0x633   :  { %14776 = vmatprep.subr.mxu1 %v23168_v12  ;;  %14736 = vmatpush3.msra.mxu0 %v19812_v8  ;;  %v6833_v13 = vand.u32 4294901760, %v6832_v3  ;;  %v20529_v3 = vand.u32 4294901760, %v4142_v24 }
 0x634   :  { %14777 = vmatpush3.msra.mxu1 %v19824_v55  ;;  %14737 = vmatprep.subr.mxu0 %v23168_v12 }
 0x635   :  { %14778 = vmatprep.subr.mxu1 %v23168_v12  ;;  %14738 = vmatpush3.msra.mxu0 %v19829_v46 }
 0x636   :  { %14779 = vmatpush3.msra.mxu1 %v19840_v17  ;;  %14739 = vmatprep.subr.mxu0 %v23168_v12  ;;  %v4150_v17 = vld [vmem:[#allocation14 + $0x158] sm:$0xff] }
 0x637   :  { %14780 = vmatprep.subr.mxu1 %v23168_v12  ;;  %14740 = vmatpush3.msra.mxu0 %v19851_v61  ;;  %v20437_v61 = vand.u32 4294901760, %v4151_v9  ;;  %v20439_v14 = vand.u32 4294901760, %v4150_v17 }
 0x638   :  { %14781 = vmatpush3.msra.mxu1 %v19856_v40  ;;  %14741 = vmatprep.subr.mxu0 %v23168_v12 }
 0x639   :  { %14782 = vmatprep.subr.mxu1 %v23168_v12  ;;  %14742 = vmatpush3.msra.mxu0 %v19867_v33  ;;  %v20442_v33 = vsub.f32 %v4151_v9, %v20437_v61  ;;  %v20445_v63 = vsub.f32 %v4150_v17, %v20439_v14 }
 0x63a   :  { %14783 = vmatpush3.msra.mxu1 %v19872_v31  ;;  %14743 = vmatprep.subr.mxu0 %v23168_v12 }
 0x63b   :  { %14784 = vmatprep.subr.mxu1 %v23168_v12  ;;  %14744 = vmatpush3.msra.mxu0 %v19883_v15  ;;  %v7322_v15 = vand.u32 4294901760, %v20442_v33  ;;  %v7329_v30 = vand.u32 4294901760, %v20445_v63 }
 0x63c   :  { %14785 = vmatpush3.msra.mxu1 %v19888_v58  ;;  %14745 = vmatprep.subr.mxu0 %v23168_v12 }
 0x63d   :  { %14786 = vmatprep.subr.mxu1 %v23168_v12  ;;  %14746 = vmatpush3.msra.mxu0 %v19899_v60  ;;  %v7323_v58 = vsub.f32 %v20442_v33, %v7322_v15  ;;  %v7330_v60 = vsub.f32 %v20445_v63, %v7329_v30 }
 0x63e   :  { %14787 = vmatpush3.msra.mxu1 %v19904_v45  ;;  %14788 = vmatprep.mubr.msk.f32.mxu1 %vm16701_vm8, %v23168_v12 }
 0x63f   :  { %14747 = vmatprep.subr.mxu0 %v23168_v12  ;;  %14789 = vmatmul.mubr.f32.vlgmr.msra.gmra.mxu1 %v20230_v50  ;;  %v7324_v11 = vand.u32 4294901760, %v7323_v58  ;;  %v7331_v45 = vand.u32 4294901760, %v7330_v60 }
 0x640   :  { %14748 = vmatpush3.msra.mxu0 %v19915_v53  ;;  %14755 = vmatprep.mubr.msk.f32.mxu0 %vm16701_vm8, %v23168_v12 }
 0x641   :  { %14749 = vmatprep.subr.mxu0 %v23168_v12  ;;  %14798 = vmatprep.subr.mxu1 %v23168_v12 }
 0x642   :  { %14750 = vmatpush3.msra.mxu0 %v23281_v62  ;;  %14799 = vmatpush3.msra.mxu1 %v6872_v5 }
 0x643   :  { %14751 = vmatprep.subr.mxu0 %v23168_v12  ;;  %14800 = vmatprep.subr.mxu1 %v23168_v12 }
 0x644   :  { %14752 = vmatpush3.msra.mxu0 %v23283_v56  ;;  %14801 = vmatpush3.msra.mxu1 %v6879_v2  ;;  %v4149_v56 = vld [vmem:[#allocation14 + $0x150] sm:$0xff]  ;;  %v20527_v2 = vsub.f32 %v4143_v28, %v20519_v52 }
 0x645   :  { %14753 = vmatprep.subr.mxu0 %v23168_v12  ;;  %14802 = vmatprep.mubr.msk.f32.mxu1 %vm16701_vm8, %v23168_v12 }
 0x646   :  { %14754 = vmatpush3.msra.mxu0 %v23285_v7  ;;  %14803 = vmatmul.mubr.f32.vlgmr.msra.gmra.mxu1 %v20359_v23  ;;  %v20463_v7 = vand.u32 4294901760, %v4149_v56 }
 0x647   :  { %14756 = vmatmul.mubr.f32.vlgmr.msra.gmra.mxu0 %v20230_v50  ;;  %14791 = vmatprep.subr.mxu0 %v23168_v12  ;;  %v20487_v50 = vand.u32 4294901760, %v4146_v32 }
 0x648   :  { %14792 = vmatpush3.msra.mxu0 %v20329_v35  ;;  %14795 = vmatprep.mubr.msk.f32.mxu0 %vm16701_vm8, %v23168_v12  ;;  %v20466_v36 = vsub.f32 %v4149_v56, %v20463_v7 }
 0x649   :  { %14793 = vmatprep.subr.mxu0 %v23168_v12  ;;  %14812 = vmatprep.subr.mxu1 %v23168_v12  ;;  %v20496_v47 = vsub.f32 %v4146_v32, %v20487_v50 }
 0x64a   :  { %14794 = vmatpush3.msra.mxu0 %v20335_v49  ;;  %14813 = vmatpush3.msra.mxu1 %v20329_v35  ;;  %v7336_v26 = vand.u32 4294901760, %v20466_v36 }
 0x64b   :  { %14796 = vmatmul.mubr.f32.vlgmr.msra.gmra.mxu0 %v6833_v13  ;;  %14805 = vmatprep.subr.mxu0 %v23168_v12  ;;  %v7357_v18 = vand.u32 4294901760, %v20496_v47 }
 0x64c   :  { %14806 = vmatpush3.msra.mxu0 %v20342_v42  ;;  %14809 = vmatprep.mubr.msk.f32.mxu0 %vm16701_vm8, %v23168_v12  ;;  %v7337_v21 = vsub.f32 %v20466_v36, %v7336_v26  ;;  %v20506_v42 = vand.u32 4294901760, %v4144_v44 }
 0x64d   :  { %14807 = vmatprep.subr.mxu0 %v23168_v12  ;;  %14814 = vmatprep.subr.mxu1 %v23168_v12 }
 0x64e   :  { %v5709_v48 = vpop.f32.mrf.mxu1  ;;  %14808 = vmatpush3.msra.mxu0 %v20349_v34  ;;  %14815 = vmatpush3.msra.mxu1 %v20335_v49  ;;  %v7338_v22 = vand.u32 4294901760, %v7337_v21  ;;  %v20510_v34 = vsub.f32 %v4145_v54, %v20499_v43  ;;  %v4138_v21 = vld [vmem:[#allocation14 + $0xf8] sm:$0xff] }
 0x64f   :  { %14810 = vmatmul.mubr.f32.vlgmr.msra.gmra.mxu0 %v6830_v29  ;;  %14816 = vmatprep.mubr.msk.f32.mxu1 %vm16701_vm8, %v23168_v12 }
 0x650   :  { %v14460_v8 = vpop.f32.mrf.mxu1  ;;  %14819 = vmatprep.subr.mxu0 %v23168_v12  ;;  %14817 = vmatmul.mubr.f32.vlgmr.msra.gmra.mxu1 %v6831_v4  ;;  %v7364_v29 = vand.u32 4294901760, %v20510_v34 }
 0x651   :  { %14820 = vmatpush3.msra.mxu0 %v6870_v37  ;;  %14826 = vmatprep.subr.mxu1 %v23168_v12 }
 0x652   :  { %14821 = vmatprep.subr.mxu0 %v23168_v12  ;;  %14827 = vmatpush3.msra.mxu1 %v20329_v35  ;;  %v7345_v35 = vand.u32 4294901760, %v7344_v59  ;;  %v7365_v13 = vsub.f32 %v20510_v34, %v7364_v29 }
 0x653   :  { %14822 = vmatpush3.msra.mxu0 %v6877_v16  ;;  %14823 = vmatprep.mubr.msk.f32.mxu0 %vm16701_vm8, %v23168_v12  ;;  %v20517_v16 = vsub.f32 %v4144_v44, %v20506_v42  ;;  %v20579_v44 = vand.u32 4294901760, %v4138_v21 }
 0x654   :  { %14828 = vmatprep.subr.mxu1 %v23168_v12  ;;  %14824 = vmatmul.mubr.f32.vlgmr.msra.gmra.mxu0 %v20359_v23  ;;  %v7366_v17 = vand.u32 4294901760, %v7365_v13 }
 0x655   :  { %14829 = vmatpush3.msra.mxu1 %v20335_v49  ;;  %14830 = vmatprep.mubr.msk.f32.mxu1 %vm16701_vm8, %v23168_v12  ;;  %v7351_v49 = vsub.f32 %v20485_v20, %v7350_v41  ;;  %v7371_v4 = vand.u32 4294901760, %v20517_v16 }
 0x656   :  { %v5563_v51 = vpop.f32.mrf.mxu0  ;;  %14831 = vmatmul.mubr.f32.vlgmr.msra.gmra.mxu1 %v20359_v23  ;;  %14866 = vmatprep.subr.mxu1 %v23168_v12  ;;  %v7358_v23 = vsub.f32 %v20496_v47, %v7357_v18 }
 0x657   :  { %v5710_v55 = vadd.f32 %v5709_v48, %v5563_v51  ;;  %14833 = vmatprep.subr.mxu0 %v23168_v12  ;;  %14896 = vmatprep.mubr.msk.f32.mxu1 %vm16701_vm8, %v23168_v12  ;;  %v7352_v37 = vand.u32 4294901760, %v7351_v49  ;;  %v4141_v48 = vld [vmem:[#allocation14 + $0x110] sm:$0xff]  ;;  %v7372_v8 = vsub.f32 %v20517_v16, %v7371_v4  ;;  %v22988_v51 = vand.u32 4294901760, %v20527_v2 }
 0x658   :  { %v14427_v46 = vpop.f32.mrf.mxu0  ;;  %14863 = vmatprep.mubr.msk.f32.mxu0 %vm16701_vm8, %v23168_v12  ;;  %14834 = vmatpush3.msra.mxu0 %v20437_v61  ;;  %v7359_v5 = vand.u32 4294901760, %v7358_v23  ;;  %v4137_v49 = vld [vmem:[#allocation14 + $0xf0] sm:$0xff]  ;;  %v20587_v23 = vsub.f32 %v4138_v21, %v20579_v44 }
 0x659   :  { %14835 = vmatprep.subr.mxu0 %v23168_v12  ;;  %14867 = vmatpush3.msra.mxu1 %v7324_v11  ;;  %v20544_v46 = vand.u32 4294901760, %v4141_v48  ;;  %v7379_v58 = vsub.f32 %v20527_v2, %v22988_v51 }
 0x65a   :  { %14836 = vmatpush3.msra.mxu0 %v20439_v14  ;;  %14868 = vmatprep.subr.mxu1 %v23168_v12 }
 0x65b   :  { %14837 = vmatprep.subr.mxu0 %v23168_v12  ;;  %14869 = vmatpush3.msra.mxu1 %v7331_v45  ;;  %v20554_v11 = vsub.f32 %v4141_v48, %v20544_v46 }
 0x65c   :  { %14870 = vmatprep.subr.mxu1 %v23168_v12  ;;  %14838 = vmatpush3.msra.mxu0 %v20463_v7 }
 0x65d   :  { %14839 = vmatprep.subr.mxu0 %v23168_v12  ;;  %14871 = vmatpush3.msra.mxu1 %v7338_v22  ;;  %v22986_v6 = vand.u32 4294901760, %v20554_v11 }
 0x65e   :  { %14840 = vmatpush3.msra.mxu0 %v20468_v57  ;;  %14872 = vmatprep.subr.mxu1 %v23168_v12 }
 0x65f   :  { %14841 = vmatprep.subr.mxu0 %v23168_v12  ;;  %14873 = vmatpush3.msra.mxu1 %v7345_v35  ;;  %v7393_v22 = vsub.f32 %v20554_v11, %v22986_v6 }
 0x660   :  { %14842 = vmatpush3.msra.mxu0 %v20476_v19  ;;  %14874 = vmatprep.subr.mxu1 %v23168_v12 }
 0x661   :  { %14843 = vmatprep.subr.mxu0 %v23168_v12  ;;  %14875 = vmatpush3.msra.mxu1 %v7352_v37  ;;  %v7394_v28 = vand.u32 4294901760, %v7393_v22 }
 0x662   :  { %14844 = vmatpush3.msra.mxu0 %v20487_v50  ;;  %14876 = vmatprep.subr.mxu1 %v23168_v12 }
 0x663   :  { %14845 = vmatprep.subr.mxu0 %v23168_v12  ;;  %14877 = vmatpush3.msra.mxu1 %v7359_v5 }
 0x664   :  { %14846 = vmatpush3.msra.mxu0 %v20499_v43  ;;  %14878 = vmatprep.subr.mxu1 %v23168_v12 }
 0x665   :  { %14847 = vmatprep.subr.mxu0 %v23168_v12  ;;  %14879 = vmatpush3.msra.mxu1 %v7366_v17  ;;  %v22983_v17 = vand.u32 4294901760, %v20587_v23 }
 0x666   :  { %14848 = vmatpush3.msra.mxu0 %v20506_v42  ;;  %14880 = vmatprep.subr.mxu1 %v23168_v12 }
 0x667   :  { %14849 = vmatprep.subr.mxu0 %v23168_v12 }
 0x668   :  { %14850 = vmatpush3.msra.mxu0 %v20519_v52 }
 0x669   :  { %14851 = vmatprep.subr.mxu0 %v23168_v12 }
 0x66a   :  { %14852 = vmatpush3.msra.mxu0 %v20529_v3 }
 0x66b   :  { %14853 = vmatprep.subr.mxu0 %v23168_v12 }
 0x66c   :  { %v5899_v40 = vpop.f32.mrf.mxu1  ;;  %14854 = vmatpush3.msra.mxu0 %v20544_v46 }
 0x66d   :  { %14855 = vmatprep.subr.mxu0 %v23168_v12 }
 0x66e   :  { %v14526_v31 = vpop.f32.mrf.mxu1 }
 0x66f   :  { %v7373_v31 = vand.u32 4294901760, %v7372_v8 }
 0x671   :  { %14881 = vmatpush3.msra.mxu1 %v7373_v31 }
 0x672   :  { %14882 = vmatprep.subr.mxu1 %v23168_v12 }
 0x675   :  { %v5811_v53 = vpop.f32.mrf.mxu0 }
 0x676   :  { %v5812_v27 = vadd.f32 %v5811_v53, %v5710_v55  ;;  %v20542_v55 = vsub.f32 %v4142_v24, %v20529_v3  ;;  %v20589_v24 = vand.u32 4294901760, %v4137_v49 }
 0x677   :  { %v14493_v25 = vpop.f32.mrf.mxu0 }
 0x678   :  { %v20460_v62 = vadd.f32 %v5899_v40, %v5812_v27  ;;  %v4140_v40 = vld [vmem:[#allocation14 + $0x108] sm:$0xff]  ;;  %v22987_v60 = vand.u32 4294901760, %v20542_v55  ;;  %v4139_v27 = vld [vmem:[#allocation14 + $0x100] sm:$0xff]  ;;  %v7380_v25 = vand.u32 4294901760, %v7379_v58 }
 0x679   :  { %v20557_v53 = vand.u32 4294901760, %v4140_v40  ;;  %v20565_v1 = vand.u32 4294901760, %v4139_v27 }
 0x67a   :  { %v7386_v56 = vsub.f32 %v20542_v55, %v22987_v60  ;;  %14883 = vmatpush3.msra.mxu1 %v7380_v25 }
 0x67b   :  { %v20569_v32 = vsub.f32 %v4140_v40, %v20557_v53  ;;  %14856 = vmatpush3.msra.mxu0 %v20557_v53  ;;  %v20577_v59 = vsub.f32 %v4139_v27, %v20565_v1  ;;  %14884 = vmatprep.subr.mxu1 %v23168_v12  ;;  %v20603_v40 = vsub.f32 %v4137_v49, %v20589_v24 }
 0x67c   :  { %v7387_v54 = vand.u32 4294901760, %v7386_v56  ;;  %14857 = vmatprep.subr.mxu0 %v23168_v12  ;;  %v7414_v27 = vsub.f32 %v20587_v23, %v22983_v17 }
 0x67d   :  { %v22985_v35 = vand.u32 4294901760, %v20569_v32  ;;  %14858 = vmatpush3.msra.mxu0 %v20565_v1  ;;  %v22984_v37 = vand.u32 4294901760, %v20577_v59  ;;  %v22982_v25 = vand.u32 4294901760, %v20603_v40 }
 0x67e   :  { %14859 = vmatprep.subr.mxu0 %v23168_v12  ;;  %14885 = vmatpush3.msra.mxu1 %v7387_v54  ;;  %v7415_v56 = vand.u32 4294901760, %v7414_v27 }
 0x67f   :  { %v7400_v13 = vsub.f32 %v20569_v32, %v22985_v35  ;;  %14860 = vmatpush3.msra.mxu0 %v20579_v44  ;;  %14886 = vmatprep.subr.mxu1 %v23168_v12  ;;  %v7407_v8 = vsub.f32 %v20577_v59, %v22984_v37  ;;  %v7421_v21 = vsub.f32 %v20603_v40, %v22982_v25 }
 0x680   :  { %14861 = vmatprep.subr.mxu0 %v23168_v12  ;;  %14887 = vmatpush3.msra.mxu1 %v7394_v28 }
 0x681   :  { %v7401_v58 = vand.u32 4294901760, %v7400_v13  ;;  %14862 = vmatpush3.msra.mxu0 %v20589_v24  ;;  %14888 = vmatprep.subr.mxu1 %v23168_v12 }
 0x682   :  { %14899 = vmatprep.subr.mxu0 %v23168_v12 }
 0x683   :  { %14889 = vmatpush3.msra.mxu1 %v7401_v58 }
 0x684   :  { %14890 = vmatprep.subr.mxu1 %v23168_v12 }
 0x68c   :  { %v6101_v9 = vpop.f32.mrf.mxu1 }
 0x68e   :  { %v14592_v45 = vpop.f32.mrf.mxu1 }
 0x694   :  { %v6015_v5 = vpop.f32.mrf.mxu0 }
 0x695   :  { %v6016_v48 = vadd.f32 %v6015_v5, %v20460_v62  ;;  %v7408_v62 = vand.u32 4294901760, %v7407_v8 }
 0x696   :  { %v14559_v31 = vpop.f32.mrf.mxu0 }
 0x697   :  { %v6102_v45 = vadd.f32 %v6101_v9, %v6016_v48  ;;  %14891 = vmatpush3.msra.mxu1 %v7408_v62  ;;  %v7422_v9 = vand.u32 4294901760, %v7421_v21 }
 0x698   :  { %14892 = vmatprep.subr.mxu1 %v23168_v12 }
 0x699   :  { %14893 = vmatpush3.msra.mxu1 %v7415_v56 }
 0x69a   :  { %14894 = vmatprep.subr.mxu1 %v23168_v12 }
 0x69b   :  { %14895 = vmatpush3.msra.mxu1 %v7422_v9 }
 0x69c   :  { %14932 = vmatprep.subr.mxu1 %v23168_v12 }
 0x6c1   :  { %v6341_v54 = vpop.f32.mrf.mxu1 }
 0x6c3   :  { %v14658_v22 = vpop.f32.mrf.mxu1 }
 0x6c9   :  { %v6195_v49 = vpop.f32.mrf.mxu0 }
 0x6ca   :  { %v6342_v28 = vadd.f32 %v6341_v54, %v6195_v49 }
 0x6cb   :  { %v14625_v5 = vpop.f32.mrf.mxu0 }
 0x6df   :  { %v6531_v13 = vpop.f32.mrf.mxu1 }
 0x6e1   :  { %v14724_v48 = vpop.f32.mrf.mxu1 }
 0x6e8   :  { %v6443_v8 = vpop.f32.mrf.mxu0 }
 0x6e9   :  { %v6444_v31 = vadd.f32 %v6443_v8, %v6342_v28 }
 0x6ea   :  { %v14691_v58 = vpop.f32.mrf.mxu0 }
 0x6eb   :  { %v6532_v62 = vadd.f32 %v6531_v13, %v6444_v31  ;;  %v20622_v58 = vmul.f32 6.2831855, %v6102_v45 }
 0x6ff   :  { %v6733_v27 = vpop.f32.mrf.mxu1 }
 0x701   :  { %v14790_v25 = vpop.f32.mrf.mxu1 }
 0x706   :  { %v6916_v21 = vpop.f32.mrf.mxu1 }
 0x707   :  { %v6647_v56 = vpop.f32.mrf.mxu0 }
 0x708   :  { %v6648_v17 = vadd.f32 %v6647_v56, %v6532_v62  ;;  %v14804_v37 = vpop.f32.mrf.mxu1  ;;  %v4161_v56 = vld [vmem:[#allocation14 + $0x1a8] sm:$0xff] }
 0x709   :  { %v14757_v9 = vpop.f32.mrf.mxu0 }
 0x70a   :  { %v20620_v35 = vadd.f32 %v6733_v27, %v6648_v17 }
 0x70b   :  { %v6835_v6 = vpop.f32.mrf.mxu0 }
 0x70c   :  { %v6917_v60 = vadd.f32 %v6916_v21, %v6835_v6 }
 0x70d   :  { %v14797_v22 = vpop.f32.mrf.mxu0 }
 0x70f   :  { %v6992_v54 = vpop.f32.mrf.mxu0 }
 0x710   :  { %v6993_v49 = vadd.f32 %v6992_v54, %v6917_v60  ;;  %v7067_v5 = vpop.f32.mrf.mxu1  ;;  %v20853_v54 = vand.u32 4294901760, %v4161_v56 }
 0x711   :  { %v14811_v48 = vpop.f32.mrf.mxu0 }
 0x712   :  { %v7068_v51 = vadd.f32 %v7067_v5, %v6993_v49  ;;  %v14818_v28 = vpop.f32.mrf.mxu1  ;;  %v4160_v49 = vld [vmem:[#allocation14 + $0x1a0] sm:$0xff]  ;;  %v20859_v48 = vsub.f32 %v4161_v56, %v20853_v54 }
 0x713   :  { %v20861_v28 = vand.u32 4294901760, %v4160_v49 }
 0x714   :  { %v7144_v8 = vpop.f32.mrf.mxu0 }
 0x715   :  { %v7145_v13 = vadd.f32 %v7144_v8, %v7068_v51  ;;  %v4159_v8 = vld [vmem:[#allocation14 + $0x198] sm:$0xff] }
 0x716   :  { %v7217_v31 = vpop.f32.mrf.mxu1  ;;  %v14825_v25 = vpop.f32.mrf.mxu0 }
 0x717   :  { %v7218_v62 = vadd.f32 %v7217_v31, %v7145_v13  ;;  %v7996_v31 = vand.u32 4294901760, %v20859_v48  ;;  %v20868_v25 = vsub.f32 %v4160_v49, %v20861_v28 }
 0x718   :  { %v14832_v37 = vpop.f32.mrf.mxu1 }
 0x719   :  { %vm7221_vm11 = vcmp.ge.f32.partialorder %v7218_v62, %v20622_v58  ;;  %v20870_v62 = vand.u32 4294901760, %v4159_v8  ;;  %v4158_v37 = vld [vmem:[#allocation14 + $0x190] sm:$0xff] }
 0x71a   :  { %v20626_v17 = vsel %vm7221_vm11, 1.0, %v23168_v12 }
 0x71b   :  { %v7225_v60 = vsel %vm4187_vm7, %v20626_v17, 0  ;;  %14897 = vmatmul.mubr.msk.f32.vlgmr.msra.gmra.mxu1 %vm4187_vm7, %v20626_v17 }
 0x71c   :  { %v20632_v6 = vsub.f32 %v7225_v60, %v7225_v60  ;;  %14933 = vmatpush3.msra.mxu1 %v20437_v61  ;;  %14962 = vmatprep.mubr.msk.f32.mxu1 %vm16701_vm8, %v23168_v12  ;;  %v7997_v60 = vsub.f32 %v20859_v48, %v7996_v31 }
 0x71d   :  { %14934 = vmatprep.subr.mxu1 %v23168_v12 }
 0x71e   :  { %14935 = vmatpush3.msra.mxu1 %v20439_v14  ;;  %v7309_v51 = vand.u32 4294901760, %v20632_v6 }
 0x71f   :  { %14936 = vmatprep.subr.mxu1 %v23168_v12 }
 0x720   :  { %14937 = vmatpush3.msra.mxu1 %v20463_v7  ;;  %v7310_v45 = vsub.f32 %v20632_v6, %v7309_v51 }
 0x721   :  { %14938 = vmatprep.subr.mxu1 %v23168_v12 }
 0x722   :  { %14939 = vmatpush3.msra.mxu1 %v20468_v57  ;;  %v7311_v27 = vand.u32 4294901760, %v7310_v45  ;;  %v20882_v45 = vand.u32 4294901760, %v4158_v37 }
 0x723   :  { %14940 = vmatprep.subr.mxu1 %v23168_v12 }
 0x724   :  { %14941 = vmatpush3.msra.mxu1 %v20476_v19  ;;  %14864 = vmatmul.mubr.f32.vlgmr.msra.gmra.mxu0 %v7311_v27  ;;  %v4157_v27 = vld [vmem:[#allocation14 + $0x188] sm:$0xff] }
 0x725   :  { %14900 = vmatpush3.msra.mxu0 %v20442_v33  ;;  %14942 = vmatprep.subr.mxu1 %v23168_v12  ;;  %v23302_v33 = vand.u32 4294901760, %v20554_v11 }
 0x726   :  { %14901 = vmatprep.subr.mxu0 %v23168_v12  ;;  %14943 = vmatpush3.msra.mxu1 %v20487_v50 }
 0x727   :  { %14902 = vmatpush3.msra.mxu0 %v20445_v63  ;;  %14944 = vmatprep.subr.mxu1 %v23168_v12  ;;  %v23303_v63 = vand.u32 4294901760, %v20569_v32 }
 0x728   :  { %14903 = vmatprep.subr.mxu0 %v23168_v12  ;;  %14945 = vmatpush3.msra.mxu1 %v20499_v43 }
 0x729   :  { %14904 = vmatpush3.msra.mxu0 %v20466_v36  ;;  %14946 = vmatprep.subr.mxu1 %v23168_v12  ;;  %v4167_v36 = vld [vmem:[#allocation14 + $0x1d8] sm:$0xff] }
 0x72a   :  { %14905 = vmatprep.subr.mxu0 %v23168_v12  ;;  %14947 = vmatpush3.msra.mxu1 %v20506_v42 }
 0x72b   :  { %14906 = vmatpush3.msra.mxu0 %v20474_v0  ;;  %14948 = vmatprep.subr.mxu1 %v23168_v12  ;;  %v4165_v0 = vld [vmem:[#allocation14 + $0x1c8] sm:$0xff] }
 0x72c   :  { %14907 = vmatprep.subr.mxu0 %v23168_v12  ;;  %14949 = vmatpush3.msra.mxu1 %v20519_v52 }
 0x72d   :  { %14908 = vmatpush3.msra.mxu0 %v20485_v20  ;;  %14950 = vmatprep.subr.mxu1 %v23168_v12  ;;  %v20792_v20 = vand.u32 4294901760, %v4165_v0 }
 0x72e   :  { %14909 = vmatprep.subr.mxu0 %v23168_v12  ;;  %14951 = vmatpush3.msra.mxu1 %v20529_v3 }
 0x72f   :  { %14910 = vmatpush3.msra.mxu0 %v20496_v47  ;;  %14952 = vmatprep.subr.mxu1 %v23168_v12  ;;  %v4162_v47 = vld [vmem:[#allocation14 + $0x1b0] sm:$0xff] }
 0x730   :  { %14911 = vmatprep.subr.mxu0 %v23168_v12  ;;  %14953 = vmatpush3.msra.mxu1 %v20544_v46 }
 0x731   :  { %14912 = vmatpush3.msra.mxu0 %v20510_v34  ;;  %14954 = vmatprep.subr.mxu1 %v23168_v12 }
 0x732   :  { %14913 = vmatprep.subr.mxu0 %v23168_v12  ;;  %14955 = vmatpush3.msra.mxu1 %v20557_v53 }
 0x733   :  { %14914 = vmatpush3.msra.mxu0 %v20517_v16  ;;  %14956 = vmatprep.subr.mxu1 %v23168_v12  ;;  %v20808_v16 = vsub.f32 %v4165_v0, %v20792_v20 }
 0x734   :  { %14915 = vmatprep.subr.mxu0 %v23168_v12  ;;  %14957 = vmatpush3.msra.mxu1 %v20565_v1 }
 0x735   :  { %14916 = vmatpush3.msra.mxu0 %v20527_v2  ;;  %14958 = vmatprep.subr.mxu1 %v23168_v12 }
 0x736   :  { %14917 = vmatprep.subr.mxu0 %v23168_v12  ;;  %14959 = vmatpush3.msra.mxu1 %v20579_v44 }
 0x737   :  { %14918 = vmatpush3.msra.mxu0 %v20542_v55  ;;  %14960 = vmatprep.subr.mxu1 %v23168_v12 }
 0x738   :  { %14919 = vmatprep.subr.mxu0 %v23168_v12  ;;  %14961 = vmatpush3.msra.mxu1 %v20589_v24 }
 0x739   :  { %14920 = vmatpush3.msra.mxu0 %v20554_v11  ;;  %14963 = vmatmul.mubr.f32.vlgmr.msra.gmra.mxu1 %v7309_v51  ;;  %v20880_v51 = vsub.f32 %v4159_v8, %v20870_v62 }
 0x73a   :  { %14998 = vmatprep.subr.mxu1 %v23168_v12  ;;  %14921 = vmatprep.subr.mxu0 %v23168_v12 }
 0x73b   :  { %14999 = vmatpush3.msra.mxu1 %v20437_v61  ;;  %14922 = vmatpush3.msra.mxu0 %v20569_v32  ;;  %v23300_v61 = vand.u32 4294901760, %v20527_v2 }
 0x73c   :  { %15000 = vmatprep.subr.mxu1 %v23168_v12  ;;  %14923 = vmatprep.subr.mxu0 %v23168_v12 }
 0x73d   :  { %15001 = vmatpush3.msra.mxu1 %v20439_v14  ;;  %14924 = vmatpush3.msra.mxu0 %v20577_v59  ;;  %v23301_v14 = vand.u32 4294901760, %v20542_v55  ;;  %v7968_v55 = vand.u32 4294901760, %v20808_v16 }
 0x73e   :  { %15002 = vmatprep.subr.mxu1 %v23168_v12  ;;  %14925 = vmatprep.subr.mxu0 %v23168_v12 }
 0x73f   :  { %15003 = vmatpush3.msra.mxu1 %v20463_v7  ;;  %14926 = vmatpush3.msra.mxu0 %v20587_v23  ;;  %v23306_v7 = vand.u32 4294901760, %v20603_v40  ;;  %v7969_v32 = vsub.f32 %v20808_v16, %v7968_v55 }
 0x740   :  { %15004 = vmatprep.subr.mxu1 %v23168_v12  ;;  %14927 = vmatprep.subr.mxu0 %v23168_v12 }
 0x741   :  { %15005 = vmatpush3.msra.mxu1 %v20468_v57  ;;  %14928 = vmatpush3.msra.mxu0 %v20603_v40  ;;  %v20788_v57 = vand.u32 4294901760, %v4167_v36  ;;  %v7970_v40 = vand.u32 4294901760, %v7969_v32 }
 0x742   :  { %14929 = vmatprep.mubr.msk.f32.mxu0 %vm16701_vm8, %v23168_v12  ;;  %15006 = vmatprep.subr.mxu1 %v23168_v12 }
 0x743   :  { %14930 = vmatmul.mubr.f32.vlgmr.msra.gmra.mxu0 %v20632_v6  ;;  %14965 = vmatprep.subr.mxu0 %v23168_v12  ;;  %v8003_v6 = vand.u32 4294901760, %v20868_v25 }
 0x744   :  { %15007 = vmatpush3.msra.mxu1 %v20476_v19  ;;  %14966 = vmatpush3.msra.mxu0 %v7322_v15  ;;  %v23304_v15 = vand.u32 4294901760, %v20577_v59  ;;  %v4164_v19 = vld [vmem:[#allocation14 + $0x1c0] sm:$0xff] }
 0x745   :  { %15008 = vmatprep.subr.mxu1 %v23168_v12  ;;  %14967 = vmatprep.subr.mxu0 %v23168_v12 }
 0x746   :  { %15009 = vmatpush3.msra.mxu1 %v20487_v50  ;;  %14968 = vmatpush3.msra.mxu0 %v7329_v30  ;;  %v23305_v30 = vand.u32 4294901760, %v20587_v23  ;;  %v20794_v50 = vand.u32 4294901760, %v4164_v19 }
 0x747   :  { %15010 = vmatprep.subr.mxu1 %v23168_v12  ;;  %14969 = vmatprep.subr.mxu0 %v23168_v12 }
 0x748   :  { %15011 = vmatpush3.msra.mxu1 %v20499_v43  ;;  %14970 = vmatpush3.msra.mxu0 %v7336_v26  ;;  %v4166_v26 = vld [vmem:[#allocation14 + $0x1d0] sm:$0xff]  ;;  %v20797_v43 = vsub.f32 %v4167_v36, %v20788_v57 }
 0x749   :  { %15012 = vmatprep.subr.mxu1 %v23168_v12  ;;  %14971 = vmatprep.subr.mxu0 %v23168_v12 }
 0x74a   :  { %15013 = vmatpush3.msra.mxu1 %v20506_v42  ;;  %14972 = vmatpush3.msra.mxu0 %v7343_v10  ;;  %v20790_v10 = vand.u32 4294901760, %v4166_v26  ;;  %v20802_v42 = vand.u32 4294901760, %v4162_v47 }
 0x74b   :  { %15014 = vmatprep.subr.mxu1 %v23168_v12  ;;  %14973 = vmatprep.subr.mxu0 %v23168_v12 }
 0x74c   :  { %15015 = vmatpush3.msra.mxu1 %v20519_v52  ;;  %14974 = vmatpush3.msra.mxu0 %v7350_v41  ;;  %v4163_v41 = vld [vmem:[#allocation14 + $0x1b8] sm:$0xff]  ;;  %v20805_v34 = vsub.f32 %v4166_v26, %v20790_v10  ;;  %v20811_v52 = vsub.f32 %v4164_v19, %v20794_v50  ;;  %v20820_v2 = vsub.f32 %v4162_v47, %v20802_v42 }
 0x74d   :  { %15016 = vmatprep.subr.mxu1 %v23168_v12  ;;  %14975 = vmatprep.subr.mxu0 %v23168_v12 }
 0x74e   :  { %15017 = vmatpush3.msra.mxu1 %v20529_v3  ;;  %14976 = vmatpush3.msra.mxu0 %v7357_v18  ;;  %v20800_v18 = vand.u32 4294901760, %v4163_v41  ;;  %v7961_v3 = vand.u32 4294901760, %v20805_v34  ;;  %v7989_v23 = vand.u32 4294901760, %v20820_v2 }
 0x74f   :  { %15018 = vmatprep.subr.mxu1 %v23168_v12  ;;  %14977 = vmatprep.subr.mxu0 %v23168_v12 }
 0x750   :  { %15019 = vmatpush3.msra.mxu1 %v20544_v46  ;;  %14978 = vmatpush3.msra.mxu0 %v7364_v29  ;;  %v7954_v29 = vand.u32 4294901760, %v20797_v43  ;;  %v7975_v46 = vand.u32 4294901760, %v20811_v52  ;;  %v7990_v22 = vsub.f32 %v20820_v2, %v7989_v23 }
 0x751   :  { %15020 = vmatprep.subr.mxu1 %v23168_v12  ;;  %14979 = vmatprep.subr.mxu0 %v23168_v12 }
 0x752   :  { %15021 = vmatpush3.msra.mxu1 %v20557_v53  ;;  %14980 = vmatpush3.msra.mxu0 %v7371_v4  ;;  %v20816_v4 = vsub.f32 %v4163_v41, %v20800_v18  ;;  %v7955_v11 = vsub.f32 %v20797_v43, %v7954_v29  ;;  %v7991_v13 = vand.u32 4294901760, %v7990_v22  ;;  %v4155_v41 = vld [vmem:[#allocation14 + $0x178] sm:$0xff]  ;;  %v4153_v22 = vld [vmem:[#allocation14 + $0x168] sm:$0xff] }
 0x753   :  { %15022 = vmatprep.subr.mxu1 %v23168_v12  ;;  %14981 = vmatprep.subr.mxu0 %v23168_v12  ;;  %v20916_v32 = vand.u32 4294901760, %v4155_v41 }
 0x754   :  { %15023 = vmatpush3.msra.mxu1 %v20565_v1  ;;  %14982 = vmatpush3.msra.mxu0 %v23300_v61  ;;  %v7982_v53 = vand.u32 4294901760, %v20816_v4  ;;  %v7962_v1 = vsub.f32 %v20805_v34, %v7961_v3  ;;  %v7956_v59 = vand.u32 4294901760, %v7955_v11  ;;  %v7998_v61 = vand.u32 4294901760, %v7997_v60 }
 0x755   :  { %15024 = vmatprep.subr.mxu1 %v23168_v12  ;;  %14983 = vmatprep.subr.mxu0 %v23168_v12 }
 0x756   :  { %15025 = vmatpush3.msra.mxu1 %v20579_v44  ;;  %14984 = vmatpush3.msra.mxu0 %v23301_v14  ;;  %v7976_v44 = vsub.f32 %v20811_v52, %v7975_v46  ;;  %v7983_v21 = vsub.f32 %v20816_v4, %v7982_v53  ;;  %v8004_v14 = vsub.f32 %v20868_v25, %v8003_v6 }
 0x757   :  { %15026 = vmatprep.subr.mxu1 %v23168_v12  ;;  %14985 = vmatprep.subr.mxu0 %v23168_v12 }
 0x758   :  { %15027 = vmatpush3.msra.mxu1 %v20589_v24  ;;  %15028 = vmatprep.mubr.msk.f32.mxu1 %vm16701_vm8, %v23168_v12  ;;  %v7963_v24 = vand.u32 4294901760, %v7962_v1  ;;  %v7977_v9 = vand.u32 4294901760, %v7976_v44  ;;  %v7984_v5 = vand.u32 4294901760, %v7983_v21  ;;  %v4154_v44 = vld [vmem:[#allocation14 + $0x170] sm:$0xff]  ;;  %v20924_v21 = vsub.f32 %v4155_v41, %v20916_v32 }
 0x759   :  { %14986 = vmatpush3.msra.mxu0 %v23302_v33  ;;  %15029 = vmatmul.mubr.msk.f32.vlgmr.msra.gmra.mxu1 %vm4187_vm7, %v20626_v17  ;;  %v8010_v33 = vand.u32 4294901760, %v20880_v51  ;;  %v20926_v56 = vand.u32 4294901760, %v4154_v44 }
 0x75a   :  { %14987 = vmatprep.subr.mxu0 %v23168_v12  ;;  %14995 = vmatprep.mubr.msk.f32.mxu0 %vm16701_vm8, %v23168_v12 }
 0x75b   :  { %14988 = vmatpush3.msra.mxu0 %v23303_v63  ;;  %15064 = vmatprep.subr.mxu1 %v23168_v12  ;;  %v20892_v63 = vsub.f32 %v4158_v37, %v20882_v45  ;;  %v8011_v36 = vsub.f32 %v20880_v51, %v8010_v33  ;;  %v20939_v8 = vsub.f32 %v4154_v44, %v20926_v56 }
 0x75c   :  { %14989 = vmatprep.subr.mxu0 %v23168_v12  ;;  %15094 = vmatprep.mubr.msk.f32.mxu1 %vm16701_vm8, %v23168_v12 }
 0x75d   :  { %14990 = vmatpush3.msra.mxu0 %v23304_v15  ;;  %15065 = vmatpush3.msra.mxu1 %v7956_v59  ;;  %v20896_v15 = vand.u32 4294901760, %v4157_v27  ;;  %v8017_v26 = vand.u32 4294901760, %v20892_v63  ;;  %v8012_v47 = vand.u32 4294901760, %v8011_v36 }
 0x75e   :  { %14991 = vmatprep.subr.mxu0 %v23168_v12  ;;  %15066 = vmatprep.subr.mxu1 %v23168_v12 }
 0x75f   :  { %14992 = vmatpush3.msra.mxu0 %v23305_v30  ;;  %15067 = vmatpush3.msra.mxu1 %v7963_v24  ;;  %v4156_v30 = vld [vmem:[#allocation14 + $0x180] sm:$0xff]  ;;  %v20907_v19 = vsub.f32 %v4157_v27, %v20896_v15  ;;  %v8018_v11 = vsub.f32 %v20892_v63, %v8017_v26 }
 0x760   :  { %14993 = vmatprep.subr.mxu0 %v23168_v12  ;;  %15068 = vmatprep.subr.mxu1 %v23168_v12  ;;  %v20903_v0 = vand.u32 4294901760, %v4156_v30 }
 0x761   :  { %14994 = vmatpush3.msra.mxu0 %v23306_v7  ;;  %15069 = vmatpush3.msra.mxu1 %v7970_v40  ;;  %v8005_v7 = vand.u32 4294901760, %v8004_v14  ;;  %v22993_v59 = vand.u32 4294901760, %v20907_v19  ;;  %v8019_v24 = vand.u32 4294901760, %v8018_v11 }
 0x762   :  { %14996 = vmatmul.mubr.msk.f32.vlgmr.msra.gmra.mxu0 %vm4187_vm7, %v20626_v17  ;;  %15031 = vmatprep.subr.mxu0 %v23168_v12  ;;  %v20914_v1 = vsub.f32 %v4156_v30, %v20903_v0 }
 0x763   :  { %15061 = vmatprep.mubr.msk.f32.mxu0 %vm16701_vm8, %v23168_v12  ;;  %15032 = vmatpush3.msra.mxu0 %v20788_v57 }
 0x764   :  { %15033 = vmatprep.subr.mxu0 %v23168_v12  ;;  %15070 = vmatprep.subr.mxu1 %v23168_v12  ;;  %v22992_v40 = vand.u32 4294901760, %v20914_v1 }
 0x765   :  { %15034 = vmatpush3.msra.mxu0 %v20790_v10  ;;  %15071 = vmatpush3.msra.mxu1 %v7977_v9  ;;  %v8025_v9 = vsub.f32 %v20907_v19, %v22993_v59 }
 0x766   :  { %15035 = vmatprep.subr.mxu0 %v23168_v12  ;;  %15072 = vmatprep.subr.mxu1 %v23168_v12  ;;  %v8032_v49 = vsub.f32 %v20914_v1, %v22992_v40 }
 0x767   :  { %15036 = vmatpush3.msra.mxu0 %v20792_v20  ;;  %15073 = vmatpush3.msra.mxu1 %v7984_v5  ;;  %v22991_v5 = vand.u32 4294901760, %v20924_v21  ;;  %v8026_v37 = vand.u32 4294901760, %v8025_v9 }
 0x768   :  { %15037 = vmatprep.subr.mxu0 %v23168_v12  ;;  %15074 = vmatprep.subr.mxu1 %v23168_v12  ;;  %v8033_v60 = vand.u32 4294901760, %v8032_v49 }
 0x769   :  { %15038 = vmatpush3.msra.mxu0 %v20794_v50  ;;  %15075 = vmatpush3.msra.mxu1 %v7991_v13  ;;  %v20941_v13 = vand.u32 4294901760, %v4153_v22  ;;  %v8039_v27 = vsub.f32 %v20924_v21, %v22991_v5 }
 0x76a   :  { %15039 = vmatprep.subr.mxu0 %v23168_v12  ;;  %15076 = vmatprep.subr.mxu1 %v23168_v12 }
 0x76b   :  { %15040 = vmatpush3.msra.mxu0 %v20800_v18  ;;  %15077 = vmatpush3.msra.mxu1 %v7998_v61  ;;  %v22990_v61 = vand.u32 4294901760, %v20939_v8  ;;  %v20951_v14 = vsub.f32 %v4153_v22, %v20941_v13  ;;  %v8040_v30 = vand.u32 4294901760, %v8039_v27 }
 0x76c   :  { %15041 = vmatprep.subr.mxu0 %v23168_v12  ;;  %15078 = vmatprep.subr.mxu1 %v23168_v12 }
 0x76d   :  { %15042 = vmatpush3.msra.mxu0 %v20802_v42  ;;  %15079 = vmatpush3.msra.mxu1 %v8005_v7  ;;  %v8046_v7 = vsub.f32 %v20939_v8, %v22990_v61  ;;  %v22989_v36 = vand.u32 4294901760, %v20951_v14 }
 0x76e   :  { %15043 = vmatprep.subr.mxu0 %v23168_v12  ;;  %15080 = vmatprep.subr.mxu1 %v23168_v12 }
 0x76f   :  { %15044 = vmatpush3.msra.mxu0 %v20853_v54  ;;  %15081 = vmatpush3.msra.mxu1 %v8012_v47  ;;  %v8047_v41 = vand.u32 4294901760, %v8046_v7  ;;  %v8053_v47 = vsub.f32 %v20951_v14, %v22989_v36 }
 0x770   :  { %15045 = vmatprep.subr.mxu0 %v23168_v12  ;;  %15082 = vmatprep.subr.mxu1 %v23168_v12 }
 0x771   :  { %15046 = vmatpush3.msra.mxu0 %v20861_v28  ;;  %15083 = vmatpush3.msra.mxu1 %v8019_v24  ;;  %v8054_v11 = vand.u32 4294901760, %v8053_v47 }
 0x772   :  { %15047 = vmatprep.subr.mxu0 %v23168_v12  ;;  %15084 = vmatprep.subr.mxu1 %v23168_v12 }
 0x773   :  { %15048 = vmatpush3.msra.mxu0 %v20870_v62  ;;  %15085 = vmatpush3.msra.mxu1 %v8026_v37 }
 0x774   :  { %15049 = vmatprep.subr.mxu0 %v23168_v12  ;;  %15086 = vmatprep.subr.mxu1 %v23168_v12 }
 0x775   :  { %15050 = vmatpush3.msra.mxu0 %v20882_v45  ;;  %15087 = vmatpush3.msra.mxu1 %v8033_v60 }
 0x776   :  { %15051 = vmatprep.subr.mxu0 %v23168_v12  ;;  %15088 = vmatprep.subr.mxu1 %v23168_v12 }
 0x777   :  { %15052 = vmatpush3.msra.mxu0 %v20896_v15  ;;  %15089 = vmatpush3.msra.mxu1 %v8040_v30 }
 0x778   :  { %15053 = vmatprep.subr.mxu0 %v23168_v12  ;;  %15090 = vmatprep.subr.mxu1 %v23168_v12 }
 0x779   :  { %15054 = vmatpush3.msra.mxu0 %v20903_v0  ;;  %15091 = vmatpush3.msra.mxu1 %v8047_v41 }
 0x77a   :  { %15055 = vmatprep.subr.mxu0 %v23168_v12  ;;  %15092 = vmatprep.subr.mxu1 %v23168_v12 }
 0x77b   :  { %15056 = vmatpush3.msra.mxu0 %v20916_v32  ;;  %15093 = vmatpush3.msra.mxu1 %v8054_v11 }
 0x77c   :  { %15057 = vmatprep.subr.mxu0 %v23168_v12  ;;  %15130 = vmatprep.subr.mxu1 %v23168_v12 }
 0x77d   :  { %15058 = vmatpush3.msra.mxu0 %v20926_v56 }
 0x77e   :  { %15059 = vmatprep.subr.mxu0 %v23168_v12 }
 0x77f   :  { %15060 = vmatpush3.msra.mxu0 %v20941_v13 }
 0x780   :  { %15097 = vmatprep.subr.mxu0 %v23168_v12 }
 0x7db   :  { %v7459_v44 = vpop.f32.mrf.mxu1 }
 0x7dd   :  { %v14898_v24 = vpop.f32.mrf.mxu1 }
 0x7de   :  { %v5472_v24 = vmul.f32 6.2831855, %v20009_v39 }
 0x7e4   :  { %v7313_v9 = vpop.f32.mrf.mxu0 }
 0x7e5   :  { %v7460_v36 = vadd.f32 %v7459_v44, %v7313_v9 }
 0x7e6   :  { %v14865_v22 = vpop.f32.mrf.mxu0 }
 0x7e7   :  { %v6737_v22 = vmul.f32 6.2831855, %v20620_v35 }
 0x7f9   :  { %v7649_v49 = vpop.f32.mrf.mxu1 }
 0x7fb   :  { %v14964_v37 = vpop.f32.mrf.mxu1 }
 0x7fc   :  { %v5473_v37 = vmul.f32 6.2831855, %v20226_v38 }
 0x803   :  { %v7561_v60 = vpop.f32.mrf.mxu0 }
 0x804   :  { %v7562_v61 = vadd.f32 %v7561_v60, %v7460_v36  ;;  %v23312_v60 = vand.u32 4294901760, %v20914_v1 }
 0x805   :  { %v14931_v27 = vpop.f32.mrf.mxu0 }
 0x806   :  { %v7650_v5 = vadd.f32 %v7649_v49, %v7562_v61 }
 0x819   :  { %v7851_v7 = vpop.f32.mrf.mxu1 }
 0x81b   :  { %v15030_v30 = vpop.f32.mrf.mxu1 }
 0x822   :  { %v7765_v47 = vpop.f32.mrf.mxu0 }
 0x823   :  { %v7766_v41 = vadd.f32 %v7765_v47, %v7650_v5 }
 0x824   :  { %v14997_v40 = vpop.f32.mrf.mxu0 }
 0x825   :  { %v7852_v59 = vadd.f32 %v7851_v7, %v7766_v41 }
 0x827   :  { %v20969_v11 = vsub.f32 %v20626_v17, %v7852_v59 }
 0x829   :  { %23307 = vst [vmem:[#allocation56_spill] sm:$0xff] %v20969_v11  ;;  %v7857_v27 = vsel %vm4187_vm7, %v20969_v11, 0  ;;  %v20977_v44 = vmul.f32 %v20969_v11, %v5472_v24  ;;  %v20982_v40 = vmul.f32 %v20969_v11, %v5473_v37  ;;  %v20985_v17 = vmul.f32 %v20969_v11, %v6737_v22  ;;  %v4173_v24 = vld [vmem:[%s22753_s10 + $0x18] sm:$0xff] }
 0x82a   :  { %v20979_v61 = vand.u32 4294901760, %v7857_v27 }
 0x82b   :  { %23308 = vst [vmem:[#allocation47_spill] sm:$0xff] %v20977_v44  ;;  %23309 = vst [vmem:[#allocation48_spill] sm:$0xff] %v20982_v40 }
 0x82c   :  { %23310 = vst [vmem:[#allocation51_spill] sm:$0xff] %v20985_v17  ;;  %v20988_v39 = vsub.f32 %v7857_v27, %v20979_v61  ;;  %15095 = vmatmul.mubr.f32.vlgmr.msra.gmra.mxu1 %v20979_v61 }
 0x82d   :  { %15131 = vmatpush3.msra.mxu1 %v20788_v57  ;;  %15160 = vmatprep.mubr.msk.f32.mxu1 %vm16701_vm8, %v23168_v12 }
 0x82e   :  { %15132 = vmatprep.subr.mxu1 %v23168_v12  ;;  %v7941_v38 = vand.u32 4294901760, %v20988_v39 }
 0x82f   :  { %15133 = vmatpush3.msra.mxu1 %v20790_v10 }
 0x830   :  { %15134 = vmatprep.subr.mxu1 %v23168_v12  ;;  %v7942_v35 = vsub.f32 %v20988_v39, %v7941_v38 }
 0x831   :  { %15135 = vmatpush3.msra.mxu1 %v20792_v20 }
 0x832   :  { %15136 = vmatprep.subr.mxu1 %v23168_v12  ;;  %v7943_v59 = vand.u32 4294901760, %v7942_v35  ;;  %v23315_v35 = vand.u32 4294901760, %v20939_v8 }
 0x833   :  { %15137 = vmatpush3.msra.mxu1 %v20794_v50 }
 0x834   :  { %15138 = vmatprep.subr.mxu1 %v23168_v12  ;;  %15062 = vmatmul.mubr.f32.vlgmr.msra.gmra.mxu0 %v7943_v59 }
 0x835   :  { %15098 = vmatpush3.msra.mxu0 %v20797_v43  ;;  %15139 = vmatpush3.msra.mxu1 %v20800_v18 }
 0x836   :  { %15099 = vmatprep.subr.mxu0 %v23168_v12  ;;  %15140 = vmatprep.subr.mxu1 %v23168_v12 }
 0x837   :  { %15100 = vmatpush3.msra.mxu0 %v20805_v34  ;;  %15141 = vmatpush3.msra.mxu1 %v20802_v42 }
 0x838   :  { %15101 = vmatprep.subr.mxu0 %v23168_v12  ;;  %15142 = vmatprep.subr.mxu1 %v23168_v12 }
 0x839   :  { %15102 = vmatpush3.msra.mxu0 %v20808_v16  ;;  %15143 = vmatpush3.msra.mxu1 %v20853_v54 }
 0x83a   :  { %15103 = vmatprep.subr.mxu0 %v23168_v12  ;;  %15144 = vmatprep.subr.mxu1 %v23168_v12 }
 0x83b   :  { %15104 = vmatpush3.msra.mxu0 %v20811_v52  ;;  %15145 = vmatpush3.msra.mxu1 %v20861_v28 }
 0x83c   :  { %15105 = vmatprep.subr.mxu0 %v23168_v12  ;;  %15146 = vmatprep.subr.mxu1 %v23168_v12 }
 0x83d   :  { %15106 = vmatpush3.msra.mxu0 %v20816_v4  ;;  %15147 = vmatpush3.msra.mxu1 %v20870_v62  ;;  %v4179_v4 = vld [vmem:[%s22753_s10 + $0x48] sm:$0xff] }
 0x83e   :  { %15107 = vmatprep.subr.mxu0 %v23168_v12  ;;  %15148 = vmatprep.subr.mxu1 %v23168_v12 }
 0x83f   :  { %15108 = vmatpush3.msra.mxu0 %v20820_v2  ;;  %15149 = vmatpush3.msra.mxu1 %v20882_v45 }
 0x840   :  { %15109 = vmatprep.subr.mxu0 %v23168_v12  ;;  %15150 = vmatprep.subr.mxu1 %v23168_v12 }
 0x841   :  { %15110 = vmatpush3.msra.mxu0 %v20859_v48  ;;  %15151 = vmatpush3.msra.mxu1 %v20896_v15 }
 0x842   :  { %15111 = vmatprep.subr.mxu0 %v23168_v12  ;;  %15152 = vmatprep.subr.mxu1 %v23168_v12 }
 0x843   :  { %15112 = vmatpush3.msra.mxu0 %v20868_v25  ;;  %15153 = vmatpush3.msra.mxu1 %v20903_v0  ;;  %v4177_v25 = vld [vmem:[%s22753_s10 + $0x38] sm:$0xff] }
 0x844   :  { %15113 = vmatprep.subr.mxu0 %v23168_v12  ;;  %15154 = vmatprep.subr.mxu1 %v23168_v12 }
 0x845   :  { %15114 = vmatpush3.msra.mxu0 %v20880_v51  ;;  %15155 = vmatpush3.msra.mxu1 %v20916_v32 }
 0x846   :  { %15115 = vmatprep.subr.mxu0 %v23168_v12  ;;  %15156 = vmatprep.subr.mxu1 %v23168_v12 }
 0x847   :  { %15116 = vmatpush3.msra.mxu0 %v20892_v63  ;;  %15157 = vmatpush3.msra.mxu1 %v20926_v56  ;;  %v23311_v63 = vand.u32 4294901760, %v20907_v19 }
 0x848   :  { %15117 = vmatprep.subr.mxu0 %v23168_v12  ;;  %15158 = vmatprep.subr.mxu1 %v23168_v12 }
 0x849   :  { %15118 = vmatpush3.msra.mxu0 %v20907_v19  ;;  %15159 = vmatpush3.msra.mxu1 %v20941_v13 }
 0x84a   :  { %15119 = vmatprep.subr.mxu0 %v23168_v12  ;;  %15161 = vmatmul.mubr.f32.vlgmr.msra.gmra.mxu1 %v7941_v38 }
 0x84b   :  { %15196 = vmatprep.subr.mxu1 %v23168_v12  ;;  %15120 = vmatpush3.msra.mxu0 %v20914_v1  ;;  %v23313_v1 = vand.u32 4294901760, %v20924_v21 }
 0x84c   :  { %15197 = vmatpush3.msra.mxu1 %v20788_v57  ;;  %15121 = vmatprep.subr.mxu0 %v23168_v12  ;;  %v4184_v57 = vld [vmem:[%s22753_s10 + $0x70] sm:$0xff] }
 0x84d   :  { %15198 = vmatprep.subr.mxu1 %v23168_v12  ;;  %15122 = vmatpush3.msra.mxu0 %v20924_v21  ;;  %v4172_v21 = vld [vmem:[%s22753_s10 + $0x10] sm:$0xff] }
 0x84e   :  { %15199 = vmatpush3.msra.mxu1 %v20790_v10  ;;  %15123 = vmatprep.subr.mxu0 %v23168_v12  ;;  %v4183_v10 = vld [vmem:[%s22753_s10 + $0x68] sm:$0xff] }
 0x84f   :  { %15200 = vmatprep.subr.mxu1 %v23168_v12  ;;  %15124 = vmatpush3.msra.mxu0 %v20939_v8  ;;  %v21094_v43 = vand.u32 4294901760, %v4183_v10  ;;  %v4171_v8 = vld [vmem:[%s22753_s10 + $0x8] sm:$0xff] }
 0x850   :  { %15201 = vmatpush3.msra.mxu1 %v20792_v20  ;;  %15125 = vmatprep.subr.mxu0 %v23168_v12  ;;  %v21084_v20 = vand.u32 4294901760, %v4184_v57 }
 0x851   :  { %15202 = vmatprep.subr.mxu1 %v23168_v12  ;;  %15126 = vmatpush3.msra.mxu0 %v20951_v14  ;;  %v21115_v16 = vsub.f32 %v4183_v10, %v21094_v43  ;;  %v21271_v10 = vand.u32 4294901760, %v4173_v24 }
 0x852   :  { %15127 = vmatprep.mubr.msk.f32.mxu0 %vm16701_vm8, %v23168_v12  ;;  %15203 = vmatpush3.msra.mxu1 %v20794_v50  ;;  %v4182_v50 = vld [vmem:[%s22753_s10 + $0x60] sm:$0xff] }
 0x853   :  { %15128 = vmatmul.mubr.f32.vlgmr.msra.gmra.mxu0 %v20988_v39  ;;  %15163 = vmatprep.subr.mxu0 %v23168_v12  ;;  %v21107_v34 = vand.u32 4294901760, %v4182_v50 }
 0x854   :  { %15204 = vmatprep.subr.mxu1 %v23168_v12  ;;  %15164 = vmatpush3.msra.mxu0 %v7954_v29  ;;  %v4180_v29 = vld [vmem:[%s22753_s10 + $0x50] sm:$0xff] }
 0x855   :  { %15205 = vmatpush3.msra.mxu1 %v20800_v18  ;;  %15165 = vmatprep.subr.mxu0 %v23168_v12  ;;  %v4181_v18 = vld [vmem:[%s22753_s10 + $0x58] sm:$0xff] }
 0x856   :  { %15206 = vmatprep.subr.mxu1 %v23168_v12  ;;  %15166 = vmatpush3.msra.mxu0 %v7961_v3  ;;  %v21117_v52 = vand.u32 4294901760, %v4181_v18  ;;  %v21134_v3 = vsub.f32 %v4182_v50, %v21107_v34 }
 0x857   :  { %15207 = vmatpush3.msra.mxu1 %v20802_v42  ;;  %15167 = vmatprep.subr.mxu0 %v23168_v12  ;;  %v21105_v42 = vsub.f32 %v4184_v57, %v21084_v20 }
 0x858   :  { %15208 = vmatprep.subr.mxu1 %v23168_v12  ;;  %15168 = vmatpush3.msra.mxu0 %v7968_v55  ;;  %v21138_v55 = vand.u32 4294901760, %v4180_v29 }
 0x859   :  { %15209 = vmatpush3.msra.mxu1 %v20853_v54  ;;  %15169 = vmatprep.subr.mxu0 %v23168_v12  ;;  %v21131_v2 = vand.u32 4294901760, %v21105_v42  ;;  %v21152_v54 = vand.u32 4294901760, %v4179_v4 }
 0x85a   :  { %15210 = vmatprep.subr.mxu1 %v23168_v12  ;;  %15170 = vmatpush3.msra.mxu0 %v7975_v46  ;;  %v4178_v46 = vld [vmem:[%s22753_s10 + $0x40] sm:$0xff] }
 0x85b   :  { %15211 = vmatpush3.msra.mxu1 %v20861_v28  ;;  %15171 = vmatprep.subr.mxu0 %v23168_v12  ;;  %v8587_v48 = vsub.f32 %v21105_v42, %v21131_v2  ;;  %v21162_v28 = vand.u32 4294901760, %v21134_v3 }
 0x85c   :  { %15212 = vmatprep.subr.mxu1 %v23168_v12  ;;  %15172 = vmatpush3.msra.mxu0 %v7982_v53  ;;  %v21147_v53 = vand.u32 4294901760, %v21115_v16 }
 0x85d   :  { %15213 = vmatpush3.msra.mxu1 %v20870_v62  ;;  %15173 = vmatprep.subr.mxu0 %v23168_v12  ;;  %v21172_v62 = vsub.f32 %v4180_v29, %v21138_v55 }
 0x85e   :  { %15214 = vmatprep.subr.mxu1 %v23168_v12  ;;  %15174 = vmatpush3.msra.mxu0 %v7989_v23  ;;  %v21150_v23 = vsub.f32 %v4181_v18, %v21117_v52  ;;  %v23316_v18 = vand.u32 4294901760, %v20951_v14  ;;  %v4170_v14 = vld [vmem:[%s22753_s10] sm:$0xff] }
 0x85f   :  { %15215 = vmatpush3.msra.mxu1 %v20882_v45  ;;  %15175 = vmatprep.subr.mxu0 %v23168_v12  ;;  %v21183_v45 = vsub.f32 %v4179_v4, %v21152_v54  ;;  %v21209_v19 = vand.u32 4294901760, %v21172_v62 }
 0x860   :  { %15216 = vmatprep.subr.mxu1 %v23168_v12  ;;  %15176 = vmatpush3.msra.mxu0 %v7996_v31  ;;  %v21164_v31 = vand.u32 4294901760, %v4178_v46  ;;  %v21180_v51 = vand.u32 4294901760, %v21150_v23 }
 0x861   :  { %15217 = vmatpush3.msra.mxu1 %v20896_v15  ;;  %15177 = vmatprep.subr.mxu0 %v23168_v12  ;;  %v21190_v15 = vand.u32 4294901760, %v4177_v25  ;;  %v21220_v49 = vand.u32 4294901760, %v21183_v45  ;;  %v8615_v22 = vsub.f32 %v21172_v62, %v21209_v19 }
 0x862   :  { %15218 = vmatprep.subr.mxu1 %v23168_v12  ;;  %15178 = vmatpush3.msra.mxu0 %v8003_v6  ;;  %v8594_v6 = vsub.f32 %v21115_v16, %v21147_v53  ;;  %v8608_v9 = vsub.f32 %v21150_v23, %v21180_v51 }
 0x863   :  { %15219 = vmatpush3.msra.mxu1 %v20903_v0  ;;  %15179 = vmatprep.subr.mxu0 %v23168_v12  ;;  %v8601_v0 = vsub.f32 %v21134_v3, %v21162_v28  ;;  %v21229_v7 = vsub.f32 %v4177_v25, %v21190_v15  ;;  %v8622_v38 = vsub.f32 %v21183_v45, %v21220_v49  ;;  %v21283_v29 = vand.u32 4294901760, %v8615_v22 }
 0x864   :  { %15220 = vmatprep.subr.mxu1 %v23168_v12  ;;  %15180 = vmatpush3.msra.mxu0 %v8010_v33  ;;  %v4176_v33 = vld [vmem:[%s22753_s10 + $0x30] sm:$0xff]  ;;  %v21215_v36 = vand.u32 4294901760, %v8594_v6  ;;  %v21255_v39 = vand.u32 4294901760, %v8608_v9 }
 0x865   :  { %15221 = vmatpush3.msra.mxu1 %v20916_v32  ;;  %15181 = vmatprep.subr.mxu0 %v23168_v12  ;;  %v21200_v32 = vsub.f32 %v4178_v46, %v21164_v31  ;;  %v21211_v5 = vand.u32 4294901760, %v4176_v33  ;;  %v21235_v47 = vand.u32 4294901760, %v8601_v0  ;;  %v21266_v59 = vand.u32 4294901760, %v21229_v7 }
 0x866   :  { %15222 = vmatprep.subr.mxu1 %v23168_v12  ;;  %15182 = vmatpush3.msra.mxu0 %v8017_v26  ;;  %v21195_v26 = vand.u32 4294901760, %v8587_v48  ;;  %23314 = vst [vmem:[#allocation66_spill] sm:$0xff] %v21255_v39  ;;  %v21291_v48 = vand.u32 4294901760, %v4172_v21  ;;  %v21296_v25 = vand.u32 4294901760, %v8622_v38  ;;  %v21311_v0 = vand.u32 4294901760, %v4171_v8 }
 0x867   :  { %15223 = vmatpush3.msra.mxu1 %v20926_v56  ;;  %15183 = vmatprep.subr.mxu0 %v23168_v12  ;;  %v4175_v56 = vld [vmem:[%s22753_s10 + $0x28] sm:$0xff]  ;;  %v21238_v41 = vand.u32 4294901760, %v21200_v32  ;;  %v21249_v37 = vsub.f32 %v4176_v33, %v21211_v5  ;;  %v8636_v6 = vsub.f32 %v21229_v7, %v21266_v59 }
 0x868   :  { %15224 = vmatprep.subr.mxu1 %v23168_v12  ;;  %15184 = vmatpush3.msra.mxu0 %v23311_v63  ;;  %v21231_v30 = vand.u32 4294901760, %v4175_v56  ;;  %v21309_v63 = vsub.f32 %v4173_v24, %v21271_v10  ;;  %v21341_v38 = vsub.f32 %v4171_v8, %v21311_v0  ;;  %v8487_v8 = vmul.f32 %v20969_v11, %v20622_v58 }
 0x869   :  { %15225 = vmatpush3.msra.mxu1 %v20941_v13  ;;  %15226 = vmatprep.mubr.msk.f32.mxu1 %vm16701_vm8, %v23168_v12  ;;  %v4174_v13 = vld [vmem:[%s22753_s10 + $0x20] sm:$0xff]  ;;  %v8629_v50 = vsub.f32 %v21200_v32, %v21238_v41  ;;  %v21286_v4 = vand.u32 4294901760, %v21249_v37  ;;  %v21333_v24 = vand.u32 4294901760, %v8636_v6 }
 0x86a   :  { %15185 = vmatprep.subr.mxu0 %v23168_v12  ;;  %15227 = vmatmul.mubr.f32.vlgmr.msra.gmra.mxu1 %v20979_v61  ;;  %v21251_v27 = vand.u32 4294901760, %v4174_v13  ;;  %v21269_v57 = vsub.f32 %v4175_v56, %v21231_v30  ;;  %23318 = vst [vmem:[#allocation25_spill] sm:$0xff] %v21309_v63  ;;  %v21338_v22 = vand.u32 4294901760, %v21309_v63  ;;  %23321 = vst [vmem:[#allocation26_spill] sm:$0xff] %v21341_v38  ;;  %v21368_v17 = vand.u32 4294901760, %v21341_v38 }
 0x86b   :  { %15262 = vmatprep.subr.mxu1 %v23168_v12  ;;  %15186 = vmatpush3.msra.mxu0 %v23312_v60  ;;  %v21315_v56 = vand.u32 4294901760, %v8629_v50  ;;  %v21327_v60 = vand.u32 4294901760, %v4170_v14  ;;  %v8489_v11 = vsel %vm4187_vm7, %v8487_v8, 0 }
 0x86c   :  { %15263 = vmatpush3.msra.mxu1 %v21195_v26  ;;  %15187 = vmatprep.subr.mxu0 %v23168_v12  ;;  %v21289_v46 = vsub.f32 %v4174_v13, %v21251_v27  ;;  %v21306_v33 = vand.u32 4294901760, %v21269_v57  ;;  %v21325_v13 = vsub.f32 %v4172_v21, %v21291_v48 }
 0x86d   :  { %15264 = vmatprep.subr.mxu1 %v23168_v12  ;;  %15188 = vmatpush3.msra.mxu0 %v23313_v1 }
 0x86e   :  { %15265 = vmatpush3.msra.mxu1 %v21215_v36  ;;  %15189 = vmatprep.subr.mxu0 %v23168_v12  ;;  %23317 = vst [vmem:[#allocation65_spill] sm:$0xff] %v21306_v33  ;;  %v21322_v9 = vand.u32 4294901760, %v21289_v46  ;;  %23320 = vst [vmem:[#allocation42_spill] sm:$0xff] %v21325_v13  ;;  %v8650_v1 = vsub.f32 %v21269_v57, %v21306_v33  ;;  %v21352_v50 = vand.u32 4294901760, %v21325_v13 }
 0x86f   :  { %15266 = vmatprep.subr.mxu1 %v23168_v12  ;;  %15190 = vmatpush3.msra.mxu0 %v23315_v35 }
 0x870   :  { %15267 = vmatpush3.msra.mxu1 %v21235_v47  ;;  %15191 = vmatprep.subr.mxu0 %v23168_v12  ;;  %23319 = vst [vmem:[#allocation33_spill] sm:$0xff] %v21322_v9  ;;  %v8657_v35 = vsub.f32 %v21289_v46, %v21322_v9  ;;  %v21363_v6 = vand.u32 4294901760, %v8650_v1 }
 0x871   :  { %15268 = vmatprep.subr.mxu1 %v23168_v12  ;;  %15192 = vmatpush3.msra.mxu0 %v23316_v18  ;;  %v21355_v18 = vsub.f32 %v4170_v14, %v21327_v60  ;;  %v8671_v14 = vsub.f32 %v21325_v13, %v21352_v50 }
 0x872   :  { %15193 = vmatprep.mubr.msk.f32.mxu0 %vm16701_vm8, %v23168_v12  ;;  %15269 = vmatpush3.msra.mxu1 %v21255_v39  ;;  %23323 = vst [vmem:[#allocation34_spill] sm:$0xff] %v21363_v6  ;;  %v21374_v58 = vand.u32 4294901760, %v8657_v35  ;;  %v8678_v35 = vsub.f32 %v21341_v38, %v21368_v17 }
 0x873   :  { %15194 = vmatmul.mubr.f32.vlgmr.msra.gmra.mxu0 %v20979_v61  ;;  %15229 = vmatprep.subr.mxu0 %v23168_v12  ;;  %v8643_v61 = vsub.f32 %v21249_v37, %v21286_v4  ;;  %23322 = vst [vmem:[#allocation41_spill] sm:$0xff] %v21355_v18  ;;  %v21379_v1 = vand.u32 4294901760, %v21355_v18  ;;  %v21394_v44 = vand.u32 4294901760, %v8671_v14 }
 0x874   :  { %15270 = vmatprep.subr.mxu1 %v23168_v12  ;;  %15230 = vmatpush3.msra.mxu0 %v21084_v20  ;;  %23324 = vst [vmem:[#allocation27_spill] sm:$0xff] %v21374_v58 }
 0x875   :  { %15271 = vmatpush3.msra.mxu1 %v21283_v29  ;;  %15231 = vmatprep.subr.mxu0 %v23168_v12  ;;  %v21347_v21 = vand.u32 4294901760, %v8643_v61  ;;  %v8664_v61 = vsub.f32 %v21309_v63, %v21338_v22  ;;  %23326 = vst [vmem:[#allocation28_spill] sm:$0xff] %v21394_v44  ;;  %v8685_v8 = vsub.f32 %v21355_v18, %v21379_v1 }
 0x876   :  { %15272 = vmatprep.subr.mxu1 %v23168_v12  ;;  %15232 = vmatpush3.msra.mxu0 %v21094_v43 }
 0x877   :  { %15273 = vmatpush3.msra.mxu1 %v21296_v25  ;;  %15233 = vmatprep.subr.mxu0 %v23168_v12  ;;  %v21386_v40 = vand.u32 4294901760, %v8664_v61  ;;  %v21404_v61 = vand.u32 4294901760, %v8678_v35  ;;  %v21410_v14 = vand.u32 4294901760, %v8685_v8 }
 0x878   :  { %15274 = vmatprep.subr.mxu1 %v23168_v12  ;;  %15234 = vmatpush3.msra.mxu0 %v21107_v34 }
 0x879   :  { %15275 = vmatpush3.msra.mxu1 %v21315_v56  ;;  %15235 = vmatprep.subr.mxu0 %v23168_v12  ;;  %23325 = vst [vmem:[#allocation36_spill] sm:$0xff] %v21386_v40  ;;  %23327 = vst [vmem:[#allocation38_spill] sm:$0xff] %v21404_v61 }
 0x87a   :  { %15276 = vmatprep.subr.mxu1 %v23168_v12  ;;  %15236 = vmatpush3.msra.mxu0 %v21117_v52  ;;  %23328 = vst [vmem:[#allocation29_spill] sm:$0xff] %v21410_v14 }
 0x87b   :  { %15277 = vmatpush3.msra.mxu1 %v21333_v24  ;;  %15237 = vmatprep.subr.mxu0 %v23168_v12 }
 0x87c   :  { %15278 = vmatprep.subr.mxu1 %v23168_v12  ;;  %15238 = vmatpush3.msra.mxu0 %v21138_v55 }
 0x87d   :  { %15279 = vmatpush3.msra.mxu1 %v21347_v21  ;;  %15239 = vmatprep.subr.mxu0 %v23168_v12 }
 0x87e   :  { %15280 = vmatprep.subr.mxu1 %v23168_v12  ;;  %15240 = vmatpush3.msra.mxu0 %v21152_v54 }
 0x87f   :  { %15281 = vmatpush3.msra.mxu1 %v21363_v6  ;;  %15241 = vmatprep.subr.mxu0 %v23168_v12  ;;  %v21398_v6 = vand.u32 4294901760, %v8489_v11 }
 0x880   :  { %15282 = vmatprep.subr.mxu1 %v23168_v12  ;;  %15242 = vmatpush3.msra.mxu0 %v21164_v31 }
 0x881   :  { %15283 = vmatpush3.msra.mxu1 %v21374_v58  ;;  %15243 = vmatprep.subr.mxu0 %v23168_v12  ;;  %v21413_v58 = vsub.f32 %v8489_v11, %v21398_v6 }
 0x882   :  { %15284 = vmatprep.subr.mxu1 %v23168_v12  ;;  %15244 = vmatpush3.msra.mxu0 %v21190_v15 }
 0x883   :  { %15285 = vmatpush3.msra.mxu1 %v21386_v40  ;;  %15245 = vmatprep.subr.mxu0 %v23168_v12  ;;  %v8573_v11 = vand.u32 4294901760, %v21413_v58 }
 0x884   :  { %15286 = vmatprep.subr.mxu1 %v23168_v12  ;;  %15246 = vmatpush3.msra.mxu0 %v21211_v5 }
 0x885   :  { %15287 = vmatpush3.msra.mxu1 %v21394_v44  ;;  %15247 = vmatprep.subr.mxu0 %v23168_v12  ;;  %v8574_v35 = vsub.f32 %v21413_v58, %v8573_v11 }
 0x886   :  { %15288 = vmatprep.subr.mxu1 %v23168_v12  ;;  %15248 = vmatpush3.msra.mxu0 %v21231_v30 }
 0x887   :  { %15289 = vmatpush3.msra.mxu1 %v21404_v61  ;;  %15249 = vmatprep.subr.mxu0 %v23168_v12  ;;  %v8575_v8 = vand.u32 4294901760, %v8574_v35  ;;  %v23331_v35 = vld [vmem:[#allocation27_spill] sm:$0xff] }
 0x888   :  { %15290 = vmatprep.subr.mxu1 %v23168_v12  ;;  %15250 = vmatpush3.msra.mxu0 %v21251_v27 }
 0x889   :  { %15291 = vmatpush3.msra.mxu1 %v21410_v14  ;;  %15292 = vmatprep.mubr.msk.f32.mxu1 %vm16701_vm8, %v23168_v12 }
 0x88a   :  { %15251 = vmatprep.subr.mxu0 %v23168_v12  ;;  %15293 = vmatmul.mubr.f32.vlgmr.msra.gmra.mxu1 %v21398_v6 }
 0x88b   :  { %15328 = vmatprep.subr.mxu1 %v23168_v12  ;;  %15252 = vmatpush3.msra.mxu0 %v21271_v10 }
 0x88c   :  { %15329 = vmatpush3.msra.mxu1 %v21084_v20  ;;  %15253 = vmatprep.subr.mxu0 %v23168_v12 }
 0x88d   :  { %15330 = vmatprep.subr.mxu1 %v23168_v12  ;;  %15254 = vmatpush3.msra.mxu0 %v21291_v48 }
 0x88e   :  { %15331 = vmatpush3.msra.mxu1 %v21094_v43  ;;  %15255 = vmatprep.subr.mxu0 %v23168_v12 }
 0x88f   :  { %15332 = vmatprep.subr.mxu1 %v23168_v12  ;;  %15256 = vmatpush3.msra.mxu0 %v21311_v0 }
 0x890   :  { %15333 = vmatpush3.msra.mxu1 %v21107_v34  ;;  %15257 = vmatprep.subr.mxu0 %v23168_v12 }
 0x891   :  { %15334 = vmatprep.subr.mxu1 %v23168_v12  ;;  %15258 = vmatpush3.msra.mxu0 %v21327_v60 }
 0x892   :  { %15259 = vmatprep.mubr.msk.f32.mxu0 %vm16701_vm8, %v23168_v12  ;;  %15335 = vmatpush3.msra.mxu1 %v21117_v52 }
 0x893   :  { %15260 = vmatmul.mubr.f32.vlgmr.msra.gmra.mxu0 %v8575_v8  ;;  %15295 = vmatprep.subr.mxu0 %v23168_v12 }
 0x894   :  { %15336 = vmatprep.subr.mxu1 %v23168_v12  ;;  %15296 = vmatpush3.msra.mxu0 %v21105_v42 }
 0x895   :  { %15337 = vmatpush3.msra.mxu1 %v21138_v55  ;;  %15297 = vmatprep.subr.mxu0 %v23168_v12 }
 0x896   :  { %15338 = vmatprep.subr.mxu1 %v23168_v12  ;;  %15298 = vmatpush3.msra.mxu0 %v21115_v16 }
 0x897   :  { %15339 = vmatpush3.msra.mxu1 %v21152_v54  ;;  %15299 = vmatprep.subr.mxu0 %v23168_v12 }
 0x898   :  { %15340 = vmatprep.subr.mxu1 %v23168_v12  ;;  %15300 = vmatpush3.msra.mxu0 %v21134_v3 }
 0x899   :  { %15341 = vmatpush3.msra.mxu1 %v21164_v31  ;;  %15301 = vmatprep.subr.mxu0 %v23168_v12 }
 0x89a   :  { %15342 = vmatprep.subr.mxu1 %v23168_v12  ;;  %15302 = vmatpush3.msra.mxu0 %v21150_v23 }
 0x89b   :  { %15343 = vmatpush3.msra.mxu1 %v21190_v15  ;;  %15303 = vmatprep.subr.mxu0 %v23168_v12 }
 0x89c   :  { %15344 = vmatprep.subr.mxu1 %v23168_v12  ;;  %15304 = vmatpush3.msra.mxu0 %v21172_v62 }
 0x89d   :  { %15345 = vmatpush3.msra.mxu1 %v21211_v5  ;;  %15305 = vmatprep.subr.mxu0 %v23168_v12 }
 0x89e   :  { %15346 = vmatprep.subr.mxu1 %v23168_v12  ;;  %15306 = vmatpush3.msra.mxu0 %v21183_v45 }
 0x89f   :  { %15347 = vmatpush3.msra.mxu1 %v21231_v30  ;;  %15307 = vmatprep.subr.mxu0 %v23168_v12 }
 0x8a0   :  { %15348 = vmatprep.subr.mxu1 %v23168_v12  ;;  %15308 = vmatpush3.msra.mxu0 %v21200_v32 }
 0x8a1   :  { %15349 = vmatpush3.msra.mxu1 %v21251_v27  ;;  %15309 = vmatprep.subr.mxu0 %v23168_v12 }
 0x8a2   :  { %15350 = vmatprep.subr.mxu1 %v23168_v12  ;;  %15310 = vmatpush3.msra.mxu0 %v21229_v7 }
 0x8a3   :  { %15351 = vmatpush3.msra.mxu1 %v21271_v10  ;;  %15311 = vmatprep.subr.mxu0 %v23168_v12 }
 0x8a4   :  { %15352 = vmatprep.subr.mxu1 %v23168_v12  ;;  %15312 = vmatpush3.msra.mxu0 %v21249_v37 }
 0x8a5   :  { %15353 = vmatpush3.msra.mxu1 %v21291_v48  ;;  %15313 = vmatprep.subr.mxu0 %v23168_v12 }
 0x8a6   :  { %15354 = vmatprep.subr.mxu1 %v23168_v12  ;;  %15314 = vmatpush3.msra.mxu0 %v21269_v57 }
 0x8a7   :  { %15355 = vmatpush3.msra.mxu1 %v21311_v0  ;;  %15315 = vmatprep.subr.mxu0 %v23168_v12 }
 0x8a8   :  { %15356 = vmatprep.subr.mxu1 %v23168_v12  ;;  %15316 = vmatpush3.msra.mxu0 %v21289_v46 }
 0x8a9   :  { %15357 = vmatpush3.msra.mxu1 %v21327_v60  ;;  %15358 = vmatprep.mubr.msk.f32.mxu1 %vm16701_vm8, %v23168_v12 }
 0x8aa   :  { %15317 = vmatprep.subr.mxu0 %v23168_v12  ;;  %15359 = vmatmul.mubr.f32.vlgmr.msra.gmra.mxu1 %v8573_v11  ;;  %v23330_v11 = vld [vmem:[#allocation34_spill] sm:$0xff] }
 0x8ab   :  { %15394 = vmatprep.subr.mxu1 %v23168_v12  ;;  %15318 = vmatpush3.msra.mxu0 %v21309_v63 }
 0x8ac   :  { %15395 = vmatpush3.msra.mxu1 %v21084_v20  ;;  %15319 = vmatprep.subr.mxu0 %v23168_v12 }
 0x8ad   :  { %15396 = vmatprep.subr.mxu1 %v23168_v12  ;;  %15320 = vmatpush3.msra.mxu0 %v21325_v13 }
 0x8ae   :  { %15397 = vmatpush3.msra.mxu1 %v21094_v43  ;;  %15321 = vmatprep.subr.mxu0 %v23168_v12 }
 0x8af   :  { %15398 = vmatprep.subr.mxu1 %v23168_v12  ;;  %15322 = vmatpush3.msra.mxu0 %v21341_v38 }
 0x8b0   :  { %15399 = vmatpush3.msra.mxu1 %v21107_v34  ;;  %15323 = vmatprep.subr.mxu0 %v23168_v12 }
 0x8b1   :  { %15400 = vmatprep.subr.mxu1 %v23168_v12  ;;  %15324 = vmatpush3.msra.mxu0 %v21355_v18 }
 0x8b2   :  { %15325 = vmatprep.mubr.msk.f32.mxu0 %vm16701_vm8, %v23168_v12  ;;  %15401 = vmatpush3.msra.mxu1 %v21117_v52 }
 0x8b3   :  { %15326 = vmatmul.mubr.f32.vlgmr.msra.gmra.mxu0 %v21413_v58  ;;  %15361 = vmatprep.subr.mxu0 %v23168_v12 }
 0x8b4   :  { %15402 = vmatprep.subr.mxu1 %v23168_v12  ;;  %15362 = vmatpush3.msra.mxu0 %v21131_v2 }
 0x8b5   :  { %15403 = vmatpush3.msra.mxu1 %v21138_v55  ;;  %15363 = vmatprep.subr.mxu0 %v23168_v12 }
 0x8b6   :  { %15404 = vmatprep.subr.mxu1 %v23168_v12  ;;  %15364 = vmatpush3.msra.mxu0 %v21147_v53 }
 0x8b7   :  { %15405 = vmatpush3.msra.mxu1 %v21152_v54  ;;  %15365 = vmatprep.subr.mxu0 %v23168_v12 }
 0x8b8   :  { %15406 = vmatprep.subr.mxu1 %v23168_v12  ;;  %15366 = vmatpush3.msra.mxu0 %v21162_v28 }
 0x8b9   :  { %15407 = vmatpush3.msra.mxu1 %v21164_v31  ;;  %15367 = vmatprep.subr.mxu0 %v23168_v12 }
 0x8ba   :  { %15408 = vmatprep.subr.mxu1 %v23168_v12  ;;  %15368 = vmatpush3.msra.mxu0 %v21180_v51 }
 0x8bb   :  { %15409 = vmatpush3.msra.mxu1 %v21190_v15  ;;  %15369 = vmatprep.subr.mxu0 %v23168_v12 }
 0x8bc   :  { %15410 = vmatprep.subr.mxu1 %v23168_v12  ;;  %15370 = vmatpush3.msra.mxu0 %v21209_v19 }
 0x8bd   :  { %15411 = vmatpush3.msra.mxu1 %v21211_v5  ;;  %15371 = vmatprep.subr.mxu0 %v23168_v12 }
 0x8be   :  { %15412 = vmatprep.subr.mxu1 %v23168_v12  ;;  %15372 = vmatpush3.msra.mxu0 %v21220_v49 }
 0x8bf   :  { %15413 = vmatpush3.msra.mxu1 %v21231_v30  ;;  %15373 = vmatprep.subr.mxu0 %v23168_v12 }
 0x8c0   :  { %15414 = vmatprep.subr.mxu1 %v23168_v12  ;;  %15374 = vmatpush3.msra.mxu0 %v21238_v41 }
 0x8c1   :  { %15415 = vmatpush3.msra.mxu1 %v21251_v27  ;;  %15375 = vmatprep.subr.mxu0 %v23168_v12 }
 0x8c2   :  { %15416 = vmatprep.subr.mxu1 %v23168_v12  ;;  %15376 = vmatpush3.msra.mxu0 %v21266_v59 }
 0x8c3   :  { %15417 = vmatpush3.msra.mxu1 %v21271_v10  ;;  %15377 = vmatprep.subr.mxu0 %v23168_v12 }
 0x8c4   :  { %15418 = vmatprep.subr.mxu1 %v23168_v12  ;;  %15378 = vmatpush3.msra.mxu0 %v21286_v4 }
 0x8c5   :  { %15419 = vmatpush3.msra.mxu1 %v21291_v48  ;;  %15379 = vmatprep.subr.mxu0 %v23168_v12 }
 0x8c6   :  { %15420 = vmatprep.subr.mxu1 %v23168_v12  ;;  %15380 = vmatpush3.msra.mxu0 %v21306_v33 }
 0x8c7   :  { %15421 = vmatpush3.msra.mxu1 %v21311_v0  ;;  %15381 = vmatprep.subr.mxu0 %v23168_v12 }
 0x8c8   :  { %15422 = vmatprep.subr.mxu1 %v23168_v12  ;;  %15382 = vmatpush3.msra.mxu0 %v21322_v9 }
 0x8c9   :  { %15423 = vmatpush3.msra.mxu1 %v21327_v60  ;;  %15424 = vmatprep.mubr.msk.f32.mxu1 %vm16701_vm8, %v23168_v12 }
 0x8ca   :  { %15383 = vmatprep.subr.mxu0 %v23168_v12  ;;  %15425 = vmatmul.mubr.f32.vlgmr.msra.gmra.mxu1 %v21398_v6 }
 0x8cb   :  { %15460 = vmatprep.subr.mxu1 %v23168_v12  ;;  %15384 = vmatpush3.msra.mxu0 %v21338_v22 }
 0x8cc   :  { %15461 = vmatpush3.msra.mxu1 %v21195_v26  ;;  %15385 = vmatprep.subr.mxu0 %v23168_v12 }
 0x8cd   :  { %15462 = vmatprep.subr.mxu1 %v23168_v12  ;;  %15386 = vmatpush3.msra.mxu0 %v21352_v50 }
 0x8ce   :  { %15463 = vmatpush3.msra.mxu1 %v21215_v36  ;;  %15387 = vmatprep.subr.mxu0 %v23168_v12 }
 0x8cf   :  { %15464 = vmatprep.subr.mxu1 %v23168_v12  ;;  %15388 = vmatpush3.msra.mxu0 %v21368_v17 }
 0x8d0   :  { %15465 = vmatpush3.msra.mxu1 %v21235_v47  ;;  %15389 = vmatprep.subr.mxu0 %v23168_v12 }
 0x8d1   :  { %15466 = vmatprep.subr.mxu1 %v23168_v12  ;;  %15390 = vmatpush3.msra.mxu0 %v21379_v1 }
 0x8d2   :  { %15391 = vmatprep.mubr.msk.f32.mxu0 %vm16701_vm8, %v23168_v12  ;;  %15467 = vmatpush3.msra.mxu1 %v21255_v39 }
 0x8d3   :  { %15392 = vmatmul.mubr.f32.vlgmr.msra.gmra.mxu0 %v21398_v6  ;;  %15427 = vmatprep.subr.mxu0 %v23168_v12  ;;  %v23329_v6 = vld [vmem:[#allocation47_spill] sm:$0xff] }
 0x8d4   :  { %15468 = vmatprep.subr.mxu1 %v23168_v12  ;;  %15428 = vmatpush3.msra.mxu0 %v21084_v20  ;;  %v9121_v58 = vsel %vm4187_vm7, %v23329_v6, 0 }
 0x8d5   :  { %15469 = vmatpush3.msra.mxu1 %v21283_v29  ;;  %15429 = vmatprep.subr.mxu0 %v23168_v12  ;;  %v21611_v8 = vand.u32 4294901760, %v9121_v58 }
 0x8d6   :  { %15470 = vmatprep.subr.mxu1 %v23168_v12  ;;  %15430 = vmatpush3.msra.mxu0 %v21094_v43 }
 0x8d7   :  { %15471 = vmatpush3.msra.mxu1 %v21296_v25  ;;  %15431 = vmatprep.subr.mxu0 %v23168_v12  ;;  %v21622_v6 = vsub.f32 %v9121_v58, %v21611_v8 }
 0x8d8   :  { %15472 = vmatprep.subr.mxu1 %v23168_v12  ;;  %15432 = vmatpush3.msra.mxu0 %v21107_v34 }
 0x8d9   :  { %15473 = vmatpush3.msra.mxu1 %v21315_v56  ;;  %15433 = vmatprep.subr.mxu0 %v23168_v12  ;;  %v23007_v58 = vand.u32 4294901760, %v21622_v6 }
 0x8da   :  { %15474 = vmatprep.subr.mxu1 %v23168_v12  ;;  %15434 = vmatpush3.msra.mxu0 %v21117_v52 }
 0x8db   :  { %15475 = vmatpush3.msra.mxu1 %v21333_v24  ;;  %15435 = vmatprep.subr.mxu0 %v23168_v12 }
 0x8dc   :  { %15476 = vmatprep.subr.mxu1 %v23168_v12  ;;  %15436 = vmatpush3.msra.mxu0 %v21138_v55 }
 0x8dd   :  { %15477 = vmatpush3.msra.mxu1 %v21347_v21  ;;  %15437 = vmatprep.subr.mxu0 %v23168_v12 }
 0x8de   :  { %15478 = vmatprep.subr.mxu1 %v23168_v12  ;;  %15438 = vmatpush3.msra.mxu0 %v21152_v54 }
 0x8df   :  { %15479 = vmatpush3.msra.mxu1 %v23330_v11  ;;  %15439 = vmatprep.subr.mxu0 %v23168_v12 }
 0x8e0   :  { %15480 = vmatprep.subr.mxu1 %v23168_v12  ;;  %15440 = vmatpush3.msra.mxu0 %v21164_v31 }
 0x8e1   :  { %15481 = vmatpush3.msra.mxu1 %v23331_v35  ;;  %15441 = vmatprep.subr.mxu0 %v23168_v12 }
 0x8e2   :  { %15482 = vmatprep.subr.mxu1 %v23168_v12  ;;  %15442 = vmatpush3.msra.mxu0 %v21190_v15 }
 0x8e3   :  { %15483 = vmatpush3.msra.mxu1 %v21386_v40  ;;  %15443 = vmatprep.subr.mxu0 %v23168_v12 }
 0x8e4   :  { %15484 = vmatprep.subr.mxu1 %v23168_v12  ;;  %15444 = vmatpush3.msra.mxu0 %v21211_v5 }
 0x8e5   :  { %15485 = vmatpush3.msra.mxu1 %v21394_v44  ;;  %15445 = vmatprep.subr.mxu0 %v23168_v12 }
 0x8e6   :  { %15486 = vmatprep.subr.mxu1 %v23168_v12  ;;  %15446 = vmatpush3.msra.mxu0 %v21231_v30 }
 0x8e7   :  { %15487 = vmatpush3.msra.mxu1 %v21404_v61  ;;  %15447 = vmatprep.subr.mxu0 %v23168_v12 }
 0x8e8   :  { %15488 = vmatprep.subr.mxu1 %v23168_v12  ;;  %15448 = vmatpush3.msra.mxu0 %v21251_v27 }
 0x8e9   :  { %15489 = vmatpush3.msra.mxu1 %v21410_v14  ;;  %15490 = vmatprep.mubr.msk.f32.mxu1 %vm16701_vm8, %v23168_v12  ;;  %v9206_v14 = vsub.f32 %v21622_v6, %v23007_v58 }
 0x8ea   :  { %15449 = vmatprep.subr.mxu0 %v23168_v12  ;;  %15491 = vmatmul.mubr.f32.vlgmr.msra.gmra.mxu1 %v21611_v8 }
 0x8eb   :  { %15526 = vmatprep.subr.mxu1 %v23168_v12  ;;  %15450 = vmatpush3.msra.mxu0 %v21271_v10  ;;  %v9207_v40 = vand.u32 4294901760, %v9206_v14 }
 0x8ec   :  { %15527 = vmatpush3.msra.mxu1 %v21084_v20  ;;  %15451 = vmatprep.subr.mxu0 %v23168_v12  ;;  %v8091_v61 = vpop.f32.mrf.mxu1 }
 0x8ed   :  { %15528 = vmatprep.subr.mxu1 %v23168_v12  ;;  %15452 = vmatpush3.msra.mxu0 %v21291_v48 }
 0x8ee   :  { %15529 = vmatpush3.msra.mxu1 %v21094_v43  ;;  %15453 = vmatprep.subr.mxu0 %v23168_v12  ;;  %v15096_v44 = vpop.f32.mrf.mxu1 }
 0x8ef   :  { %15530 = vmatprep.subr.mxu1 %v23168_v12  ;;  %15454 = vmatpush3.msra.mxu0 %v21311_v0 }
 0x8f0   :  { %15531 = vmatpush3.msra.mxu1 %v21107_v34  ;;  %15455 = vmatprep.subr.mxu0 %v23168_v12 }
 0x8f1   :  { %15532 = vmatprep.subr.mxu1 %v23168_v12  ;;  %15456 = vmatpush3.msra.mxu0 %v21327_v60 }
 0x8f2   :  { %15457 = vmatprep.mubr.msk.f32.mxu0 %vm16701_vm8, %v23168_v12  ;;  %15533 = vmatpush3.msra.mxu1 %v21117_v52 }
 0x8f3   :  { %15458 = vmatmul.mubr.f32.vlgmr.msra.gmra.mxu0 %v9207_v40  ;;  %15493 = vmatprep.subr.mxu0 %v23168_v12  ;;  %v23332_v40 = vand.u32 4294901760, %v21622_v6 }
 0x8f4   :  { %15534 = vmatprep.subr.mxu1 %v23168_v12  ;;  %15494 = vmatpush3.msra.mxu0 %v21105_v42  ;;  %v7945_v44 = vpop.f32.mrf.mxu0 }
 0x8f5   :  { %15535 = vmatpush3.msra.mxu1 %v21138_v55  ;;  %15495 = vmatprep.subr.mxu0 %v23168_v12  ;;  %v21661_v58 = vadd.f32 %v8091_v61, %v7945_v44 }
 0x8f6   :  { %15536 = vmatprep.subr.mxu1 %v23168_v12  ;;  %15496 = vmatpush3.msra.mxu0 %v21115_v16  ;;  %v15063_v14 = vpop.f32.mrf.mxu0 }
 0x8f7   :  { %15537 = vmatpush3.msra.mxu1 %v21152_v54  ;;  %15497 = vmatprep.subr.mxu0 %v23168_v12 }
 0x8f8   :  { %15538 = vmatprep.subr.mxu1 %v23168_v12  ;;  %15498 = vmatpush3.msra.mxu0 %v21134_v3 }
 0x8f9   :  { %15539 = vmatpush3.msra.mxu1 %v21164_v31  ;;  %15499 = vmatprep.subr.mxu0 %v23168_v12 }
 0x8fa   :  { %15540 = vmatprep.subr.mxu1 %v23168_v12  ;;  %15500 = vmatpush3.msra.mxu0 %v21150_v23 }
 0x8fb   :  { %15541 = vmatpush3.msra.mxu1 %v21190_v15  ;;  %15501 = vmatprep.subr.mxu0 %v23168_v12 }
 0x8fc   :  { %15542 = vmatprep.subr.mxu1 %v23168_v12  ;;  %15502 = vmatpush3.msra.mxu0 %v21172_v62 }
 0x8fd   :  { %15543 = vmatpush3.msra.mxu1 %v21211_v5  ;;  %15503 = vmatprep.subr.mxu0 %v23168_v12 }
 0x8fe   :  { %15544 = vmatprep.subr.mxu1 %v23168_v12  ;;  %15504 = vmatpush3.msra.mxu0 %v21183_v45 }
 0x8ff   :  { %15545 = vmatpush3.msra.mxu1 %v21231_v30  ;;  %15505 = vmatprep.subr.mxu0 %v23168_v12 }
 0x900   :  { %15546 = vmatprep.subr.mxu1 %v23168_v12  ;;  %15506 = vmatpush3.msra.mxu0 %v21200_v32 }
 0x901   :  { %15547 = vmatpush3.msra.mxu1 %v21251_v27  ;;  %15507 = vmatprep.subr.mxu0 %v23168_v12 }
 0x902   :  { %15548 = vmatprep.subr.mxu1 %v23168_v12  ;;  %15508 = vmatpush3.msra.mxu0 %v21229_v7 }
 0x903   :  { %15549 = vmatpush3.msra.mxu1 %v21271_v10  ;;  %15509 = vmatprep.subr.mxu0 %v23168_v12 }
 0x904   :  { %15550 = vmatprep.subr.mxu1 %v23168_v12  ;;  %15510 = vmatpush3.msra.mxu0 %v21249_v37 }
 0x905   :  { %15551 = vmatpush3.msra.mxu1 %v21291_v48  ;;  %15511 = vmatprep.subr.mxu0 %v23168_v12 }
 0x906   :  { %15552 = vmatprep.subr.mxu1 %v23168_v12  ;;  %15512 = vmatpush3.msra.mxu0 %v21269_v57 }
 0x907   :  { %15553 = vmatpush3.msra.mxu1 %v21311_v0  ;;  %15513 = vmatprep.subr.mxu0 %v23168_v12 }
 0x908   :  { %15554 = vmatprep.subr.mxu1 %v23168_v12  ;;  %15514 = vmatpush3.msra.mxu0 %v21289_v46 }
 0x909   :  { %15555 = vmatpush3.msra.mxu1 %v21327_v60  ;;  %15556 = vmatprep.mubr.msk.f32.mxu1 %vm16701_vm8, %v23168_v12 }
 0x90a   :  { %15515 = vmatprep.subr.mxu0 %v23168_v12  ;;  %15557 = vmatmul.mubr.f32.vlgmr.msra.gmra.mxu1 %v23332_v40  ;;  %v8281_v61 = vpop.f32.mrf.mxu1 }
 0x90b   :  { %15592 = vmatprep.subr.mxu1 %v23168_v12  ;;  %15516 = vmatpush3.msra.mxu0 %v21309_v63 }
 0x90c   :  { %15593 = vmatpush3.msra.mxu1 %v21084_v20  ;;  %15517 = vmatprep.subr.mxu0 %v23168_v12  ;;  %v15162_v44 = vpop.f32.mrf.mxu1 }
 0x90d   :  { %15594 = vmatprep.subr.mxu1 %v23168_v12  ;;  %15518 = vmatpush3.msra.mxu0 %v21325_v13 }
 0x90e   :  { %15595 = vmatpush3.msra.mxu1 %v21094_v43  ;;  %15519 = vmatprep.subr.mxu0 %v23168_v12 }
 0x90f   :  { %15596 = vmatprep.subr.mxu1 %v23168_v12  ;;  %15520 = vmatpush3.msra.mxu0 %v21341_v38 }
 0x910   :  { %15597 = vmatpush3.msra.mxu1 %v21107_v34  ;;  %15521 = vmatprep.subr.mxu0 %v23168_v12 }
 0x911   :  { %15598 = vmatprep.subr.mxu1 %v23168_v12  ;;  %15522 = vmatpush3.msra.mxu0 %v21355_v18 }
 0x912   :  { %15523 = vmatprep.mubr.msk.f32.mxu0 %vm16701_vm8, %v23168_v12  ;;  %15599 = vmatpush3.msra.mxu1 %v21117_v52 }
 0x913   :  { %15524 = vmatmul.mubr.f32.vlgmr.msra.gmra.mxu0 %v21622_v6  ;;  %15559 = vmatprep.subr.mxu0 %v23168_v12  ;;  %v8193_v14 = vpop.f32.mrf.mxu0 }
 0x914   :  { %15600 = vmatprep.subr.mxu1 %v23168_v12  ;;  %15560 = vmatpush3.msra.mxu0 %v21131_v2  ;;  %v8194_v40 = vadd.f32 %v8193_v14, %v21661_v58 }
 0x915   :  { %15601 = vmatpush3.msra.mxu1 %v21138_v55  ;;  %15561 = vmatprep.subr.mxu0 %v23168_v12  ;;  %v15129_v44 = vpop.f32.mrf.mxu0 }
 0x916   :  { %15602 = vmatprep.subr.mxu1 %v23168_v12  ;;  %15562 = vmatpush3.msra.mxu0 %v21147_v53  ;;  %v21733_v18 = vadd.f32 %v8281_v61, %v8194_v40 }
 0x917   :  { %15603 = vmatpush3.msra.mxu1 %v21152_v54  ;;  %15563 = vmatprep.subr.mxu0 %v23168_v12 }
 0x918   :  { %15604 = vmatprep.subr.mxu1 %v23168_v12  ;;  %15564 = vmatpush3.msra.mxu0 %v21162_v28 }
 0x919   :  { %15605 = vmatpush3.msra.mxu1 %v21164_v31  ;;  %15565 = vmatprep.subr.mxu0 %v23168_v12 }
 0x91a   :  { %15606 = vmatprep.subr.mxu1 %v23168_v12  ;;  %15566 = vmatpush3.msra.mxu0 %v21180_v51 }
 0x91b   :  { %15607 = vmatpush3.msra.mxu1 %v21190_v15  ;;  %15567 = vmatprep.subr.mxu0 %v23168_v12 }
 0x91c   :  { %15608 = vmatprep.subr.mxu1 %v23168_v12  ;;  %15568 = vmatpush3.msra.mxu0 %v21209_v19 }
 0x91d   :  { %15609 = vmatpush3.msra.mxu1 %v21211_v5  ;;  %15569 = vmatprep.subr.mxu0 %v23168_v12 }
 0x91e   :  { %15610 = vmatprep.subr.mxu1 %v23168_v12  ;;  %15570 = vmatpush3.msra.mxu0 %v21220_v49 }
 0x91f   :  { %15611 = vmatpush3.msra.mxu1 %v21231_v30  ;;  %15571 = vmatprep.subr.mxu0 %v23168_v12 }
 0x920   :  { %15612 = vmatprep.subr.mxu1 %v23168_v12  ;;  %15572 = vmatpush3.msra.mxu0 %v21238_v41 }
 0x921   :  { %15613 = vmatpush3.msra.mxu1 %v21251_v27  ;;  %15573 = vmatprep.subr.mxu0 %v23168_v12 }
 0x922   :  { %15614 = vmatprep.subr.mxu1 %v23168_v12  ;;  %15574 = vmatpush3.msra.mxu0 %v21266_v59 }
 0x923   :  { %15615 = vmatpush3.msra.mxu1 %v21271_v10  ;;  %15575 = vmatprep.subr.mxu0 %v23168_v12 }
 0x924   :  { %15616 = vmatprep.subr.mxu1 %v23168_v12  ;;  %15576 = vmatpush3.msra.mxu0 %v21286_v4 }
 0x925   :  { %15617 = vmatpush3.msra.mxu1 %v21291_v48  ;;  %15577 = vmatprep.subr.mxu0 %v23168_v12 }
 0x926   :  { %15618 = vmatprep.subr.mxu1 %v23168_v12  ;;  %15578 = vmatpush3.msra.mxu0 %v21306_v33 }
 0x927   :  { %15619 = vmatpush3.msra.mxu1 %v21311_v0  ;;  %15579 = vmatprep.subr.mxu0 %v23168_v12 }
 0x928   :  { %15620 = vmatprep.subr.mxu1 %v23168_v12  ;;  %15580 = vmatpush3.msra.mxu0 %v21322_v9 }
 0x929   :  { %15621 = vmatpush3.msra.mxu1 %v21327_v60  ;;  %15622 = vmatprep.mubr.msk.f32.mxu1 %vm16701_vm8, %v23168_v12 }
 0x92a   :  { %15581 = vmatprep.subr.mxu0 %v23168_v12  ;;  %15623 = vmatmul.mubr.f32.vlgmr.msra.gmra.mxu1 %v21611_v8  ;;  %v8483_v6 = vpop.f32.mrf.mxu1 }
 0x92b   :  { %15658 = vmatprep.subr.mxu1 %v23168_v12  ;;  %15582 = vmatpush3.msra.mxu0 %v21338_v22 }
 0x92c   :  { %15659 = vmatpush3.msra.mxu1 %v21195_v26  ;;  %15583 = vmatprep.subr.mxu0 %v23168_v12  ;;  %v15228_v58 = vpop.f32.mrf.mxu1 }
 0x92d   :  { %15660 = vmatprep.subr.mxu1 %v23168_v12  ;;  %15584 = vmatpush3.msra.mxu0 %v21352_v50  ;;  %v23335_v58 = vld [vmem:[#allocation36_spill] sm:$0xff] }
 0x92e   :  { %15661 = vmatpush3.msra.mxu1 %v21215_v36  ;;  %15585 = vmatprep.subr.mxu0 %v23168_v12 }
 0x92f   :  { %15662 = vmatprep.subr.mxu1 %v23168_v12  ;;  %15586 = vmatpush3.msra.mxu0 %v21368_v17 }
 0x930   :  { %15663 = vmatpush3.msra.mxu1 %v21235_v47  ;;  %15587 = vmatprep.subr.mxu0 %v23168_v12 }
 0x931   :  { %15664 = vmatprep.subr.mxu1 %v23168_v12  ;;  %15588 = vmatpush3.msra.mxu0 %v21379_v1 }
 0x932   :  { %15589 = vmatprep.mubr.msk.f32.mxu0 %vm16701_vm8, %v23168_v12  ;;  %15665 = vmatpush3.msra.mxu1 %v21255_v39 }
 0x933   :  { %15590 = vmatmul.mubr.f32.vlgmr.msra.gmra.mxu0 %v21611_v8  ;;  %15625 = vmatprep.subr.mxu0 %v23168_v12  ;;  %v8397_v61 = vpop.f32.mrf.mxu0 }
 0x934   :  { %15666 = vmatprep.subr.mxu1 %v23168_v12  ;;  %15626 = vmatpush3.msra.mxu0 %v21084_v20  ;;  %v8398_v14 = vadd.f32 %v8397_v61, %v21733_v18  ;;  %v23334_v18 = vld [vmem:[#allocation48_spill] sm:$0xff] }
 0x935   :  { %15667 = vmatpush3.msra.mxu1 %v21283_v29  ;;  %15627 = vmatprep.subr.mxu0 %v23168_v12  ;;  %v15195_v40 = vpop.f32.mrf.mxu0  ;;  %v9754_v8 = vsel %vm4187_vm7, %v23334_v18, 0  ;;  %v23336_v61 = vld [vmem:[#allocation28_spill] sm:$0xff]  ;;  %v23338_v18 = vld [vmem:[#allocation29_spill] sm:$0xff] }
 0x936   :  { %15668 = vmatprep.subr.mxu1 %v23168_v12  ;;  %15628 = vmatpush3.msra.mxu0 %v21094_v43  ;;  %v21802_v44 = vadd.f32 %v8483_v6, %v8398_v14  ;;  %v21828_v6 = vand.u32 4294901760, %v9754_v8  ;;  %v23337_v40 = vld [vmem:[#allocation38_spill] sm:$0xff] }
 0x937   :  { %15669 = vmatpush3.msra.mxu1 %v21296_v25  ;;  %15629 = vmatprep.subr.mxu0 %v23168_v12 }
 0x938   :  { %23333 = vst [vmem:[#allocation40_spill] sm:$0xff] %v21802_v44  ;;  %15670 = vmatprep.subr.mxu1 %v23168_v12  ;;  %15630 = vmatpush3.msra.mxu0 %v21107_v34  ;;  %v21839_v14 = vsub.f32 %v9754_v8, %v21828_v6 }
 0x939   :  { %15671 = vmatpush3.msra.mxu1 %v21315_v56  ;;  %15631 = vmatprep.subr.mxu0 %v23168_v12 }
 0x93a   :  { %15672 = vmatprep.subr.mxu1 %v23168_v12  ;;  %15632 = vmatpush3.msra.mxu0 %v21117_v52  ;;  %v23010_v8 = vand.u32 4294901760, %v21839_v14 }
 0x93b   :  { %15673 = vmatpush3.msra.mxu1 %v21333_v24  ;;  %15633 = vmatprep.subr.mxu0 %v23168_v12 }
 0x93c   :  { %15674 = vmatprep.subr.mxu1 %v23168_v12  ;;  %15634 = vmatpush3.msra.mxu0 %v21138_v55 }
 0x93d   :  { %15675 = vmatpush3.msra.mxu1 %v21347_v21  ;;  %15635 = vmatprep.subr.mxu0 %v23168_v12 }
 0x93e   :  { %15676 = vmatprep.subr.mxu1 %v23168_v12  ;;  %15636 = vmatpush3.msra.mxu0 %v21152_v54 }
 0x93f   :  { %15677 = vmatpush3.msra.mxu1 %v23330_v11  ;;  %15637 = vmatprep.subr.mxu0 %v23168_v12 }
 0x940   :  { %15678 = vmatprep.subr.mxu1 %v23168_v12  ;;  %15638 = vmatpush3.msra.mxu0 %v21164_v31 }
 0x941   :  { %15679 = vmatpush3.msra.mxu1 %v23331_v35  ;;  %15639 = vmatprep.subr.mxu0 %v23168_v12 }
 0x942   :  { %15680 = vmatprep.subr.mxu1 %v23168_v12  ;;  %15640 = vmatpush3.msra.mxu0 %v21190_v15 }
 0x943   :  { %15681 = vmatpush3.msra.mxu1 %v23335_v58  ;;  %15641 = vmatprep.subr.mxu0 %v23168_v12 }
 0x944   :  { %15682 = vmatprep.subr.mxu1 %v23168_v12  ;;  %15642 = vmatpush3.msra.mxu0 %v21211_v5 }
 0x945   :  { %15683 = vmatpush3.msra.mxu1 %v23336_v61  ;;  %15643 = vmatprep.subr.mxu0 %v23168_v12 }
 0x946   :  { %15684 = vmatprep.subr.mxu1 %v23168_v12  ;;  %15644 = vmatpush3.msra.mxu0 %v21231_v30 }
 0x947   :  { %15685 = vmatpush3.msra.mxu1 %v23337_v40  ;;  %15645 = vmatprep.subr.mxu0 %v23168_v12 }
 0x948   :  { %15686 = vmatprep.subr.mxu1 %v23168_v12  ;;  %15646 = vmatpush3.msra.mxu0 %v21251_v27 }
 0x949   :  { %15687 = vmatpush3.msra.mxu1 %v23338_v18  ;;  %15688 = vmatprep.mubr.msk.f32.mxu1 %vm16701_vm8, %v23168_v12  ;;  %v9839_v18 = vsub.f32 %v21839_v14, %v23010_v8 }
 0x94a   :  { %15647 = vmatprep.subr.mxu0 %v23168_v12  ;;  %15689 = vmatmul.mubr.f32.vlgmr.msra.gmra.mxu1 %v21828_v6  ;;  %v8723_v44 = vpop.f32.mrf.mxu1 }
 0x94b   :  { %15724 = vmatprep.subr.mxu1 %v23168_v12  ;;  %15648 = vmatpush3.msra.mxu0 %v21271_v10 }
 0x94c   :  { %15725 = vmatpush3.msra.mxu1 %v21084_v20  ;;  %15649 = vmatprep.subr.mxu0 %v23168_v12  ;;  %v15294_v40 = vpop.f32.mrf.mxu1 }
 0x94d   :  { %15726 = vmatprep.subr.mxu1 %v23168_v12  ;;  %15650 = vmatpush3.msra.mxu0 %v21291_v48  ;;  %v9840_v40 = vand.u32 4294901760, %v9839_v18 }
 0x94e   :  { %15727 = vmatpush3.msra.mxu1 %v21094_v43  ;;  %15651 = vmatprep.subr.mxu0 %v23168_v12 }
 0x94f   :  { %15728 = vmatprep.subr.mxu1 %v23168_v12  ;;  %15652 = vmatpush3.msra.mxu0 %v21311_v0 }
 0x950   :  { %15729 = vmatpush3.msra.mxu1 %v21107_v34  ;;  %15653 = vmatprep.subr.mxu0 %v23168_v12 }
 0x951   :  { %15730 = vmatprep.subr.mxu1 %v23168_v12  ;;  %15654 = vmatpush3.msra.mxu0 %v21327_v60 }
 0x952   :  { %15655 = vmatprep.mubr.msk.f32.mxu0 %vm16701_vm8, %v23168_v12  ;;  %15731 = vmatpush3.msra.mxu1 %v21117_v52 }
 0x953   :  { %15656 = vmatmul.mubr.f32.vlgmr.msra.gmra.mxu0 %v9840_v40  ;;  %15691 = vmatprep.subr.mxu0 %v23168_v12  ;;  %v8577_v8 = vpop.f32.mrf.mxu0 }
 0x954   :  { %15732 = vmatprep.subr.mxu1 %v23168_v12  ;;  %15692 = vmatpush3.msra.mxu0 %v21105_v42  ;;  %v21876_v61 = vadd.f32 %v8723_v44, %v8577_v8  ;;  %v23339_v44 = vld [vmem:[#allocation23_spill] sm:$0xff] }
 0x955   :  { %15733 = vmatpush3.msra.mxu1 %v21138_v55  ;;  %15693 = vmatprep.subr.mxu0 %v23168_v12  ;;  %v15261_v18 = vpop.f32.mrf.mxu0  ;;  %v6739_v8 = vand.u32 2147483647, %v23339_v44 }
 0x956   :  { %15734 = vmatprep.subr.mxu1 %v23168_v12  ;;  %15694 = vmatpush3.msra.mxu0 %v21115_v16 }
 0x957   :  { %15735 = vmatpush3.msra.mxu1 %v21152_v54  ;;  %15695 = vmatprep.subr.mxu0 %v23168_v12  ;;  %v6740_v40 = vsub.f32 0.0, %v6739_v8  ;;  %v23340_v8 = vand.u32 4294901760, %v21839_v14 }
 0x958   :  { %15736 = vmatprep.subr.mxu1 %v23168_v12  ;;  %15696 = vmatpush3.msra.mxu0 %v21134_v3 }
 0x959   :  { %15737 = vmatpush3.msra.mxu1 %v21164_v31  ;;  %15697 = vmatprep.subr.mxu0 %v23168_v12  ;;  %v6741_v18 = vmul.f32 1.442695, %v6740_v40 }
 0x95a   :  { %15738 = vmatprep.subr.mxu1 %v23168_v12  ;;  %15698 = vmatpush3.msra.mxu0 %v21150_v23 }
 0x95b   :  { %15739 = vmatpush3.msra.mxu1 %v21190_v15  ;;  %15699 = vmatprep.subr.mxu0 %v23168_v12  ;;  %16484 = vpow2.f32 %v6741_v18 }
 0x95c   :  { %15740 = vmatprep.subr.mxu1 %v23168_v12  ;;  %15700 = vmatpush3.msra.mxu0 %v21172_v62 }
 0x95d   :  { %15741 = vmatpush3.msra.mxu1 %v21211_v5  ;;  %15701 = vmatprep.subr.mxu0 %v23168_v12 }
 0x95e   :  { %15742 = vmatprep.subr.mxu1 %v23168_v12  ;;  %15702 = vmatpush3.msra.mxu0 %v21183_v45 }
 0x95f   :  { %15743 = vmatpush3.msra.mxu1 %v21231_v30  ;;  %15703 = vmatprep.subr.mxu0 %v23168_v12 }
 0x960   :  { %15744 = vmatprep.subr.mxu1 %v23168_v12  ;;  %15704 = vmatpush3.msra.mxu0 %v21200_v32 }
 0x961   :  { %15745 = vmatpush3.msra.mxu1 %v21251_v27  ;;  %15705 = vmatprep.subr.mxu0 %v23168_v12 }
 0x962   :  { %15746 = vmatprep.subr.mxu1 %v23168_v12  ;;  %15706 = vmatpush3.msra.mxu0 %v21229_v7 }
 0x963   :  { %15747 = vmatpush3.msra.mxu1 %v21271_v10  ;;  %15707 = vmatprep.subr.mxu0 %v23168_v12 }
 0x964   :  { %15748 = vmatprep.subr.mxu1 %v23168_v12  ;;  %15708 = vmatpush3.msra.mxu0 %v21249_v37 }
 0x965   :  { %15749 = vmatpush3.msra.mxu1 %v21291_v48  ;;  %15709 = vmatprep.subr.mxu0 %v23168_v12 }
 0x966   :  { %15750 = vmatprep.subr.mxu1 %v23168_v12  ;;  %15710 = vmatpush3.msra.mxu0 %v21269_v57 }
 0x967   :  { %15751 = vmatpush3.msra.mxu1 %v21311_v0  ;;  %15711 = vmatprep.subr.mxu0 %v23168_v12 }
 0x968   :  { %15752 = vmatprep.subr.mxu1 %v23168_v12  ;;  %15712 = vmatpush3.msra.mxu0 %v21289_v46 }
 0x969   :  { %15753 = vmatpush3.msra.mxu1 %v21327_v60  ;;  %15754 = vmatprep.mubr.msk.f32.mxu1 %vm16701_vm8, %v23168_v12 }
 0x96a   :  { %15713 = vmatprep.subr.mxu0 %v23168_v12  ;;  %15755 = vmatmul.mubr.f32.vlgmr.msra.gmra.mxu1 %v23340_v8  ;;  %v8913_v40 = vpop.f32.mrf.mxu1  ;;  %v23341_v8 = vld [vmem:[#allocation41_spill] sm:$0xff] }
 0x96b   :  { %15790 = vmatprep.subr.mxu1 %v23168_v12  ;;  %15714 = vmatpush3.msra.mxu0 %v21309_v63 }
 0x96c   :  { %15791 = vmatpush3.msra.mxu1 %v21084_v20  ;;  %15715 = vmatprep.subr.mxu0 %v23168_v12  ;;  %v15360_v18 = vpop.f32.mrf.mxu1 }
 0x96d   :  { %15792 = vmatprep.subr.mxu1 %v23168_v12  ;;  %15716 = vmatpush3.msra.mxu0 %v21325_v13  ;;  %v21949_v13 = vpop.eup %16484 }
 0x96e   :  { %15793 = vmatpush3.msra.mxu1 %v21094_v43  ;;  %15717 = vmatprep.subr.mxu0 %v23168_v12 }
 0x96f   :  { %15794 = vmatprep.subr.mxu1 %v23168_v12  ;;  %15718 = vmatpush3.msra.mxu0 %v21341_v38 }
 0x970   :  { %15795 = vmatpush3.msra.mxu1 %v21107_v34  ;;  %15719 = vmatprep.subr.mxu0 %v23168_v12 }
 0x971   :  { %15796 = vmatprep.subr.mxu1 %v23168_v12  ;;  %15720 = vmatpush3.msra.mxu0 %v23341_v8 }
 0x972   :  { %15721 = vmatprep.mubr.msk.f32.mxu0 %vm16701_vm8, %v23168_v12  ;;  %15797 = vmatpush3.msra.mxu1 %v21117_v52 }
 0x973   :  { %15722 = vmatmul.mubr.f32.vlgmr.msra.gmra.mxu0 %v21839_v14  ;;  %15757 = vmatprep.subr.mxu0 %v23168_v12  ;;  %v8825_v18 = vpop.f32.mrf.mxu0 }
 0x974   :  { %15798 = vmatprep.subr.mxu1 %v23168_v12  ;;  %15758 = vmatpush3.msra.mxu0 %v21131_v2  ;;  %v8826_v38 = vadd.f32 %v8825_v18, %v21876_v61  ;;  %v6743_v61 = vadd.f32 1.0, %v21949_v13 }
 0x975   :  { %15799 = vmatpush3.msra.mxu1 %v21138_v55  ;;  %15759 = vmatprep.subr.mxu0 %v23168_v12  ;;  %v15327_v8 = vpop.f32.mrf.mxu0 }
 0x976   :  { %15800 = vmatprep.subr.mxu1 %v23168_v12  ;;  %15760 = vmatpush3.msra.mxu0 %v21147_v53  ;;  %v21953_v14 = vadd.f32 %v8913_v40, %v8826_v38  ;;  %16486 = vlog2.f32 %v6743_v61  ;;  %v6746_v38 = vmul.f32 -0.5, %v21949_v13  ;;  %v6749_v61 = vand.u32 2147483647, %v21949_v13 }
 0x977   :  { %15801 = vmatpush3.msra.mxu1 %v21152_v54  ;;  %15761 = vmatprep.subr.mxu0 %v23168_v12 }
 0x978   :  { %15802 = vmatprep.subr.mxu1 %v23168_v12  ;;  %15762 = vmatpush3.msra.mxu0 %v21162_v28  ;;  %v6747_v18 = vadd.f32 1.0, %v6746_v38  ;;  %vm6750_vm12 = vcmp.lt.f32.partialorder %v6749_v61, 0.0004427343 }
 0x979   :  { %15803 = vmatpush3.msra.mxu1 %v21164_v31  ;;  %15763 = vmatprep.subr.mxu0 %v23168_v12 }
 0x97a   :  { %15804 = vmatprep.subr.mxu1 %v23168_v12  ;;  %15764 = vmatpush3.msra.mxu0 %v21180_v51  ;;  %v6748_v38 = vmul.f32 %v21949_v13, %v6747_v18 }
 0x97b   :  { %15805 = vmatpush3.msra.mxu1 %v21190_v15  ;;  %15765 = vmatprep.subr.mxu0 %v23168_v12 }
 0x97c   :  { %15806 = vmatprep.subr.mxu1 %v23168_v12  ;;  %15766 = vmatpush3.msra.mxu0 %v21209_v19 }
 0x97d   :  { %15807 = vmatpush3.msra.mxu1 %v21211_v5  ;;  %15767 = vmatprep.subr.mxu0 %v23168_v12 }
 0x97e   :  { %15808 = vmatprep.subr.mxu1 %v23168_v12  ;;  %15768 = vmatpush3.msra.mxu0 %v21220_v49 }
 0x97f   :  { %15809 = vmatpush3.msra.mxu1 %v21231_v30  ;;  %15769 = vmatprep.subr.mxu0 %v23168_v12 }
 0x980   :  { %15810 = vmatprep.subr.mxu1 %v23168_v12  ;;  %15770 = vmatpush3.msra.mxu0 %v21238_v41 }
 0x981   :  { %15811 = vmatpush3.msra.mxu1 %v21251_v27  ;;  %15771 = vmatprep.subr.mxu0 %v23168_v12 }
 0x982   :  { %15812 = vmatprep.subr.mxu1 %v23168_v12  ;;  %15772 = vmatpush3.msra.mxu0 %v21266_v59 }
 0x983   :  { %15813 = vmatpush3.msra.mxu1 %v21271_v10  ;;  %15773 = vmatprep.subr.mxu0 %v23168_v12  ;;  %v16487_v40 = vpop.eup %16486 }
 0x984   :  { %15814 = vmatprep.subr.mxu1 %v23168_v12  ;;  %15774 = vmatpush3.msra.mxu0 %v21286_v4 }
 0x985   :  { %15815 = vmatpush3.msra.mxu1 %v21291_v48  ;;  %15775 = vmatprep.subr.mxu0 %v23168_v12 }
 0x986   :  { %15816 = vmatprep.subr.mxu1 %v23168_v12  ;;  %15776 = vmatpush3.msra.mxu0 %v21306_v33  ;;  %v6745_v33 = vmul.f32 0.6931472, %v16487_v40  ;;  %v6738_v40 = vmax.f32 %v23339_v44, 0.0 }
 0x987   :  { %15817 = vmatpush3.msra.mxu1 %v21311_v0  ;;  %15777 = vmatprep.subr.mxu0 %v23168_v12 }
 0x988   :  { %15818 = vmatprep.subr.mxu1 %v23168_v12  ;;  %15778 = vmatpush3.msra.mxu0 %v21322_v9 }
 0x989   :  { %15819 = vmatpush3.msra.mxu1 %v21327_v60  ;;  %15820 = vmatprep.mubr.msk.f32.mxu1 %vm16701_vm8, %v23168_v12 }
 0x98a   :  { %15779 = vmatprep.subr.mxu0 %v23168_v12  ;;  %15821 = vmatmul.mubr.f32.vlgmr.msra.gmra.mxu1 %v21828_v6  ;;  %v9115_v8 = vpop.f32.mrf.mxu1 }
 0x98b   :  { %15856 = vmatprep.subr.mxu1 %v23168_v12  ;;  %15780 = vmatpush3.msra.mxu0 %v21338_v22 }
 0x98c   :  { %15857 = vmatpush3.msra.mxu1 %v21195_v26  ;;  %15781 = vmatprep.subr.mxu0 %v23168_v12  ;;  %v15426_v9 = vpop.f32.mrf.mxu1 }
 0x98d   :  { %15858 = vmatprep.subr.mxu1 %v23168_v12  ;;  %15782 = vmatpush3.msra.mxu0 %v21352_v50  ;;  %v6751_v9 = vsel %vm6750_vm12, %v6748_v38, %v6745_v33 }
 0x98e   :  { %15859 = vmatpush3.msra.mxu1 %v21215_v36  ;;  %15783 = vmatprep.subr.mxu0 %v23168_v12  ;;  %v6752_v18 = vadd.f32 %v6751_v9, %v6738_v40  ;;  %v23343_v40 = vld [vmem:[#allocation28_spill] sm:$0xff] }
 0x98f   :  { %15860 = vmatprep.subr.mxu1 %v23168_v12  ;;  %15784 = vmatpush3.msra.mxu0 %v21368_v17 }
 0x990   :  { %15861 = vmatpush3.msra.mxu1 %v21235_v47  ;;  %15785 = vmatprep.subr.mxu0 %v23168_v12  ;;  %v22031_v61 = vadd.f32 0.001, %v6752_v18  ;;  %v23344_v18 = vld [vmem:[#allocation38_spill] sm:$0xff] }
 0x991   :  { %15862 = vmatprep.subr.mxu1 %v23168_v12  ;;  %15786 = vmatpush3.msra.mxu0 %v21379_v1 }
 0x992   :  { %15787 = vmatprep.mubr.msk.f32.mxu0 %vm16701_vm8, %v23168_v12  ;;  %15863 = vmatpush3.msra.mxu1 %v21255_v39 }
 0x993   :  { %15788 = vmatmul.mubr.f32.vlgmr.msra.gmra.mxu0 %v21828_v6  ;;  %15823 = vmatprep.subr.mxu0 %v23168_v12  ;;  %v9029_v13 = vpop.f32.mrf.mxu0 }
 0x994   :  { %15864 = vmatprep.subr.mxu1 %v23168_v12  ;;  %15824 = vmatpush3.msra.mxu0 %v21084_v20  ;;  %v9030_v33 = vadd.f32 %v9029_v13, %v21953_v14  ;;  %v23342_v14 = vld [vmem:[#allocation56_spill] sm:$0xff] }
 0x995   :  { %15865 = vmatpush3.msra.mxu1 %v21283_v29  ;;  %15825 = vmatprep.subr.mxu0 %v23168_v12  ;;  %v15393_v44 = vpop.f32.mrf.mxu0  ;;  %v10384_v38 = vmul.f32 %v23342_v14, %v22031_v61 }
 0x996   :  { %15866 = vmatprep.subr.mxu1 %v23168_v12  ;;  %15826 = vmatpush3.msra.mxu0 %v21094_v43  ;;  %v22027_v6 = vadd.f32 %v9115_v8, %v9030_v33  ;;  %v23345_v33 = vld [vmem:[#allocation29_spill] sm:$0xff] }
 0x997   :  { %15867 = vmatpush3.msra.mxu1 %v21296_v25  ;;  %15827 = vmatprep.subr.mxu0 %v23168_v12  ;;  %v10386_v8 = vsel %vm4187_vm7, %v10384_v38, 0 }
 0x998   :  { %15868 = vmatprep.subr.mxu1 %v23168_v12  ;;  %15828 = vmatpush3.msra.mxu0 %v21107_v34  ;;  %v22056_v9 = vand.u32 4294901760, %v10386_v8 }
 0x999   :  { %15869 = vmatpush3.msra.mxu1 %v21315_v56  ;;  %15829 = vmatprep.subr.mxu0 %v23168_v12 }
 0x99a   :  { %15870 = vmatprep.subr.mxu1 %v23168_v12  ;;  %15830 = vmatpush3.msra.mxu0 %v21117_v52  ;;  %v22067_v13 = vsub.f32 %v10386_v8, %v22056_v9 }
 0x99b   :  { %15871 = vmatpush3.msra.mxu1 %v21333_v24  ;;  %15831 = vmatprep.subr.mxu0 %v23168_v12 }
 0x99c   :  { %15872 = vmatprep.subr.mxu1 %v23168_v12  ;;  %15832 = vmatpush3.msra.mxu0 %v21138_v55  ;;  %v23019_v44 = vand.u32 4294901760, %v22067_v13 }
 0x99d   :  { %15873 = vmatpush3.msra.mxu1 %v21347_v21  ;;  %15833 = vmatprep.subr.mxu0 %v23168_v12 }
 0x99e   :  { %15874 = vmatprep.subr.mxu1 %v23168_v12  ;;  %15834 = vmatpush3.msra.mxu0 %v21152_v54  ;;  %v10471_v8 = vsub.f32 %v22067_v13, %v23019_v44 }
 0x99f   :  { %15875 = vmatpush3.msra.mxu1 %v23330_v11  ;;  %15835 = vmatprep.subr.mxu0 %v23168_v12 }
 0x9a0   :  { %15876 = vmatprep.subr.mxu1 %v23168_v12  ;;  %15836 = vmatpush3.msra.mxu0 %v21164_v31 }
 0x9a1   :  { %15877 = vmatpush3.msra.mxu1 %v23331_v35  ;;  %15837 = vmatprep.subr.mxu0 %v23168_v12 }
 0x9a2   :  { %15878 = vmatprep.subr.mxu1 %v23168_v12  ;;  %15838 = vmatpush3.msra.mxu0 %v21190_v15 }
 0x9a3   :  { %15879 = vmatpush3.msra.mxu1 %v23335_v58  ;;  %15839 = vmatprep.subr.mxu0 %v23168_v12 }
 0x9a4   :  { %15880 = vmatprep.subr.mxu1 %v23168_v12  ;;  %15840 = vmatpush3.msra.mxu0 %v21211_v5 }
 0x9a5   :  { %15881 = vmatpush3.msra.mxu1 %v23343_v40  ;;  %15841 = vmatprep.subr.mxu0 %v23168_v12 }
 0x9a6   :  { %15882 = vmatprep.subr.mxu1 %v23168_v12  ;;  %15842 = vmatpush3.msra.mxu0 %v21231_v30 }
 0x9a7   :  { %15883 = vmatpush3.msra.mxu1 %v23344_v18  ;;  %15843 = vmatprep.subr.mxu0 %v23168_v12 }
 0x9a8   :  { %15884 = vmatprep.subr.mxu1 %v23168_v12  ;;  %15844 = vmatpush3.msra.mxu0 %v21251_v27 }
 0x9a9   :  { %15885 = vmatpush3.msra.mxu1 %v23345_v33  ;;  %15886 = vmatprep.mubr.msk.f32.mxu1 %vm16701_vm8, %v23168_v12 }
 0x9aa   :  { %15845 = vmatprep.subr.mxu0 %v23168_v12  ;;  %15887 = vmatmul.mubr.f32.vlgmr.msra.gmra.mxu1 %v22056_v9  ;;  %v9355_v14 = vpop.f32.mrf.mxu1 }
 0x9ab   :  { %15922 = vmatprep.subr.mxu1 %v23168_v12  ;;  %15846 = vmatpush3.msra.mxu0 %v21271_v10 }
 0x9ac   :  { %15923 = vmatpush3.msra.mxu1 %v21084_v20  ;;  %15847 = vmatprep.subr.mxu0 %v23168_v12  ;;  %v15492_v38 = vpop.f32.mrf.mxu1 }
 0x9ad   :  { %15924 = vmatprep.subr.mxu1 %v23168_v12  ;;  %15848 = vmatpush3.msra.mxu0 %v21291_v48  ;;  %v10472_v38 = vand.u32 4294901760, %v10471_v8 }
 0x9ae   :  { %15925 = vmatpush3.msra.mxu1 %v21094_v43  ;;  %15849 = vmatprep.subr.mxu0 %v23168_v12 }
 0x9af   :  { %15926 = vmatprep.subr.mxu1 %v23168_v12  ;;  %15850 = vmatpush3.msra.mxu0 %v21311_v0 }
 0x9b0   :  { %15927 = vmatpush3.msra.mxu1 %v21107_v34  ;;  %15851 = vmatprep.subr.mxu0 %v23168_v12 }
 0x9b1   :  { %15928 = vmatprep.subr.mxu1 %v23168_v12  ;;  %15852 = vmatpush3.msra.mxu0 %v21327_v60 }
 0x9b2   :  { %15853 = vmatprep.mubr.msk.f32.mxu0 %vm16701_vm8, %v23168_v12  ;;  %15929 = vmatpush3.msra.mxu1 %v21117_v52 }
 0x9b3   :  { %15854 = vmatmul.mubr.f32.vlgmr.msra.gmra.mxu0 %v10472_v38  ;;  %15889 = vmatprep.subr.mxu0 %v23168_v12  ;;  %v9209_v44 = vpop.f32.mrf.mxu0 }
 0x9b4   :  { %15930 = vmatprep.subr.mxu1 %v23168_v12  ;;  %15890 = vmatpush3.msra.mxu0 %v21105_v42  ;;  %v22104_v33 = vadd.f32 %v9355_v14, %v9209_v44  ;;  %v23346_v44 = vand.u32 4294901760, %v22067_v13 }
 0x9b5   :  { %15931 = vmatpush3.msra.mxu1 %v21138_v55  ;;  %15891 = vmatprep.subr.mxu0 %v23168_v12  ;;  %v15459_v8 = vpop.f32.mrf.mxu0 }
 0x9b6   :  { %15932 = vmatprep.subr.mxu1 %v23168_v12  ;;  %15892 = vmatpush3.msra.mxu0 %v21115_v16  ;;  %v23347_v8 = vld [vmem:[#allocation42_spill] sm:$0xff] }
 0x9b7   :  { %15933 = vmatpush3.msra.mxu1 %v21152_v54  ;;  %15893 = vmatprep.subr.mxu0 %v23168_v12 }
 0x9b8   :  { %15934 = vmatprep.subr.mxu1 %v23168_v12  ;;  %15894 = vmatpush3.msra.mxu0 %v21134_v3 }
 0x9b9   :  { %15935 = vmatpush3.msra.mxu1 %v21164_v31  ;;  %15895 = vmatprep.subr.mxu0 %v23168_v12 }
 0x9ba   :  { %15936 = vmatprep.subr.mxu1 %v23168_v12  ;;  %15896 = vmatpush3.msra.mxu0 %v21150_v23 }
 0x9bb   :  { %15937 = vmatpush3.msra.mxu1 %v21190_v15  ;;  %15897 = vmatprep.subr.mxu0 %v23168_v12 }
 0x9bc   :  { %15938 = vmatprep.subr.mxu1 %v23168_v12  ;;  %15898 = vmatpush3.msra.mxu0 %v21172_v62 }
 0x9bd   :  { %15939 = vmatpush3.msra.mxu1 %v21211_v5  ;;  %15899 = vmatprep.subr.mxu0 %v23168_v12 }
 0x9be   :  { %15940 = vmatprep.subr.mxu1 %v23168_v12  ;;  %15900 = vmatpush3.msra.mxu0 %v21183_v45 }
 0x9bf   :  { %15941 = vmatpush3.msra.mxu1 %v21231_v30  ;;  %15901 = vmatprep.subr.mxu0 %v23168_v12 }
 0x9c0   :  { %15942 = vmatprep.subr.mxu1 %v23168_v12  ;;  %15902 = vmatpush3.msra.mxu0 %v21200_v32 }
 0x9c1   :  { %15943 = vmatpush3.msra.mxu1 %v21251_v27  ;;  %15903 = vmatprep.subr.mxu0 %v23168_v12 }
 0x9c2   :  { %15944 = vmatprep.subr.mxu1 %v23168_v12  ;;  %15904 = vmatpush3.msra.mxu0 %v21229_v7 }
 0x9c3   :  { %15945 = vmatpush3.msra.mxu1 %v21271_v10  ;;  %15905 = vmatprep.subr.mxu0 %v23168_v12 }
 0x9c4   :  { %15946 = vmatprep.subr.mxu1 %v23168_v12  ;;  %15906 = vmatpush3.msra.mxu0 %v21249_v37 }
 0x9c5   :  { %15947 = vmatpush3.msra.mxu1 %v21291_v48  ;;  %15907 = vmatprep.subr.mxu0 %v23168_v12 }
 0x9c6   :  { %15948 = vmatprep.subr.mxu1 %v23168_v12  ;;  %15908 = vmatpush3.msra.mxu0 %v21269_v57 }
 0x9c7   :  { %15949 = vmatpush3.msra.mxu1 %v21311_v0  ;;  %15909 = vmatprep.subr.mxu0 %v23168_v12 }
 0x9c8   :  { %15950 = vmatprep.subr.mxu1 %v23168_v12  ;;  %15910 = vmatpush3.msra.mxu0 %v21289_v46 }
 0x9c9   :  { %15951 = vmatpush3.msra.mxu1 %v21327_v60  ;;  %15952 = vmatprep.mubr.msk.f32.mxu1 %vm16701_vm8, %v23168_v12 }
 0x9ca   :  { %15911 = vmatprep.subr.mxu0 %v23168_v12  ;;  %15953 = vmatmul.mubr.f32.vlgmr.msra.gmra.mxu1 %v23346_v44  ;;  %v9545_v14 = vpop.f32.mrf.mxu1  ;;  %v23348_v44 = vld [vmem:[#allocation26_spill] sm:$0xff] }
 0x9cb   :  { %15988 = vmatprep.subr.mxu1 %v23168_v12  ;;  %15912 = vmatpush3.msra.mxu0 %v21309_v63  ;;  %v23349_v63 = vld [vmem:[#allocation41_spill] sm:$0xff] }
 0x9cc   :  { %15989 = vmatpush3.msra.mxu1 %v21084_v20  ;;  %15913 = vmatprep.subr.mxu0 %v23168_v12  ;;  %v15558_v38 = vpop.f32.mrf.mxu1 }
 0x9cd   :  { %15990 = vmatprep.subr.mxu1 %v23168_v12  ;;  %15914 = vmatpush3.msra.mxu0 %v23347_v8 }
 0x9ce   :  { %15991 = vmatpush3.msra.mxu1 %v21094_v43  ;;  %15915 = vmatprep.subr.mxu0 %v23168_v12 }
 0x9cf   :  { %15992 = vmatprep.subr.mxu1 %v23168_v12  ;;  %15916 = vmatpush3.msra.mxu0 %v23348_v44 }
 0x9d0   :  { %15993 = vmatpush3.msra.mxu1 %v21107_v34  ;;  %15917 = vmatprep.subr.mxu0 %v23168_v12 }
 0x9d1   :  { %15994 = vmatprep.subr.mxu1 %v23168_v12  ;;  %15918 = vmatpush3.msra.mxu0 %v23349_v63 }
 0x9d2   :  { %15919 = vmatprep.mubr.msk.f32.mxu0 %vm16701_vm8, %v23168_v12  ;;  %15995 = vmatpush3.msra.mxu1 %v21117_v52 }
 0x9d3   :  { %15920 = vmatmul.mubr.f32.vlgmr.msra.gmra.mxu0 %v22067_v13  ;;  %15955 = vmatprep.subr.mxu0 %v23168_v12  ;;  %v9457_v38 = vpop.f32.mrf.mxu0  ;;  %v23351_v13 = vld [vmem:[#allocation33_spill] sm:$0xff] }
 0x9d4   :  { %15996 = vmatprep.subr.mxu1 %v23168_v12  ;;  %15956 = vmatpush3.msra.mxu0 %v21131_v2  ;;  %v9458_v44 = vadd.f32 %v9457_v38, %v22104_v33 }
 0x9d5   :  { %15997 = vmatpush3.msra.mxu1 %v21138_v55  ;;  %15957 = vmatprep.subr.mxu0 %v23168_v12  ;;  %v15525_v63 = vpop.f32.mrf.mxu0 }
 0x9d6   :  { %15998 = vmatprep.subr.mxu1 %v23168_v12  ;;  %15958 = vmatpush3.msra.mxu0 %v21147_v53  ;;  %v22178_v8 = vadd.f32 %v9545_v14, %v9458_v44  ;;  %v23350_v63 = vld [vmem:[#allocation65_spill] sm:$0xff] }
 0x9d7   :  { %15999 = vmatpush3.msra.mxu1 %v21152_v54  ;;  %15959 = vmatprep.subr.mxu0 %v23168_v12 }
 0x9d8   :  { %16000 = vmatprep.subr.mxu1 %v23168_v12  ;;  %15960 = vmatpush3.msra.mxu0 %v21162_v28 }
 0x9d9   :  { %16001 = vmatpush3.msra.mxu1 %v21164_v31  ;;  %15961 = vmatprep.subr.mxu0 %v23168_v12 }
 0x9da   :  { %16002 = vmatprep.subr.mxu1 %v23168_v12  ;;  %15962 = vmatpush3.msra.mxu0 %v21180_v51 }
 0x9db   :  { %16003 = vmatpush3.msra.mxu1 %v21190_v15  ;;  %15963 = vmatprep.subr.mxu0 %v23168_v12 }
 0x9dc   :  { %16004 = vmatprep.subr.mxu1 %v23168_v12  ;;  %15964 = vmatpush3.msra.mxu0 %v21209_v19 }
 0x9dd   :  { %16005 = vmatpush3.msra.mxu1 %v21211_v5  ;;  %15965 = vmatprep.subr.mxu0 %v23168_v12 }
 0x9de   :  { %16006 = vmatprep.subr.mxu1 %v23168_v12  ;;  %15966 = vmatpush3.msra.mxu0 %v21220_v49 }
 0x9df   :  { %16007 = vmatpush3.msra.mxu1 %v21231_v30  ;;  %15967 = vmatprep.subr.mxu0 %v23168_v12 }
 0x9e0   :  { %16008 = vmatprep.subr.mxu1 %v23168_v12  ;;  %15968 = vmatpush3.msra.mxu0 %v21238_v41 }
 0x9e1   :  { %16009 = vmatpush3.msra.mxu1 %v21251_v27  ;;  %15969 = vmatprep.subr.mxu0 %v23168_v12 }
 0x9e2   :  { %16010 = vmatprep.subr.mxu1 %v23168_v12  ;;  %15970 = vmatpush3.msra.mxu0 %v21266_v59 }
 0x9e3   :  { %16011 = vmatpush3.msra.mxu1 %v21271_v10  ;;  %15971 = vmatprep.subr.mxu0 %v23168_v12 }
 0x9e4   :  { %16012 = vmatprep.subr.mxu1 %v23168_v12  ;;  %15972 = vmatpush3.msra.mxu0 %v21286_v4 }
 0x9e5   :  { %16013 = vmatpush3.msra.mxu1 %v21291_v48  ;;  %15973 = vmatprep.subr.mxu0 %v23168_v12 }
 0x9e6   :  { %16014 = vmatprep.subr.mxu1 %v23168_v12  ;;  %15974 = vmatpush3.msra.mxu0 %v23350_v63 }
 0x9e7   :  { %16015 = vmatpush3.msra.mxu1 %v21311_v0  ;;  %15975 = vmatprep.subr.mxu0 %v23168_v12 }
 0x9e8   :  { %16016 = vmatprep.subr.mxu1 %v23168_v12  ;;  %15976 = vmatpush3.msra.mxu0 %v23351_v13 }
 0x9e9   :  { %16017 = vmatpush3.msra.mxu1 %v21327_v60  ;;  %16018 = vmatprep.mubr.msk.f32.mxu1 %vm16701_vm8, %v23168_v12 }
 0x9ea   :  { %15977 = vmatprep.subr.mxu0 %v23168_v12  ;;  %16019 = vmatmul.mubr.f32.vlgmr.msra.gmra.mxu1 %v22056_v9  ;;  %v9747_v33 = vpop.f32.mrf.mxu1 }
 0x9eb   :  { %16054 = vmatprep.subr.mxu1 %v23168_v12  ;;  %15978 = vmatpush3.msra.mxu0 %v21338_v22 }
 0x9ec   :  { %16055 = vmatpush3.msra.mxu1 %v21195_v26  ;;  %15979 = vmatprep.subr.mxu0 %v23168_v12  ;;  %v15624_v14 = vpop.f32.mrf.mxu1 }
 0x9ed   :  { %16056 = vmatprep.subr.mxu1 %v23168_v12  ;;  %15980 = vmatpush3.msra.mxu0 %v21352_v50 }
 0x9ee   :  { %16057 = vmatpush3.msra.mxu1 %v21215_v36  ;;  %15981 = vmatprep.subr.mxu0 %v23168_v12 }
 0x9ef   :  { %16058 = vmatprep.subr.mxu1 %v23168_v12  ;;  %15982 = vmatpush3.msra.mxu0 %v21368_v17 }
 0x9f0   :  { %16059 = vmatpush3.msra.mxu1 %v21235_v47  ;;  %15983 = vmatprep.subr.mxu0 %v23168_v12 }
 0x9f1   :  { %16060 = vmatprep.subr.mxu1 %v23168_v12  ;;  %15984 = vmatpush3.msra.mxu0 %v21379_v1 }
 0x9f2   :  { %15985 = vmatprep.mubr.msk.f32.mxu0 %vm16701_vm8, %v23168_v12  ;;  %16061 = vmatpush3.msra.mxu1 %v21255_v39 }
 0x9f3   :  { %15986 = vmatmul.mubr.f32.vlgmr.msra.gmra.mxu0 %v22056_v9  ;;  %16021 = vmatprep.subr.mxu0 %v23168_v12  ;;  %v9661_v44 = vpop.f32.mrf.mxu0  ;;  %v23352_v9 = vld [vmem:[#allocation40_spill] sm:$0xff] }
 0x9f4   :  { %16062 = vmatprep.subr.mxu1 %v23168_v12  ;;  %16022 = vmatpush3.msra.mxu0 %v21084_v20  ;;  %v9662_v38 = vadd.f32 %v9661_v44, %v22178_v8  ;;  %v11016_v8 = vmul.f32 %v23352_v9, %v22031_v61 }
 0x9f5   :  { %16063 = vmatpush3.msra.mxu1 %v21283_v29  ;;  %16023 = vmatprep.subr.mxu0 %v23168_v12  ;;  %v15591_v14 = vpop.f32.mrf.mxu0 }
 0x9f6   :  { %16064 = vmatprep.subr.mxu1 %v23168_v12  ;;  %16024 = vmatpush3.msra.mxu0 %v21094_v43  ;;  %v9748_v39 = vadd.f32 %v9747_v33, %v9662_v38  ;;  %v16494_v33 = vld [vmem:[#allocation5] sm:$0xff] }
 0x9f7   :  { %16065 = vmatpush3.msra.mxu1 %v21296_v25  ;;  %16025 = vmatprep.subr.mxu0 %v23168_v12  ;;  %v11654_v44 = vsub.f32 %v16494_v33, %v22027_v6  ;;  %v23355_v6 = vld [vmem:[#allocation29_spill] sm:$0xff] }
 0x9f8   :  { %16066 = vmatprep.subr.mxu1 %v23168_v12  ;;  %16026 = vmatpush3.msra.mxu0 %v21107_v34  ;;  %16488 = vrcp.f32 %v9748_v39  ;;  %v11018_v39 = vsel %vm4187_vm7, %v11016_v8, 0 }
 0x9f9   :  { %16067 = vmatpush3.msra.mxu1 %v21315_v56  ;;  %16027 = vmatprep.subr.mxu0 %v23168_v12  ;;  %v22270_v61 = vand.u32 4294901760, %v11018_v39 }
 0x9fa   :  { %16068 = vmatprep.subr.mxu1 %v23168_v12  ;;  %16028 = vmatpush3.msra.mxu0 %v21117_v52 }
 0x9fb   :  { %16069 = vmatpush3.msra.mxu1 %v21333_v24  ;;  %16029 = vmatprep.subr.mxu0 %v23168_v12  ;;  %v22284_v14 = vsub.f32 %v11018_v39, %v22270_v61 }
 0x9fc   :  { %16070 = vmatprep.subr.mxu1 %v23168_v12  ;;  %16030 = vmatpush3.msra.mxu0 %v21138_v55 }
 0x9fd   :  { %16071 = vmatpush3.msra.mxu1 %v21347_v21  ;;  %16031 = vmatprep.subr.mxu0 %v23168_v12  ;;  %v23023_v8 = vand.u32 4294901760, %v22284_v14 }
 0x9fe   :  { %16072 = vmatprep.subr.mxu1 %v23168_v12  ;;  %16032 = vmatpush3.msra.mxu0 %v21152_v54 }
 0x9ff   :  { %16073 = vmatpush3.msra.mxu1 %v23330_v11  ;;  %16033 = vmatprep.subr.mxu0 %v23168_v12 }
 0xa00   :  { %16074 = vmatprep.subr.mxu1 %v23168_v12  ;;  %16034 = vmatpush3.msra.mxu0 %v21164_v31 }
 0xa01   :  { %16075 = vmatpush3.msra.mxu1 %v23331_v35  ;;  %16035 = vmatprep.subr.mxu0 %v23168_v12 }
 0xa02   :  { %16076 = vmatprep.subr.mxu1 %v23168_v12  ;;  %16036 = vmatpush3.msra.mxu0 %v21190_v15 }
 0xa03   :  { %16077 = vmatpush3.msra.mxu1 %v23335_v58  ;;  %16037 = vmatprep.subr.mxu0 %v23168_v12 }
 0xa04   :  { %16078 = vmatprep.subr.mxu1 %v23168_v12  ;;  %16038 = vmatpush3.msra.mxu0 %v21211_v5 }
 0xa05   :  { %v22281_v38 = vpop.eup %16488  ;;  %16079 = vmatpush3.msra.mxu1 %v23343_v40  ;;  %16039 = vmatprep.subr.mxu0 %v23168_v12 }
 0xa06   :  { %23353 = vst [vmem:[#allocation30_spill] sm:$0xff] %v22281_v38  ;;  %v22289_v9 = vmul.f32 %v22281_v38, %v11654_v44  ;;  %16080 = vmatprep.subr.mxu1 %v23168_v12  ;;  %16040 = vmatpush3.msra.mxu0 %v21231_v30  ;;  %v11103_v44 = vsub.f32 %v22284_v14, %v23023_v8  ;;  %v23358_v38 = vld [vmem:[#allocation42_spill] sm:$0xff] }
 0xa07   :  { %16081 = vmatpush3.msra.mxu1 %v23344_v18  ;;  %16041 = vmatprep.subr.mxu0 %v23168_v12 }
 0xa08   :  { %23354 = vst [vmem:[#allocation31_spill] sm:$0xff] %v22289_v9  ;;  %16082 = vmatprep.subr.mxu1 %v23168_v12  ;;  %16042 = vmatpush3.msra.mxu0 %v21251_v27 }
 0xa09   :  { %16083 = vmatpush3.msra.mxu1 %v23355_v6  ;;  %16084 = vmatprep.mubr.msk.f32.mxu1 %vm16701_vm8, %v23168_v12 }
 0xa0a   :  { %16043 = vmatprep.subr.mxu0 %v23168_v12  ;;  %16085 = vmatmul.mubr.f32.vlgmr.msra.gmra.mxu1 %v22270_v61  ;;  %v9988_v39 = vpop.f32.mrf.mxu1 }
 0xa0b   :  { %16120 = vmatprep.subr.mxu1 %v23168_v12  ;;  %16044 = vmatpush3.msra.mxu0 %v21271_v10 }
 0xa0c   :  { %16121 = vmatpush3.msra.mxu1 %v21084_v20  ;;  %16045 = vmatprep.subr.mxu0 %v23168_v12  ;;  %v15690_v33 = vpop.f32.mrf.mxu1 }
 0xa0d   :  { %16122 = vmatprep.subr.mxu1 %v23168_v12  ;;  %16046 = vmatpush3.msra.mxu0 %v21291_v48  ;;  %v11104_v33 = vand.u32 4294901760, %v11103_v44 }
 0xa0e   :  { %16123 = vmatpush3.msra.mxu1 %v21094_v43  ;;  %16047 = vmatprep.subr.mxu0 %v23168_v12 }
 0xa0f   :  { %16124 = vmatprep.subr.mxu1 %v23168_v12  ;;  %16048 = vmatpush3.msra.mxu0 %v21311_v0 }
 0xa10   :  { %16125 = vmatpush3.msra.mxu1 %v21107_v34  ;;  %16049 = vmatprep.subr.mxu0 %v23168_v12 }
 0xa11   :  { %16126 = vmatprep.subr.mxu1 %v23168_v12  ;;  %16050 = vmatpush3.msra.mxu0 %v21327_v60 }
 0xa12   :  { %16051 = vmatprep.mubr.msk.f32.mxu0 %vm16701_vm8, %v23168_v12  ;;  %16127 = vmatpush3.msra.mxu1 %v21117_v52 }
 0xa13   :  { %16052 = vmatmul.mubr.f32.vlgmr.msra.gmra.mxu0 %v11104_v33  ;;  %16087 = vmatprep.subr.mxu0 %v23168_v12  ;;  %v9842_v8 = vpop.f32.mrf.mxu0  ;;  %v23357_v33 = vld [vmem:[#allocation25_spill] sm:$0xff] }
 0xa14   :  { %16128 = vmatprep.subr.mxu1 %v23168_v12  ;;  %16088 = vmatpush3.msra.mxu0 %v21105_v42  ;;  %v22326_v9 = vadd.f32 %v9988_v39, %v9842_v8  ;;  %v23356_v8 = vand.u32 4294901760, %v22284_v14 }
 0xa15   :  { %16129 = vmatpush3.msra.mxu1 %v21138_v55  ;;  %16089 = vmatprep.subr.mxu0 %v23168_v12  ;;  %v15657_v44 = vpop.f32.mrf.mxu0 }
 0xa16   :  { %16130 = vmatprep.subr.mxu1 %v23168_v12  ;;  %16090 = vmatpush3.msra.mxu0 %v21115_v16 }
 0xa17   :  { %16131 = vmatpush3.msra.mxu1 %v21152_v54  ;;  %16091 = vmatprep.subr.mxu0 %v23168_v12 }
 0xa18   :  { %16132 = vmatprep.subr.mxu1 %v23168_v12  ;;  %16092 = vmatpush3.msra.mxu0 %v21134_v3 }
 0xa19   :  { %16133 = vmatpush3.msra.mxu1 %v21164_v31  ;;  %16093 = vmatprep.subr.mxu0 %v23168_v12 }
 0xa1a   :  { %16134 = vmatprep.subr.mxu1 %v23168_v12  ;;  %16094 = vmatpush3.msra.mxu0 %v21150_v23 }
 0xa1b   :  { %16135 = vmatpush3.msra.mxu1 %v21190_v15  ;;  %16095 = vmatprep.subr.mxu0 %v23168_v12 }
 0xa1c   :  { %16136 = vmatprep.subr.mxu1 %v23168_v12  ;;  %16096 = vmatpush3.msra.mxu0 %v21172_v62 }
 0xa1d   :  { %16137 = vmatpush3.msra.mxu1 %v21211_v5  ;;  %16097 = vmatprep.subr.mxu0 %v23168_v12 }
 0xa1e   :  { %16138 = vmatprep.subr.mxu1 %v23168_v12  ;;  %16098 = vmatpush3.msra.mxu0 %v21183_v45 }
 0xa1f   :  { %16139 = vmatpush3.msra.mxu1 %v21231_v30  ;;  %16099 = vmatprep.subr.mxu0 %v23168_v12 }
 0xa20   :  { %16140 = vmatprep.subr.mxu1 %v23168_v12  ;;  %16100 = vmatpush3.msra.mxu0 %v21200_v32 }
 0xa21   :  { %16141 = vmatpush3.msra.mxu1 %v21251_v27  ;;  %16101 = vmatprep.subr.mxu0 %v23168_v12 }
 0xa22   :  { %16142 = vmatprep.subr.mxu1 %v23168_v12  ;;  %16102 = vmatpush3.msra.mxu0 %v21229_v7 }
 0xa23   :  { %16143 = vmatpush3.msra.mxu1 %v21271_v10  ;;  %16103 = vmatprep.subr.mxu0 %v23168_v12 }
 0xa24   :  { %16144 = vmatprep.subr.mxu1 %v23168_v12  ;;  %16104 = vmatpush3.msra.mxu0 %v21249_v37 }
 0xa25   :  { %16145 = vmatpush3.msra.mxu1 %v21291_v48  ;;  %16105 = vmatprep.subr.mxu0 %v23168_v12 }
 0xa26   :  { %16146 = vmatprep.subr.mxu1 %v23168_v12  ;;  %16106 = vmatpush3.msra.mxu0 %v21269_v57 }
 0xa27   :  { %16147 = vmatpush3.msra.mxu1 %v21311_v0  ;;  %16107 = vmatprep.subr.mxu0 %v23168_v12 }
 0xa28   :  { %16148 = vmatprep.subr.mxu1 %v23168_v12  ;;  %16108 = vmatpush3.msra.mxu0 %v21289_v46 }
 0xa29   :  { %16149 = vmatpush3.msra.mxu1 %v21327_v60  ;;  %16150 = vmatprep.mubr.msk.f32.mxu1 %vm16701_vm8, %v23168_v12 }
 0xa2a   :  { %16109 = vmatprep.subr.mxu0 %v23168_v12  ;;  %16151 = vmatmul.mubr.f32.vlgmr.msra.gmra.mxu1 %v23356_v8  ;;  %v10178_v39 = vpop.f32.mrf.mxu1  ;;  %v23359_v8 = vld [vmem:[#allocation26_spill] sm:$0xff] }
 0xa2b   :  { %16186 = vmatprep.subr.mxu1 %v23168_v12  ;;  %16110 = vmatpush3.msra.mxu0 %v23357_v33  ;;  %v23360_v33 = vld [vmem:[#allocation41_spill] sm:$0xff] }
 0xa2c   :  { %16187 = vmatpush3.msra.mxu1 %v21084_v20  ;;  %16111 = vmatprep.subr.mxu0 %v23168_v12  ;;  %v15756_v44 = vpop.f32.mrf.mxu1 }
 0xa2d   :  { %16188 = vmatprep.subr.mxu1 %v23168_v12  ;;  %16112 = vmatpush3.msra.mxu0 %v23358_v38 }
 0xa2e   :  { %16189 = vmatpush3.msra.mxu1 %v21094_v43  ;;  %16113 = vmatprep.subr.mxu0 %v23168_v12 }
 0xa2f   :  { %16190 = vmatprep.subr.mxu1 %v23168_v12  ;;  %16114 = vmatpush3.msra.mxu0 %v23359_v8 }
 0xa30   :  { %16191 = vmatpush3.msra.mxu1 %v21107_v34  ;;  %16115 = vmatprep.subr.mxu0 %v23168_v12 }
 0xa31   :  { %16192 = vmatprep.subr.mxu1 %v23168_v12  ;;  %16116 = vmatpush3.msra.mxu0 %v23360_v33 }
 0xa32   :  { %16117 = vmatprep.mubr.msk.f32.mxu0 %vm16701_vm8, %v23168_v12  ;;  %16193 = vmatpush3.msra.mxu1 %v21117_v52 }
 0xa33   :  { %16118 = vmatmul.mubr.f32.vlgmr.msra.gmra.mxu0 %v22284_v14  ;;  %16153 = vmatprep.subr.mxu0 %v23168_v12  ;;  %v10090_v44 = vpop.f32.mrf.mxu0 }
 0xa34   :  { %16194 = vmatprep.subr.mxu1 %v23168_v12  ;;  %16154 = vmatpush3.msra.mxu0 %v21131_v2  ;;  %v10091_v8 = vadd.f32 %v10090_v44, %v22326_v9  ;;  %v23367_v44 = vld [vmem:[#allocation30_spill] sm:$0xff] }
 0xa35   :  { %16195 = vmatpush3.msra.mxu1 %v21138_v55  ;;  %16155 = vmatprep.subr.mxu0 %v23168_v12  ;;  %v15723_v33 = vpop.f32.mrf.mxu0 }
 0xa36   :  { %16196 = vmatprep.subr.mxu1 %v23168_v12  ;;  %16156 = vmatpush3.msra.mxu0 %v21147_v53  ;;  %v22400_v38 = vadd.f32 %v10178_v39, %v10091_v8 }
 0xa37   :  { %16197 = vmatpush3.msra.mxu1 %v21152_v54  ;;  %16157 = vmatprep.subr.mxu0 %v23168_v12 }
 0xa38   :  { %16198 = vmatprep.subr.mxu1 %v23168_v12  ;;  %16158 = vmatpush3.msra.mxu0 %v21162_v28 }
 0xa39   :  { %16199 = vmatpush3.msra.mxu1 %v21164_v31  ;;  %16159 = vmatprep.subr.mxu0 %v23168_v12 }
 0xa3a   :  { %16200 = vmatprep.subr.mxu1 %v23168_v12  ;;  %16160 = vmatpush3.msra.mxu0 %v21180_v51 }
 0xa3b   :  { %16201 = vmatpush3.msra.mxu1 %v21190_v15  ;;  %16161 = vmatprep.subr.mxu0 %v23168_v12 }
 0xa3c   :  { %16202 = vmatprep.subr.mxu1 %v23168_v12  ;;  %16162 = vmatpush3.msra.mxu0 %v21209_v19 }
 0xa3d   :  { %16203 = vmatpush3.msra.mxu1 %v21211_v5  ;;  %16163 = vmatprep.subr.mxu0 %v23168_v12 }
 0xa3e   :  { %16204 = vmatprep.subr.mxu1 %v23168_v12  ;;  %16164 = vmatpush3.msra.mxu0 %v21220_v49 }
 0xa3f   :  { %16205 = vmatpush3.msra.mxu1 %v21231_v30  ;;  %16165 = vmatprep.subr.mxu0 %v23168_v12 }
 0xa40   :  { %16206 = vmatprep.subr.mxu1 %v23168_v12  ;;  %16166 = vmatpush3.msra.mxu0 %v21238_v41 }
 0xa41   :  { %16207 = vmatpush3.msra.mxu1 %v21251_v27  ;;  %16167 = vmatprep.subr.mxu0 %v23168_v12 }
 0xa42   :  { %16208 = vmatprep.subr.mxu1 %v23168_v12  ;;  %16168 = vmatpush3.msra.mxu0 %v21266_v59 }
 0xa43   :  { %16209 = vmatpush3.msra.mxu1 %v21271_v10  ;;  %16169 = vmatprep.subr.mxu0 %v23168_v12 }
 0xa44   :  { %16210 = vmatprep.subr.mxu1 %v23168_v12  ;;  %16170 = vmatpush3.msra.mxu0 %v21286_v4 }
 0xa45   :  { %16211 = vmatpush3.msra.mxu1 %v21291_v48  ;;  %16171 = vmatprep.subr.mxu0 %v23168_v12 }
 0xa46   :  { %16212 = vmatprep.subr.mxu1 %v23168_v12  ;;  %16172 = vmatpush3.msra.mxu0 %v23350_v63 }
 0xa47   :  { %16213 = vmatpush3.msra.mxu1 %v21311_v0  ;;  %16173 = vmatprep.subr.mxu0 %v23168_v12 }
 0xa48   :  { %16214 = vmatprep.subr.mxu1 %v23168_v12  ;;  %16174 = vmatpush3.msra.mxu0 %v23351_v13 }
 0xa49   :  { %16215 = vmatpush3.msra.mxu1 %v21327_v60  ;;  %16216 = vmatprep.mubr.msk.f32.mxu1 %vm16701_vm8, %v23168_v12 }
 0xa4a   :  { %16175 = vmatprep.subr.mxu0 %v23168_v12  ;;  %16217 = vmatmul.mubr.f32.vlgmr.msra.gmra.mxu1 %v22270_v61  ;;  %v10380_v14 = vpop.f32.mrf.mxu1 }
 0xa4b   :  { %16252 = vmatprep.subr.mxu1 %v23168_v12  ;;  %16176 = vmatpush3.msra.mxu0 %v21338_v22 }
 0xa4c   :  { %16253 = vmatpush3.msra.mxu1 %v21195_v26  ;;  %16177 = vmatprep.subr.mxu0 %v23168_v12  ;;  %v15822_v9 = vpop.f32.mrf.mxu1  ;;  %v23361_v26 = vld [vmem:[#allocation66_spill] sm:$0xff] }
 0xa4d   :  { %16254 = vmatprep.subr.mxu1 %v23168_v12  ;;  %16178 = vmatpush3.msra.mxu0 %v21352_v50 }
 0xa4e   :  { %16255 = vmatpush3.msra.mxu1 %v21215_v36  ;;  %16179 = vmatprep.subr.mxu0 %v23168_v12 }
 0xa4f   :  { %16256 = vmatprep.subr.mxu1 %v23168_v12  ;;  %16180 = vmatpush3.msra.mxu0 %v21368_v17 }
 0xa50   :  { %16257 = vmatpush3.msra.mxu1 %v21235_v47  ;;  %16181 = vmatprep.subr.mxu0 %v23168_v12 }
 0xa51   :  { %16258 = vmatprep.subr.mxu1 %v23168_v12  ;;  %16182 = vmatpush3.msra.mxu0 %v21379_v1 }
 0xa52   :  { %16183 = vmatprep.mubr.msk.f32.mxu0 %vm16701_vm8, %v23168_v12  ;;  %16259 = vmatpush3.msra.mxu1 %v23361_v26 }
 0xa53   :  { %16184 = vmatmul.mubr.f32.vlgmr.msra.gmra.mxu0 %v22270_v61  ;;  %16219 = vmatprep.subr.mxu0 %v23168_v12  ;;  %v10294_v36 = vpop.f32.mrf.mxu0 }
 0xa54   :  { %16260 = vmatprep.subr.mxu1 %v23168_v12  ;;  %16220 = vmatpush3.msra.mxu0 %v21084_v20  ;;  %v10295_v47 = vadd.f32 %v10294_v36, %v22400_v38  ;;  %v23368_v36 = vld [vmem:[#allocation31_spill] sm:$0xff] }
 0xa55   :  { %16261 = vmatpush3.msra.mxu1 %v21283_v29  ;;  %16221 = vmatprep.subr.mxu0 %v23168_v12  ;;  %v15789_v39 = vpop.f32.mrf.mxu0  ;;  %v23362_v29 = vld [vmem:[#allocation51_spill] sm:$0xff] }
 0xa56   :  { %16262 = vmatprep.subr.mxu1 %v23168_v12  ;;  %16222 = vmatpush3.msra.mxu0 %v21094_v43  ;;  %v22469_v33 = vadd.f32 %v10380_v14, %v10295_v47  ;;  %v11656_v47 = vsub.f32 1.0, %v23368_v36 }
 0xa57   :  { %16263 = vmatpush3.msra.mxu1 %v21296_v25  ;;  %16223 = vmatprep.subr.mxu0 %v23168_v12  ;;  %v11669_v25 = vsel %vm4187_vm7, %v23362_v29, 0 }
 0xa58   :  { %16264 = vmatprep.subr.mxu1 %v23168_v12  ;;  %16224 = vmatpush3.msra.mxu0 %v21107_v34  ;;  %v11650_v14 = vmul.f32 %v23367_v44, %v22469_v33 }
 0xa59   :  { %16265 = vmatpush3.msra.mxu1 %v21315_v56  ;;  %16225 = vmatprep.subr.mxu0 %v23168_v12  ;;  %v22495_v56 = vand.u32 4294901760, %v11669_v25 }
 0xa5a   :  { %16266 = vmatprep.subr.mxu1 %v23168_v12  ;;  %16226 = vmatpush3.msra.mxu0 %v21117_v52 }
 0xa5b   :  { %16267 = vmatpush3.msra.mxu1 %v21333_v24  ;;  %16227 = vmatprep.subr.mxu0 %v23168_v12  ;;  %v22506_v24 = vsub.f32 %v11669_v25, %v22495_v56  ;;  %v11652_v25 = vmul.f32 2.0, %v11650_v14 }
 0xa5c   :  { %16268 = vmatprep.subr.mxu1 %v23168_v12  ;;  %16228 = vmatpush3.msra.mxu0 %v21138_v55 }
 0xa5d   :  { %16269 = vmatpush3.msra.mxu1 %v21347_v21  ;;  %16229 = vmatprep.subr.mxu0 %v23168_v12  ;;  %v11753_v21 = vand.u32 4294901760, %v22506_v24 }
 0xa5e   :  { %16270 = vmatprep.subr.mxu1 %v23168_v12  ;;  %16230 = vmatpush3.msra.mxu0 %v21152_v54 }
 0xa5f   :  { %16271 = vmatpush3.msra.mxu1 %v23330_v11  ;;  %16231 = vmatprep.subr.mxu0 %v23168_v12 }
 0xa60   :  { %16272 = vmatprep.subr.mxu1 %v23168_v12  ;;  %16232 = vmatpush3.msra.mxu0 %v21164_v31 }
 0xa61   :  { %16273 = vmatpush3.msra.mxu1 %v23331_v35  ;;  %16233 = vmatprep.subr.mxu0 %v23168_v12 }
 0xa62   :  { %16274 = vmatprep.subr.mxu1 %v23168_v12  ;;  %16234 = vmatpush3.msra.mxu0 %v21190_v15 }
 0xa63   :  { %16275 = vmatpush3.msra.mxu1 %v23335_v58  ;;  %16235 = vmatprep.subr.mxu0 %v23168_v12  ;;  %v11754_v58 = vsub.f32 %v22506_v24, %v11753_v21 }
 0xa64   :  { %16276 = vmatprep.subr.mxu1 %v23168_v12  ;;  %16236 = vmatpush3.msra.mxu0 %v21211_v5 }
 0xa65   :  { %16277 = vmatpush3.msra.mxu1 %v23343_v40  ;;  %16237 = vmatprep.subr.mxu0 %v23168_v12  ;;  %v11755_v40 = vand.u32 4294901760, %v11754_v58 }
 0xa66   :  { %16278 = vmatprep.subr.mxu1 %v23168_v12  ;;  %16238 = vmatpush3.msra.mxu0 %v21231_v30 }
 0xa67   :  { %16279 = vmatpush3.msra.mxu1 %v23344_v18  ;;  %16239 = vmatprep.subr.mxu0 %v23168_v12 }
 0xa68   :  { %16280 = vmatprep.subr.mxu1 %v23168_v12  ;;  %16240 = vmatpush3.msra.mxu0 %v21251_v27 }
 0xa69   :  { %16281 = vmatpush3.msra.mxu1 %v23355_v6  ;;  %16282 = vmatprep.mubr.msk.f32.mxu1 %vm16701_vm8, %v23168_v12 }
 0xa6a   :  { %16241 = vmatprep.subr.mxu0 %v23168_v12  ;;  %16283 = vmatmul.mubr.f32.vlgmr.msra.gmra.mxu1 %v22495_v56  ;;  %v10620_v11 = vpop.f32.mrf.mxu1 }
 0xa6b   :  { %16318 = vmatprep.subr.mxu1 %v23168_v12  ;;  %16242 = vmatpush3.msra.mxu0 %v21271_v10 }
 0xa6c   :  { %16319 = vmatpush3.msra.mxu1 %v21084_v20  ;;  %16243 = vmatprep.subr.mxu0 %v23168_v12  ;;  %v15888_v35 = vpop.f32.mrf.mxu1 }
 0xa6d   :  { %16320 = vmatprep.subr.mxu1 %v23168_v12  ;;  %16244 = vmatpush3.msra.mxu0 %v21291_v48 }
 0xa6e   :  { %16321 = vmatpush3.msra.mxu1 %v21094_v43  ;;  %16245 = vmatprep.subr.mxu0 %v23168_v12 }
 0xa6f   :  { %16322 = vmatprep.subr.mxu1 %v23168_v12  ;;  %16246 = vmatpush3.msra.mxu0 %v21311_v0 }
 0xa70   :  { %16323 = vmatpush3.msra.mxu1 %v21107_v34  ;;  %16247 = vmatprep.subr.mxu0 %v23168_v12 }
 0xa71   :  { %16324 = vmatprep.subr.mxu1 %v23168_v12  ;;  %16248 = vmatpush3.msra.mxu0 %v21327_v60 }
 0xa72   :  { %16249 = vmatprep.mubr.msk.f32.mxu0 %vm16701_vm8, %v23168_v12  ;;  %16325 = vmatpush3.msra.mxu1 %v21117_v52 }
 0xa73   :  { %16250 = vmatmul.mubr.f32.vlgmr.msra.gmra.mxu0 %v11755_v40  ;;  %16285 = vmatprep.subr.mxu0 %v23168_v12  ;;  %v10474_v18 = vpop.f32.mrf.mxu0 }
 0xa74   :  { %16326 = vmatprep.subr.mxu1 %v23168_v12  ;;  %16286 = vmatpush3.msra.mxu0 %v21105_v42  ;;  %v22543_v61 = vadd.f32 %v10620_v11, %v10474_v18 }
 0xa75   :  { %16327 = vmatpush3.msra.mxu1 %v21138_v55  ;;  %16287 = vmatprep.subr.mxu0 %v23168_v12  ;;  %v15855_v38 = vpop.f32.mrf.mxu0 }
 0xa76   :  { %16328 = vmatprep.subr.mxu1 %v23168_v12  ;;  %16288 = vmatpush3.msra.mxu0 %v21115_v16  ;;  %v23363_v16 = vld [vmem:[#allocation25_spill] sm:$0xff] }
 0xa77   :  { %16329 = vmatpush3.msra.mxu1 %v21152_v54  ;;  %16289 = vmatprep.subr.mxu0 %v23168_v12 }
 0xa78   :  { %16330 = vmatprep.subr.mxu1 %v23168_v12  ;;  %16290 = vmatpush3.msra.mxu0 %v21134_v3 }
 0xa79   :  { %16331 = vmatpush3.msra.mxu1 %v21164_v31  ;;  %16291 = vmatprep.subr.mxu0 %v23168_v12 }
 0xa7a   :  { %16332 = vmatprep.subr.mxu1 %v23168_v12  ;;  %16292 = vmatpush3.msra.mxu0 %v21150_v23  ;;  %v23364_v23 = vld [vmem:[#allocation42_spill] sm:$0xff] }
 0xa7b   :  { %16333 = vmatpush3.msra.mxu1 %v21190_v15  ;;  %16293 = vmatprep.subr.mxu0 %v23168_v12 }
 0xa7c   :  { %16334 = vmatprep.subr.mxu1 %v23168_v12  ;;  %16294 = vmatpush3.msra.mxu0 %v21172_v62  ;;  %v23365_v62 = vld [vmem:[#allocation26_spill] sm:$0xff] }
 0xa7d   :  { %16335 = vmatpush3.msra.mxu1 %v21211_v5  ;;  %16295 = vmatprep.subr.mxu0 %v23168_v12 }
 0xa7e   :  { %16336 = vmatprep.subr.mxu1 %v23168_v12  ;;  %16296 = vmatpush3.msra.mxu0 %v21183_v45 }
 0xa7f   :  { %16337 = vmatpush3.msra.mxu1 %v21231_v30  ;;  %16297 = vmatprep.subr.mxu0 %v23168_v12 }
 0xa80   :  { %16338 = vmatprep.subr.mxu1 %v23168_v12  ;;  %16298 = vmatpush3.msra.mxu0 %v21200_v32 }
 0xa81   :  { %16339 = vmatpush3.msra.mxu1 %v21251_v27  ;;  %16299 = vmatprep.subr.mxu0 %v23168_v12 }
 0xa82   :  { %16340 = vmatprep.subr.mxu1 %v23168_v12  ;;  %16300 = vmatpush3.msra.mxu0 %v21229_v7 }
 0xa83   :  { %16341 = vmatpush3.msra.mxu1 %v21271_v10  ;;  %16301 = vmatprep.subr.mxu0 %v23168_v12 }
 0xa84   :  { %16342 = vmatprep.subr.mxu1 %v23168_v12  ;;  %16302 = vmatpush3.msra.mxu0 %v21249_v37 }
 0xa85   :  { %16343 = vmatpush3.msra.mxu1 %v21291_v48  ;;  %16303 = vmatprep.subr.mxu0 %v23168_v12 }
 0xa86   :  { %16344 = vmatprep.subr.mxu1 %v23168_v12  ;;  %16304 = vmatpush3.msra.mxu0 %v21269_v57 }
 0xa87   :  { %16345 = vmatpush3.msra.mxu1 %v21311_v0  ;;  %16305 = vmatprep.subr.mxu0 %v23168_v12 }
 0xa88   :  { %16346 = vmatprep.subr.mxu1 %v23168_v12  ;;  %16306 = vmatpush3.msra.mxu0 %v21289_v46 }
 0xa89   :  { %16347 = vmatpush3.msra.mxu1 %v21327_v60  ;;  %16348 = vmatprep.mubr.msk.f32.mxu1 %vm16701_vm8, %v23168_v12 }
 0xa8a   :  { %16307 = vmatprep.subr.mxu0 %v23168_v12  ;;  %16349 = vmatmul.mubr.f32.vlgmr.msra.gmra.mxu1 %v11753_v21  ;;  %v10810_v42 = vpop.f32.mrf.mxu1 }
 0xa8b   :  { %16384 = vmatprep.subr.mxu1 %v23168_v12  ;;  %16308 = vmatpush3.msra.mxu0 %v23363_v16 }
 0xa8c   :  { %16385 = vmatpush3.msra.mxu1 %v21084_v20  ;;  %16309 = vmatprep.subr.mxu0 %v23168_v12  ;;  %v15954_v3 = vpop.f32.mrf.mxu1  ;;  %v23366_v20 = vld [vmem:[#allocation41_spill] sm:$0xff] }
 0xa8d   :  { %16386 = vmatprep.subr.mxu1 %v23168_v12  ;;  %16310 = vmatpush3.msra.mxu0 %v23364_v23  ;;  %v12299_v23 = vmul.f32 %v11650_v14, %v11650_v14 }
 0xa8e   :  { %16387 = vmatpush3.msra.mxu1 %v21094_v43  ;;  %16311 = vmatprep.subr.mxu0 %v23168_v12 }
 0xa8f   :  { %16388 = vmatprep.subr.mxu1 %v23168_v12  ;;  %16312 = vmatpush3.msra.mxu0 %v23365_v62 }
 0xa90   :  { %16389 = vmatpush3.msra.mxu1 %v21107_v34  ;;  %16313 = vmatprep.subr.mxu0 %v23168_v12 }
 0xa91   :  { %16390 = vmatprep.subr.mxu1 %v23168_v12  ;;  %16314 = vmatpush3.msra.mxu0 %v23366_v20 }
 0xa92   :  { %16315 = vmatprep.mubr.msk.f32.mxu0 %vm16701_vm8, %v23168_v12  ;;  %16391 = vmatpush3.msra.mxu1 %v21117_v52 }
 0xa93   :  { %16316 = vmatmul.mubr.f32.vlgmr.msra.gmra.mxu0 %v22506_v24  ;;  %16351 = vmatprep.subr.mxu0 %v23168_v12  ;;  %v10722_v43 = vpop.f32.mrf.mxu0 }
 0xa94   :  { %16392 = vmatprep.subr.mxu1 %v23168_v12  ;;  %16352 = vmatpush3.msra.mxu0 %v21131_v2  ;;  %v10723_v34 = vadd.f32 %v10722_v43, %v22543_v61  ;;  %v4186_v2 = vld [vmem:[%s22754_s11 + $0x8] sm:$0x7f] }
 0xa95   :  { %16393 = vmatpush3.msra.mxu1 %v21138_v55  ;;  %16353 = vmatprep.subr.mxu0 %v23168_v12  ;;  %v15921_v45 = vpop.f32.mrf.mxu0  ;;  %v12316_v55 = vsel %vm6758_vm9, %v4186_v2, 0 }
 0xa96   :  { %16394 = vmatprep.subr.mxu1 %v23168_v12  ;;  %16354 = vmatpush3.msra.mxu0 %v21147_v53  ;;  %v10811_v52 = vadd.f32 %v10810_v42, %v10723_v34  ;;  %v11662_v42 = vmul.f32 %v23368_v36, %v11650_v14 }
 0xa97   :  { %16395 = vmatpush3.msra.mxu1 %v21152_v54  ;;  %16355 = vmatprep.subr.mxu0 %v23168_v12 }
 0xa98   :  { %16396 = vmatprep.subr.mxu1 %v23168_v12  ;;  %16356 = vmatpush3.msra.mxu0 %v21162_v28  ;;  %v22667_v28 = vand.u32 4294901760, %v12316_v55  ;;  %v11663_v20 = vmul.f32 %v11662_v42, %v23368_v36 }
 0xa99   :  { %16397 = vmatpush3.msra.mxu1 %v21164_v31  ;;  %16357 = vmatprep.subr.mxu0 %v23168_v12 }
 0xa9a   :  { %16398 = vmatprep.subr.mxu1 %v23168_v12  ;;  %16358 = vmatpush3.msra.mxu0 %v21180_v51  ;;  %v22676_v31 = vsub.f32 %v12316_v55, %v22667_v28 }
 0xa9b   :  { %16399 = vmatpush3.msra.mxu1 %v21190_v15  ;;  %16359 = vmatprep.subr.mxu0 %v23168_v12 }
 0xa9c   :  { %16400 = vmatprep.subr.mxu1 %v23168_v12  ;;  %16360 = vmatpush3.msra.mxu0 %v21209_v19  ;;  %v12426_v32 = vand.u32 4294901760, %v22676_v31  ;;  %v4185_v19 = vld [vmem:[%s22754_s11] sm:$0xff]  ;;  %s16702_s11 = smov 15  }
 0xa9d   :  { %16401 = vmatpush3.msra.mxu1 %v21211_v5  ;;  %16361 = vmatprep.subr.mxu0 %v23168_v12 }
 0xa9e   :  { %16402 = vmatprep.subr.mxu1 %v23168_v12  ;;  %16362 = vmatpush3.msra.mxu0 %v21220_v49  ;;  %v22689_v49 = vand.u32 4294901760, %v4185_v19  ;;  %v12427_v7 = vsub.f32 %v22676_v31, %v12426_v32 }
 0xa9f   :  { %16403 = vmatpush3.msra.mxu1 %v21231_v30  ;;  %16363 = vmatprep.subr.mxu0 %v23168_v12 }
 0xaa0   :  { %16404 = vmatprep.subr.mxu1 %v23168_v12  ;;  %16364 = vmatpush3.msra.mxu0 %v21238_v41  ;;  %v22695_v30 = vsub.f32 %v4185_v19, %v22689_v49  ;;  %v12428_v41 = vand.u32 4294901760, %v12427_v7 }
 0xaa1   :  { %16405 = vmatpush3.msra.mxu1 %v21251_v27  ;;  %16365 = vmatprep.subr.mxu0 %v23168_v12 }
 0xaa2   :  { %16406 = vmatprep.subr.mxu1 %v23168_v12  ;;  %16366 = vmatpush3.msra.mxu0 %v21266_v59  ;;  %v12433_v37 = vand.u32 4294901760, %v22695_v30 }
 0xaa3   :  { %16407 = vmatpush3.msra.mxu1 %v21271_v10  ;;  %16367 = vmatprep.subr.mxu0 %v23168_v12 }
 0xaa4   :  { %16408 = vmatprep.subr.mxu1 %v23168_v12  ;;  %16368 = vmatpush3.msra.mxu0 %v21286_v4  ;;  %v12434_v27 = vsub.f32 %v22695_v30, %v12433_v37 }
 0xaa5   :  { %16409 = vmatpush3.msra.mxu1 %v21291_v48  ;;  %16369 = vmatprep.subr.mxu0 %v23168_v12 }
 0xaa6   :  { %16410 = vmatprep.subr.mxu1 %v23168_v12  ;;  %16370 = vmatpush3.msra.mxu0 %v23350_v63  ;;  %v12435_v59 = vand.u32 4294901760, %v12434_v27 }
 0xaa7   :  { %16411 = vmatpush3.msra.mxu1 %v21311_v0  ;;  %16371 = vmatprep.subr.mxu0 %v23168_v12 }
 0xaa8   :  { %16412 = vmatprep.subr.mxu1 %v23168_v12  ;;  %16372 = vmatpush3.msra.mxu0 %v23351_v13 }
 0xaa9   :  { %16413 = vmatpush3.msra.mxu1 %v21327_v60  ;;  %16414 = vmatprep.mubr.msk.f32.mxu1 %vm16701_vm8, %v23168_v12 }
 0xaaa   :  { %16373 = vmatprep.subr.mxu0 %v23168_v12  ;;  %16415 = vmatmul.mubr.f32.vlgmr.msra.gmra.mxu1 %v22495_v56  ;;  %v11012_v53 = vpop.f32.mrf.mxu1 }
 0xaab   :  { %16374 = vmatpush3.msra.mxu0 %v21338_v22  ;;  %16381 = vmatprep.mubr.msk.f32.mxu0 %vm16701_vm8, %v23168_v12 }
 0xaac   :  { %16375 = vmatprep.subr.mxu0 %v23168_v12  ;;  %v16020_v54 = vpop.f32.mrf.mxu1  ;;  %16424 = vmatprep.subr.mxu1 %v23168_v12 }
 0xaad   :  { %16376 = vmatpush3.msra.mxu0 %v21352_v50  ;;  %16428 = vmatprep.mubr.msk.f32.mxu1 %vm16701_vm8, %v23168_v12 }
 0xaae   :  { %16377 = vmatprep.subr.mxu0 %v23168_v12  ;;  %16425 = vmatpush3.msra.mxu1 %v12428_v41 }
 0xaaf   :  { %16378 = vmatpush3.msra.mxu0 %v21368_v17  ;;  %16426 = vmatprep.subr.mxu1 %v23168_v12 }
 0xab0   :  { %16379 = vmatprep.subr.mxu0 %v23168_v12  ;;  %16427 = vmatpush3.msra.mxu1 %v12435_v59 }
 0xab1   :  { %16380 = vmatpush3.msra.mxu0 %v21379_v1  ;;  %16438 = vmatprep.subr.mxu1 %v23168_v12 }
 0xab2   :  { %16382 = vmatmul.mubr.f32.vlgmr.msra.gmra.mxu0 %v22495_v56  ;;  %16417 = vmatprep.subr.mxu0 %v23168_v12  ;;  %v11657_v56 = vmul.f32 %v11656_v47, %v23368_v36 }
 0xab3   :  { %v10926_v51 = vpop.f32.mrf.mxu0  ;;  %16418 = vmatpush3.msra.mxu0 %v22667_v28  ;;  %16421 = vmatprep.mubr.msk.f32.mxu0 %vm16701_vm8, %v23168_v12 }
 0xab4   :  { %v10927_v15 = vadd.f32 %v10926_v51, %v10811_v52  ;;  %16419 = vmatprep.subr.mxu0 %v23168_v12  ;;  %v12302_v18 = vmul.f32 %v11657_v56, %v11652_v25 }
 0xab5   :  { %v15987_v17 = vpop.f32.mrf.mxu0  ;;  %16420 = vmatpush3.msra.mxu0 %v22689_v49 }
 0xab6   :  { %v11013_v5 = vadd.f32 %v11012_v53, %v10927_v15  ;;  %16431 = vmatprep.subr.mxu0 %v23168_v12 }
 0xab8   :  { %v12304_v40 = vmul.f32 %v11656_v47, %v11013_v5  ;;  %v11664_v16 = vmul.f32 %v11657_v56, %v11013_v5 }
 0xaba   :  { %v12305_v38 = vmul.f32 %v12304_v40, %v11656_v47  ;;  %v11665_v45 = vadd.f32 %v11664_v16, %v11663_v20 }
 0xabc   :  { %v11666_v55 = vmul.f32 %v11665_v45, %v22469_v33 }
 0xaca   :  { %v11252_v57 = vpop.f32.mrf.mxu1 }
 0xacc   :  { %v16086_v10 = vpop.f32.mrf.mxu1 }
 0xad3   :  { %v11106_v4 = vpop.f32.mrf.mxu0 }
 0xad4   :  { %v11253_v1 = vadd.f32 %v11252_v57, %v11106_v4 }
 0xad5   :  { %v16053_v46 = vpop.f32.mrf.mxu0 }
 0xaea   :  { %v11442_v48 = vpop.f32.mrf.mxu1 }
 0xaec   :  { %v16152_v0 = vpop.f32.mrf.mxu1 }
 0xaf3   :  { %v11354_v60 = vpop.f32.mrf.mxu0 }
 0xaf4   :  { %v11355_v13 = vadd.f32 %v11354_v60, %v11253_v1 }
 0xaf5   :  { %v16119_v22 = vpop.f32.mrf.mxu0 }
 0xaf6   :  { %v11443_v6 = vadd.f32 %v11442_v48, %v11355_v13 }
 0xb0a   :  { %v11644_v50 = vpop.f32.mrf.mxu1 }
 0xb0c   :  { %v16218_v63 = vpop.f32.mrf.mxu1 }
 0xb13   :  { %v11558_v8 = vpop.f32.mrf.mxu0 }
 0xb14   :  { %v11559_v9 = vadd.f32 %v11558_v8, %v11443_v6 }
 0xb15   :  { %v16185_v26 = vpop.f32.mrf.mxu0 }
 0xb16   :  { %v11645_v39 = vadd.f32 %v11644_v50, %v11559_v9 }
 0xb18   :  { %v11651_v29 = vadd.f32 %v11645_v39, %v11013_v5  ;;  %v12300_v11 = vmul.f32 %v23368_v36, %v11645_v39 }
 0xb1a   :  { %v11653_v24 = vsub.f32 %v11651_v29, %v11652_v25  ;;  %v12301_v58 = vmul.f32 %v12300_v11, %v23368_v36 }
 0xb1c   :  { %v11658_v21 = vmul.f32 %v11657_v56, %v11653_v24  ;;  %v12303_v61 = vadd.f32 %v12302_v18, %v12301_v58 }
 0xb1e   :  { %v11659_v35 = vadd.f32 %v11658_v21, %v11650_v14  ;;  %v12306_v3 = vadd.f32 %v12305_v38, %v12303_v61 }
 0xb20   :  { %16490 = vrcp.f32 %v11659_v35  ;;  %v12307_v43 = vmul.f32 %v12306_v3, %v12299_v23 }
 0xb2a   :  { %v11903_v62 = vpop.f32.mrf.mxu1 }
 0xb2c   :  { %v16284_v34 = vpop.f32.mrf.mxu1 }
 0xb2d   :  { %v16491_v52 = vpop.eup %16490 }
 0xb2e   :  { %v12308_v2 = vmul.f32 %v16491_v52, %v12307_v43  ;;  %v11667_v54 = vmul.f32 %v16491_v52, %v11666_v55 }
 0xb30   :  { %v12309_v53 = vmul.f32 %v16491_v52, %v12308_v2 }
 0xb32   :  { %16492 = vlog2.f32 %v12309_v53 }
 0xb33   :  { %v11757_v51 = vpop.f32.mrf.mxu0 }
 0xb34   :  { %v11758_v15 = vadd.f32 %v11757_v51, %v11667_v54 }
 0xb35   :  { %v16251_v17 = vpop.f32.mrf.mxu0 }
 0xb36   :  { %v11904_v19 = vadd.f32 %v11903_v62, %v11758_v15 }
 0xb3f   :  { %v16493_v5 = vpop.eup %16492 }
 0xb40   :  { %v12311_v7 = vmul.f32 0.6931472, %v16493_v5 }
 0xb42   :  { %v12313_v41 = vsel %vm6754_vm10, %v12311_v7, 0 }
 0xb43   :  { %v12385_v27 = vand.u32 4294901760, %v12313_v41 }
 0xb45   :  { %v12386_v59 = vsub.f32 %v12313_v41, %v12385_v27  ;;  %16429 = vmatmul.mubr.f32.vlgmr.msra.gmra.mxu1 %v12385_v27 }
 0xb46   :  { %16439 = vmatpush3.msra.mxu1 %v22667_v28  ;;  %16442 = vmatprep.mubr.msk.f32.mxu1 %vm16701_vm8, %v23168_v12 }
 0xb47   :  { %16440 = vmatprep.subr.mxu1 %v23168_v12  ;;  %v12387_v33 = vand.u32 4294901760, %v12386_v59 }
 0xb48   :  { %16441 = vmatpush3.msra.mxu1 %v22689_v49 }
 0xb49   :  { %16443 = vmatmul.mubr.f32.vlgmr.msra.gmra.mxu1 %v12387_v33  ;;  %16452 = vmatprep.subr.mxu1 %v23168_v12  ;;  %v12388_v57 = vsub.f32 %v12386_v59, %v12387_v33 }
 0xb4a   :  { %v12093_v10 = vpop.f32.mrf.mxu1  ;;  %16453 = vmatpush3.msra.mxu1 %v22667_v28  ;;  %16456 = vmatprep.mubr.msk.f32.mxu1 %vm16701_vm8, %v23168_v12 }
 0xb4b   :  { %16454 = vmatprep.subr.mxu1 %v23168_v12  ;;  %v12389_v4 = vand.u32 4294901760, %v12388_v57 }
 0xb4c   :  { %v16350_v46 = vpop.f32.mrf.mxu1  ;;  %16455 = vmatpush3.msra.mxu1 %v22689_v49 }
 0xb4d   :  { %16422 = vmatmul.mubr.f32.vlgmr.msra.gmra.mxu0 %v12389_v4  ;;  %16457 = vmatmul.mubr.f32.vlgmr.msra.gmra.mxu1 %v12385_v27 }
 0xb4e   :  { %16432 = vmatpush3.msra.mxu0 %v22676_v31  ;;  %16435 = vmatprep.mubr.msk.f32.mxu0 %vm16701_vm8, %v23168_v12 }
 0xb4f   :  { %16433 = vmatprep.subr.mxu0 %v23168_v12 }
 0xb50   :  { %16434 = vmatpush3.msra.mxu0 %v22695_v30 }
 0xb51   :  { %16436 = vmatmul.mubr.f32.vlgmr.msra.gmra.mxu0 %v12386_v59  ;;  %16445 = vmatprep.subr.mxu0 %v23168_v12 }
 0xb52   :  { %16446 = vmatpush3.msra.mxu0 %v12426_v32  ;;  %16449 = vmatprep.mubr.msk.f32.mxu0 %vm16701_vm8, %v23168_v12 }
 0xb53   :  { %v12005_v28 = vpop.f32.mrf.mxu0  ;;  %16447 = vmatprep.subr.mxu0 %v23168_v12 }
 0xb54   :  { %v12006_v49 = vadd.f32 %v12005_v28, %v11904_v19  ;;  %16448 = vmatpush3.msra.mxu0 %v12433_v37 }
 0xb55   :  { %v16317_v48 = vpop.f32.mrf.mxu0  ;;  %16450 = vmatmul.mubr.f32.vlgmr.msra.gmra.mxu0 %v12385_v27 }
 0xb56   :  { %v12094_v0 = vadd.f32 %v12093_v10, %v12006_v49 }
 0xb6a   :  { %v12295_v60 = vpop.f32.mrf.mxu1 }
 0xb6c   :  { %v16416_v22 = vpop.f32.mrf.mxu1 }
 0xb72   :  { %v12209_v50 = vpop.f32.mrf.mxu0 }
 0xb73   :  { %v12210_v1 = vadd.f32 %v12209_v50, %v12094_v0 }
 0xb74   :  { %v16383_v63 = vpop.f32.mrf.mxu0 }
 0xb75   :  { %v12296_v31 = vadd.f32 %v12295_v60, %v12210_v1 }
 0xc05   :  { %v12472_v32 = vpop.f32.mrf.mxu1 }
 0xc07   :  { %v16430_v13 = vpop.f32.mrf.mxu1 }
 0xc09   :  { %v12623_v6 = vpop.f32.mrf.mxu1 }
 0xc0b   :  { %v16444_v8 = vpop.f32.mrf.mxu1 }
 0xc0d   :  { %v12391_v44 = vpop.f32.mrf.mxu0  ;;  %v12773_v14 = vpop.f32.mrf.mxu1 }
 0xc0e   :  { %v12473_v26 = vadd.f32 %v12472_v32, %v12391_v44 }
 0xc0f   :  { %v16423_v12 = vpop.f32.mrf.mxu0  ;;  %v16458_v9 = vpop.f32.mrf.mxu1 }
 0xc11   :  { %v12548_v30 = vpop.f32.mrf.mxu0 }
 0xc12   :  { %v12549_v37 = vadd.f32 %v12548_v30, %v12473_v26 }
 0xc13   :  { %v16437_v36 = vpop.f32.mrf.mxu0 }
 0xc14   :  { %v12624_v47 = vadd.f32 %v12623_v6, %v12549_v37 }
 0xc15   :  { %v12700_v39 = vpop.f32.mrf.mxu0 }
 0xc16   :  { %v12701_v29 = vadd.f32 %v12700_v39, %v12624_v47 }
 0xc17   :  { %v16451_v25 = vpop.f32.mrf.mxu0 }
 0xc18   :  { %v12774_v56 = vadd.f32 %v12773_v14, %v12701_v29 }
 0xc1a   :  { %12778 = vrot.lane.b32.xlu1 %v12774_v56, %s16702_s11 }
 0xc8c   :  { %v12779_v24 = vpop.permute.xlu1 %12778 }
 0xc8d   :  { %v12781_v21 = vsel %vm6754_vm10, %v12296_v31, %v12779_v24 }
 0xc8e   :  { %v12783_v11 = vsel %vm12782_vm13, %v12781_v21, 0.0 }
 0xc8f   :  { %12784 = vst [vmem:[#allocation16] sm:$0xff] %v12783_v11 }
 0xc90   :  { %16666 = shalt.err (!%p16663_p2)
}
 0xc91   :  { %12794 = dma.vmem_to_hbm [thread:$0]  %s12792_s20, 128, %s22755_s12, [#allocation4]  }
 0xc92   :  { %16685 = dma.done.wait [#allocation4], 128  }
 0xc93   :  { %16686 = vsyncadd [#allocation4], 4294967168 }
 0xc94   :  { %12798 = vsyncpa [#allocation3], 1 }
 0xc95   :  { %12799 = vsyncpa [#allocation6], 1 }
 0xc96   :  { %12800 = vsyncpa [#allocation9], 1 }
 0xc97   :  { %12801 = vsyncpa [#allocation12], 1 }
 0xc98   :  { %12802 = vsyncpa [#allocation15], 1 }
 0xc99   :  { %12803 = vsyncpa [#allocation4], 1 }

</bundles_post_ra>
